<compile_context>
chip_gen: v5e
topology: v5e:2x2
jax: 0.10.0
libtpu: 0.0.40
codegen_flags: <defaults>
</compile_context>

<pallas_src>
import functools

import jax
import jax.numpy as jnp
from jax.experimental import pallas as pl
from jax.experimental.pallas import tpu as pltpu

HALO = 4       # zero rows kept on each side of the time axis (>= 2 * max conv pad)
LANE = 128     # lane width; feat_dim is padded up to a multiple of this
TT_MAX = 128   # time-chunk rows processed per inner-loop iteration


# ---------------------------------------------------------------------------
# Fused (conv1 + ReLU -> conv2 [+ skip | + ReLU [+ Linear]]) kernel
# ---------------------------------------------------------------------------
def _fused_block_kernel(*refs, T, TT, NC, K1, K2, relu2, residual, linear,
                        out_halo):
    """One fused two-conv block for a single batch element.

    refs = (x, w1, b1, w2, b2, [wl, bl,] out, h_scratch)
      x   : (1, T + 2*HALO, Cin)  bf16, zero halo rows (global row g = padded g+HALO)
      w1  : (K1, Cin, Hid)  bf16     b1 : (1, Hid)  f32
      w2  : (K2, Hid, Cout) bf16     b2 : (1, Cout) f32
      wl  : (Cout, Fp) bf16          bl : (1, Fp)   f32     (only if linear)
      out : (1, T + 2*HALO, Cout)  (halo layout)  or (1, T, Fp) if linear
      h   : (TT + K2 - 1, Hid) bf16 VMEM scratch  (the fused intermediate)
    """
    if linear:
        x_ref, w1_ref, b1_ref, w2_ref, b2_ref, wl_ref, bl_ref, o_ref, h_ref = refs
    else:
        x_ref, w1_ref, b1_ref, w2_ref, b2_ref, o_ref, h_ref = refs
        wl_ref = bl_ref = None

    p1 = (K1 - 1) // 2
    p2 = (K2 - 1) // 2
    tte = TT + 2 * p2                     # extended intermediate window length
    hid = w1_ref.shape[2]
    cout = w2_ref.shape[2]

    if out_halo:
        # Halo rows of the output are the next layer's zero padding.
        o_ref[0, 0:HALO, :] = jnp.zeros((HALO, o_ref.shape[2]), o_ref.dtype)
        o_ref[0, T + HALO:T + 2 * HALO, :] = jnp.zeros((HALO, o_ref.shape[2]),
                                                       o_ref.dtype)

    # Loop-invariant small operands, loaded once (hoisted out of the chunk loop;
    # JAX does not CSE broadcasts inside the loop body).
    b1 = b1_ref[...]                      # (1, Hid)   f32
    b2 = b2_ref[...]                      # (1, Cout)  f32
    if linear:
        wl = wl_ref[...]                  # (Cout, Fp) bf16
        bl = bl_ref[...]                  # (1, Fp)    f32

    @pl.loop(0, NC)
    def _chunk(ci):
        # Chunk start row.  The last chunk is shifted back so every chunk is a
        # full TT rows; overlapping rows are recomputed identically (idempotent).
        r0 = jnp.minimum(ci * TT, T - TT)

        # ---- conv1 (+ bias + ReLU) over the extended window of tte rows ------
        # extended row j  <->  intermediate global row (r0 - p2 + j)
        acc1 = jnp.zeros((tte, hid), jnp.float32)
        for k in range(K1):               # unrolled taps -> K1 MXU matmuls
            start = r0 + (HALO - p2 - p1) + k          # padded-row start of tap
            acc1 += jnp.dot(x_ref[0, pl.ds(start, tte), :], w1_ref[k],
                            preferred_element_type=jnp.float32)
        acc1 = jnp.maximum(acc1 + b1, 0.0)             # ConvSample ReLU
        # Rows whose global index falls outside [0, T) are conv2's zero padding
        # (relu(bias) there is NOT zero, so mask explicitly).
        g = r0 - p2 + jax.lax.broadcasted_iota(jnp.int32, (tte, 1), 0)
        acc1 = jnp.where((g >= 0) & (g < T), acc1, 0.0)
        h_ref[...] = acc1.astype(h_ref.dtype)          # intermediate stays in VMEM

        # ---- conv2 (+ bias + epilogue) over the TT output rows ---------------
        acc2 = jnp.zeros((TT, cout), jnp.float32)
        for k in range(K2):
            acc2 += jnp.dot(h_ref[k:k + TT, :], w2_ref[k],
                            preferred_element_type=jnp.float32)
        acc2 = acc2 + b2
        if relu2:
            acc2 = jnp.maximum(acc2, 0.0)
        if residual:
            acc2 = acc2 + x_ref[0, pl.ds(r0 + HALO, TT), :].astype(jnp.float32)
        if linear:                                     # fused nn.Linear epilogue
            acc2 = jnp.dot(acc2.astype(wl.dtype), wl,
                           preferred_element_type=jnp.float32) + bl
        if out_halo:
            o_ref[0, pl.ds(r0 + HALO, TT), :] = acc2.astype(o_ref.dtype)
        else:
            o_ref[0, pl.ds(r0, TT), :] = acc2.astype(o_ref.dtype)


def _fused_block(x_pad, w1, b1, w2, b2, *, relu2, residual,
                 wl=None, bl=None, out_dtype=jnp.bfloat16):
    """x_pad: (B, T + 2*HALO, Cin) bf16 with zero halo rows.
    Returns a halo-padded (B, T + 2*HALO, Cout) activation, or the final
    (B, T, Fp) output when a fused Linear (wl, bl) is given."""
    B, Tp, Cin = x_pad.shape
    T = Tp - 2 * HALO
    K1, _, hid = w1.shape
    K2, _, cout = w2.shape
    linear = wl is not None
    out_halo = not linear
    p2 = (K2 - 1) // 2
    TT = min(TT_MAX, T)
    NC = pl.cdiv(T, TT)
    tte = TT + 2 * p2

    args = [x_pad, w1, b1, w2, b2]
    in_specs = [
        pl.BlockSpec((1, Tp, Cin), lambda b: (b, 0, 0)),   # resident per batch elem
        pl.BlockSpec(w1.shape, lambda b: (0, 0, 0)),       # weights: constant block
        pl.BlockSpec(b1.shape, lambda b: (0, 0)),          #   -> DMA'd once
        pl.BlockSpec(w2.shape, lambda b: (0, 0, 0)),
        pl.BlockSpec(b2.shape, lambda b: (0, 0)),
    ]
    flops = 2 * B * T * (K1 * Cin * hid + K2 * hid * cout)

    if linear:
        args += [wl, bl]
        in_specs += [pl.BlockSpec(wl.shape, lambda b: (0, 0)),
                     pl.BlockSpec(bl.shape, lambda b: (0, 0))]
        out_c = wl.shape[1]
        flops += 2 * B * T * wl.shape[0] * out_c
        out_shape = jax.ShapeDtypeStruct((B, T, out_c), out_dtype)
        out_spec = pl.BlockSpec((1, T, out_c), lambda b: (b, 0, 0))
        out_elems = B * T * out_c
    else:
        out_shape = jax.ShapeDtypeStruct((B, Tp, cout), out_dtype)
        out_spec = pl.BlockSpec((1, Tp, cout), lambda b: (b, 0, 0))
        out_elems = B * Tp * cout

    bytes_accessed = sum(int(a.size) * a.dtype.itemsize for a in args)
    bytes_accessed += out_elems * (4 if out_dtype == jnp.float32 else 2)

    kernel = functools.partial(
        _fused_block_kernel, T=T, TT=TT, NC=NC, K1=K1, K2=K2,
        relu2=relu2, residual=residual, linear=linear, out_halo=out_halo)

    return pl.pallas_call(
        kernel,
        out_shape=out_shape,
        grid=(B,),
        in_specs=in_specs,
        out_specs=out_spec,
        scratch_shapes=[pltpu.VMEM((tte, hid), jnp.bfloat16)],
        compiler_params=pltpu.CompilerParams(
            dimension_semantics=("parallel",)),            # megacore over batch
        cost_estimate=pl.CostEstimate(flops=flops, transcendentals=0,
                                      bytes_accessed=bytes_accessed),
    )(*args)


# ---------------------------------------------------------------------------
# Parameters (deterministic synthetic init) + full forward
# ---------------------------------------------------------------------------
def _init_conv(key, cin, cout, k):
    k1, k2 = jax.random.split(key)
    scale = 1.0 / (cin * k) ** 0.5
    w = jax.random.uniform(k1, (k, cin, cout), jnp.float32, -scale, scale)
    b = jax.random.uniform(k2, (cout,), jnp.float32, -scale, scale)
    return w, b


def init_generator_params(key, feat_dim):
    """Returns (params, raw): `params` are lane-padded bf16 tensors for the Pallas
    kernels; `raw` keeps the unpadded f32 originals for the pure-JAX reference."""
    fp = ((feat_dim + LANE - 1) // LANE) * LANE
    keys = jax.random.split(key, 16)
    raw = {}
    raw["down0"] = _init_conv(keys[0], feat_dim, 128, 5)
    raw["down1"] = _init_conv(keys[1], 128, 256, 5)
    for i in range(4):
        raw[f"res{i}a"] = _init_conv(keys[2 + 2 * i], 256, 512, 3)
        raw[f"res{i}b"] = _init_conv(keys[3 + 2 * i], 512, 256, 3)
    raw["up0"] = _init_conv(keys[10], 256, 128, 5)
    raw["up1"] = _init_conv(keys[11], 128, feat_dim, 5)
    scale = 1.0 / feat_dim ** 0.5
    raw["lin_w"] = jax.random.uniform(keys[12], (feat_dim, feat_dim), jnp.float32,
                                      -scale, scale)       # PyTorch (out, in)
    raw["lin_b"] = jax.random.uniform(keys[13], (feat_dim,), jnp.float32,
                                      -scale, scale)

    def wb(w, b, cin_pad=None, cout_pad=None):
        if cin_pad is not None:
            w = jnp.pad(w, ((0, 0), (0, cin_pad - w.shape[1]), (0, 0)))
        if cout_pad is not None:
            w = jnp.pad(w, ((0, 0), (0, 0), (0, cout_pad - w.shape[2])))
            b = jnp.pad(b, ((0, cout_pad - b.shape[0]),))
        return w.astype(jnp.bfloat16), b.astype(jnp.float32).reshape(1, -1)

    p = {}
    p["down0"] = wb(*raw["down0"], cin_pad=fp)             # (5, fp, 128)
    p["down1"] = wb(*raw["down1"])
    for i in range(4):
        p[f"res{i}a"] = wb(*raw[f"res{i}a"])
        p[f"res{i}b"] = wb(*raw[f"res{i}b"])
    p["up0"] = wb(*raw["up0"])
    p["up1"] = wb(*raw["up1"], cout_pad=fp)                # (5, 128, fp)
    wl = jnp.zeros((fp, fp), jnp.float32).at[:feat_dim, :feat_dim].set(raw["lin_w"].T)
    bl = jnp.zeros((fp,), jnp.float32).at[:feat_dim].set(raw["lin_b"])
    p["lin_w_t"] = wl.astype(jnp.bfloat16)
    p["lin_b"] = bl.reshape(1, -1)
    return p, raw


def generator_cnn_forward(x, params):
    """x: (B, T, feat_dim) f32 -> (B, T, feat_dim) f32."""
    B, T, F = x.shape
    fp = params["down0"][0].shape[1]
    # Single entry-time copy: bf16 cast + time halo + lane padding of feat_dim.
    h = jnp.pad(x.astype(jnp.bfloat16), ((0, 0), (HALO, HALO), (0, fp - F)))
    # fused downsample (2 x ConvSample)
    h = _fused_block(h, *params["down0"], *params["down1"],
                     relu2=True, residual=False)
    # 4 fused residual blocks
    for i in range(4):
        h = _fused_block(h, *params[f"res{i}a"], *params[f"res{i}b"],
                         relu2=False, residual=True)
    # fused upsample (2 x ConvSample) + final nn.Linear
    y = _fused_block(h, *params["up0"], *params["up1"],
                     relu2=True, residual=False,
                     wl=params["lin_w_t"], bl=params["lin_b"],
                     out_dtype=jnp.float32)
    return y[..., :F]


# ---------------------------------------------------------------------------
# Pure-JAX reference (f32) for a correctness check
# ---------------------------------------------------------------------------
def _conv1d_same_ref(x, w, b):
    y = jax.lax.conv_general_dilated(x, w, window_strides=(1,), padding="SAME",
                                     dimension_numbers=("NWC", "WIO", "NWC"))
    return y + b


def generator_cnn_reference(x, raw):
    h = jax.nn.relu(_conv1d_same_ref(x, *raw["down0"]))
    h = jax.nn.relu(_conv1d_same_ref(h, *raw["down1"]))
    for i in range(4):
        r = jax.nn.relu(_conv1d_same_ref(h, *raw[f"res{i}a"]))
        h = h + _conv1d_same_ref(r, *raw[f"res{i}b"])
    h = jax.nn.relu(_conv1d_same_ref(h, *raw["up0"]))
    h = jax.nn.relu(_conv1d_same_ref(h, *raw["up1"]))
    return h @ raw["lin_w"].T + raw["lin_b"]


if __name__ == "__main__":
    B, T, FEAT = 2, 16, 16          # small test shapes (feat_dim is a ctor kwarg)
    key = jax.random.PRNGKey(0)
    k_x, k_p = jax.random.split(key)
    x = jax.random.normal(k_x, (B, T, FEAT), jnp.float32)
    params, raw = init_generator_params(k_p, FEAT)

    out = jax.block_until_ready(jax.jit(generator_cnn_forward)(x, params))
    assert out.shape == (B, T, FEAT), out.shape
    assert bool(jnp.all(jnp.isfinite(out)))

    ref = generator_cnn_reference(x, raw)
    err = float(jnp.max(jnp.abs(out - ref)))
    assert err < 0.2, f"max |out - ref| = {err}"      # bf16-vs-f32 tolerance
    print("KERNEL_OK")
</pallas_src>

<mosaic_0001>
module attributes {stable_mosaic.version = 11 : i64} {
  func.func @_fused_block_kernel(%arg0: i32, %arg1: memref<1x24x128xbf16, #tpu.memory_space<vmem>>, %arg2: memref<5x128x128xbf16, #tpu.memory_space<vmem>>, %arg3: memref<1x128xf32, #tpu.memory_space<vmem>>, %arg4: memref<5x128x256xbf16, #tpu.memory_space<vmem>>, %arg5: memref<1x256xf32, #tpu.memory_space<vmem>>, %arg6: memref<1x24x256xbf16, #tpu.memory_space<vmem>>, %arg7: memref<20x128xbf16, #tpu.memory_space<vmem>>) attributes {dimension_semantics = [#tpu.dimension_semantics<parallel>], iteration_bounds = array<i64: 2>, scalar_prefetch = 0 : i64, scratch_operands = 1 : i64, tpu.core_type = #tpu.core_type<tc>, window_params = [{transform_indices = @transform_0, window_bounds = array<i64: 1, 24, 128>}, {pipeline_mode = #tpu.pipeline_mode<synchronous>, transform_indices = @transform_1, window_bounds = array<i64: 5, 128, 128>}, {pipeline_mode = #tpu.pipeline_mode<synchronous>, transform_indices = @transform_2, window_bounds = array<i64: 1, 128>}, {pipeline_mode = #tpu.pipeline_mode<synchronous>, transform_indices = @transform_3, window_bounds = array<i64: 5, 128, 256>}, {pipeline_mode = #tpu.pipeline_mode<synchronous>, transform_indices = @transform_4, window_bounds = array<i64: 1, 256>}, {transform_indices = @transform_5, window_bounds = array<i64: 1, 24, 256>}]} {
    %cst = arith.constant 0.000000e+00 : bf16
    %0 = vector.broadcast %cst : bf16 to vector<4x256xbf16>
    %c0 = arith.constant 0 : index
    %c0_0 = arith.constant 0 : index
    %c0_1 = arith.constant 0 : index
    %1 = vector.load %arg6[%c0, %c0_0, %c0_1] : memref<1x24x256xbf16, #tpu.memory_space<vmem>>, vector<1x4x256xbf16>
    %2 = vector.shape_cast %1 : vector<1x4x256xbf16> to vector<4x256xbf16>
    %3 = vector.shape_cast %0 : vector<4x256xbf16> to vector<1x4x256xbf16>
    tpu.vector_store %arg6[%c0, %c0_0, %c0_1], %3 {strides = array<i32>} : memref<1x24x256xbf16, #tpu.memory_space<vmem>>, vector<1x4x256xbf16>,
    %cst_2 = arith.constant 0.000000e+00 : bf16
    %4 = vector.broadcast %cst_2 : bf16 to vector<4x256xbf16>
    %c0_3 = arith.constant 0 : index
    %c20 = arith.constant 20 : index
    %c0_4 = arith.constant 0 : index
    %5 = vector.load %arg6[%c0_3, %c20, %c0_4] : memref<1x24x256xbf16, #tpu.memory_space<vmem>>, vector<1x4x256xbf16>
    %6 = vector.shape_cast %5 : vector<1x4x256xbf16> to vector<4x256xbf16>
    %7 = vector.shape_cast %4 : vector<4x256xbf16> to vector<1x4x256xbf16>
    tpu.vector_store %arg6[%c0_3, %c20, %c0_4], %7 {strides = array<i32>} : memref<1x24x256xbf16, #tpu.memory_space<vmem>>, vector<1x4x256xbf16>,
    %c0_5 = arith.constant 0 : index
    %c0_6 = arith.constant 0 : index
    %8 = vector.load %arg3[%c0_5, %c0_6] : memref<1x128xf32, #tpu.memory_space<vmem>>, vector<1x128xf32>
    %c0_7 = arith.constant 0 : index
    %c0_8 = arith.constant 0 : index
    %9 = vector.load %arg5[%c0_7, %c0_8] : memref<1x256xf32, #tpu.memory_space<vmem>>, vector<1x256xf32>
    %c0_i32 = arith.constant 0 : i32
    %c1_i32 = arith.constant 1 : i32
    %10 = arith.muli %c0_i32, %c1_i32 : i32
    %c0_i32_9 = arith.constant 0 : i32
    %11 = arith.addi %c0_i32_9, %10 : i32
    %c16_i32 = arith.constant 16 : i32
    %12 = arith.muli %11, %c16_i32 : i32
    %c0_i32_10 = arith.constant 0 : i32
    %13 = arith.minsi %12, %c0_i32_10 : i32
    %cst_11 = arith.constant 0.000000e+00 : f32
    %14 = vector.broadcast %cst_11 : f32 to vector<20x128xf32>
    %c0_i32_12 = arith.constant 0 : i32
    %15 = arith.addi %13, %c0_i32_12 : i32
    %c0_i32_13 = arith.constant 0 : i32
    %16 = arith.addi %15, %c0_i32_13 : i32
    %c0_14 = arith.constant 0 : index
    %17 = arith.index_cast %16 : i32 to index
    %c0_15 = arith.constant 0 : index
    %18 = vector.load %arg1[%c0_14, %17, %c0_15] : memref<1x24x128xbf16, #tpu.memory_space<vmem>>, vector<1x20x128xbf16>
    %19 = vector.shape_cast %18 : vector<1x20x128xbf16> to vector<20x128xbf16>
    %c0_16 = arith.constant 0 : index
    %c0_17 = arith.constant 0 : index
    %c0_18 = arith.constant 0 : index
    %20 = vector.load %arg2[%c0_16, %c0_17, %c0_18] : memref<5x128x128xbf16, #tpu.memory_space<vmem>>, vector<1x128x128xbf16>
    %21 = vector.shape_cast %20 : vector<1x128x128xbf16> to vector<128x128xbf16>
    %cst_19 = arith.constant dense<0.000000e+00> : vector<20x128xf32>
    %22 = tpu.matmul %19, %21, %cst_19 {dimension_numbers = #tpu.dot_dimension_numbers<[1], [0], [0], [1], [0, 0, 1, 1], [], []>} : vector<20x128xbf16>, vector<128x128xbf16>, vector<20x128xf32> -> vector<20x128xf32>
    %23 = arith.addf %14, %22 : vector<20x128xf32>
    %c0_i32_20 = arith.constant 0 : i32
    %24 = arith.addi %13, %c0_i32_20 : i32
    %c1_i32_21 = arith.constant 1 : i32
    %25 = arith.addi %24, %c1_i32_21 : i32
    %c0_22 = arith.constant 0 : index
    %26 = arith.index_cast %25 : i32 to index
    %c0_23 = arith.constant 0 : index
    %27 = vector.load %arg1[%c0_22, %26, %c0_23] : memref<1x24x128xbf16, #tpu.memory_space<vmem>>, vector<1x20x128xbf16>
    %28 = vector.shape_cast %27 : vector<1x20x128xbf16> to vector<20x128xbf16>
    %c1 = arith.constant 1 : index
    %c0_24 = arith.constant 0 : index
    %c0_25 = arith.constant 0 : index
    %29 = vector.load %arg2[%c1, %c0_24, %c0_25] : memref<5x128x128xbf16, #tpu.memory_space<vmem>>, vector<1x128x128xbf16>
    %30 = vector.shape_cast %29 : vector<1x128x128xbf16> to vector<128x128xbf16>
    %cst_26 = arith.constant dense<0.000000e+00> : vector<20x128xf32>
    %31 = tpu.matmul %28, %30, %cst_26 {dimension_numbers = #tpu.dot_dimension_numbers<[1], [0], [0], [1], [0, 0, 1, 1], [], []>} : vector<20x128xbf16>, vector<128x128xbf16>, vector<20x128xf32> -> vector<20x128xf32>
    %32 = arith.addf %23, %31 : vector<20x128xf32>
    %c0_i32_27 = arith.constant 0 : i32
    %33 = arith.addi %13, %c0_i32_27 : i32
    %c2_i32 = arith.constant 2 : i32
    %34 = arith.addi %33, %c2_i32 : i32
    %c0_28 = arith.constant 0 : index
    %35 = arith.index_cast %34 : i32 to index
    %c0_29 = arith.constant 0 : index
    %36 = vector.load %arg1[%c0_28, %35, %c0_29] : memref<1x24x128xbf16, #tpu.memory_space<vmem>>, vector<1x20x128xbf16>
    %37 = vector.shape_cast %36 : vector<1x20x128xbf16> to vector<20x128xbf16>
    %c2 = arith.constant 2 : index
    %c0_30 = arith.constant 0 : index
    %c0_31 = arith.constant 0 : index
    %38 = vector.load %arg2[%c2, %c0_30, %c0_31] : memref<5x128x128xbf16, #tpu.memory_space<vmem>>, vector<1x128x128xbf16>
    %39 = vector.shape_cast %38 : vector<1x128x128xbf16> to vector<128x128xbf16>
    %cst_32 = arith.constant dense<0.000000e+00> : vector<20x128xf32>
    %40 = tpu.matmul %37, %39, %cst_32 {dimension_numbers = #tpu.dot_dimension_numbers<[1], [0], [0], [1], [0, 0, 1, 1], [], []>} : vector<20x128xbf16>, vector<128x128xbf16>, vector<20x128xf32> -> vector<20x128xf32>
    %41 = arith.addf %32, %40 : vector<20x128xf32>
    %c0_i32_33 = arith.constant 0 : i32
    %42 = arith.addi %13, %c0_i32_33 : i32
    %c3_i32 = arith.constant 3 : i32
    %43 = arith.addi %42, %c3_i32 : i32
    %c0_34 = arith.constant 0 : index
    %44 = arith.index_cast %43 : i32 to index
    %c0_35 = arith.constant 0 : index
    %45 = vector.load %arg1[%c0_34, %44, %c0_35] : memref<1x24x128xbf16, #tpu.memory_space<vmem>>, vector<1x20x128xbf16>
    %46 = vector.shape_cast %45 : vector<1x20x128xbf16> to vector<20x128xbf16>
    %c3 = arith.constant 3 : index
    %c0_36 = arith.constant 0 : index
    %c0_37 = arith.constant 0 : index
    %47 = vector.load %arg2[%c3, %c0_36, %c0_37] : memref<5x128x128xbf16, #tpu.memory_space<vmem>>, vector<1x128x128xbf16>
    %48 = vector.shape_cast %47 : vector<1x128x128xbf16> to vector<128x128xbf16>
    %cst_38 = arith.constant dense<0.000000e+00> : vector<20x128xf32>
    %49 = tpu.matmul %46, %48, %cst_38 {dimension_numbers = #tpu.dot_dimension_numbers<[1], [0], [0], [1], [0, 0, 1, 1], [], []>} : vector<20x128xbf16>, vector<128x128xbf16>, vector<20x128xf32> -> vector<20x128xf32>
    %50 = arith.addf %41, %49 : vector<20x128xf32>
    %c0_i32_39 = arith.constant 0 : i32
    %51 = arith.addi %13, %c0_i32_39 : i32
    %c4_i32 = arith.constant 4 : i32
    %52 = arith.addi %51, %c4_i32 : i32
    %c0_40 = arith.constant 0 : index
    %53 = arith.index_cast %52 : i32 to index
    %c0_41 = arith.constant 0 : index
    %54 = vector.load %arg1[%c0_40, %53, %c0_41] : memref<1x24x128xbf16, #tpu.memory_space<vmem>>, vector<1x20x128xbf16>
    %55 = vector.shape_cast %54 : vector<1x20x128xbf16> to vector<20x128xbf16>
    %c4 = arith.constant 4 : index
    %c0_42 = arith.constant 0 : index
    %c0_43 = arith.constant 0 : index
    %56 = vector.load %arg2[%c4, %c0_42, %c0_43] : memref<5x128x128xbf16, #tpu.memory_space<vmem>>, vector<1x128x128xbf16>
    %57 = vector.shape_cast %56 : vector<1x128x128xbf16> to vector<128x128xbf16>
    %cst_44 = arith.constant dense<0.000000e+00> : vector<20x128xf32>
    %58 = tpu.matmul %55, %57, %cst_44 {dimension_numbers = #tpu.dot_dimension_numbers<[1], [0], [0], [1], [0, 0, 1, 1], [], []>} : vector<20x128xbf16>, vector<128x128xbf16>, vector<20x128xf32> -> vector<20x128xf32>
    %59 = arith.addf %50, %58 : vector<20x128xf32>
    %60 = vector.broadcast %8 : vector<1x128xf32> to vector<20x128xf32>
    %61 = arith.addf %59, %60 : vector<20x128xf32>
    %cst_45 = arith.constant 0.000000e+00 : f32
    %62 = vector.broadcast %cst_45 : f32 to vector<20x128xf32>
    %63 = arith.maximumf %61, %62 : vector<20x128xf32>
    %c2_i32_46 = arith.constant 2 : i32
    %64 = arith.subi %13, %c2_i32_46 : i32
    %65 = tpu.iota {dimensions = array<i32: 0>} : vector<20x1xi32>
    %66 = vector.broadcast %64 : i32 to vector<20x1xi32>
    %67 = arith.addi %66, %65 : vector<20x1xi32>
    %c0_i32_47 = arith.constant 0 : i32
    %68 = vector.broadcast %c0_i32_47 : i32 to vector<20x1xi32>
    %69 = arith.cmpi sge, %67, %68 : vector<20x1xi32>
    %c16_i32_48 = arith.constant 16 : i32
    %70 = vector.broadcast %c16_i32_48 : i32 to vector<20x1xi32>
    %71 = arith.cmpi slt, %67, %70 : vector<20x1xi32>
    %72 = arith.andi %69, %71 : vector<20x1xi1>
    %cst_49 = arith.constant 0.000000e+00 : f32
    %73 = vector.shape_cast %72 : vector<20x1xi1> to vector<20x1xi1>
    %74 = vector.broadcast %73 : vector<20x1xi1> to vector<20x128xi1>
    %75 = vector.broadcast %cst_49 : f32 to vector<20x128xf32>
    %76 = arith.select %74, %63, %75 : vector<20x128xi1>, vector<20x128xf32>
    %77 = arith.truncf %76 : vector<20x128xf32> to vector<20x128xbf16>
    %c0_50 = arith.constant 0 : index
    %c0_51 = arith.constant 0 : index
    %78 = vector.load %arg7[%c0_50, %c0_51] : memref<20x128xbf16, #tpu.memory_space<vmem>>, vector<20x128xbf16>
    tpu.vector_store %arg7[%c0_50, %c0_51], %77 {strides = array<i32>} : memref<20x128xbf16, #tpu.memory_space<vmem>>, vector<20x128xbf16>,
    %cst_52 = arith.constant 0.000000e+00 : f32
    %79 = vector.broadcast %cst_52 : f32 to vector<16x256xf32>
    %c0_53 = arith.constant 0 : index
    %c0_54 = arith.constant 0 : index
    %80 = vector.load %arg7[%c0_53, %c0_54] : memref<20x128xbf16, #tpu.memory_space<vmem>>, vector<16x128xbf16>
    %c0_55 = arith.constant 0 : index
    %c0_56 = arith.constant 0 : index
    %c0_57 = arith.constant 0 : index
    %81 = vector.load %arg4[%c0_55, %c0_56, %c0_57] : memref<5x128x256xbf16, #tpu.memory_space<vmem>>, vector<1x128x256xbf16>
    %82 = vector.shape_cast %81 : vector<1x128x256xbf16> to vector<128x256xbf16>
    %cst_58 = arith.constant dense<0.000000e+00> : vector<16x256xf32>
    %83 = tpu.matmul %80, %82, %cst_58 {dimension_numbers = #tpu.dot_dimension_numbers<[1], [0], [0], [1], [0, 0, 1, 1], [], []>} : vector<16x128xbf16>, vector<128x256xbf16>, vector<16x256xf32> -> vector<16x256xf32>
    %84 = arith.addf %79, %83 : vector<16x256xf32>
    %c1_59 = arith.constant 1 : index
    %c0_60 = arith.constant 0 : index
    %85 = vector.load %arg7[%c1_59, %c0_60] : memref<20x128xbf16, #tpu.memory_space<vmem>>, vector<16x128xbf16>
    %c1_61 = arith.constant 1 : index
    %c0_62 = arith.constant 0 : index
    %c0_63 = arith.constant 0 : index
    %86 = vector.load %arg4[%c1_61, %c0_62, %c0_63] : memref<5x128x256xbf16, #tpu.memory_space<vmem>>, vector<1x128x256xbf16>
    %87 = vector.shape_cast %86 : vector<1x128x256xbf16> to vector<128x256xbf16>
    %cst_64 = arith.constant dense<0.000000e+00> : vector<16x256xf32>
    %88 = tpu.matmul %85, %87, %cst_64 {dimension_numbers = #tpu.dot_dimension_numbers<[1], [0], [0], [1], [0, 0, 1, 1], [], []>} : vector<16x128xbf16>, vector<128x256xbf16>, vector<16x256xf32> -> vector<16x256xf32>
    %89 = arith.addf %84, %88 : vector<16x256xf32>
    %c2_65 = arith.constant 2 : index
    %c0_66 = arith.constant 0 : index
    %90 = vector.load %arg7[%c2_65, %c0_66] : memref<20x128xbf16, #tpu.memory_space<vmem>>, vector<16x128xbf16>
    %c2_67 = arith.constant 2 : index
    %c0_68 = arith.constant 0 : index
    %c0_69 = arith.constant 0 : index
    %91 = vector.load %arg4[%c2_67, %c0_68, %c0_69] : memref<5x128x256xbf16, #tpu.memory_space<vmem>>, vector<1x128x256xbf16>
    %92 = vector.shape_cast %91 : vector<1x128x256xbf16> to vector<128x256xbf16>
    %cst_70 = arith.constant dense<0.000000e+00> : vector<16x256xf32>
    %93 = tpu.matmul %90, %92, %cst_70 {dimension_numbers = #tpu.dot_dimension_numbers<[1], [0], [0], [1], [0, 0, 1, 1], [], []>} : vector<16x128xbf16>, vector<128x256xbf16>, vector<16x256xf32> -> vector<16x256xf32>
    %94 = arith.addf %89, %93 : vector<16x256xf32>
    %c3_71 = arith.constant 3 : index
    %c0_72 = arith.constant 0 : index
    %95 = vector.load %arg7[%c3_71, %c0_72] : memref<20x128xbf16, #tpu.memory_space<vmem>>, vector<16x128xbf16>
    %c3_73 = arith.constant 3 : index
    %c0_74 = arith.constant 0 : index
    %c0_75 = arith.constant 0 : index
    %96 = vector.load %arg4[%c3_73, %c0_74, %c0_75] : memref<5x128x256xbf16, #tpu.memory_space<vmem>>, vector<1x128x256xbf16>
    %97 = vector.shape_cast %96 : vector<1x128x256xbf16> to vector<128x256xbf16>
    %cst_76 = arith.constant dense<0.000000e+00> : vector<16x256xf32>
    %98 = tpu.matmul %95, %97, %cst_76 {dimension_numbers = #tpu.dot_dimension_numbers<[1], [0], [0], [1], [0, 0, 1, 1], [], []>} : vector<16x128xbf16>, vector<128x256xbf16>, vector<16x256xf32> -> vector<16x256xf32>
    %99 = arith.addf %94, %98 : vector<16x256xf32>
    %c4_77 = arith.constant 4 : index
    %c0_78 = arith.constant 0 : index
    %100 = vector.load %arg7[%c4_77, %c0_78] : memref<20x128xbf16, #tpu.memory_space<vmem>>, vector<16x128xbf16>
    %c4_79 = arith.constant 4 : index
    %c0_80 = arith.constant 0 : index
    %c0_81 = arith.constant 0 : index
    %101 = vector.load %arg4[%c4_79, %c0_80, %c0_81] : memref<5x128x256xbf16, #tpu.memory_space<vmem>>, vector<1x128x256xbf16>
    %102 = vector.shape_cast %101 : vector<1x128x256xbf16> to vector<128x256xbf16>
    %cst_82 = arith.constant dense<0.000000e+00> : vector<16x256xf32>
    %103 = tpu.matmul %100, %102, %cst_82 {dimension_numbers = #tpu.dot_dimension_numbers<[1], [0], [0], [1], [0, 0, 1, 1], [], []>} : vector<16x128xbf16>, vector<128x256xbf16>, vector<16x256xf32> -> vector<16x256xf32>
    %104 = arith.addf %99, %103 : vector<16x256xf32>
    %105 = vector.broadcast %9 : vector<1x256xf32> to vector<16x256xf32>
    %106 = arith.addf %104, %105 : vector<16x256xf32>
    %cst_83 = arith.constant 0.000000e+00 : f32
    %107 = vector.broadcast %cst_83 : f32 to vector<16x256xf32>
    %108 = arith.maximumf %106, %107 : vector<16x256xf32>
    %109 = arith.truncf %108 : vector<16x256xf32> to vector<16x256xbf16>
    %c4_i32_84 = arith.constant 4 : i32
    %110 = arith.addi %13, %c4_i32_84 : i32
    %c0_85 = arith.constant 0 : index
    %111 = arith.index_cast %110 : i32 to index
    %c0_86 = arith.constant 0 : index
    %112 = vector.load %arg6[%c0_85, %111, %c0_86] : memref<1x24x256xbf16, #tpu.memory_space<vmem>>, vector<1x16x256xbf16>
    %113 = vector.shape_cast %112 : vector<1x16x256xbf16> to vector<16x256xbf16>
    %114 = vector.shape_cast %109 : vector<16x256xbf16> to vector<1x16x256xbf16>
    tpu.vector_store %arg6[%c0_85, %111, %c0_86], %114 {strides = array<i32>} : memref<1x24x256xbf16, #tpu.memory_space<vmem>>, vector<1x16x256xbf16>,
    %c1_i32_87 = arith.constant 1 : i32
    return
  }
  func.func @transform_0(%arg0: i32) -> (i32, i32, i32) {
    %c0_i32 = arith.constant 0 : i32
    %c0_i32_0 = arith.constant 0 : i32
    %c0_i32_1 = arith.constant 0 : i32
    return %arg0, %c0_i32, %c0_i32_0 : i32, i32, i32
  }
  func.func @transform_1(%arg0: i32) -> (i32, i32, i32) {
    %c0_i32 = arith.constant 0 : i32
    %c0_i32_0 = arith.constant 0 : i32
    %c0_i32_1 = arith.constant 0 : i32
    %c0_i32_2 = arith.constant 0 : i32
    return %c0_i32, %c0_i32_0, %c0_i32_1 : i32, i32, i32
  }
  func.func @transform_2(%arg0: i32) -> (i32, i32) {
    %c0_i32 = arith.constant 0 : i32
    %c0_i32_0 = arith.constant 0 : i32
    %c0_i32_1 = arith.constant 0 : i32
    return %c0_i32, %c0_i32_0 : i32, i32
  }
  func.func @transform_3(%arg0: i32) -> (i32, i32, i32) {
    %c0_i32 = arith.constant 0 : i32
    %c0_i32_0 = arith.constant 0 : i32
    %c0_i32_1 = arith.constant 0 : i32
    %c0_i32_2 = arith.constant 0 : i32
    return %c0_i32, %c0_i32_0, %c0_i32_1 : i32, i32, i32
  }
  func.func @transform_4(%arg0: i32) -> (i32, i32) {
    %c0_i32 = arith.constant 0 : i32
    %c0_i32_0 = arith.constant 0 : i32
    %c0_i32_1 = arith.constant 0 : i32
    return %c0_i32, %c0_i32_0 : i32, i32
  }
  func.func @transform_5(%arg0: i32) -> (i32, i32, i32) {
    %c0_i32 = arith.constant 0 : i32
    %c0_i32_0 = arith.constant 0 : i32
    %c0_i32_1 = arith.constant 0 : i32
    return %arg0, %c0_i32, %c0_i32_0 : i32, i32, i32
  }
}

module attributes {stable_mosaic.version = 11 : i64} {
  func.func @_fused_block_kernel(%arg0: i32, %arg1: memref<1x24x256xbf16, #tpu.memory_space<vmem>>, %arg2: memref<5x256x128xbf16, #tpu.memory_space<vmem>>, %arg3: memref<1x128xf32, #tpu.memory_space<vmem>>, %arg4: memref<5x128x128xbf16, #tpu.memory_space<vmem>>, %arg5: memref<1x128xf32, #tpu.memory_space<vmem>>, %arg6: memref<128x128xbf16, #tpu.memory_space<vmem>>, %arg7: memref<1x128xf32, #tpu.memory_space<vmem>>, %arg8: memref<1x16x128xf32, #tpu.memory_space<vmem>>, %arg9: memref<20x128xbf16, #tpu.memory_space<vmem>>) attributes {dimension_semantics = [#tpu.dimension_semantics<parallel>], iteration_bounds = array<i64: 2>, scalar_prefetch = 0 : i64, scratch_operands = 1 : i64, tpu.core_type = #tpu.core_type<tc>, window_params = [{transform_indices = @transform_0, window_bounds = array<i64: 1, 24, 256>}, {pipeline_mode = #tpu.pipeline_mode<synchronous>, transform_indices = @transform_1, window_bounds = array<i64: 5, 256, 128>}, {pipeline_mode = #tpu.pipeline_mode<synchronous>, transform_indices = @transform_2, window_bounds = array<i64: 1, 128>}, {pipeline_mode = #tpu.pipeline_mode<synchronous>, transform_indices = @transform_3, window_bounds = array<i64: 5, 128, 128>}, {pipeline_mode = #tpu.pipeline_mode<synchronous>, transform_indices = @transform_4, window_bounds = array<i64: 1, 128>}, {pipeline_mode = #tpu.pipeline_mode<synchronous>, transform_indices = @transform_5, window_bounds = array<i64: 128, 128>}, {pipeline_mode = #tpu.pipeline_mode<synchronous>, transform_indices = @transform_6, window_bounds = array<i64: 1, 128>}, {transform_indices = @transform_7, window_bounds = array<i64: 1, 16, 128>}]} {
    %c0 = arith.constant 0 : index
    %c0_0 = arith.constant 0 : index
    %0 = vector.load %arg3[%c0, %c0_0] : memref<1x128xf32, #tpu.memory_space<vmem>>, vector<1x128xf32>
    %c0_1 = arith.constant 0 : index
    %c0_2 = arith.constant 0 : index
    %1 = vector.load %arg5[%c0_1, %c0_2] : memref<1x128xf32, #tpu.memory_space<vmem>>, vector<1x128xf32>
    %c0_3 = arith.constant 0 : index
    %c0_4 = arith.constant 0 : index
    %2 = vector.load %arg6[%c0_3, %c0_4] : memref<128x128xbf16, #tpu.memory_space<vmem>>, vector<128x128xbf16>
    %c0_5 = arith.constant 0 : index
    %c0_6 = arith.constant 0 : index
    %3 = vector.load %arg7[%c0_5, %c0_6] : memref<1x128xf32, #tpu.memory_space<vmem>>, vector<1x128xf32>
    %c0_i32 = arith.constant 0 : i32
    %c1_i32 = arith.constant 1 : i32
    %4 = arith.muli %c0_i32, %c1_i32 : i32
    %c0_i32_7 = arith.constant 0 : i32
    %5 = arith.addi %c0_i32_7, %4 : i32
    %c16_i32 = arith.constant 16 : i32
    %6 = arith.muli %5, %c16_i32 : i32
    %c0_i32_8 = arith.constant 0 : i32
    %7 = arith.minsi %6, %c0_i32_8 : i32
    %cst = arith.constant 0.000000e+00 : f32
    %8 = vector.broadcast %cst : f32 to vector<20x128xf32>
    %c0_i32_9 = arith.constant 0 : i32
    %9 = arith.addi %7, %c0_i32_9 : i32
    %c0_i32_10 = arith.constant 0 : i32
    %10 = arith.addi %9, %c0_i32_10 : i32
    %c0_11 = arith.constant 0 : index
    %11 = arith.index_cast %10 : i32 to index
    %c0_12 = arith.constant 0 : index
    %12 = vector.load %arg1[%c0_11, %11, %c0_12] : memref<1x24x256xbf16, #tpu.memory_space<vmem>>, vector<1x20x256xbf16>
    %13 = vector.shape_cast %12 : vector<1x20x256xbf16> to vector<20x256xbf16>
    %c0_13 = arith.constant 0 : index
    %c0_14 = arith.constant 0 : index
    %c0_15 = arith.constant 0 : index
    %14 = vector.load %arg2[%c0_13, %c0_14, %c0_15] : memref<5x256x128xbf16, #tpu.memory_space<vmem>>, vector<1x256x128xbf16>
    %15 = vector.shape_cast %14 : vector<1x256x128xbf16> to vector<256x128xbf16>
    %cst_16 = arith.constant dense<0.000000e+00> : vector<20x128xf32>
    %16 = tpu.matmul %13, %15, %cst_16 {dimension_numbers = #tpu.dot_dimension_numbers<[1], [0], [0], [1], [0, 0, 1, 1], [], []>} : vector<20x256xbf16>, vector<256x128xbf16>, vector<20x128xf32> -> vector<20x128xf32>
    %17 = arith.addf %8, %16 : vector<20x128xf32>
    %c0_i32_17 = arith.constant 0 : i32
    %18 = arith.addi %7, %c0_i32_17 : i32
    %c1_i32_18 = arith.constant 1 : i32
    %19 = arith.addi %18, %c1_i32_18 : i32
    %c0_19 = arith.constant 0 : index
    %20 = arith.index_cast %19 : i32 to index
    %c0_20 = arith.constant 0 : index
    %21 = vector.load %arg1[%c0_19, %20, %c0_20] : memref<1x24x256xbf16, #tpu.memory_space<vmem>>, vector<1x20x256xbf16>
    %22 = vector.shape_cast %21 : vector<1x20x256xbf16> to vector<20x256xbf16>
    %c1 = arith.constant 1 : index
    %c0_21 = arith.constant 0 : index
    %c0_22 = arith.constant 0 : index
    %23 = vector.load %arg2[%c1, %c0_21, %c0_22] : memref<5x256x128xbf16, #tpu.memory_space<vmem>>, vector<1x256x128xbf16>
    %24 = vector.shape_cast %23 : vector<1x256x128xbf16> to vector<256x128xbf16>
    %cst_23 = arith.constant dense<0.000000e+00> : vector<20x128xf32>
    %25 = tpu.matmul %22, %24, %cst_23 {dimension_numbers = #tpu.dot_dimension_numbers<[1], [0], [0], [1], [0, 0, 1, 1], [], []>} : vector<20x256xbf16>, vector<256x128xbf16>, vector<20x128xf32> -> vector<20x128xf32>
    %26 = arith.addf %17, %25 : vector<20x128xf32>
    %c0_i32_24 = arith.constant 0 : i32
    %27 = arith.addi %7, %c0_i32_24 : i32
    %c2_i32 = arith.constant 2 : i32
    %28 = arith.addi %27, %c2_i32 : i32
    %c0_25 = arith.constant 0 : index
    %29 = arith.index_cast %28 : i32 to index
    %c0_26 = arith.constant 0 : index
    %30 = vector.load %arg1[%c0_25, %29, %c0_26] : memref<1x24x256xbf16, #tpu.memory_space<vmem>>, vector<1x20x256xbf16>
    %31 = vector.shape_cast %30 : vector<1x20x256xbf16> to vector<20x256xbf16>
    %c2 = arith.constant 2 : index
    %c0_27 = arith.constant 0 : index
    %c0_28 = arith.constant 0 : index
    %32 = vector.load %arg2[%c2, %c0_27, %c0_28] : memref<5x256x128xbf16, #tpu.memory_space<vmem>>, vector<1x256x128xbf16>
    %33 = vector.shape_cast %32 : vector<1x256x128xbf16> to vector<256x128xbf16>
    %cst_29 = arith.constant dense<0.000000e+00> : vector<20x128xf32>
    %34 = tpu.matmul %31, %33, %cst_29 {dimension_numbers = #tpu.dot_dimension_numbers<[1], [0], [0], [1], [0, 0, 1, 1], [], []>} : vector<20x256xbf16>, vector<256x128xbf16>, vector<20x128xf32> -> vector<20x128xf32>
    %35 = arith.addf %26, %34 : vector<20x128xf32>
    %c0_i32_30 = arith.constant 0 : i32
    %36 = arith.addi %7, %c0_i32_30 : i32
    %c3_i32 = arith.constant 3 : i32
    %37 = arith.addi %36, %c3_i32 : i32
    %c0_31 = arith.constant 0 : index
    %38 = arith.index_cast %37 : i32 to index
    %c0_32 = arith.constant 0 : index
    %39 = vector.load %arg1[%c0_31, %38, %c0_32] : memref<1x24x256xbf16, #tpu.memory_space<vmem>>, vector<1x20x256xbf16>
    %40 = vector.shape_cast %39 : vector<1x20x256xbf16> to vector<20x256xbf16>
    %c3 = arith.constant 3 : index
    %c0_33 = arith.constant 0 : index
    %c0_34 = arith.constant 0 : index
    %41 = vector.load %arg2[%c3, %c0_33, %c0_34] : memref<5x256x128xbf16, #tpu.memory_space<vmem>>, vector<1x256x128xbf16>
    %42 = vector.shape_cast %41 : vector<1x256x128xbf16> to vector<256x128xbf16>
    %cst_35 = arith.constant dense<0.000000e+00> : vector<20x128xf32>
    %43 = tpu.matmul %40, %42, %cst_35 {dimension_numbers = #tpu.dot_dimension_numbers<[1], [0], [0], [1], [0, 0, 1, 1], [], []>} : vector<20x256xbf16>, vector<256x128xbf16>, vector<20x128xf32> -> vector<20x128xf32>
    %44 = arith.addf %35, %43 : vector<20x128xf32>
    %c0_i32_36 = arith.constant 0 : i32
    %45 = arith.addi %7, %c0_i32_36 : i32
    %c4_i32 = arith.constant 4 : i32
    %46 = arith.addi %45, %c4_i32 : i32
    %c0_37 = arith.constant 0 : index
    %47 = arith.index_cast %46 : i32 to index
    %c0_38 = arith.constant 0 : index
    %48 = vector.load %arg1[%c0_37, %47, %c0_38] : memref<1x24x256xbf16, #tpu.memory_space<vmem>>, vector<1x20x256xbf16>
    %49 = vector.shape_cast %48 : vector<1x20x256xbf16> to vector<20x256xbf16>
    %c4 = arith.constant 4 : index
    %c0_39 = arith.constant 0 : index
    %c0_40 = arith.constant 0 : index
    %50 = vector.load %arg2[%c4, %c0_39, %c0_40] : memref<5x256x128xbf16, #tpu.memory_space<vmem>>, vector<1x256x128xbf16>
    %51 = vector.shape_cast %50 : vector<1x256x128xbf16> to vector<256x128xbf16>
    %cst_41 = arith.constant dense<0.000000e+00> : vector<20x128xf32>
    %52 = tpu.matmul %49, %51, %cst_41 {dimension_numbers = #tpu.dot_dimension_numbers<[1], [0], [0], [1], [0, 0, 1, 1], [], []>} : vector<20x256xbf16>, vector<256x128xbf16>, vector<20x128xf32> -> vector<20x128xf32>
    %53 = arith.addf %44, %52 : vector<20x128xf32>
    %54 = vector.broadcast %0 : vector<1x128xf32> to vector<20x128xf32>
    %55 = arith.addf %53, %54 : vector<20x128xf32>
    %cst_42 = arith.constant 0.000000e+00 : f32
    %56 = vector.broadcast %cst_42 : f32 to vector<20x128xf32>
    %57 = arith.maximumf %55, %56 : vector<20x128xf32>
    %c2_i32_43 = arith.constant 2 : i32
    %58 = arith.subi %7, %c2_i32_43 : i32
    %59 = tpu.iota {dimensions = array<i32: 0>} : vector<20x1xi32>
    %60 = vector.broadcast %58 : i32 to vector<20x1xi32>
    %61 = arith.addi %60, %59 : vector<20x1xi32>
    %c0_i32_44 = arith.constant 0 : i32
    %62 = vector.broadcast %c0_i32_44 : i32 to vector<20x1xi32>
    %63 = arith.cmpi sge, %61, %62 : vector<20x1xi32>
    %c16_i32_45 = arith.constant 16 : i32
    %64 = vector.broadcast %c16_i32_45 : i32 to vector<20x1xi32>
    %65 = arith.cmpi slt, %61, %64 : vector<20x1xi32>
    %66 = arith.andi %63, %65 : vector<20x1xi1>
    %cst_46 = arith.constant 0.000000e+00 : f32
    %67 = vector.shape_cast %66 : vector<20x1xi1> to vector<20x1xi1>
    %68 = vector.broadcast %67 : vector<20x1xi1> to vector<20x128xi1>
    %69 = vector.broadcast %cst_46 : f32 to vector<20x128xf32>
    %70 = arith.select %68, %57, %69 : vector<20x128xi1>, vector<20x128xf32>
    %71 = arith.truncf %70 : vector<20x128xf32> to vector<20x128xbf16>
    %c0_47 = arith.constant 0 : index
    %c0_48 = arith.constant 0 : index
    %72 = vector.load %arg9[%c0_47, %c0_48] : memref<20x128xbf16, #tpu.memory_space<vmem>>, vector<20x128xbf16>
    tpu.vector_store %arg9[%c0_47, %c0_48], %71 {strides = array<i32>} : memref<20x128xbf16, #tpu.memory_space<vmem>>, vector<20x128xbf16>,
    %cst_49 = arith.constant 0.000000e+00 : f32
    %73 = vector.broadcast %cst_49 : f32 to vector<16x128xf32>
    %c0_50 = arith.constant 0 : index
    %c0_51 = arith.constant 0 : index
    %74 = vector.load %arg9[%c0_50, %c0_51] : memref<20x128xbf16, #tpu.memory_space<vmem>>, vector<16x128xbf16>
    %c0_52 = arith.constant 0 : index
    %c0_53 = arith.constant 0 : index
    %c0_54 = arith.constant 0 : index
    %75 = vector.load %arg4[%c0_52, %c0_53, %c0_54] : memref<5x128x128xbf16, #tpu.memory_space<vmem>>, vector<1x128x128xbf16>
    %76 = vector.shape_cast %75 : vector<1x128x128xbf16> to vector<128x128xbf16>
    %cst_55 = arith.constant dense<0.000000e+00> : vector<16x128xf32>
    %77 = tpu.matmul %74, %76, %cst_55 {dimension_numbers = #tpu.dot_dimension_numbers<[1], [0], [0], [1], [0, 0, 1, 1], [], []>} : vector<16x128xbf16>, vector<128x128xbf16>, vector<16x128xf32> -> vector<16x128xf32>
    %78 = arith.addf %73, %77 : vector<16x128xf32>
    %c1_56 = arith.constant 1 : index
    %c0_57 = arith.constant 0 : index
    %79 = vector.load %arg9[%c1_56, %c0_57] : memref<20x128xbf16, #tpu.memory_space<vmem>>, vector<16x128xbf16>
    %c1_58 = arith.constant 1 : index
    %c0_59 = arith.constant 0 : index
    %c0_60 = arith.constant 0 : index
    %80 = vector.load %arg4[%c1_58, %c0_59, %c0_60] : memref<5x128x128xbf16, #tpu.memory_space<vmem>>, vector<1x128x128xbf16>
    %81 = vector.shape_cast %80 : vector<1x128x128xbf16> to vector<128x128xbf16>
    %cst_61 = arith.constant dense<0.000000e+00> : vector<16x128xf32>
    %82 = tpu.matmul %79, %81, %cst_61 {dimension_numbers = #tpu.dot_dimension_numbers<[1], [0], [0], [1], [0, 0, 1, 1], [], []>} : vector<16x128xbf16>, vector<128x128xbf16>, vector<16x128xf32> -> vector<16x128xf32>
    %83 = arith.addf %78, %82 : vector<16x128xf32>
    %c2_62 = arith.constant 2 : index
    %c0_63 = arith.constant 0 : index
    %84 = vector.load %arg9[%c2_62, %c0_63] : memref<20x128xbf16, #tpu.memory_space<vmem>>, vector<16x128xbf16>
    %c2_64 = arith.constant 2 : index
    %c0_65 = arith.constant 0 : index
    %c0_66 = arith.constant 0 : index
    %85 = vector.load %arg4[%c2_64, %c0_65, %c0_66] : memref<5x128x128xbf16, #tpu.memory_space<vmem>>, vector<1x128x128xbf16>
    %86 = vector.shape_cast %85 : vector<1x128x128xbf16> to vector<128x128xbf16>
    %cst_67 = arith.constant dense<0.000000e+00> : vector<16x128xf32>
    %87 = tpu.matmul %84, %86, %cst_67 {dimension_numbers = #tpu.dot_dimension_numbers<[1], [0], [0], [1], [0, 0, 1, 1], [], []>} : vector<16x128xbf16>, vector<128x128xbf16>, vector<16x128xf32> -> vector<16x128xf32>
    %88 = arith.addf %83, %87 : vector<16x128xf32>
    %c3_68 = arith.constant 3 : index
    %c0_69 = arith.constant 0 : index
    %89 = vector.load %arg9[%c3_68, %c0_69] : memref<20x128xbf16, #tpu.memory_space<vmem>>, vector<16x128xbf16>
    %c3_70 = arith.constant 3 : index
    %c0_71 = arith.constant 0 : index
    %c0_72 = arith.constant 0 : index
    %90 = vector.load %arg4[%c3_70, %c0_71, %c0_72] : memref<5x128x128xbf16, #tpu.memory_space<vmem>>, vector<1x128x128xbf16>
    %91 = vector.shape_cast %90 : vector<1x128x128xbf16> to vector<128x128xbf16>
    %cst_73 = arith.constant dense<0.000000e+00> : vector<16x128xf32>
    %92 = tpu.matmul %89, %91, %cst_73 {dimension_numbers = #tpu.dot_dimension_numbers<[1], [0], [0], [1], [0, 0, 1, 1], [], []>} : vector<16x128xbf16>, vector<128x128xbf16>, vector<16x128xf32> -> vector<16x128xf32>
    %93 = arith.addf %88, %92 : vector<16x128xf32>
    %c4_74 = arith.constant 4 : index
    %c0_75 = arith.constant 0 : index
    %94 = vector.load %arg9[%c4_74, %c0_75] : memref<20x128xbf16, #tpu.memory_space<vmem>>, vector<16x128xbf16>
    %c4_76 = arith.constant 4 : index
    %c0_77 = arith.constant 0 : index
    %c0_78 = arith.constant 0 : index
    %95 = vector.load %arg4[%c4_76, %c0_77, %c0_78] : memref<5x128x128xbf16, #tpu.memory_space<vmem>>, vector<1x128x128xbf16>
    %96 = vector.shape_cast %95 : vector<1x128x128xbf16> to vector<128x128xbf16>
    %cst_79 = arith.constant dense<0.000000e+00> : vector<16x128xf32>
    %97 = tpu.matmul %94, %96, %cst_79 {dimension_numbers = #tpu.dot_dimension_numbers<[1], [0], [0], [1], [0, 0, 1, 1], [], []>} : vector<16x128xbf16>, vector<128x128xbf16>, vector<16x128xf32> -> vector<16x128xf32>
    %98 = arith.addf %93, %97 : vector<16x128xf32>
    %99 = vector.broadcast %1 : vector<1x128xf32> to vector<16x128xf32>
    %100 = arith.addf %98, %99 : vector<16x128xf32>
    %cst_80 = arith.constant 0.000000e+00 : f32
    %101 = vector.broadcast %cst_80 : f32 to vector<16x128xf32>
    %102 = arith.maximumf %100, %101 : vector<16x128xf32>
    %103 = arith.truncf %102 : vector<16x128xf32> to vector<16x128xbf16>
    %cst_81 = arith.constant dense<0.000000e+00> : vector<16x128xf32>
    %104 = tpu.matmul %103, %2, %cst_81 {dimension_numbers = #tpu.dot_dimension_numbers<[1], [0], [0], [1], [0, 0, 1, 1], [], []>} : vector<16x128xbf16>, vector<128x128xbf16>, vector<16x128xf32> -> vector<16x128xf32>
    %105 = vector.broadcast %3 : vector<1x128xf32> to vector<16x128xf32>
    %106 = arith.addf %104, %105 : vector<16x128xf32>
    %c0_82 = arith.constant 0 : index
    %107 = arith.index_cast %7 : i32 to index
    %c0_83 = arith.constant 0 : index
    %108 = vector.load %arg8[%c0_82, %107, %c0_83] : memref<1x16x128xf32, #tpu.memory_space<vmem>>, vector<1x16x128xf32>
    %109 = vector.shape_cast %108 : vector<1x16x128xf32> to vector<16x128xf32>
    %110 = vector.shape_cast %106 : vector<16x128xf32> to vector<1x16x128xf32>
    tpu.vector_store %arg8[%c0_82, %107, %c0_83], %110 {strides = array<i32>} : memref<1x16x128xf32, #tpu.memory_space<vmem>>, vector<1x16x128xf32>,
    %c1_i32_84 = arith.constant 1 : i32
    return
  }
  func.func @transform_0(%arg0: i32) -> (i32, i32, i32) {
    %c0_i32 = arith.constant 0 : i32
    %c0_i32_0 = arith.constant 0 : i32
    %c0_i32_1 = arith.constant 0 : i32
    return %arg0, %c0_i32, %c0_i32_0 : i32, i32, i32
  }
  func.func @transform_1(%arg0: i32) -> (i32, i32, i32) {
    %c0_i32 = arith.constant 0 : i32
    %c0_i32_0 = arith.constant 0 : i32
    %c0_i32_1 = arith.constant 0 : i32
    %c0_i32_2 = arith.constant 0 : i32
    return %c0_i32, %c0_i32_0, %c0_i32_1 : i32, i32, i32
  }
  func.func @transform_2(%arg0: i32) -> (i32, i32) {
    %c0_i32 = arith.constant 0 : i32
    %c0_i32_0 = arith.constant 0 : i32
    %c0_i32_1 = arith.constant 0 : i32
    return %c0_i32, %c0_i32_0 : i32, i32
  }
  func.func @transform_3(%arg0: i32) -> (i32, i32, i32) {
    %c0_i32 = arith.constant 0 : i32
    %c0_i32_0 = arith.constant 0 : i32
    %c0_i32_1 = arith.constant 0 : i32
    %c0_i32_2 = arith.constant 0 : i32
    return %c0_i32, %c0_i32_0, %c0_i32_1 : i32, i32, i32
  }
  func.func @transform_4(%arg0: i32) -> (i32, i32) {
    %c0_i32 = arith.constant 0 : i32
    %c0_i32_0 = arith.constant 0 : i32
    %c0_i32_1 = arith.constant 0 : i32
    return %c0_i32, %c0_i32_0 : i32, i32
  }
  func.func @transform_5(%arg0: i32) -> (i32, i32) {
    %c0_i32 = arith.constant 0 : i32
    %c0_i32_0 = arith.constant 0 : i32
    %c0_i32_1 = arith.constant 0 : i32
    return %c0_i32, %c0_i32_0 : i32, i32
  }
  func.func @transform_6(%arg0: i32) -> (i32, i32) {
    %c0_i32 = arith.constant 0 : i32
    %c0_i32_0 = arith.constant 0 : i32
    %c0_i32_1 = arith.constant 0 : i32
    return %c0_i32, %c0_i32_0 : i32, i32
  }
  func.func @transform_7(%arg0: i32) -> (i32, i32, i32) {
    %c0_i32 = arith.constant 0 : i32
    %c0_i32_0 = arith.constant 0 : i32
    %c0_i32_1 = arith.constant 0 : i32
    return %arg0, %c0_i32, %c0_i32_0 : i32, i32, i32
  }
}

module attributes {stable_mosaic.version = 11 : i64} {
  func.func @_fused_block_kernel(%arg0: i32, %arg1: memref<1x24x256xbf16, #tpu.memory_space<vmem>>, %arg2: memref<3x256x512xbf16, #tpu.memory_space<vmem>>, %arg3: memref<1x512xf32, #tpu.memory_space<vmem>>, %arg4: memref<3x512x256xbf16, #tpu.memory_space<vmem>>, %arg5: memref<1x256xf32, #tpu.memory_space<vmem>>, %arg6: memref<1x24x256xbf16, #tpu.memory_space<vmem>>, %arg7: memref<18x512xbf16, #tpu.memory_space<vmem>>) attributes {dimension_semantics = [#tpu.dimension_semantics<parallel>], iteration_bounds = array<i64: 2>, scalar_prefetch = 0 : i64, scratch_operands = 1 : i64, tpu.core_type = #tpu.core_type<tc>, window_params = [{transform_indices = @transform_0, window_bounds = array<i64: 1, 24, 256>}, {pipeline_mode = #tpu.pipeline_mode<synchronous>, transform_indices = @transform_1, window_bounds = array<i64: 3, 256, 512>}, {pipeline_mode = #tpu.pipeline_mode<synchronous>, transform_indices = @transform_2, window_bounds = array<i64: 1, 512>}, {pipeline_mode = #tpu.pipeline_mode<synchronous>, transform_indices = @transform_3, window_bounds = array<i64: 3, 512, 256>}, {pipeline_mode = #tpu.pipeline_mode<synchronous>, transform_indices = @transform_4, window_bounds = array<i64: 1, 256>}, {transform_indices = @transform_5, window_bounds = array<i64: 1, 24, 256>}]} {
    %cst = arith.constant 0.000000e+00 : bf16
    %0 = vector.broadcast %cst : bf16 to vector<4x256xbf16>
    %c0 = arith.constant 0 : index
    %c0_0 = arith.constant 0 : index
    %c0_1 = arith.constant 0 : index
    %1 = vector.load %arg6[%c0, %c0_0, %c0_1] : memref<1x24x256xbf16, #tpu.memory_space<vmem>>, vector<1x4x256xbf16>
    %2 = vector.shape_cast %1 : vector<1x4x256xbf16> to vector<4x256xbf16>
    %3 = vector.shape_cast %0 : vector<4x256xbf16> to vector<1x4x256xbf16>
    tpu.vector_store %arg6[%c0, %c0_0, %c0_1], %3 {strides = array<i32>} : memref<1x24x256xbf16, #tpu.memory_space<vmem>>, vector<1x4x256xbf16>,
    %cst_2 = arith.constant 0.000000e+00 : bf16
    %4 = vector.broadcast %cst_2 : bf16 to vector<4x256xbf16>
    %c0_3 = arith.constant 0 : index
    %c20 = arith.constant 20 : index
    %c0_4 = arith.constant 0 : index
    %5 = vector.load %arg6[%c0_3, %c20, %c0_4] : memref<1x24x256xbf16, #tpu.memory_space<vmem>>, vector<1x4x256xbf16>
    %6 = vector.shape_cast %5 : vector<1x4x256xbf16> to vector<4x256xbf16>
    %7 = vector.shape_cast %4 : vector<4x256xbf16> to vector<1x4x256xbf16>
    tpu.vector_store %arg6[%c0_3, %c20, %c0_4], %7 {strides = array<i32>} : memref<1x24x256xbf16, #tpu.memory_space<vmem>>, vector<1x4x256xbf16>,
    %c0_5 = arith.constant 0 : index
    %c0_6 = arith.constant 0 : index
    %8 = vector.load %arg3[%c0_5, %c0_6] : memref<1x512xf32, #tpu.memory_space<vmem>>, vector<1x512xf32>
    %c0_7 = arith.constant 0 : index
    %c0_8 = arith.constant 0 : index
    %9 = vector.load %arg5[%c0_7, %c0_8] : memref<1x256xf32, #tpu.memory_space<vmem>>, vector<1x256xf32>
    %c0_i32 = arith.constant 0 : i32
    %c1_i32 = arith.constant 1 : i32
    %10 = arith.muli %c0_i32, %c1_i32 : i32
    %c0_i32_9 = arith.constant 0 : i32
    %11 = arith.addi %c0_i32_9, %10 : i32
    %c16_i32 = arith.constant 16 : i32
    %12 = arith.muli %11, %c16_i32 : i32
    %c0_i32_10 = arith.constant 0 : i32
    %13 = arith.minsi %12, %c0_i32_10 : i32
    %cst_11 = arith.constant 0.000000e+00 : f32
    %14 = vector.broadcast %cst_11 : f32 to vector<18x512xf32>
    %c2_i32 = arith.constant 2 : i32
    %15 = arith.addi %13, %c2_i32 : i32
    %c0_i32_12 = arith.constant 0 : i32
    %16 = arith.addi %15, %c0_i32_12 : i32
    %c0_13 = arith.constant 0 : index
    %17 = arith.index_cast %16 : i32 to index
    %c0_14 = arith.constant 0 : index
    %18 = vector.load %arg1[%c0_13, %17, %c0_14] : memref<1x24x256xbf16, #tpu.memory_space<vmem>>, vector<1x18x256xbf16>
    %19 = vector.shape_cast %18 : vector<1x18x256xbf16> to vector<18x256xbf16>
    %c0_15 = arith.constant 0 : index
    %c0_16 = arith.constant 0 : index
    %c0_17 = arith.constant 0 : index
    %20 = vector.load %arg2[%c0_15, %c0_16, %c0_17] : memref<3x256x512xbf16, #tpu.memory_space<vmem>>, vector<1x256x512xbf16>
    %21 = vector.shape_cast %20 : vector<1x256x512xbf16> to vector<256x512xbf16>
    %cst_18 = arith.constant dense<0.000000e+00> : vector<18x512xf32>
    %22 = tpu.matmul %19, %21, %cst_18 {dimension_numbers = #tpu.dot_dimension_numbers<[1], [0], [0], [1], [0, 0, 1, 1], [], []>} : vector<18x256xbf16>, vector<256x512xbf16>, vector<18x512xf32> -> vector<18x512xf32>
    %23 = arith.addf %14, %22 : vector<18x512xf32>
    %c2_i32_19 = arith.constant 2 : i32
    %24 = arith.addi %13, %c2_i32_19 : i32
    %c1_i32_20 = arith.constant 1 : i32
    %25 = arith.addi %24, %c1_i32_20 : i32
    %c0_21 = arith.constant 0 : index
    %26 = arith.index_cast %25 : i32 to index
    %c0_22 = arith.constant 0 : index
    %27 = vector.load %arg1[%c0_21, %26, %c0_22] : memref<1x24x256xbf16, #tpu.memory_space<vmem>>, vector<1x18x256xbf16>
    %28 = vector.shape_cast %27 : vector<1x18x256xbf16> to vector<18x256xbf16>
    %c1 = arith.constant 1 : index
    %c0_23 = arith.constant 0 : index
    %c0_24 = arith.constant 0 : index
    %29 = vector.load %arg2[%c1, %c0_23, %c0_24] : memref<3x256x512xbf16, #tpu.memory_space<vmem>>, vector<1x256x512xbf16>
    %30 = vector.shape_cast %29 : vector<1x256x512xbf16> to vector<256x512xbf16>
    %cst_25 = arith.constant dense<0.000000e+00> : vector<18x512xf32>
    %31 = tpu.matmul %28, %30, %cst_25 {dimension_numbers = #tpu.dot_dimension_numbers<[1], [0], [0], [1], [0, 0, 1, 1], [], []>} : vector<18x256xbf16>, vector<256x512xbf16>, vector<18x512xf32> -> vector<18x512xf32>
    %32 = arith.addf %23, %31 : vector<18x512xf32>
    %c2_i32_26 = arith.constant 2 : i32
    %33 = arith.addi %13, %c2_i32_26 : i32
    %c2_i32_27 = arith.constant 2 : i32
    %34 = arith.addi %33, %c2_i32_27 : i32
    %c0_28 = arith.constant 0 : index
    %35 = arith.index_cast %34 : i32 to index
    %c0_29 = arith.constant 0 : index
    %36 = vector.load %arg1[%c0_28, %35, %c0_29] : memref<1x24x256xbf16, #tpu.memory_space<vmem>>, vector<1x18x256xbf16>
    %37 = vector.shape_cast %36 : vector<1x18x256xbf16> to vector<18x256xbf16>
    %c2 = arith.constant 2 : index
    %c0_30 = arith.constant 0 : index
    %c0_31 = arith.constant 0 : index
    %38 = vector.load %arg2[%c2, %c0_30, %c0_31] : memref<3x256x512xbf16, #tpu.memory_space<vmem>>, vector<1x256x512xbf16>
    %39 = vector.shape_cast %38 : vector<1x256x512xbf16> to vector<256x512xbf16>
    %cst_32 = arith.constant dense<0.000000e+00> : vector<18x512xf32>
    %40 = tpu.matmul %37, %39, %cst_32 {dimension_numbers = #tpu.dot_dimension_numbers<[1], [0], [0], [1], [0, 0, 1, 1], [], []>} : vector<18x256xbf16>, vector<256x512xbf16>, vector<18x512xf32> -> vector<18x512xf32>
    %41 = arith.addf %32, %40 : vector<18x512xf32>
    %42 = vector.broadcast %8 : vector<1x512xf32> to vector<18x512xf32>
    %43 = arith.addf %41, %42 : vector<18x512xf32>
    %cst_33 = arith.constant 0.000000e+00 : f32
    %44 = vector.broadcast %cst_33 : f32 to vector<18x512xf32>
    %45 = arith.maximumf %43, %44 : vector<18x512xf32>
    %c1_i32_34 = arith.constant 1 : i32
    %46 = arith.subi %13, %c1_i32_34 : i32
    %47 = tpu.iota {dimensions = array<i32: 0>} : vector<18x1xi32>
    %48 = vector.broadcast %46 : i32 to vector<18x1xi32>
    %49 = arith.addi %48, %47 : vector<18x1xi32>
    %c0_i32_35 = arith.constant 0 : i32
    %50 = vector.broadcast %c0_i32_35 : i32 to vector<18x1xi32>
    %51 = arith.cmpi sge, %49, %50 : vector<18x1xi32>
    %c16_i32_36 = arith.constant 16 : i32
    %52 = vector.broadcast %c16_i32_36 : i32 to vector<18x1xi32>
    %53 = arith.cmpi slt, %49, %52 : vector<18x1xi32>
    %54 = arith.andi %51, %53 : vector<18x1xi1>
    %cst_37 = arith.constant 0.000000e+00 : f32
    %55 = vector.shape_cast %54 : vector<18x1xi1> to vector<18x1xi1>
    %56 = vector.broadcast %55 : vector<18x1xi1> to vector<18x512xi1>
    %57 = vector.broadcast %cst_37 : f32 to vector<18x512xf32>
    %58 = arith.select %56, %45, %57 : vector<18x512xi1>, vector<18x512xf32>
    %59 = arith.truncf %58 : vector<18x512xf32> to vector<18x512xbf16>
    %c0_38 = arith.constant 0 : index
    %c0_39 = arith.constant 0 : index
    %60 = vector.load %arg7[%c0_38, %c0_39] : memref<18x512xbf16, #tpu.memory_space<vmem>>, vector<18x512xbf16>
    tpu.vector_store %arg7[%c0_38, %c0_39], %59 {strides = array<i32>} : memref<18x512xbf16, #tpu.memory_space<vmem>>, vector<18x512xbf16>,
    %cst_40 = arith.constant 0.000000e+00 : f32
    %61 = vector.broadcast %cst_40 : f32 to vector<16x256xf32>
    %c0_41 = arith.constant 0 : index
    %c0_42 = arith.constant 0 : index
    %62 = vector.load %arg7[%c0_41, %c0_42] : memref<18x512xbf16, #tpu.memory_space<vmem>>, vector<16x512xbf16>
    %c0_43 = arith.constant 0 : index
    %c0_44 = arith.constant 0 : index
    %c0_45 = arith.constant 0 : index
    %63 = vector.load %arg4[%c0_43, %c0_44, %c0_45] : memref<3x512x256xbf16, #tpu.memory_space<vmem>>, vector<1x512x256xbf16>
    %64 = vector.shape_cast %63 : vector<1x512x256xbf16> to vector<512x256xbf16>
    %cst_46 = arith.constant dense<0.000000e+00> : vector<16x256xf32>
    %65 = tpu.matmul %62, %64, %cst_46 {dimension_numbers = #tpu.dot_dimension_numbers<[1], [0], [0], [1], [0, 0, 1, 1], [], []>} : vector<16x512xbf16>, vector<512x256xbf16>, vector<16x256xf32> -> vector<16x256xf32>
    %66 = arith.addf %61, %65 : vector<16x256xf32>
    %c1_47 = arith.constant 1 : index
    %c0_48 = arith.constant 0 : index
    %67 = vector.load %arg7[%c1_47, %c0_48] : memref<18x512xbf16, #tpu.memory_space<vmem>>, vector<16x512xbf16>
    %c1_49 = arith.constant 1 : index
    %c0_50 = arith.constant 0 : index
    %c0_51 = arith.constant 0 : index
    %68 = vector.load %arg4[%c1_49, %c0_50, %c0_51] : memref<3x512x256xbf16, #tpu.memory_space<vmem>>, vector<1x512x256xbf16>
    %69 = vector.shape_cast %68 : vector<1x512x256xbf16> to vector<512x256xbf16>
    %cst_52 = arith.constant dense<0.000000e+00> : vector<16x256xf32>
    %70 = tpu.matmul %67, %69, %cst_52 {dimension_numbers = #tpu.dot_dimension_numbers<[1], [0], [0], [1], [0, 0, 1, 1], [], []>} : vector<16x512xbf16>, vector<512x256xbf16>, vector<16x256xf32> -> vector<16x256xf32>
    %71 = arith.addf %66, %70 : vector<16x256xf32>
    %c2_53 = arith.constant 2 : index
    %c0_54 = arith.constant 0 : index
    %72 = vector.load %arg7[%c2_53, %c0_54] : memref<18x512xbf16, #tpu.memory_space<vmem>>, vector<16x512xbf16>
    %c2_55 = arith.constant 2 : index
    %c0_56 = arith.constant 0 : index
    %c0_57 = arith.constant 0 : index
    %73 = vector.load %arg4[%c2_55, %c0_56, %c0_57] : memref<3x512x256xbf16, #tpu.memory_space<vmem>>, vector<1x512x256xbf16>
    %74 = vector.shape_cast %73 : vector<1x512x256xbf16> to vector<512x256xbf16>
    %cst_58 = arith.constant dense<0.000000e+00> : vector<16x256xf32>
    %75 = tpu.matmul %72, %74, %cst_58 {dimension_numbers = #tpu.dot_dimension_numbers<[1], [0], [0], [1], [0, 0, 1, 1], [], []>} : vector<16x512xbf16>, vector<512x256xbf16>, vector<16x256xf32> -> vector<16x256xf32>
    %76 = arith.addf %71, %75 : vector<16x256xf32>
    %77 = vector.broadcast %9 : vector<1x256xf32> to vector<16x256xf32>
    %78 = arith.addf %76, %77 : vector<16x256xf32>
    %c4_i32 = arith.constant 4 : i32
    %79 = arith.addi %13, %c4_i32 : i32
    %c0_59 = arith.constant 0 : index
    %80 = arith.index_cast %79 : i32 to index
    %c0_60 = arith.constant 0 : index
    %81 = vector.load %arg1[%c0_59, %80, %c0_60] : memref<1x24x256xbf16, #tpu.memory_space<vmem>>, vector<1x16x256xbf16>
    %82 = vector.shape_cast %81 : vector<1x16x256xbf16> to vector<16x256xbf16>
    %83 = arith.extf %82 : vector<16x256xbf16> to vector<16x256xf32>
    %84 = arith.addf %78, %83 : vector<16x256xf32>
    %85 = arith.truncf %84 : vector<16x256xf32> to vector<16x256xbf16>
    %c4_i32_61 = arith.constant 4 : i32
    %86 = arith.addi %13, %c4_i32_61 : i32
    %c0_62 = arith.constant 0 : index
    %87 = arith.index_cast %86 : i32 to index
    %c0_63 = arith.constant 0 : index
    %88 = vector.load %arg6[%c0_62, %87, %c0_63] : memref<1x24x256xbf16, #tpu.memory_space<vmem>>, vector<1x16x256xbf16>
    %89 = vector.shape_cast %88 : vector<1x16x256xbf16> to vector<16x256xbf16>
    %90 = vector.shape_cast %85 : vector<16x256xbf16> to vector<1x16x256xbf16>
    tpu.vector_store %arg6[%c0_62, %87, %c0_63], %90 {strides = array<i32>} : memref<1x24x256xbf16, #tpu.memory_space<vmem>>, vector<1x16x256xbf16>,
    %c1_i32_64 = arith.constant 1 : i32
    return
  }
  func.func @transform_0(%arg0: i32) -> (i32, i32, i32) {
    %c0_i32 = arith.constant 0 : i32
    %c0_i32_0 = arith.constant 0 : i32
    %c0_i32_1 = arith.constant 0 : i32
    return %arg0, %c0_i32, %c0_i32_0 : i32, i32, i32
  }
  func.func @transform_1(%arg0: i32) -> (i32, i32, i32) {
    %c0_i32 = arith.constant 0 : i32
    %c0_i32_0 = arith.constant 0 : i32
    %c0_i32_1 = arith.constant 0 : i32
    %c0_i32_2 = arith.constant 0 : i32
    return %c0_i32, %c0_i32_0, %c0_i32_1 : i32, i32, i32
  }
  func.func @transform_2(%arg0: i32) -> (i32, i32) {
    %c0_i32 = arith.constant 0 : i32
    %c0_i32_0 = arith.constant 0 : i32
    %c0_i32_1 = arith.constant 0 : i32
    return %c0_i32, %c0_i32_0 : i32, i32
  }
  func.func @transform_3(%arg0: i32) -> (i32, i32, i32) {
    %c0_i32 = arith.constant 0 : i32
    %c0_i32_0 = arith.constant 0 : i32
    %c0_i32_1 = arith.constant 0 : i32
    %c0_i32_2 = arith.constant 0 : i32
    return %c0_i32, %c0_i32_0, %c0_i32_1 : i32, i32, i32
  }
  func.func @transform_4(%arg0: i32) -> (i32, i32) {
    %c0_i32 = arith.constant 0 : i32
    %c0_i32_0 = arith.constant 0 : i32
    %c0_i32_1 = arith.constant 0 : i32
    return %c0_i32, %c0_i32_0 : i32, i32
  }
  func.func @transform_5(%arg0: i32) -> (i32, i32, i32) {
    %c0_i32 = arith.constant 0 : i32
    %c0_i32_0 = arith.constant 0 : i32
    %c0_i32_1 = arith.constant 0 : i32
    return %arg0, %c0_i32, %c0_i32_0 : i32, i32, i32
  }
}

module attributes {stable_mosaic.version = 11 : i64} {
  func.func @_fused_block_kernel(%arg0: i32, %arg1: memref<1x24x256xbf16, #tpu.memory_space<vmem>>, %arg2: memref<3x256x512xbf16, #tpu.memory_space<vmem>>, %arg3: memref<1x512xf32, #tpu.memory_space<vmem>>, %arg4: memref<3x512x256xbf16, #tpu.memory_space<vmem>>, %arg5: memref<1x256xf32, #tpu.memory_space<vmem>>, %arg6: memref<1x24x256xbf16, #tpu.memory_space<vmem>>, %arg7: memref<18x512xbf16, #tpu.memory_space<vmem>>) attributes {dimension_semantics = [#tpu.dimension_semantics<parallel>], iteration_bounds = array<i64: 2>, scalar_prefetch = 0 : i64, scratch_operands = 1 : i64, tpu.core_type = #tpu.core_type<tc>, window_params = [{transform_indices = @transform_0, window_bounds = array<i64: 1, 24, 256>}, {pipeline_mode = #tpu.pipeline_mode<synchronous>, transform_indices = @transform_1, window_bounds = array<i64: 3, 256, 512>}, {pipeline_mode = #tpu.pipeline_mode<synchronous>, transform_indices = @transform_2, window_bounds = array<i64: 1, 512>}, {pipeline_mode = #tpu.pipeline_mode<synchronous>, transform_indices = @transform_3, window_bounds = array<i64: 3, 512, 256>}, {pipeline_mode = #tpu.pipeline_mode<synchronous>, transform_indices = @transform_4, window_bounds = array<i64: 1, 256>}, {transform_indices = @transform_5, window_bounds = array<i64: 1, 24, 256>}]} {
    %cst = arith.constant 0.000000e+00 : bf16
    %0 = vector.broadcast %cst : bf16 to vector<4x256xbf16>
    %c0 = arith.constant 0 : index
    %c0_0 = arith.constant 0 : index
    %c0_1 = arith.constant 0 : index
    %1 = vector.load %arg6[%c0, %c0_0, %c0_1] : memref<1x24x256xbf16, #tpu.memory_space<vmem>>, vector<1x4x256xbf16>
    %2 = vector.shape_cast %1 : vector<1x4x256xbf16> to vector<4x256xbf16>
    %3 = vector.shape_cast %0 : vector<4x256xbf16> to vector<1x4x256xbf16>
    tpu.vector_store %arg6[%c0, %c0_0, %c0_1], %3 {strides = array<i32>} : memref<1x24x256xbf16, #tpu.memory_space<vmem>>, vector<1x4x256xbf16>,
    %cst_2 = arith.constant 0.000000e+00 : bf16
    %4 = vector.broadcast %cst_2 : bf16 to vector<4x256xbf16>
    %c0_3 = arith.constant 0 : index
    %c20 = arith.constant 20 : index
    %c0_4 = arith.constant 0 : index
    %5 = vector.load %arg6[%c0_3, %c20, %c0_4] : memref<1x24x256xbf16, #tpu.memory_space<vmem>>, vector<1x4x256xbf16>
    %6 = vector.shape_cast %5 : vector<1x4x256xbf16> to vector<4x256xbf16>
    %7 = vector.shape_cast %4 : vector<4x256xbf16> to vector<1x4x256xbf16>
    tpu.vector_store %arg6[%c0_3, %c20, %c0_4], %7 {strides = array<i32>} : memref<1x24x256xbf16, #tpu.memory_space<vmem>>, vector<1x4x256xbf16>,
    %c0_5 = arith.constant 0 : index
    %c0_6 = arith.constant 0 : index
    %8 = vector.load %arg3[%c0_5, %c0_6] : memref<1x512xf32, #tpu.memory_space<vmem>>, vector<1x512xf32>
    %c0_7 = arith.constant 0 : index
    %c0_8 = arith.constant 0 : index
    %9 = vector.load %arg5[%c0_7, %c0_8] : memref<1x256xf32, #tpu.memory_space<vmem>>, vector<1x256xf32>
    %c0_i32 = arith.constant 0 : i32
    %c1_i32 = arith.constant 1 : i32
    %10 = arith.muli %c0_i32, %c1_i32 : i32
    %c0_i32_9 = arith.constant 0 : i32
    %11 = arith.addi %c0_i32_9, %10 : i32
    %c16_i32 = arith.constant 16 : i32
    %12 = arith.muli %11, %c16_i32 : i32
    %c0_i32_10 = arith.constant 0 : i32
    %13 = arith.minsi %12, %c0_i32_10 : i32
    %cst_11 = arith.constant 0.000000e+00 : f32
    %14 = vector.broadcast %cst_11 : f32 to vector<18x512xf32>
    %c2_i32 = arith.constant 2 : i32
    %15 = arith.addi %13, %c2_i32 : i32
    %c0_i32_12 = arith.constant 0 : i32
    %16 = arith.addi %15, %c0_i32_12 : i32
    %c0_13 = arith.constant 0 : index
    %17 = arith.index_cast %16 : i32 to index
    %c0_14 = arith.constant 0 : index
    %18 = vector.load %arg1[%c0_13, %17, %c0_14] : memref<1x24x256xbf16, #tpu.memory_space<vmem>>, vector<1x18x256xbf16>
    %19 = vector.shape_cast %18 : vector<1x18x256xbf16> to vector<18x256xbf16>
    %c0_15 = arith.constant 0 : index
    %c0_16 = arith.constant 0 : index
    %c0_17 = arith.constant 0 : index
    %20 = vector.load %arg2[%c0_15, %c0_16, %c0_17] : memref<3x256x512xbf16, #tpu.memory_space<vmem>>, vector<1x256x512xbf16>
    %21 = vector.shape_cast %20 : vector<1x256x512xbf16> to vector<256x512xbf16>
    %cst_18 = arith.constant dense<0.000000e+00> : vector<18x512xf32>
    %22 = tpu.matmul %19, %21, %cst_18 {dimension_numbers = #tpu.dot_dimension_numbers<[1], [0], [0], [1], [0, 0, 1, 1], [], []>} : vector<18x256xbf16>, vector<256x512xbf16>, vector<18x512xf32> -> vector<18x512xf32>
    %23 = arith.addf %14, %22 : vector<18x512xf32>
    %c2_i32_19 = arith.constant 2 : i32
    %24 = arith.addi %13, %c2_i32_19 : i32
    %c1_i32_20 = arith.constant 1 : i32
    %25 = arith.addi %24, %c1_i32_20 : i32
    %c0_21 = arith.constant 0 : index
    %26 = arith.index_cast %25 : i32 to index
    %c0_22 = arith.constant 0 : index
    %27 = vector.load %arg1[%c0_21, %26, %c0_22] : memref<1x24x256xbf16, #tpu.memory_space<vmem>>, vector<1x18x256xbf16>
    %28 = vector.shape_cast %27 : vector<1x18x256xbf16> to vector<18x256xbf16>
    %c1 = arith.constant 1 : index
    %c0_23 = arith.constant 0 : index
    %c0_24 = arith.constant 0 : index
    %29 = vector.load %arg2[%c1, %c0_23, %c0_24] : memref<3x256x512xbf16, #tpu.memory_space<vmem>>, vector<1x256x512xbf16>
    %30 = vector.shape_cast %29 : vector<1x256x512xbf16> to vector<256x512xbf16>
    %cst_25 = arith.constant dense<0.000000e+00> : vector<18x512xf32>
    %31 = tpu.matmul %28, %30, %cst_25 {dimension_numbers = #tpu.dot_dimension_numbers<[1], [0], [0], [1], [0, 0, 1, 1], [], []>} : vector<18x256xbf16>, vector<256x512xbf16>, vector<18x512xf32> -> vector<18x512xf32>
    %32 = arith.addf %23, %31 : vector<18x512xf32>
    %c2_i32_26 = arith.constant 2 : i32
    %33 = arith.addi %13, %c2_i32_26 : i32
    %c2_i32_27 = arith.constant 2 : i32
    %34 = arith.addi %33, %c2_i32_27 : i32
    %c0_28 = arith.constant 0 : index
    %35 = arith.index_cast %34 : i32 to index
    %c0_29 = arith.constant 0 : index
    %36 = vector.load %arg1[%c0_28, %35, %c0_29] : memref<1x24x256xbf16, #tpu.memory_space<vmem>>, vector<1x18x256xbf16>
    %37 = vector.shape_cast %36 : vector<1x18x256xbf16> to vector<18x256xbf16>
    %c2 = arith.constant 2 : index
    %c0_30 = arith.constant 0 : index
    %c0_31 = arith.constant 0 : index
    %38 = vector.load %arg2[%c2, %c0_30, %c0_31] : memref<3x256x512xbf16, #tpu.memory_space<vmem>>, vector<1x256x512xbf16>
    %39 = vector.shape_cast %38 : vector<1x256x512xbf16> to vector<256x512xbf16>
    %cst_32 = arith.constant dense<0.000000e+00> : vector<18x512xf32>
    %40 = tpu.matmul %37, %39, %cst_32 {dimension_numbers = #tpu.dot_dimension_numbers<[1], [0], [0], [1], [0, 0, 1, 1], [], []>} : vector<18x256xbf16>, vector<256x512xbf16>, vector<18x512xf32> -> vector<18x512xf32>
    %41 = arith.addf %32, %40 : vector<18x512xf32>
    %42 = vector.broadcast %8 : vector<1x512xf32> to vector<18x512xf32>
    %43 = arith.addf %41, %42 : vector<18x512xf32>
    %cst_33 = arith.constant 0.000000e+00 : f32
    %44 = vector.broadcast %cst_33 : f32 to vector<18x512xf32>
    %45 = arith.maximumf %43, %44 : vector<18x512xf32>
    %c1_i32_34 = arith.constant 1 : i32
    %46 = arith.subi %13, %c1_i32_34 : i32
    %47 = tpu.iota {dimensions = array<i32: 0>} : vector<18x1xi32>
    %48 = vector.broadcast %46 : i32 to vector<18x1xi32>
    %49 = arith.addi %48, %47 : vector<18x1xi32>
    %c0_i32_35 = arith.constant 0 : i32
    %50 = vector.broadcast %c0_i32_35 : i32 to vector<18x1xi32>
    %51 = arith.cmpi sge, %49, %50 : vector<18x1xi32>
    %c16_i32_36 = arith.constant 16 : i32
    %52 = vector.broadcast %c16_i32_36 : i32 to vector<18x1xi32>
    %53 = arith.cmpi slt, %49, %52 : vector<18x1xi32>
    %54 = arith.andi %51, %53 : vector<18x1xi1>
    %cst_37 = arith.constant 0.000000e+00 : f32
    %55 = vector.shape_cast %54 : vector<18x1xi1> to vector<18x1xi1>
    %56 = vector.broadcast %55 : vector<18x1xi1> to vector<18x512xi1>
    %57 = vector.broadcast %cst_37 : f32 to vector<18x512xf32>
    %58 = arith.select %56, %45, %57 : vector<18x512xi1>, vector<18x512xf32>
    %59 = arith.truncf %58 : vector<18x512xf32> to vector<18x512xbf16>
    %c0_38 = arith.constant 0 : index
    %c0_39 = arith.constant 0 : index
    %60 = vector.load %arg7[%c0_38, %c0_39] : memref<18x512xbf16, #tpu.memory_space<vmem>>, vector<18x512xbf16>
    tpu.vector_store %arg7[%c0_38, %c0_39], %59 {strides = array<i32>} : memref<18x512xbf16, #tpu.memory_space<vmem>>, vector<18x512xbf16>,
    %cst_40 = arith.constant 0.000000e+00 : f32
    %61 = vector.broadcast %cst_40 : f32 to vector<16x256xf32>
    %c0_41 = arith.constant 0 : index
    %c0_42 = arith.constant 0 : index
    %62 = vector.load %arg7[%c0_41, %c0_42] : memref<18x512xbf16, #tpu.memory_space<vmem>>, vector<16x512xbf16>
    %c0_43 = arith.constant 0 : index
    %c0_44 = arith.constant 0 : index
    %c0_45 = arith.constant 0 : index
    %63 = vector.load %arg4[%c0_43, %c0_44, %c0_45] : memref<3x512x256xbf16, #tpu.memory_space<vmem>>, vector<1x512x256xbf16>
    %64 = vector.shape_cast %63 : vector<1x512x256xbf16> to vector<512x256xbf16>
    %cst_46 = arith.constant dense<0.000000e+00> : vector<16x256xf32>
    %65 = tpu.matmul %62, %64, %cst_46 {dimension_numbers = #tpu.dot_dimension_numbers<[1], [0], [0], [1], [0, 0, 1, 1], [], []>} : vector<16x512xbf16>, vector<512x256xbf16>, vector<16x256xf32> -> vector<16x256xf32>
    %66 = arith.addf %61, %65 : vector<16x256xf32>
    %c1_47 = arith.constant 1 : index
    %c0_48 = arith.constant 0 : index
    %67 = vector.load %arg7[%c1_47, %c0_48] : memref<18x512xbf16, #tpu.memory_space<vmem>>, vector<16x512xbf16>
    %c1_49 = arith.constant 1 : index
    %c0_50 = arith.constant 0 : index
    %c0_51 = arith.constant 0 : index
    %68 = vector.load %arg4[%c1_49, %c0_50, %c0_51] : memref<3x512x256xbf16, #tpu.memory_space<vmem>>, vector<1x512x256xbf16>
    %69 = vector.shape_cast %68 : vector<1x512x256xbf16> to vector<512x256xbf16>
    %cst_52 = arith.constant dense<0.000000e+00> : vector<16x256xf32>
    %70 = tpu.matmul %67, %69, %cst_52 {dimension_numbers = #tpu.dot_dimension_numbers<[1], [0], [0], [1], [0, 0, 1, 1], [], []>} : vector<16x512xbf16>, vector<512x256xbf16>, vector<16x256xf32> -> vector<16x256xf32>
    %71 = arith.addf %66, %70 : vector<16x256xf32>
    %c2_53 = arith.constant 2 : index
    %c0_54 = arith.constant 0 : index
    %72 = vector.load %arg7[%c2_53, %c0_54] : memref<18x512xbf16, #tpu.memory_space<vmem>>, vector<16x512xbf16>
    %c2_55 = arith.constant 2 : index
    %c0_56 = arith.constant 0 : index
    %c0_57 = arith.constant 0 : index
    %73 = vector.load %arg4[%c2_55, %c0_56, %c0_57] : memref<3x512x256xbf16, #tpu.memory_space<vmem>>, vector<1x512x256xbf16>
    %74 = vector.shape_cast %73 : vector<1x512x256xbf16> to vector<512x256xbf16>
    %cst_58 = arith.constant dense<0.000000e+00> : vector<16x256xf32>
    %75 = tpu.matmul %72, %74, %cst_58 {dimension_numbers = #tpu.dot_dimension_numbers<[1], [0], [0], [1], [0, 0, 1, 1], [], []>} : vector<16x512xbf16>, vector<512x256xbf16>, vector<16x256xf32> -> vector<16x256xf32>
    %76 = arith.addf %71, %75 : vector<16x256xf32>
    %77 = vector.broadcast %9 : vector<1x256xf32> to vector<16x256xf32>
    %78 = arith.addf %76, %77 : vector<16x256xf32>
    %c4_i32 = arith.constant 4 : i32
    %79 = arith.addi %13, %c4_i32 : i32
    %c0_59 = arith.constant 0 : index
    %80 = arith.index_cast %79 : i32 to index
    %c0_60 = arith.constant 0 : index
    %81 = vector.load %arg1[%c0_59, %80, %c0_60] : memref<1x24x256xbf16, #tpu.memory_space<vmem>>, vector<1x16x256xbf16>
    %82 = vector.shape_cast %81 : vector<1x16x256xbf16> to vector<16x256xbf16>
    %83 = arith.extf %82 : vector<16x256xbf16> to vector<16x256xf32>
    %84 = arith.addf %78, %83 : vector<16x256xf32>
    %85 = arith.truncf %84 : vector<16x256xf32> to vector<16x256xbf16>
    %c4_i32_61 = arith.constant 4 : i32
    %86 = arith.addi %13, %c4_i32_61 : i32
    %c0_62 = arith.constant 0 : index
    %87 = arith.index_cast %86 : i32 to index
    %c0_63 = arith.constant 0 : index
    %88 = vector.load %arg6[%c0_62, %87, %c0_63] : memref<1x24x256xbf16, #tpu.memory_space<vmem>>, vector<1x16x256xbf16>
    %89 = vector.shape_cast %88 : vector<1x16x256xbf16> to vector<16x256xbf16>
    %90 = vector.shape_cast %85 : vector<16x256xbf16> to vector<1x16x256xbf16>
    tpu.vector_store %arg6[%c0_62, %87, %c0_63], %90 {strides = array<i32>} : memref<1x24x256xbf16, #tpu.memory_space<vmem>>, vector<1x16x256xbf16>,
    %c1_i32_64 = arith.constant 1 : i32
    return
  }
  func.func @transform_0(%arg0: i32) -> (i32, i32, i32) {
    %c0_i32 = arith.constant 0 : i32
    %c0_i32_0 = arith.constant 0 : i32
    %c0_i32_1 = arith.constant 0 : i32
    return %arg0, %c0_i32, %c0_i32_0 : i32, i32, i32
  }
  func.func @transform_1(%arg0: i32) -> (i32, i32, i32) {
    %c0_i32 = arith.constant 0 : i32
    %c0_i32_0 = arith.constant 0 : i32
    %c0_i32_1 = arith.constant 0 : i32
    %c0_i32_2 = arith.constant 0 : i32
    return %c0_i32, %c0_i32_0, %c0_i32_1 : i32, i32, i32
  }
  func.func @transform_2(%arg0: i32) -> (i32, i32) {
    %c0_i32 = arith.constant 0 : i32
    %c0_i32_0 = arith.constant 0 : i32
    %c0_i32_1 = arith.constant 0 : i32
    return %c0_i32, %c0_i32_0 : i32, i32
  }
  func.func @transform_3(%arg0: i32) -> (i32, i32, i32) {
    %c0_i32 = arith.constant 0 : i32
    %c0_i32_0 = arith.constant 0 : i32
    %c0_i32_1 = arith.constant 0 : i32
    %c0_i32_2 = arith.constant 0 : i32
    return %c0_i32, %c0_i32_0, %c0_i32_1 : i32, i32, i32
  }
  func.func @transform_4(%arg0: i32) -> (i32, i32) {
    %c0_i32 = arith.constant 0 : i32
    %c0_i32_0 = arith.constant 0 : i32
    %c0_i32_1 = arith.constant 0 : i32
    return %c0_i32, %c0_i32_0 : i32, i32
  }
  func.func @transform_5(%arg0: i32) -> (i32, i32, i32) {
    %c0_i32 = arith.constant 0 : i32
    %c0_i32_0 = arith.constant 0 : i32
    %c0_i32_1 = arith.constant 0 : i32
    return %arg0, %c0_i32, %c0_i32_0 : i32, i32, i32
  }
}

</mosaic_0001>

<bundles_post_ra>
// kernel: generator_cnn_forward.6
= control target key start
LH: loop header
LB: loop body
LE: loop exit
PB: predicated region body
PF: predicated region fallthrough
CT: control target
= control target key end

     0   :  { %10 = vsyncpa [#allocation4], 0  ;;  %s2552_s0 = inlined_call_operand.vmem [shape: bf16[2,24,128], index: 0, kind: input, shape index: {}]   ;;  %s2553_s1 = inlined_call_operand.hbm [shape: bf16[5,128,128], index: 1, kind: input, shape index: {}]   ;;  %s2554_s2 = inlined_call_operand.vmem [shape: f32[1,128], index: 2, kind: input, shape index: {}]   ;;  %s2555_s3 = inlined_call_operand.hbm [shape: bf16[5,128,256], index: 3, kind: input, shape index: {}]   ;;  %s2556_s4 = inlined_call_operand.vmem [shape: f32[1,256], index: 4, kind: input, shape index: {}]   ;;  %s2557_s5 = inlined_call_operand.vmem [shape: bf16[2,24,256], index: 5, kind: output, shape index: {}]  }
   0x1   :  { %11 = vsyncpa [#allocation6], 0  ;;  %s2396_s18 = smov 0  }
   0x2 LB: > { %s169_s21 = sshll.u32 %s2553_s1, 4  ;;  %s1613_s22 = sadd.s32 4294967295, %s2356_s18   ;;  %s2356_s18 = sphi %s2396_s18, %s17_s18   ;;  %s170_s21 = int_to_ptr.hbm [resolvable:$true] %s169_s21 }
   0x3   : > { %p1615_p0 = scmp.ge.s32.totalorder %s2356_s18, 1  ;;  %p158_p1 = scmp.lt.s32.totalorder %s2356_s18, 3 }
   0x4   : > { %p2256_p2 = scmp.eq.s32.totalorder %s1613_s22, 0  ;;  %s2358_s24 = smov [#allocation3]  }
   0x5   : > { %p2407_p3 = pnand %p1615_p0, %p158_p1  ;;  %s171_s25 = sshll.u32 %s2358_s24, 4  ;;  %s172_s25 = int_to_ptr.vmem [resolvable:$true] %s171_s25 }
   0x6   : > { %s186_s28 = sshll.u32 %s2555_s3, 4  ;;  %s2359_s29 = smov [#allocation5]   ;;  %s187_s28 = int_to_ptr.hbm [resolvable:$true] %s186_s28 }
   0x7   : > { %p2249_p4 = pneg %p2407_p3  ;;  %s188_s30 = sshll.u32 %s2359_s29, 4  ;;  %s189_s30 = int_to_ptr.vmem [resolvable:$true] %s188_s30 }
   0x8   : > { %s2360_s6 = smov 64   ;;  %s2361_s7 = smov 4  }
   0x9   : > { %p2250_p5 = pnand %p2256_p2, %p2249_p4  ;;  %s2362_s8 = smov 128  }
   0xa   : > { %s2363_s9 = smov 8   ;;  %215 = sbr.rel (%p2407_p3) target bundleno = 435 (0x1b3), region = 40 }
   0xb   : > { %2252 = dma.hbm_to_vmem [thread:$0]  (!%p2250_p5), %s170_s21, 5120, %s172_s25, [#allocation4], %s2360_s6, %s2360_s6, %s2361_s7  }
   0xc   : > { %2255 = dma.hbm_to_vmem [thread:$0]  (!%p2250_p5), %s187_s28, 10240, %s189_s30, [#allocation6], %s2362_s8, %s2362_s8, %s2363_s9  }
   0xf   : > { %2347 = dma.done.wait (%p2256_p2), [#allocation4], 5120  }
  0x10   : > { %2349 = vsyncadd (%p2256_p2), [#allocation4], 4294962176 }
  0x11   : > { %2351 = dma.done.wait (%p2256_p2), [#allocation6], 10240  }
  0x12   : > { %2353 = vsyncadd (%p2256_p2), [#allocation6], 4294957056  ;;  %p249_p6 = scmp.lt.s32.totalorder %s1613_s22, 1  ;;  %v2121_v0 = vld [vmem:[#allocation3 + $0x78] sm:$0xff]  ;;  %v2120_v4 = vld [vmem:[#allocation3 + $0x70] sm:$0xff]  ;;  %vm485_vm1 = vcmask 1046528  }
  0x13   : > { %v2113_v1 = vld [vmem:[#allocation3 + $0x38] sm:$0xff]  ;;  %375 = vmatpush.bf16.msra.mxu0 %v2121_v0  ;;  %v2112_v5 = vld [vmem:[#allocation3 + $0x30] sm:$0xff]  ;;  %v2119_v8 = vld [vmem:[#allocation3 + $0x68] sm:$0xff]  ;;  %vm309_vm0 = vsmask.f32 7424  ;;  %vm691_vm3 = vcmask 1045504  }
  0x14   : > { %s2560_s22 = smov (!%p249_p6, %s1613_s22), 1  ;;  %v2129_v2 = vld [vmem:[#allocation3 + $0xb8] sm:$0xff]  ;;  %446 = vmatpush.bf16.msra.mxu1 %v2113_v1  ;;  %v2128_v6 = vld [vmem:[#allocation3 + $0xb0] sm:$0xff]  ;;  %v2111_v9 = vld [vmem:[#allocation3 + $0x28] sm:$0xff]  ;;  %vm581_vm2 = vsmask.f32 6400 }
  0x15   : > { %v2137_v3 = vld [vmem:[#allocation3 + $0xf8] sm:$0xff]  ;;  %539 = vmatpush.bf16.msra.mxu2 %v2129_v2  ;;  %v2136_v7 = vld [vmem:[#allocation3 + $0xf0] sm:$0xff]  ;;  %s2239_s10 = smul.u32 12, %s2560_s22  ;;  %v2127_v10 = vld [vmem:[#allocation3 + $0xa8] sm:$0xff]  ;;  %vm2364_vm5 = vmmov 1   ;;  %vm1522_vm8 = vcmask 1041408  }
  0x16   : > { %649 = vmatpush.bf16.msra.mxu3 %v2137_v3  ;;  %v2135_v11 = vld [vmem:[#allocation3 + $0xe8] sm:$0xff]  ;;  %v2118_v12 = vld [vmem:[#allocation3 + $0x60] sm:$0xff]  ;;  %v2117_v23 = vld [vmem:[#allocation3 + $0x58] sm:$0xff]  ;;  %s2240_s16 = smul.u32 24, %s2560_s22  ;;  %vm1523_vm9 = vcmask 1045508  }
  0x17   : > { %376 = vmatpush.bf16.msra.mxu0 %v2120_v4  ;;  %s2429_s13 = scalar_lea.vmem %s2552_s0, %s2239_s10  ;;  %v2110_v13 = vld [vmem:[#allocation3 + $0x20] sm:$0xff]  ;;  %v2109_v24 = vld [vmem:[#allocation3 + $0x18] sm:$0xff]  ;;  %v2116_v30 = vld [vmem:[#allocation3 + $0x50] sm:$0xff] }
  0x18   : > { %447 = vmatpush.bf16.msra.mxu1 %v2112_v5  ;;  %v2126_v14 = vld [vmem:[#allocation3 + $0xa0] sm:$0xff]  ;;  %v2432_v15 = vld [vmem:[%s2429_s13] sm:$0xff]   ;;  %v283_v17 = vld [vmem:[%s2429_s13 + $0x8] sm:$0x7]  ;;  %s2539_s20 = scalar_lea.vmem %s2557_s5, %s2240_s16 }
  0x19   : > { %540 = vmatpush.bf16.msra.mxu2 %v2128_v6  ;;  %v2134_v16 = vld [vmem:[#allocation3 + $0xe0] sm:$0xff]  ;;  %v2229_v18 = vunpack.c.h.b16 %v2432_v15  ;;  %v464_v19 = vld [vmem:[%s2429_s13] sm:$0xe]  ;;  %v560_v21 = vld [vmem:[%s2429_s13 + $0x8] sm:$0xf]  ;;  %v306_v25 = vunpack.c.l.b16 %v283_v17  ;;  %v313_v33 = vshll.u32 %v2432_v15, 16 }
  0x1a   : > { %650 = vmatpush.bf16.msra.mxu3 %v2136_v7  ;;  %v483_v20 = vunpack.c.l.b16 %v464_v19  ;;  %v579_v22 = vunpack.c.l.b16 %v560_v21  ;;  %v2125_v26 = vld [vmem:[#allocation3 + $0x98] sm:$0xff]  ;;  %v2108_v31 = vld [vmem:[#allocation3 + $0x10] sm:$0xff]  ;;  %v2115_v40 = vld [vmem:[#allocation3 + $0x48] sm:$0xff]  ;;  %v311_v42 = vshrl.u32 %v2432_v15, 16 }
  0x1b   : > { %377 = vmatpush.bf16.msra.mxu0 %v2119_v8  ;;  %v2133_v27 = vld [vmem:[#allocation3 + $0xd8] sm:$0xff]  ;;  %v2442_v32 = vpack.c.b16 %v306_v25, %v306_v25  ;;  %v2124_v34 = vld [vmem:[#allocation3 + $0x90] sm:$0xff]  ;;  %v2107_v41 = vld [vmem:[#allocation3 + $0x8] sm:$0xff]  ;;  %v315_v43 = vrot.slane %v313_v33, 1 }
  0x1c   : > { %448 = vmatpush.bf16.msra.mxu1 %v2111_v9  ;;  %v484_v28 = vpack.c.b16 %v2229_v18, %v483_v20  ;;  %v2440_v29 = vpack.c.b16 %v579_v22, %v579_v22  ;;  %v2132_v35 = vld [vmem:[#allocation3 + $0xd0] sm:$0xff]  ;;  %v2123_v45 = vld [vmem:[#allocation3 + $0x88] sm:$0xff]  ;;  %v2114_v51 = vld [vmem:[#allocation3 + $0x40] sm:$0xff] }
  0x1d   : > { %541 = vmatpush.bf16.msra.mxu2 %v2127_v10  ;;  %v318_v44 = vshll.u32 %v2442_v32, 16  ;;  %v2131_v46 = vld [vmem:[#allocation3 + $0xc8] sm:$0xff]  ;;  %v2106_v52 = vld [vmem:[#allocation3] sm:$0xff]  ;;  %v316_v53 = vor.u32 %v315_v43, %v311_v42  ;;  %v487_v58 = vrot.slane %v2442_v32, 1  ;;  %v2145_v61 = vld [vmem:[#allocation3 + $0x138] sm:$0xff]  ;;  %v322_v5 = vshrl.u32 %v2442_v32, 16 }
  0x1e   : > { %651 = vmatpush.bf16.msra.mxu3 %v2135_v11  ;;  %v583_v36 = vshrl.u32 %v484_v28, 16  ;;  %v586_v37 = vshll.u32 %v484_v28, 16  ;;  %v591_v38 = vshrl.u32 %v2440_v29, 16  ;;  %v594_v39 = vshll.u32 %v2440_v29, 16  ;;  %v2122_v55 = vld [vmem:[#allocation3 + $0x80] sm:$0xff]  ;;  %v2144_v1 = vld [vmem:[#allocation3 + $0x130] sm:$0xff]  ;;  %vm1524_vm10 = vmor %vm1522_vm8, %vm1523_vm9 }
  0x1f   : > { %378 = vmatpush.bf16.msra.mxu0 %v2118_v12  ;;  %v320_v54 = vrot.slane %v318_v44, 1  ;;  %v2130_v56 = vld [vmem:[#allocation3 + $0xc0] sm:$0xff]  ;;  %v486_v57 = vrot.slane %v484_v28, 1  ;;  %v2143_v2 = vld [vmem:[#allocation3 + $0x128] sm:$0xff]  ;;  %v266_v3 = vld [vmem:[%s2429_s13 + $0x8] sm:$0x3] }
  0x20   : > { %449 = vmatpush.bf16.msra.mxu1 %v2110_v13  ;;  %v585_v47 = vrot.slane %v583_v36, 1  ;;  %v588_v48 = vrot.slane %v586_v37, 2  ;;  %v593_v49 = vrot.slane %v591_v38, 1  ;;  %v596_v50 = vrot.slane %v594_v39, 2  ;;  %v2142_v4 = vld [vmem:[#allocation3 + $0x120] sm:$0xff]  ;;  %v2141_v7 = vld [vmem:[#allocation3 + $0x118] sm:$0xff] }
  0x21   : > { %542 = vmatpush.bf16.msra.mxu2 %v2126_v14  ;;  %v321_v62 = vsel %vm309_vm0, %v316_v53, %v320_v54  ;;  %v488_v63 = vsel %vm485_vm1, %v486_v57, %v487_v58  ;;  %v394_v6 = vunpack.c.l.b16 %v266_v3  ;;  %v324_v8 = vor.u32 %v322_v5, %v320_v54  ;;  %v670_v10 = vld [vmem:[%s2429_s13] sm:$0xc]  ;;  %v2139_v13 = vld [vmem:[#allocation3 + $0x108] sm:$0xff]  ;;  %v1906_v21 = vld [vmem:[#allocation5 + $0x70] sm:$0xf] }
  0x22   : > { %652 = vmatpush.bf16.msra.mxu3 %v2134_v16  ;;  %v589_v59 = vor.u32 %v588_v48, %v585_v47  ;;  %v597_v60 = vor.u32 %v596_v50, %v593_v49  ;;  %v2140_v11 = vld [vmem:[#allocation3 + $0x110] sm:$0xff]  ;;  %v689_v12 = vunpack.c.l.b16 %v670_v10  ;;  %v2138_v16 = vld [vmem:[#allocation3 + $0x100] sm:$0xff]  ;;  %v693_v19 = vrot.slane %v2440_v29, 2  ;;  %v2161_v22 = vld [vmem:[#allocation5 + $0x74] sm:$0xf0] }
  0x23   : > { %379 = vmatpush.bf16.msra.mxu0 %v2117_v23  ;;  %v395_v9 = vpack.c.b16 %v394_v6, %v394_v6  ;;  %v2160_v23 = vld [vmem:[#allocation5 + $0x74] sm:$0xf]  ;;  %v1908_v25 = vld [vmem:[#allocation5 + $0x78] sm:$0xf0]  ;;  %v1898_v29 = vld [vmem:[#allocation5 + $0x60] sm:$0xf] }
  0x24   : > { %450 = vmatpush.bf16.msra.mxu1 %v2109_v24  ;;  %v598_v0 = vsel %vm581_vm2, %v589_v59, %v597_v60  ;;  %v690_v14 = vpack.c.b16 %v2229_v18, %v689_v12  ;;  %v1907_v24 = vor.u32 %v2161_v22, %v1906_v21  ;;  %v2176_v28 = vld [vmem:[#allocation5 + $0xf4] sm:$0xf]  ;;  %v2159_v32 = vld [vmem:[#allocation5 + $0x64] sm:$0xf0]  ;;  %v2158_v33 = vld [vmem:[#allocation5 + $0x64] sm:$0xf] }
  0x25   : > { %543 = vmatpush.bf16.msra.mxu2 %v2125_v26  ;;  %v1842_v26 = vld [vmem:[#allocation5 + $0xf0] sm:$0xf]  ;;  %v1834_v37 = vld [vmem:[#allocation5 + $0xe0] sm:$0xf]  ;;  %v2175_v38 = vld [vmem:[#allocation5 + $0xe4] sm:$0xf0] }
  0x26   : > { %653 = vmatpush.bf16.msra.mxu3 %v2133_v27  ;;  %v692_v17 = vrot.slane %v690_v14, 2  ;;  %v2177_v27 = vld [vmem:[#allocation5 + $0xf4] sm:$0xf0]  ;;  %v2174_v39 = vld [vmem:[#allocation5 + $0xe4] sm:$0xf] }
  0x27   : > { %380 = vmatpush.bf16.msra.mxu0 %v2116_v30  ;;  %v1843_v18 = vor.u32 %v2177_v27, %v1842_v26  ;;  %v1844_v30 = vld [vmem:[#allocation5 + $0xf8] sm:$0xf0]  ;;  %v1890_v43 = vld [vmem:[#allocation5 + $0x50] sm:$0xf]  ;;  %v2157_v44 = vld [vmem:[#allocation5 + $0x54] sm:$0xf0] }
  0x28   : > { %451 = vmatpush.bf16.msra.mxu1 %v2108_v31  ;;  %v694_v20 = vsel %vm691_vm3, %v692_v17, %v693_v19  ;;  %v1847_v31 = vor.u32 %v2176_v28, %v1844_v30  ;;  %v1892_v47 = vld [vmem:[#allocation5 + $0x58] sm:$0xf0]  ;;  %v1826_v48 = vld [vmem:[#allocation5 + $0xd0] sm:$0xf]  ;;  %v2173_v49 = vld [vmem:[#allocation5 + $0xd4] sm:$0xf0] }
  0x29   : > { %544 = vmatpush.bf16.msra.mxu2 %v2124_v34  ;;  %v1899_v34 = vor.u32 %v2159_v32, %v1898_v29  ;;  %v1828_v53 = vld [vmem:[#allocation5 + $0xd8] sm:$0xf0]  ;;  %v2154_v57 = vld [vmem:[#allocation5 + $0x44] sm:$0xf]  ;;  %v1884_v59 = vld [vmem:[#allocation5 + $0x48] sm:$0xf0] }
  0x2a   : > { %654 = vmatpush.bf16.msra.mxu3 %v2132_v35  ;;  %v1900_v35 = vld [vmem:[#allocation5 + $0x68] sm:$0xf0]  ;;  %v1874_v3 = vld [vmem:[#allocation5 + $0x30] sm:$0xf]  ;;  %v2152_v5 = vld [vmem:[#allocation5 + $0x34] sm:$0xf] }
  0x2b   : > { %381 = vmatpush.bf16.msra.mxu0 %v2115_v40  ;;  %v1903_v36 = vor.u32 %v2158_v33, %v1900_v35  ;;  %v1835_v40 = vor.u32 %v2175_v38, %v1834_v37  ;;  %v1810_v10 = vld [vmem:[#allocation5 + $0xb0] sm:$0xf]  ;;  %v2168_v14 = vld [vmem:[#allocation5 + $0xb4] sm:$0xf]  ;;  %v2150_v22 = vld [vmem:[#allocation5 + $0x24] sm:$0xf] }
  0x2c   : > { %452 = vmatpush.bf16.msra.mxu1 %v2107_v41  ;;  %v1836_v41 = vld [vmem:[#allocation5 + $0xe8] sm:$0xf0]  ;;  %v2167_v26 = vld [vmem:[#allocation5 + $0xa4] sm:$0xf0]  ;;  %v2166_v27 = vld [vmem:[#allocation5 + $0xa4] sm:$0xf] }
  0x2d   : > { %545 = vmatpush.bf16.msra.mxu2 %v2123_v45  ;;  %v1839_v42 = vor.u32 %v2174_v39, %v1836_v41  ;;  %v2156_v45 = vld [vmem:[#allocation5 + $0x54] sm:$0xf]  ;;  %v1858_v29 = vld [vmem:[#allocation5 + $0x10] sm:$0xf]  ;;  %v2149_v32 = vld [vmem:[#allocation5 + $0x14] sm:$0xf0] }
  0x2e   : > { %655 = vmatpush.bf16.msra.mxu3 %v2131_v46  ;;  %v1891_v46 = vor.u32 %v2157_v44, %v1890_v43  ;;  %v1895_v50 = vor.u32 %v2156_v45, %v1892_v47  ;;  %v1859_v35 = vor.u32 %v2149_v32, %v1858_v29  ;;  %v1860_v37 = vld [vmem:[#allocation5 + $0x18] sm:$0xf0]  ;;  %v1794_v38 = vld [vmem:[#allocation5 + $0x90] sm:$0xf]  ;;  %v2164_v41 = vld [vmem:[#allocation5 + $0x94] sm:$0xf] }
  0x2f   : > { %382 = vmatpush.bf16.msra.mxu0 %v2114_v51  ;;  %v1827_v51 = vor.u32 %v2173_v49, %v1826_v48  ;;  %v1850_v45 = vld [vmem:[#allocation5] sm:$0xf]  ;;  %v2146_v47 = vld [vmem:[#allocation5 + $0x4] sm:$0xf]  ;;  %v1852_v49 = vld [vmem:[#allocation5 + $0x8] sm:$0xf0] }
  0x30   : > { %453 = vmatpush.bf16.msra.mxu1 %v2106_v52  ;;  %v2172_v52 = vld [vmem:[#allocation5 + $0xd4] sm:$0xf]  ;;  %v2189_v32 = vld [vmem:[#allocation5 + $0x154] sm:$0xf0] }
  0x31   : > { %546 = vmatpush.bf16.msra.mxu2 %v2122_v55  ;;  %v1831_v54 = vor.u32 %v2172_v52, %v1828_v53  ;;  %v1882_v55 = vld [vmem:[#allocation5 + $0x40] sm:$0xf]  ;;  %v1855_v52 = vor.u32 %v2146_v47, %v1852_v49  ;;  %v2012_v47 = vld [vmem:[#allocation5 + $0x1c8] sm:$0xf0]  ;;  %v2187_v49 = vld [vmem:[#allocation5 + $0x144] sm:$0xf0] }
  0x32   : > { %656 = vmatpush.bf16.msra.mxu3 %v2130_v56  ;;  %383 = vmatmul.bf16.vlgmr.msra.gmra.mxu0 %v321_v62  ;;  %v2155_v56 = vld [vmem:[#allocation5 + $0x44] sm:$0xf0]  ;;  %v1887_v62 = vor.u32 %v2154_v57, %v1884_v59  ;;  %v2208_v59 = vld [vmem:[#allocation5 + $0x1f4] sm:$0xf] }
  0x33   : > { %745 = vmatpush.bf16.msrb.mxu0 %v2145_v61  ;;  %454 = vmatmul.bf16.vlgmr.msra.gmra.mxu1 %v2432_v15  ;;  %v1911_v15 = vor.u32 %v2160_v23, %v1908_v25  ;;  %v2171_v61 = vld [vmem:[#allocation5 + $0xc4] sm:$0xf0]  ;;  %v1868_v23 = vld [vmem:[#allocation5 + $0x28] sm:$0xf0] }
  0x34   : > { %547 = vmatmul.bf16.vlgmr.msra.gmra.mxu2 %v488_v63  ;;  %943 = vmatpush.bf16.msrb.mxu1 %v1843_v18  ;;  %v1871_v25 = vor.u32 %v2150_v22, %v1868_v23  ;;  %v1804_v18 = vld [vmem:[#allocation5 + $0xa8] sm:$0xf0] }
  0x35   : > { %657 = vmatmul.bf16.vlgmr.msra.gmra.mxu3 %v598_v0  ;;  %957 = vmatpush.bf16.msrb.mxu2 %v1847_v31  ;;  %v2170_v0 = vld [vmem:[#allocation5 + $0xc4] sm:$0xf]  ;;  %v1807_v31 = vor.u32 %v2166_v27, %v1804_v18  ;;  %v1964_v22 = vld [vmem:[#allocation5 + $0x168] sm:$0xf0]  ;;  %v2204_v27 = vld [vmem:[#allocation5 + $0x1d4] sm:$0xf] }
  0x36   : > { %1052 = vmatpush.bf16.msrb.mxu3 %v1907_v24  ;;  %v1802_v24 = vld [vmem:[#allocation5 + $0xa0] sm:$0xf]  ;;  %v2020_v18 = vld [vmem:[#allocation5 + $0x1d8] sm:$0xf0] }
  0x37   : > { %746 = vmatpush.bf16.msrb.mxu0 %v2144_v1  ;;  %v1820_v1 = vld [vmem:[#allocation5 + $0xc8] sm:$0xf0]  ;;  %v2023_v29 = vor.u32 %v2204_v27, %v2020_v18 }
  0x38   : > { %944 = vmatpush.bf16.msrb.mxu1 %v1835_v40  ;;  %v2165_v40 = vld [vmem:[#allocation5 + $0x94] sm:$0xf0] }
  0x39   : > { %958 = vmatpush.bf16.msrb.mxu2 %v1839_v42  ;;  %v1796_v42 = vld [vmem:[#allocation5 + $0x98] sm:$0xf0]  ;;  %v1795_v43 = vor.u32 %v2165_v40, %v1794_v38 }
  0x3a   : > { %1053 = vmatpush.bf16.msrb.mxu3 %v1899_v34  ;;  %v1799_v44 = vor.u32 %v2164_v41, %v1796_v42 }
  0x3b   : > { %747 = vmatpush.bf16.msrb.mxu0 %v2143_v2  ;;  %v1823_v2 = vor.u32 %v2170_v0, %v1820_v1  ;;  %v1970_v1 = vld [vmem:[#allocation5 + $0x170] sm:$0xf] }
  0x3c   : > { %945 = vmatpush.bf16.msrb.mxu1 %v1827_v51  ;;  %v2163_v51 = vld [vmem:[#allocation5 + $0x84] sm:$0xf0] }
  0x3d   : > { %959 = vmatpush.bf16.msrb.mxu2 %v1831_v54  ;;  %v2162_v54 = vld [vmem:[#allocation5 + $0x84] sm:$0xf] }
  0x3e   : > { %1054 = vmatpush.bf16.msrb.mxu3 %v1891_v46  ;;  %v2147_v46 = vld [vmem:[#allocation5 + $0x4] sm:$0xf0] }
  0x3f   : > { %748 = vmatpush.bf16.msrb.mxu0 %v2142_v4  ;;  %v2153_v4 = vld [vmem:[#allocation5 + $0x34] sm:$0xf0]  ;;  %v1851_v48 = vor.u32 %v2147_v46, %v1850_v45  ;;  %v2202_v45 = vld [vmem:[#allocation5 + $0x1c4] sm:$0xf] }
  0x41   : > { %960 = vmatpush.bf16.msrb.mxu2 %v1823_v2  ;;  %v2193_v2 = vld [vmem:[#allocation5 + $0x174] sm:$0xf0] }
  0x42   : > { %388 = vmatmul.bf16.gmra.mxu0 %v324_v8  ;;  %v1875_v8 = vor.u32 %v2153_v4, %v1874_v3  ;;  %v2192_v3 = vld [vmem:[#allocation5 + $0x174] sm:$0xf] }
  0x43   : > { %749 = vmatpush.bf16.msrb.mxu0 %v2141_v7  ;;  %459 = vmatmul.bf16.gmra.mxu1 %v395_v9  ;;  %v1876_v9 = vld [vmem:[#allocation5 + $0x38] sm:$0xf0] }
  0x44   : > { %552 = vmatmul.bf16.gmra.mxu2 %v487_v58  ;;  %v1883_v58 = vor.u32 %v2155_v56, %v1882_v55  ;;  %v1879_v12 = vor.u32 %v2152_v5, %v1876_v9  ;;  %v1788_v55 = vld [vmem:[#allocation5 + $0x88] sm:$0xf0]  ;;  %v2034_v56 = vld [vmem:[#allocation5 + $0x1f0] sm:$0xf]  ;;  %v1972_v9 = vld [vmem:[#allocation5 + $0x178] sm:$0xf0] }
  0x45   : > { %662 = vmatmul.bf16.gmra.mxu3 %v597_v60  ;;  %v1818_v60 = vld [vmem:[#allocation5 + $0xc0] sm:$0xf]  ;;  %v1791_v57 = vor.u32 %v2162_v54, %v1788_v55  ;;  %v1948_v54 = vld [vmem:[#allocation5 + $0x148] sm:$0xf0] }
  0x46   : > { %v1819_v63 = vor.u32 %v2171_v61, %v1818_v60  ;;  %1055 = vmatpush.bf16.msrb.mxu3 %v1883_v58  ;;  %v2209_v58 = vld [vmem:[#allocation5 + $0x1f4] sm:$0xf0]  ;;  %v2036_v60 = vld [vmem:[#allocation5 + $0x1f8] sm:$0xf0] }
  0x47   : > { %750 = vmatpush.bf16.msrb.mxu0 %v2140_v11  ;;  %v2169_v11 = vld [vmem:[#allocation5 + $0xb4] sm:$0xf0]  ;;  %v2039_v0 = vor.u32 %v2208_v59, %v2036_v60  ;;  %v2004_v60 = vld [vmem:[#allocation5 + $0x1b8] sm:$0xf0] }
  0x48   : > { %946 = vmatpush.bf16.msrb.mxu1 %v1819_v63  ;;  %v2035_v63 = vor.u32 %v2209_v58, %v2034_v56  ;;  %v2002_v56 = vld [vmem:[#allocation5 + $0x1b0] sm:$0xf]  ;;  %v2200_v58 = vld [vmem:[#allocation5 + $0x1b4] sm:$0xf] }
  0x4a   : > { %1056 = vmatpush.bf16.msrb.mxu3 %v1875_v8  ;;  %v1971_v8 = vor.u32 %v2193_v2, %v1970_v1  ;;  %v775_v1 = vlaneseq }
  0x4b   : > { %751 = vmatpush.bf16.msrb.mxu0 %v2139_v13  ;;  %v1811_v13 = vor.u32 %v2169_v11, %v1810_v10  ;;  %v2026_v10 = vld [vmem:[#allocation5 + $0x1e0] sm:$0xf]  ;;  %v2207_v11 = vld [vmem:[#allocation5 + $0x1e4] sm:$0xf0] }
  0x4d   : > { %947 = vmatpush.bf16.msrb.mxu1 %v1811_v13  ;;  %v2027_v13 = vor.u32 %v2207_v11, %v2026_v10  ;;  %v2199_v10 = vld [vmem:[#allocation5 + $0x1a4] sm:$0xf0]  ;;  %v2198_v11 = vld [vmem:[#allocation5 + $0x1a4] sm:$0xf] }
  0x4f   : > { %752 = vmatpush.bf16.msrb.mxu0 %v2138_v16  ;;  %v1812_v16 = vld [vmem:[#allocation5 + $0xb8] sm:$0xf0] }
  0x50   : > { %v1815_v17 = vor.u32 %v2168_v14, %v1812_v16  ;;  %v2206_v14 = vld [vmem:[#allocation5 + $0x1e4] sm:$0xf]  ;;  %v2028_v16 = vld [vmem:[#allocation5 + $0x1e8] sm:$0xf0] }
  0x52   : > { %753 = vmatmul.bf16.vlgmr.msrb.gmra.mxu0 %v694_v20  ;;  %v2151_v20 = vld [vmem:[#allocation5 + $0x24] sm:$0xf0]  ;;  %961 = vmatpush.bf16.msrb.mxu2 %v1815_v17  ;;  %v1962_v17 = vld [vmem:[#allocation5 + $0x160] sm:$0xf] }
  0x53   : > { %1066 = vmatpush.bf16.msra.mxu0 %v1911_v15  ;;  %v1803_v15 = vor.u32 %v2167_v26, %v1802_v24  ;;  %v2205_v26 = vld [vmem:[#allocation5 + $0x1d4] sm:$0xf0] }
  0x55   : > { %948 = vmatpush.bf16.msrb.mxu1 %v1803_v15 }
  0x56   : > { %962 = vmatpush.bf16.msrb.mxu2 %v1807_v31  ;;  %v1954_v31 = vld [vmem:[#allocation5 + $0x150] sm:$0xf] }
  0x57   : > { %1067 = vmatpush.bf16.msra.mxu0 %v1903_v36  ;;  %v2148_v36 = vld [vmem:[#allocation5 + $0x14] sm:$0xf] }
  0x58   : > { %v1863_v39 = vor.u32 %v2148_v36, %v1860_v37  ;;  %v1956_v36 = vld [vmem:[#allocation5 + $0x158] sm:$0xf0] }
  0x59   : > { %949 = vmatpush.bf16.msrb.mxu1 %v1795_v43  ;;  %v2010_v43 = vld [vmem:[#allocation5 + $0x1c0] sm:$0xf] }
  0x5a   : > { %963 = vmatpush.bf16.msrb.mxu2 %v1799_v44  ;;  %v2203_v44 = vld [vmem:[#allocation5 + $0x1c4] sm:$0xf0] }
  0x5b   : > { %1068 = vmatpush.bf16.msra.mxu0 %v1895_v50  ;;  %v1786_v50 = vld [vmem:[#allocation5 + $0x80] sm:$0xf]  ;;  %v2011_v46 = vor.u32 %v2203_v44, %v2010_v43 }
  0x5c   : > { %v1787_v53 = vor.u32 %v2163_v51, %v1786_v50  ;;  %v2015_v51 = vor.u32 %v2202_v45, %v2012_v47  ;;  %v1978_v45 = vld [vmem:[#allocation5 + $0x180] sm:$0xf] }
  0x5e   : > { %950 = vmatpush.bf16.msrb.mxu1 %v1787_v53  ;;  %964 = vmatpush.bf16.msrb.mxu2 %v1791_v57  ;;  %v2186_v53 = vld [vmem:[#allocation5 + $0x144] sm:$0xf]  ;;  %v2201_v57 = vld [vmem:[#allocation5 + $0x1b4] sm:$0xf0] }
  0x5f   : > { %1069 = vmatpush.bf16.msra.mxu0 %v1887_v62  ;;  %v1951_v55 = vor.u32 %v2186_v53, %v1948_v54  ;;  %v2003_v2 = vor.u32 %v2201_v57, %v2002_v56  ;;  %v2179_v56 = vld [vmem:[#allocation5 + $0x104] sm:$0xf0]  ;;  %v2178_v57 = vld [vmem:[#allocation5 + $0x104] sm:$0xf] }
  0x62   : > { %758 = vmatmul.bf16.gmra.mxu0 %v693_v19  ;;  %v1866_v19 = vld [vmem:[#allocation5 + $0x20] sm:$0xf]  ;;  %1185 = vmatpush.bf16.msra.mxu1 %v1971_v8 }
  0x63   : > { %1070 = vmatpush.bf16.msra.mxu0 %v1879_v12  ;;  %v1867_v21 = vor.u32 %v2151_v20, %v1866_v19  ;;  %v1975_v12 = vor.u32 %v2192_v3, %v1972_v9  ;;  %v2031_v19 = vor.u32 %v2206_v14, %v2028_v16  ;;  %v2191_v20 = vld [vmem:[#allocation5 + $0x164] sm:$0xf0]  ;;  %v2007_v3 = vor.u32 %v2200_v58, %v2004_v60  ;;  %v1994_v9 = vld [vmem:[#allocation5 + $0x1a0] sm:$0xf]  ;;  %v1916_v60 = vld [vmem:[#allocation5 + $0x108] sm:$0xf0] }
  0x64   : > { %v1963_v23 = vor.u32 %v2191_v20, %v1962_v17  ;;  %v1930_v16 = vld [vmem:[#allocation5 + $0x120] sm:$0xf]  ;;  %v2183_v17 = vld [vmem:[#allocation5 + $0x124] sm:$0xf0] }
  0x65   : > { %1057 = vmatpush.bf16.msrb.mxu3 %v1867_v21  ;;  %v2190_v21 = vld [vmem:[#allocation5 + $0x164] sm:$0xf]  ;;  %1199 = vmatpush.bf16.msra.mxu2 %v1975_v12  ;;  %v1931_v18 = vor.u32 %v2183_v17, %v1930_v16 }
  0x66   : > { %v1967_v24 = vor.u32 %v2190_v21, %v1964_v22  ;;  %1186 = vmatpush.bf16.msra.mxu1 %v1963_v23  ;;  %v2182_v21 = vld [vmem:[#allocation5 + $0x124] sm:$0xf]  ;;  %v1932_v22 = vld [vmem:[#allocation5 + $0x128] sm:$0xf0] }
  0x67   : > { %1071 = vmatpush.bf16.msra.mxu0 %v1871_v25  ;;  %v2018_v25 = vld [vmem:[#allocation5 + $0x1d0] sm:$0xf] }
  0x68   : > { %v2019_v15 = vor.u32 %v2205_v26, %v2018_v25  ;;  %v776_v25 = vshrl.u32 %v775_v1, 7  ;;  %v1995_v26 = vor.u32 %v2199_v10, %v1994_v9  ;;  %v1919_v1 = vor.u32 %v2178_v57, %v1916_v60  ;;  %v2220_v57 = vld [vmem:[#allocation5 + $0x254] sm:$0xf]  ;;  %v2074_v60 = vld [vmem:[#allocation5 + $0x240] sm:$0xf] }
  0x69   : > { %1058 = vmatpush.bf16.msrb.mxu3 %v1859_v35  ;;  %v2188_v35 = vld [vmem:[#allocation5 + $0x154] sm:$0xf]  ;;  %1200 = vmatpush.bf16.msra.mxu2 %v1967_v24 }
  0x6a   : > { %v1959_v40 = vor.u32 %v2188_v35, %v1956_v36  ;;  %v2494_v24 = vld [vmem:[%s2554_s2] ss:$0 sm:$0xff]  ;;  %v1922_v35 = vld [vmem:[#allocation5 + $0x110] sm:$0xf]  ;;  %v2181_v36 = vld [vmem:[#allocation5 + $0x114] sm:$0xf0] }
  0x6b   : > { %1072 = vmatpush.bf16.msra.mxu0 %v1863_v39  ;;  %v1955_v39 = vor.u32 %v2189_v32, %v1954_v31  ;;  %v2197_v31 = vld [vmem:[#allocation5 + $0x194] sm:$0xf0]  ;;  %v1923_v44 = vor.u32 %v2181_v36, %v1922_v35 }
  0x6d   : > { %1059 = vmatpush.bf16.msrb.mxu3 %v1851_v48  ;;  %v1946_v48 = vld [vmem:[#allocation5 + $0x140] sm:$0xf]  ;;  %1187 = vmatpush.bf16.msra.mxu1 %v1955_v39  ;;  %v2180_v39 = vld [vmem:[#allocation5 + $0x114] sm:$0xf] }
  0x6e   : > { %1201 = vmatpush.bf16.msra.mxu2 %v1959_v40  ;;  %v1924_v40 = vld [vmem:[#allocation5 + $0x118] sm:$0xf0] }
  0x6f   : > { %1073 = vmatpush.bf16.msra.mxu0 %v1855_v52  ;;  %v1947_v52 = vor.u32 %v2187_v49, %v1946_v48  ;;  %v1927_v48 = vor.u32 %v2180_v39, %v1924_v40  ;;  %v2194_v49 = vld [vmem:[#allocation5 + $0x184] sm:$0xf] }
  0x71   : > { %1336 = vmatpush.bf16.msra.mxu3 %v2035_v63  ;;  %v1938_v63 = vld [vmem:[#allocation5 + $0x130] sm:$0xf]  ;;  %1188 = vmatpush.bf16.msra.mxu1 %v1947_v52 }
  0x72   : > { %1202 = vmatpush.bf16.msra.mxu2 %v1951_v55  ;;  %v1914_v55 = vld [vmem:[#allocation5 + $0x100] sm:$0xf] }
  0x73   : > { %1350 = vmatpush.bf16.msrb.mxu0 %v2039_v0  ;;  %v2185_v0 = vld [vmem:[#allocation5 + $0x134] sm:$0xf0] }
  0x74   : > { %v1939_v8 = vor.u32 %v2185_v0, %v1938_v63 }
  0x75   : > { %1337 = vmatpush.bf16.msra.mxu3 %v2027_v13 }
  0x76   : > { %1189 = vmatpush.bf16.msra.mxu1 %v1939_v8 }
  0x77   : > { %1351 = vmatpush.bf16.msrb.mxu0 %v2031_v19 }
  0x79   : > { %1338 = vmatpush.bf16.msra.mxu3 %v2019_v15 }
  0x7a   : > { %1190 = vmatpush.bf16.msra.mxu1 %v1931_v18 }
  0x7b   : > { %1352 = vmatpush.bf16.msrb.mxu0 %v2023_v29  ;;  %v2196_v29 = vld [vmem:[#allocation5 + $0x194] sm:$0xf] }
  0x7d   : > { %1339 = vmatpush.bf16.msra.mxu3 %v2011_v46  ;;  %v2195_v46 = vld [vmem:[#allocation5 + $0x184] sm:$0xf0] }
  0x7e   : > { %v1979_v54 = vor.u32 %v2195_v46, %v1978_v45  ;;  %1191 = vmatpush.bf16.msra.mxu1 %v1923_v44  ;;  %v2090_v46 = vld [vmem:[#allocation5 + $0x260] sm:$0xf] }
  0x7f   : > { %1353 = vmatpush.bf16.msrb.mxu0 %v2015_v51 }
  0x81   : > { %1340 = vmatpush.bf16.msra.mxu3 %v2003_v2 }
  0x83   : > { %1354 = vmatpush.bf16.msrb.mxu0 %v2007_v3 }
  0x85   : > { %1341 = vmatpush.bf16.msra.mxu3 %v1995_v26  ;;  %v2098_v26 = vld [vmem:[#allocation5 + $0x270] sm:$0xf] }
  0xaf   : > { %v2461_v6 = vpop.f32.mrf.mxu0 }
  0xb0   : > { %v2463_v7 = vpop.f32.mrf.mxu1 }
  0xb1   : > { %v456_v50 = vadd.f32 %v2463_v7, %v2461_v6  ;;  %v2184_v6 = vld [vmem:[#allocation5 + $0x134] sm:$0xf]  ;;  %v1940_v7 = vld [vmem:[#allocation5 + $0x138] sm:$0xf0] }
  0xb2   : > { %v1943_v14 = vor.u32 %v2184_v6, %v1940_v7 }
  0xb4   : > { %1203 = vmatpush.bf16.msra.mxu2 %v1943_v14 }
  0xb7   : > { %v2465_v28 = vpop.f32.mrf.mxu2  ;;  %v2469_v33 = vpop.f32.mrf.mxu0 }
  0xb8   : > { %v2467_v30 = vpop.f32.mrf.mxu3  ;;  %v2471_v34 = vpop.f32.mrf.mxu1  ;;  %v557_v59 = vadd.f32 %v2465_v28, %v456_v50  ;;  %v1996_v28 = vld [vmem:[#allocation5 + $0x1a8] sm:$0xf0] }
  0xb9   : > { %v458_v23 = vadd.f32 %v2471_v34, %v2469_v33  ;;  %v1999_v15 = vor.u32 %v2198_v11, %v1996_v28  ;;  %v1935_v33 = vor.u32 %v2182_v21, %v1932_v22  ;;  %v1988_v34 = vld [vmem:[#allocation5 + $0x198] sm:$0xf0]  ;;  %v1980_v50 = vld [vmem:[#allocation5 + $0x188] sm:$0xf0] }
  0xba   : > { %v667_v19 = vadd.f32 %v2467_v30, %v557_v59  ;;  %v1986_v30 = vld [vmem:[#allocation5 + $0x190] sm:$0xf]  ;;  %v1991_v43 = vor.u32 %v2196_v29, %v1988_v34  ;;  %v1983_v59 = vor.u32 %v2194_v49, %v1980_v50 }
  0xbb   : > { %1355 = vmatpush.bf16.msrb.mxu0 %v1999_v15  ;;  %1204 = vmatpush.bf16.msra.mxu2 %v1935_v33 }
  0xbf   : > { %v2473_v61 = vpop.f32.mrf.mxu2  ;;  %v2477_v4 = vpop.f32.mrf.mxu0  ;;  %1356 = vmatpush.bf16.msrb.mxu0 %v1991_v43  ;;  %1205 = vmatpush.bf16.msra.mxu2 %v1927_v48  ;;  %v2092_v48 = vld [vmem:[#allocation5 + $0x268] sm:$0xf0] }
  0xc0   : > { %v2475_v62 = vpop.f32.mrf.mxu3  ;;  %v2479_v5 = vpop.f32.mrf.mxu1  ;;  %v558_v32 = vadd.f32 %v2473_v61, %v458_v23  ;;  %v779_v61 = vadd.s32 4294967294, %v776_v25 }
  0xc1   : > { %v461_v52 = vadd.f32 %v2479_v5, %v2477_v4  ;;  %v778_v4 = vadd.s32 16, %v776_v25 }
  0xc2   : > { %v668_v47 = vadd.f32 %v2475_v62, %v558_v32  ;;  %v1915_v62 = vor.u32 %v2179_v56, %v1914_v55  ;;  %vm782_vm4 = vcmp.ge.s32.totalorder %v779_v61, 0  ;;  %v2222_v61 = vld [vmem:[#allocation5 + $0x264] sm:$0xf]  ;;  %v2082_v55 = vld [vmem:[#allocation5 + $0x250] sm:$0xf] }
  0xc3   : > { %1357 = vmatpush.bf16.msrb.mxu0 %v1983_v59  ;;  %1206 = vmatpush.bf16.msra.mxu2 %v1919_v1  ;;  %v781_v8 = vadd.s32 4294967294, %v778_v4  ;;  %vm2276_vm6 = vmpackc.low %vm2364_vm5, %vm782_vm4  ;;  %v2221_v56 = vld [vmem:[#allocation5 + $0x254] sm:$0xf0]  ;;  %v2076_v1 = vld [vmem:[#allocation5 + $0x248] sm:$0xf0] }
  0xc4   : > { %1192 = vmatpush.bf16.msra.mxu1 %v1915_v62  ;;  %v2083_v59 = vor.u32 %v2221_v56, %v2082_v55 }
  0xc5   : > { %vm787_vm7 = vcmp.lt.s32.totalorder %v781_v8, 16  ;;  %v2068_v8 = vld [vmem:[#allocation5 + $0x238] sm:$0xf0] }
  0xc7   : > { %v2481_v37 = vpop.f32.mrf.mxu2  ;;  %v391_v41 = vpop.f32.mrf.mxu0 }
  0xc8   : > { %v2483_v38 = vpop.f32.mrf.mxu3  ;;  %v462_v42 = vpop.f32.mrf.mxu1  ;;  %v1987_v41 = vor.u32 %v2197_v31, %v1986_v30  ;;  %v559_v63 = vadd.f32 %v2481_v37, %v461_v52  ;;  %v2224_v30 = vld [vmem:[#allocation5 + $0x274] sm:$0xf]  ;;  %v2100_v31 = vld [vmem:[#allocation5 + $0x278] sm:$0xf0] }
  0xca   : > { %1342 = vmatpush.bf16.msra.mxu3 %v1987_v41  ;;  %v669_v6 = vadd.f32 %v2483_v38, %v559_v63  ;;  %v2103_v41 = vor.u32 %v2224_v30, %v2100_v31  ;;  %v2219_v63 = vld [vmem:[#allocation5 + $0x244] sm:$0xf0]  ;;  %v2210_v30 = vld [vmem:[#allocation5 + $0x204] sm:$0xf]  ;;  %v2044_v31 = vld [vmem:[#allocation5 + $0x208] sm:$0xf0] }
  0xcb   : > { %v2075_v4 = vor.u32 %v2219_v63, %v2074_v60 }
  0xce   : > { %1343 = vmatpush.bf16.msra.mxu3 %v1979_v54  ;;  %v2095_v54 = vor.u32 %v2222_v61, %v2092_v48 }
  0xcf   : > { %v555_v12 = vpop.f32.mrf.mxu2  ;;  %v754_v20 = vpop.f32.mrf.mxu0 }
  0xd0   : > { %v665_v13 = vpop.f32.mrf.mxu3  ;;  %v763_v27 = vadd.f32 %v754_v20, %v667_v19 }
  0xd2   : > { %v769_v42 = vadd.f32 %v2494_v24, %v763_v27  ;;  %v2225_v27 = vld [vmem:[#allocation5 + $0x274] sm:$0xf0] }
  0xd3   : > { %v2099_v40 = vor.u32 %v2225_v27, %v2098_v26  ;;  %v2042_v27 = vld [vmem:[#allocation5 + $0x200] sm:$0xf] }
  0xd4   : > { %v772_v58 = vmax.f32 %v769_v42, 0.0 }
  0xd6   : > { %v797_v2 = vsel %vm782_vm4, %v772_v58, 0.0 }
  0xd7   : > { %v756_v51 = vpop.f32.mrf.mxu0 }
  0xd8   : > { %v764_v53 = vadd.f32 %v756_v51, %v668_v47  ;;  %v2223_v47 = vld [vmem:[#allocation5 + $0x264] sm:$0xf0] }
  0xda   : > { %v770_v0 = vadd.f32 %v2494_v24, %v764_v53  ;;  %v2091_v53 = vor.u32 %v2223_v47, %v2090_v46 }
  0xdc   : > { %v773_v5 = vmax.f32 %v770_v0, 0.0  ;;  %v2218_v0 = vld [vmem:[#allocation5 + $0x244] sm:$0xf] }
  0xde   : > { %v2505_v7 = vpack.c.bf16 %v773_v5, %v797_v2  ;;  %v2277_v9 = vpack.c.bf16 %v773_v5, %v772_v58  ;;  %v2084_v58 = vld [vmem:[#allocation5 + $0x258] sm:$0xf0]  ;;  %v2079_v5 = vor.u32 %v2218_v0, %v2076_v1  ;;  %v2066_v2 = vld [vmem:[#allocation5 + $0x230] sm:$0xf] }
  0xdf   : > { %v759_v3 = vpop.f32.mrf.mxu0  ;;  %v2087_v62 = vor.u32 %v2220_v57, %v2084_v58 }
  0xe0   : > { %2234 = vst [vmem:[#allocation2] sm:$0xff] %v2505_v7   ;;  %v765_v37 = vadd.f32 %v759_v3, %v669_v6  ;;  %2278 = vmatmul.msk.bf16.vlgmr.msrb.gmra.mxu3 %vm2276_vm6, %v2277_v9  ;;  %2281 = vmatmul.msk.bf16.vlgmr.msra.gmra.mxu0 %vm2276_vm6, %v2277_v9  ;;  %v2238_v16 = vunpack.c.h.b16 %v2505_v7  ;;  %v853_v19 = vshll.u32 %v2505_v7, 16  ;;  %v851_v32 = vshrl.u32 %v2505_v7, 16  ;;  %v2217_v6 = vld [vmem:[#allocation5 + $0x234] sm:$0xf0] }
  0xe1   : > { %v2216_v3 = vld [vmem:[#allocation5 + $0x234] sm:$0xf] }
  0xe2   : > { %v771_v10 = vadd.f32 %v2494_v24, %v765_v37  ;;  %v855_v18 = vrot.slane %v853_v19, 1 }
  0xe4   : > { %v774_v11 = vmax.f32 %v771_v10, 0.0  ;;  %v856_v42 = vor.u32 %v855_v18, %v851_v32  ;;  %v2067_v10 = vor.u32 %v2217_v6, %v2066_v2  ;;  %v2211_v18 = vld [vmem:[#allocation5 + $0x204] sm:$0xf0] }
  0xe5   : > { %v2043_v32 = vor.u32 %v2211_v18, %v2042_v27 }
  0xe6   : > { %v799_v12 = vsel %vm787_vm7, %v774_v11, 0.0  ;;  %v2071_v11 = vor.u32 %v2216_v3, %v2068_v8 }
  0xe7   : > { %v802_v38 = vpack.c.bf16 %v799_v12, %v799_v12  ;;  %v761_v13 = vpop.f32.mrf.mxu0  ;;  %v1080_v14 = vld [vmem:[#allocation2] sm:$0xe]  ;;  %v2058_v12 = vld [vmem:[#allocation5 + $0x220] sm:$0xf] }
  0xe8   : > { %v1099_v28 = vunpack.c.l.b16 %v1080_v14  ;;  %v2214_v13 = vld [vmem:[#allocation5 + $0x224] sm:$0xf]  ;;  %v2060_v14 = vld [vmem:[#allocation5 + $0x228] sm:$0xf0] }
  0xe9   : > { %805 = vst [vmem:[#allocation2 + $0x8] sm:$0x3] %v802_v38  ;;  %v2215_v38 = vld [vmem:[#allocation5 + $0x224] sm:$0xf0] }
  0xea   : > { %v2513_v17 = vpack.c.b16 %v2238_v16, %v1099_v28  ;;  %v2059_v19 = vor.u32 %v2215_v38, %v2058_v12 }
  0xec   : > { %v1239_v22 = vshrl.u32 %v2513_v17, 16  ;;  %v1242_v25 = vshll.u32 %v2513_v17, 16  ;;  %v1101_v9 = vrot.slane %v2513_v17, 1 }
  0xee   : > { %v1241_v33 = vrot.slane %v1239_v22, 1  ;;  %v1244_v35 = vrot.slane %v1242_v25, 2  ;;  %v1368_v22 = vld [vmem:[#allocation2] sm:$0xc]  ;;  %v2052_v25 = vld [vmem:[#allocation5 + $0x218] sm:$0xf0] }
  0xf0   : > { %v824_v20 = vld [vmem:[#allocation2 + $0x8] sm:$0x1]  ;;  %v1245_v50 = vor.u32 %v1244_v35, %v1241_v33  ;;  %v2047_v33 = vor.u32 %v2210_v30, %v2044_v31 }
  0xf1   : > { %v1217_v21 = vld [vmem:[#allocation2 + $0x8] sm:$0x3]  ;;  %v847_v23 = vunpack.c.l.b16 %v824_v20  ;;  %v2063_v20 = vor.u32 %v2214_v13, %v2060_v14 }
  0xf2   : > { %v1236_v24 = vunpack.c.l.b16 %v1217_v21  ;;  %v2050_v21 = vld [vmem:[#allocation5 + $0x210] sm:$0xf] }
  0xf3   : > { %v2518_v15 = vpack.c.b16 %v847_v23, %v847_v23  ;;  %v2213_v23 = vld [vmem:[#allocation5 + $0x214] sm:$0xf0] }
  0xf4   : > { %v2520_v29 = vpack.c.b16 %v1236_v24, %v1236_v24  ;;  %v2212_v24 = vld [vmem:[#allocation5 + $0x214] sm:$0xf]  ;;  %v2051_v17 = vor.u32 %v2213_v23, %v2050_v21 }
  0xf5   : > { %v858_v34 = vshll.u32 %v2518_v15, 16  ;;  %v1102_v37 = vrot.slane %v2518_v15, 1  ;;  %v2055_v26 = vor.u32 %v2212_v24, %v2052_v25  ;;  %v1387_v15 = vunpack.c.l.b16 %v1368_v22 }
  0xf6   : > { %v1247_v36 = vshrl.u32 %v2520_v29, 16  ;;  %v1250_v39 = vshll.u32 %v2520_v29, 16  ;;  %v1390_v35 = vrot.slane %v2520_v29, 2 }
  0xf7   : > { %v860_v43 = vrot.slane %v858_v34, 1  ;;  %v1103_v28 = vsel %vm485_vm1, %v1101_v9, %v1102_v37  ;;  %v1388_v34 = vpack.c.b16 %v2238_v16, %v1387_v15  ;;  %v2365_v16 = vmov 0  }
  0xf8   : > { %v1249_v44 = vrot.slane %v1247_v36, 1  ;;  %v1252_v45 = vrot.slane %v1250_v39, 2  ;;  %260 = vst [vmem:[%s2539_s20] sm:$0x33] %v2365_v16 }
  0xf9   : > { %v861_v49 = vsel %vm309_vm0, %v856_v42, %v860_v43  ;;  %v1389_v36 = vrot.slane %v1388_v34, 2  ;;  %261 = vst [vmem:[%s2539_s20 + $0x10] sm:$0xcc] %v2365_v16 }
  0xfa   : > { %v1253_v51 = vor.u32 %v1252_v45, %v1249_v44  ;;  %951 = vmatmul.bf16.vlgmr.msrb.gmra.mxu1 %v861_v49  ;;  %965 = vmatmul.bf16.vlgmr.msrb.gmra.mxu2 %v861_v49 }
  0xfb   : > { %1473 = vmatpush.bf16.msrb.mxu1 %v2099_v40  ;;  %1487 = vmatpush.bf16.msrb.mxu2 %v2103_v41  ;;  %v1391_v39 = vsel %vm691_vm3, %v1389_v36, %v1390_v35 }
  0xfc   : > { %v1254_v52 = vsel %vm581_vm2, %v1245_v50, %v1253_v51 }
  0xfd   : > { %1344 = vmatmul.bf16.vlgmr.msra.gmra.mxu3 %v1254_v52  ;;  %1358 = vmatmul.bf16.vlgmr.msrb.gmra.mxu0 %v1254_v52 }
  0xff   : > { %1474 = vmatpush.bf16.msrb.mxu1 %v2091_v53  ;;  %1488 = vmatpush.bf16.msrb.mxu2 %v2095_v54  ;;  %v263_v53 = vld [vmem:[%s2556_s4] sm:$0x3] }
 0x100   : > { %v1507_v0 = vperm.slane %v263_v53, 1 }
 0x103   : > { %1475 = vmatpush.bf16.msrb.mxu1 %v2083_v59  ;;  %1489 = vmatpush.bf16.msrb.mxu2 %v2087_v62  ;;  %v1506_v62 = vperm.slane %v263_v53, 0 }
 0x107   : > { %1476 = vmatpush.bf16.msrb.mxu1 %v2075_v4  ;;  %1490 = vmatpush.bf16.msrb.mxu2 %v2079_v5 }
 0x10a   : > { %1193 = vmatmul.bf16.vlgmr.msra.gmra.mxu1 %v1103_v28  ;;  %1207 = vmatmul.bf16.vlgmr.msra.gmra.mxu2 %v1103_v28 }
 0x10b   : > { %1477 = vmatpush.bf16.msrb.mxu1 %v2067_v10  ;;  %1491 = vmatpush.bf16.msrb.mxu2 %v2071_v11 }
 0x10f   : > { %1478 = vmatpush.bf16.msrb.mxu1 %v2059_v19  ;;  %1492 = vmatpush.bf16.msrb.mxu2 %v2063_v20 }
 0x113   : > { %1479 = vmatpush.bf16.msrb.mxu1 %v2051_v17  ;;  %1493 = vmatpush.bf16.msrb.mxu2 %v2055_v26 }
 0x117   : > { %1480 = vmatpush.bf16.msrb.mxu1 %v2043_v32  ;;  %1494 = vmatpush.bf16.msrb.mxu2 %v2047_v33 }
 0x11a   : > { %1481 = vmatmul.bf16.vlgmr.msrb.gmra.mxu1 %v1391_v39  ;;  %1495 = vmatmul.bf16.vlgmr.msrb.gmra.mxu2 %v1391_v39 }
 0x15d   : > { %v1075_v43 = vpop.f32.mrf.mxu0 }
 0x163   : > { %v1061_v41 = vpop.f32.mrf.mxu3 }
 0x165   : > { %v1077_v61 = vpop.f32.mrf.mxu0 }
 0x16b   : > { %v1063_v45 = vpop.f32.mrf.mxu3 }
 0x177   : > { %v952_v40 = vpop.f32.mrf.mxu1 }
 0x178   : > { %v1062_v48 = vadd.f32 %v1061_v41, %v952_v40 }
 0x17a   : > { %v1359_v57 = vpop.f32.mrf.mxu0 }
 0x17d   : > { %v966_v7 = vpop.f32.mrf.mxu2 }
 0x17e   : > { %v1076_v52 = vadd.f32 %v1075_v43, %v966_v7 }
 0x17f   : > { %v954_v29 = vpop.f32.mrf.mxu1 }
 0x180   : > { %v1345_v50 = vpop.f32.mrf.mxu3  ;;  %v1064_v58 = vadd.f32 %v1063_v45, %v954_v29 }
 0x182   : > { %v1361_v38 = vpop.f32.mrf.mxu0 }
 0x185   : > { %v968_v42 = vpop.f32.mrf.mxu2 }
 0x186   : > { %v1078_v4 = vadd.f32 %v1077_v61, %v968_v42 }
 0x187   : > { %v1194_v44 = vpop.f32.mrf.mxu1 }
 0x188   : > { %v1213_v49 = vadd.f32 %v1194_v44, %v1062_v48  ;;  %v1347_v6 = vpop.f32.mrf.mxu3 }
 0x18a   : > { %v1364_v56 = vadd.f32 %v1345_v50, %v1213_v49 }
 0x18d   : > { %v1208_v46 = vpop.f32.mrf.mxu2 }
 0x18e   : > { %v1214_v55 = vadd.f32 %v1208_v46, %v1076_v52 }
 0x18f   : > { %v1196_v47 = vpop.f32.mrf.mxu1 }
 0x190   : > { %v1215_v60 = vadd.f32 %v1196_v47, %v1064_v58  ;;  %v1365_v63 = vadd.f32 %v1359_v57, %v1214_v55 }
 0x192   : > { %v1366_v9 = vadd.f32 %v1347_v6, %v1215_v60 }
 0x195   : > { %v1210_v51 = vpop.f32.mrf.mxu2 }
 0x196   : > { %v1216_v8 = vadd.f32 %v1210_v51, %v1078_v4 }
 0x197   : > { %v1482_v54 = vpop.f32.mrf.mxu1 }
 0x198   : > { %v1501_v59 = vadd.f32 %v1482_v54, %v1364_v56  ;;  %v1367_v14 = vadd.f32 %v1361_v38, %v1216_v8 }
 0x19a   : > { %v1510_v5 = vadd.f32 %v1506_v62, %v1501_v59 }
 0x19c   : > { %v1514_v10 = vmax.f32 %v1510_v5, 0.0 }
 0x19d   : > { %v1496_v1 = vpop.f32.mrf.mxu2 }
 0x19e   : > { %v1502_v2 = vadd.f32 %v1496_v1, %v1365_v63 }
 0x19f   : > { %v1484_v3 = vpop.f32.mrf.mxu1 }
 0x1a0   : > { %v1511_v37 = vadd.f32 %v1507_v0, %v1502_v2  ;;  %v1503_v12 = vadd.f32 %v1484_v3, %v1366_v9 }
 0x1a2   : > { %v1515_v11 = vmax.f32 %v1511_v37, 0.0  ;;  %v1512_v20 = vadd.f32 %v1506_v62, %v1503_v12 }
 0x1a4   : > { %v1518_v13 = vpack.c.bf16 %v1515_v11, %v1514_v10  ;;  %v1516_v23 = vmax.f32 %v1512_v20, 0.0 }
 0x1a5   : > { %v1498_v28 = vpop.f32.mrf.mxu2 }
 0x1a6   : > { %v1525_v19 = vrot.slane %v1518_v13, 6  ;;  %v1504_v21 = vadd.f32 %v1498_v28, %v1367_v14 }
 0x1a8   : > { %1533 = vst [vmem:[%s2539_s20] sm:$0xcc] %v1525_v19  ;;  %v1513_v22 = vadd.f32 %v1507_v0, %v1504_v21  ;;  %v1526_v17 = vrot.slane %v1525_v19, 4 }
 0x1aa   : > { %v1517_v24 = vmax.f32 %v1513_v22, 0.0 }
 0x1ac   : > { %v1519_v25 = vpack.c.bf16 %v1517_v24, %v1516_v23 }
 0x1ae   : > { %v1527_v26 = vrot.slane %v1519_v25, 6 }
 0x1b0   : > { %v1528_v27 = vsel %vm1524_vm10, %v1526_v17, %v1527_v26  ;;  %v1529_v15 = vrot.slane %v1527_v26, 4 }
 0x1b1   : > { %1534 = vst [vmem:[%s2539_s20 + $0x8] sm:$0xff] %v1528_v27 }
 0x1b2   : > { %1535 = vst [vmem:[%s2539_s20 + $0x10] sm:$0x33] %v1529_v15 }
 0x1b3 PF: > { %s17_s18 = sadd.s32 1, %s2356_s18  }
 0x1b4   : > { %p14_p7 = scmp.ge.s32.totalorder %s17_s18, 4  }
 0x1b6   :  { %16 = sbr.rel (!%p14_p7) target bundleno = 2 (0x2), region = 87 }
 0x1bb   :  { %1557 = vsyncpa [#allocation4], 1 }
 0x1bc   :  { %1559 = vsyncpa [#allocation4 + $0x1], 1 }
 0x1bd   :  { %1560 = vsyncpa [#allocation6], 1 }

// kernel: generator_cnn_forward.11
= control target key start
LH: loop header
LB: loop body
LE: loop exit
PB: predicated region body
PF: predicated region fallthrough
CT: control target
= control target key end

     0   :  { %12 = vsyncpa [#allocation4], 0  ;;  %s3534_s0 = inlined_call_operand.vmem [shape: bf16[2,24,256], index: 0, kind: input, shape index: {}]   ;;  %s3535_s1 = inlined_call_operand.vmem [shape: bf16[5,256,128], index: 1, kind: input, shape index: {}]   ;;  %s3536_s2 = inlined_call_operand.vmem [shape: f32[1,128], index: 2, kind: input, shape index: {}]   ;;  %s3537_s3 = inlined_call_operand.vmem [shape: bf16[5,128,128], index: 3, kind: input, shape index: {}]   ;;  %s3538_s4 = inlined_call_operand.vmem [shape: f32[1,128], index: 4, kind: input, shape index: {}]   ;;  %s3539_s5 = inlined_call_operand.vmem [shape: bf16[128,128], index: 5, kind: input, shape index: {}]   ;;  %s3540_s6 = inlined_call_operand.vmem [shape: f32[1,128], index: 6, kind: input, shape index: {}]   ;;  %s3541_s7 = inlined_call_operand.hbm [shape: f32[2,16,128], index: 7, kind: output, shape index: {}]  }
   0x1   :  { %14 = vsyncpa [#allocation4 + $0x1], 0  ;;  %s2933_s24 = smov 0   ;;  %s2935_s25 = smov 0  }
   0x2   :  { %s2937_s26 = smov 0   ;;  %s2939_s27 = smov 0  }
   0x3 LB: > { %s2954_s28 = sadd.s32 4294967295, %s2888_s27   ;;  %s1925_s29 = sadd.s32 4294967294, %s2888_s27   ;;  %s2888_s27 = sphi %s2939_s27, %s3547_s27   ;;  %s2884_s26 = sphi %s2937_s26, %s3546_s26   ;;  %s2880_s25 = sphi %s2935_s25, %s3545_s25   ;;  %s2876_s24 = sphi %s2933_s24, %s3544_s24  }
   0x4   : > { %s2958_s30 = sadd.s32 1, %s2888_s27   ;;  %s179_s8 = sadd.s32 1, %s2884_s26 }
   0x5   : > { %s176_s9 = ssub.s32 %s2888_s27, %s2958_s30  ;;  %p189_p0 = scmp.ne.s32.totalorder %s2884_s26, %s2880_s25 }
   0x6   : > { %p177_p1 = scmp.eq.s32.totalorder %s176_s9, 0  ;;  %p190_p2 = scmp.eq.s32.totalorder %s2954_s28, 1 }
   0x7   : > { %p195_p3 = scmp.ne.s32.totalorder %s2880_s25, %s2876_s24  ;;  %p196_p4 = scmp.eq.s32.totalorder %s1925_s29, 1 }
   0x8   : > { %s2969_s10 = scalar_select %p177_p1, %s2884_s26, %s179_s8  }
   0x9   : > { %p2971_p5 = por %p190_p2, %p189_p0  ;;  %p2975_p6 = por %p196_p4, %p195_p3 }
   0xa   : > { %p1928_p7 = scmp.ge.s32.totalorder %s2888_s27, 1  ;;  %p240_p8 = scmp.lt.s32.totalorder %s2888_s27, 3 }
   0xc   : > { %p241_p9 = pnand %p1928_p7, %p240_p8 }
   0xd   : > { %p272_p10 = scmp.lt.s32.totalorder (!%p241_p9), %s2954_s28, 1  ;;  %s269_s20 = sand.u32 (!%p241_p9), 1, %s2880_s25  }
   0xe   : > { %244 = sbr.rel (%p241_p9) target bundleno = 596 (0x254), region = 48  ;;  %s2768_s23 = sshll.u32 (!%p241_p9), %s2954_s28, 4 }
   0xf   : > { %s1859_s14 = scalar_lea.hbm (!%p241_p9), %s3541_s7, %s2768_s23  ;;  %s1848_s18 = scalar_lea.sflag (!%p241_p9), [#allocation4], %s269_s20 }
  0x10   : > { %s1862_s17 = sshll.u32 (!%p241_p9), %s1859_s14, 4  ;;  %s2846_s21 = scalar_lea.hbm (!%p241_p9), %s3541_s7, 32  ;;  %s1863_s17 = int_to_ptr.hbm [resolvable:$true] %s1862_s17 }
  0x13   : > { %v2671_v0 = vld [vmem:[%s3535_s1 + $0xb8] sm:$0xff]  ;;  %v2670_v4 = vld [vmem:[%s3535_s1 + $0xb0] sm:$0xff]  ;;  %s273_s8 = scalar_select %p272_p10, %s2954_s28, 1  ;;  %v2669_v8 = vld [vmem:[%s3535_s1 + $0xa8] sm:$0xff]  ;;  %vm378_vm0 = vsmask.f32 7424 }
  0x14   : > { %v2679_v1 = vld [vmem:[%s3535_s1 + $0xf8] sm:$0xff]  ;;  %509 = vmatpush.bf16.msra.mxu0 %v2671_v0  ;;  %v2678_v5 = vld [vmem:[%s3535_s1 + $0xf0] sm:$0xff]  ;;  %v2677_v9 = vld [vmem:[%s3535_s1 + $0xe8] sm:$0xff]  ;;  %vm725_vm1 = vcmask 1046528   ;;  %vm910_vm2 = vsmask.f32 6400 }
  0x15   : > { %v2655_v2 = vld [vmem:[%s3535_s1 + $0x38] sm:$0xff]  ;;  %527 = vmatpush.bf16.msra.mxu1 %v2679_v1  ;;  %v2654_v6 = vld [vmem:[%s3535_s1 + $0x30] sm:$0xff]  ;;  %s2778_s16 = smul.u32 24, %s273_s8  ;;  %v2653_v10 = vld [vmem:[%s3535_s1 + $0x28] sm:$0xff]  ;;  %vm1123_vm3 = vcmask 1045504   ;;  %vm2890_vm5 = vmmov 1  }
  0x16   : > { %v2663_v3 = vld [vmem:[%s3535_s1 + $0x78] sm:$0xff]  ;;  %650 = vmatpush.bf16.msra.mxu2 %v2655_v2  ;;  %v2662_v7 = vld [vmem:[%s3535_s1 + $0x70] sm:$0xff]  ;;  %v2661_v11 = vld [vmem:[%s3535_s1 + $0x68] sm:$0xff] }
  0x17   : > { %668 = vmatpush.bf16.msra.mxu3 %v2663_v3  ;;  %s3022_s13 = scalar_lea.vmem %s3534_s0, %s2778_s16  ;;  %v2668_v12 = vld [vmem:[%s3535_s1 + $0xa0] sm:$0xff]  ;;  %v2667_v24 = vld [vmem:[%s3535_s1 + $0x98] sm:$0xff]  ;;  %v2666_v32 = vld [vmem:[%s3535_s1 + $0x90] sm:$0xff]  ;;  %s1929_s16 = sshll.u32 %s269_s20, 4 }
  0x18   : > { %510 = vmatpush.bf16.msra.mxu0 %v2670_v4  ;;  %v2676_v13 = vld [vmem:[%s3535_s1 + $0xe0] sm:$0xff]  ;;  %v297_v17 = vld [vmem:[%s3022_s13 + $0x8] sm:$0xff]  ;;  %v331_v18 = vld [vmem:[%s3022_s13 + $0x10] sm:$0x77]  ;;  %s271_s29 = scalar_lea.vmem [#allocation3], %s1929_s16 }
  0x19   : > { %528 = vmatpush.bf16.msra.mxu1 %v2678_v5  ;;  %v2652_v14 = vld [vmem:[%s3535_s1 + $0x20] sm:$0xff]  ;;  %v3039_v21 = vunpack.c.l.b16 %v297_v17  ;;  %v3041_v22 = vunpack.c.h.b16 %v297_v17  ;;  %v372_v23 = vunpack.c.l.b16 %v331_v18  ;;  %v2675_v25 = vld [vmem:[%s3535_s1 + $0xd8] sm:$0xff]  ;;  %v373_v27 = vunpack.c.h.b16 %v331_v18  ;;  %v2674_v33 = vld [vmem:[%s3535_s1 + $0xd0] sm:$0xff]  ;;  %s1860_s15 = sshll.u32 %s271_s29, 4  ;;  %s1861_s15 = int_to_ptr.vmem [resolvable:$true] %s1860_s15 }
  0x1a   : > { %651 = vmatpush.bf16.msra.mxu2 %v2654_v6  ;;  %v296_v15 = vld [vmem:[%s3022_s13] sm:$0xff]  ;;  %v2651_v29 = vld [vmem:[%s3535_s1 + $0x18] sm:$0xff]  ;;  %v2650_v37 = vld [vmem:[%s3535_s1 + $0x10] sm:$0xff] }
  0x1b   : > { %669 = vmatpush.bf16.msra.mxu3 %v2662_v7  ;;  %v2660_v16 = vld [vmem:[%s3535_s1 + $0x60] sm:$0xff]  ;;  %v368_v19 = vunpack.c.l.b16 %v296_v15  ;;  %v369_v20 = vunpack.c.h.b16 %v296_v15  ;;  %v2659_v30 = vld [vmem:[%s3535_s1 + $0x58] sm:$0xff]  ;;  %v3057_v31 = vpack.c.b16 %v372_v23, %v372_v23  ;;  %v3065_v35 = vpack.c.b16 %v373_v27, %v373_v27  ;;  %v2658_v38 = vld [vmem:[%s3535_s1 + $0x50] sm:$0xff] }
  0x1c   : > { %511 = vmatpush.bf16.msra.mxu0 %v2669_v8  ;;  %v2665_v41 = vld [vmem:[%s3535_s1 + $0x88] sm:$0xff]  ;;  %v2664_v49 = vld [vmem:[%s3535_s1 + $0x80] sm:$0xff]  ;;  %v2687_v57 = vld [vmem:[%s3535_s1 + $0x138] sm:$0xff] }
  0x1d   : > { %529 = vmatpush.bf16.msra.mxu1 %v2677_v9  ;;  %v374_v26 = vpack.c.b16 %v3039_v21, %v368_v19  ;;  %v375_v28 = vpack.c.b16 %v3041_v22, %v369_v20  ;;  %v387_v40 = vshll.u32 %v3057_v31, 16  ;;  %v2673_v42 = vld [vmem:[%s3535_s1 + $0xc8] sm:$0xff]  ;;  %v399_v46 = vshll.u32 %v3065_v35, 16  ;;  %v2672_v50 = vld [vmem:[%s3535_s1 + $0xc0] sm:$0xff]  ;;  %v2695_v58 = vld [vmem:[%s3535_s1 + $0x178] sm:$0xff] }
  0x1e   : > { %652 = vmatpush.bf16.msra.mxu2 %v2653_v10  ;;  %v2649_v47 = vld [vmem:[%s3535_s1 + $0x8] sm:$0xff]  ;;  %v2648_v55 = vld [vmem:[%s3535_s1] sm:$0xff]  ;;  %v2703_v61 = vld [vmem:[%s3535_s1 + $0x1b8] sm:$0xff] }
  0x1f   : > { %670 = vmatpush.bf16.msra.mxu3 %v2661_v11  ;;  %v382_v34 = vshll.u32 %v374_v26, 16  ;;  %v394_v36 = vshll.u32 %v375_v28, 16  ;;  %v380_v39 = vshrl.u32 %v374_v26, 16  ;;  %v392_v44 = vshrl.u32 %v375_v28, 16  ;;  %v2657_v48 = vld [vmem:[%s3535_s1 + $0x48] sm:$0xff]  ;;  %v2656_v56 = vld [vmem:[%s3535_s1 + $0x40] sm:$0xff] }
  0x20   : > { %512 = vmatpush.bf16.msra.mxu0 %v2668_v12  ;;  %v389_v52 = vrot.slane %v387_v40, 1  ;;  %v401_v54 = vrot.slane %v399_v46, 1  ;;  %v2711_v62 = vld [vmem:[%s3535_s1 + $0x1f8] sm:$0xff]  ;;  %v2686_v63 = vld [vmem:[%s3535_s1 + $0x130] sm:$0xff]  ;;  %v2685_v3 = vld [vmem:[%s3535_s1 + $0x128] sm:$0xff]  ;;  %v403_v12 = vshrl.u32 %v3057_v31, 16 }
  0x21   : > { %530 = vmatpush.bf16.msra.mxu1 %v2676_v13  ;;  %v384_v43 = vrot.slane %v382_v34, 1  ;;  %v396_v45 = vrot.slane %v394_v36, 1  ;;  %v2694_v0 = vld [vmem:[%s3535_s1 + $0x170] sm:$0xff]  ;;  %v2693_v4 = vld [vmem:[%s3535_s1 + $0x168] sm:$0xff]  ;;  %v686_v8 = vld [vmem:[%s3022_s13] sm:$0xee] }
  0x22   : > { %653 = vmatpush.bf16.msra.mxu2 %v2652_v14  ;;  %v2702_v1 = vld [vmem:[%s3535_s1 + $0x1b0] sm:$0xff]  ;;  %v2701_v5 = vld [vmem:[%s3535_s1 + $0x1a8] sm:$0xff]  ;;  %v2684_v10 = vld [vmem:[%s3535_s1 + $0x120] sm:$0xff]  ;;  %v406_v13 = vshrl.u32 %v3065_v35, 16  ;;  %v722_v20 = vunpack.c.h.b16 %v686_v8 }
  0x23   : > { %671 = vmatpush.bf16.msra.mxu3 %v2660_v16  ;;  %v385_v51 = vor.u32 %v384_v43, %v380_v39  ;;  %v397_v53 = vor.u32 %v396_v45, %v392_v44  ;;  %v2710_v2 = vld [vmem:[%s3535_s1 + $0x1f0] sm:$0xff]  ;;  %v2709_v6 = vld [vmem:[%s3535_s1 + $0x1e8] sm:$0xff]  ;;  %v2692_v11 = vld [vmem:[%s3535_s1 + $0x160] sm:$0xff]  ;;  %v721_v16 = vunpack.c.l.b16 %v686_v8 }
  0x24   : > { %513 = vmatpush.bf16.msra.mxu0 %v2667_v24  ;;  %v298_v7 = vld [vmem:[%s3022_s13 + $0x10] sm:$0x33]  ;;  %v2700_v18 = vld [vmem:[%s3535_s1 + $0x1a0] sm:$0xff]  ;;  %v2683_v24 = vld [vmem:[%s3535_s1 + $0x118] sm:$0xff]  ;;  %v408_v27 = vor.u32 %v406_v13, %v401_v54  ;;  %v3172_v36 = vpack.c.b16 %v3041_v22, %v722_v20 }
  0x25   : > { %531 = vmatpush.bf16.msra.mxu1 %v2675_v25  ;;  %v390_v59 = vsel %vm378_vm0, %v385_v51, %v389_v52  ;;  %v402_v60 = vsel %vm378_vm0, %v397_v53, %v401_v54  ;;  %v871_v9 = vld [vmem:[%s3022_s13 + $0x10] sm:$0xff]  ;;  %v546_v14 = vunpack.c.l.b16 %v298_v7  ;;  %v547_v15 = vunpack.c.h.b16 %v298_v7  ;;  %v2708_v19 = vld [vmem:[%s3535_s1 + $0x1e0] sm:$0xff]  ;;  %v2691_v25 = vld [vmem:[%s3535_s1 + $0x158] sm:$0xff] }
  0x26   : > { %654 = vmatpush.bf16.msra.mxu2 %v2651_v29  ;;  %v906_v17 = vunpack.c.l.b16 %v871_v9  ;;  %v907_v23 = vunpack.c.h.b16 %v871_v9  ;;  %v2707_v34 = vld [vmem:[%s3535_s1 + $0x1d8] sm:$0xff]  ;;  %v2690_v39 = vld [vmem:[%s3535_s1 + $0x150] sm:$0xff]  ;;  %v929_v46 = vshrl.u32 %v3172_v36, 16  ;;  %v2689_v51 = vld [vmem:[%s3535_s1 + $0x148] sm:$0xff] }
  0x27   : > { %672 = vmatpush.bf16.msra.mxu3 %v2659_v30  ;;  %v549_v29 = vpack.c.b16 %v547_v15, %v547_v15  ;;  %v3161_v30 = vpack.c.b16 %v3039_v21, %v721_v16  ;;  %v2698_v44 = vld [vmem:[%s3535_s1 + $0x190] sm:$0xff]  ;;  %v1084_v8 = vld [vmem:[%s3022_s13] sm:$0xcc]  ;;  %v2725_v20 = vld [vmem:[%s3535_s1 + $0x268] sm:$0xff]  ;;  %s2840_s13 = sshra.s32 %s1863_s17, 4  ;;  %s2841_s13 = int_to_ptr.hbm [resolvable:$true] %s2840_s13 }
  0x28   : > { %514 = vmatpush.bf16.msra.mxu0 %v2666_v32  ;;  %v3163_v32 = vpack.c.b16 %v906_v17, %v906_v17  ;;  %v2706_v45 = vld [vmem:[%s3535_s1 + $0x1d0] sm:$0xff]  ;;  %v2704_v9 = vld [vmem:[%s3535_s1 + $0x1c0] sm:$0xff]  ;;  %v1120_v13 = vunpack.c.h.b16 %v1084_v8  ;;  %s2842_s19 = scalar_lea.hbm %s2841_s13, 16  ;;  %p2847_p0 = scmp.lt.s32.totalorder %s2841_s13, %s3541_s7 }
  0x29   : > { %532 = vmatpush.bf16.msra.mxu1 %v2674_v33  ;;  %v2699_v33 = vld [vmem:[%s3535_s1 + $0x198] sm:$0xff]  ;;  %v912_v40 = vshrl.u32 %v3161_v30, 16  ;;  %p2843_p11 = scmp.ne.s32.totalorder %s2841_s13, %s2842_s19  ;;  %p2848_p1 = scmp.lt.s32.totalorder %s2846_s21, %s2842_s19 }
  0x2a   : > { %655 = vmatpush.bf16.msra.mxu2 %v2650_v37  ;;  %v3174_v37 = vpack.c.b16 %v907_v23, %v907_v23  ;;  %v923_v43 = vshll.u32 %v3163_v32, 16  ;;  %v2716_v23 = vld [vmem:[%s3535_s1 + $0x220] sm:$0xff] }
  0x2b   : > { %673 = vmatpush.bf16.msra.mxu3 %v2658_v38  ;;  %v2682_v38 = vld [vmem:[%s3535_s1 + $0x110] sm:$0xff]  ;;  %p2844_p12 = pnand %p2843_p11, %p2971_p5  ;;  %p2849_p2 = por %p2848_p1, %p2847_p0 }
  0x2c   : > { %515 = vmatpush.bf16.msra.mxu0 %v2665_v41  ;;  %v915_v41 = vshll.u32 %v3161_v30, 16 }
  0x2d   : > { %533 = vmatpush.bf16.msra.mxu1 %v2673_v42  ;;  %v920_v42 = vshrl.u32 %v3163_v32, 16  ;;  %p2845_p13 = pneg %p2844_p12 }
  0x2e   : > { %656 = vmatpush.bf16.msra.mxu2 %v2649_v47  ;;  %v932_v47 = vshll.u32 %v3172_v36, 16  ;;  %v917_v53 = vrot.slane %v915_v41, 2 }
  0x2f   : > { %674 = vmatpush.bf16.msra.mxu3 %v2657_v48  ;;  %v937_v48 = vshrl.u32 %v3174_v37, 16  ;;  %v922_v54 = vrot.slane %v920_v42, 1  ;;  %p2850_p3 = pnand %p2849_p2, %p2845_p13 }
  0x30   : > { %516 = vmatpush.bf16.msra.mxu0 %v2664_v49  ;;  %v940_v49 = vshll.u32 %v3174_v37, 16 }
  0x31   : > { %534 = vmatpush.bf16.msra.mxu1 %v2672_v50  ;;  %v2681_v50 = vld [vmem:[%s3535_s1 + $0x108] sm:$0xff] }
  0x32   : > { %657 = vmatpush.bf16.msra.mxu2 %v2648_v55  ;;  %v925_v55 = vrot.slane %v923_v43, 2 }
  0x33   : > { %675 = vmatpush.bf16.msra.mxu3 %v2656_v56  ;;  %517 = vmatmul.bf16.vlgmr.msra.gmra.mxu0 %v390_v59  ;;  %v2697_v56 = vld [vmem:[%s3535_s1 + $0x188] sm:$0xff]  ;;  %v934_v59 = vrot.slane %v932_v47, 2 }
  0x34   : > { %832 = vmatpush.bf16.msrb.mxu0 %v2687_v57  ;;  %535 = vmatmul.bf16.vlgmr.msra.gmra.mxu1 %v402_v60  ;;  %v2705_v57 = vld [vmem:[%s3535_s1 + $0x1c8] sm:$0xff]  ;;  %v939_v60 = vrot.slane %v937_v48, 1  ;;  %v926_v7 = vor.u32 %v925_v55, %v922_v54  ;;  %v2734_v54 = vld [vmem:[%s3537_s3 + $0x30] sm:$0xff] }
  0x35   : > { %850 = vmatpush.bf16.msrb.mxu1 %v2695_v58  ;;  %658 = vmatmul.bf16.vlgmr.msra.gmra.mxu2 %v374_v26  ;;  %v405_v26 = vor.u32 %v403_v12, %v389_v52  ;;  %v914_v52 = vrot.slane %v912_v40, 1  ;;  %v931_v58 = vrot.slane %v929_v46, 1  ;;  %v1119_v12 = vunpack.c.l.b16 %v1084_v8  ;;  %v2751_v8 = vld [vmem:[%s3537_s3 + $0xb8] sm:$0xff] }
  0x36   : > { %676 = vmatmul.bf16.vlgmr.msra.gmra.mxu3 %v375_v28  ;;  %1045 = vmatpush.bf16.msrb.mxu2 %v2703_v61  ;;  %v548_v28 = vpack.c.b16 %v546_v14, %v546_v14  ;;  %v942_v61 = vrot.slane %v940_v49, 2  ;;  %v1122_v14 = vpack.c.b16 %v3041_v22, %v1120_v13  ;;  %v2717_v22 = vld [vmem:[%s3535_s1 + $0x228] sm:$0xff]  ;;  %v1128_v40 = vrot.slane %v3174_v37, 2  ;;  %v2759_v13 = vld [vmem:[%s3537_s3 + $0xf8] sm:$0xff] }
  0x37   : > { %1063 = vmatpush.bf16.msrb.mxu3 %v2711_v62  ;;  %v2680_v62 = vld [vmem:[%s3535_s1 + $0x100] sm:$0xff] }
  0x38   : > { %833 = vmatpush.bf16.msrb.mxu0 %v2686_v63  ;;  %v2688_v63 = vld [vmem:[%s3535_s1 + $0x140] sm:$0xff] }
  0x39   : > { %851 = vmatpush.bf16.msrb.mxu1 %v2694_v0  ;;  %v726_v0 = vrot.slane %v3161_v30, 1  ;;  %v2721_v30 = vld [vmem:[%s3535_s1 + $0x248] sm:$0xff] }
  0x3a   : > { %1046 = vmatpush.bf16.msrb.mxu2 %v2702_v1  ;;  %v727_v1 = vrot.slane %v3057_v31, 1  ;;  %v2696_v31 = vld [vmem:[%s3535_s1 + $0x180] sm:$0xff] }
  0x3b   : > { %1064 = vmatpush.bf16.msrb.mxu3 %v2710_v2  ;;  %v2719_v2 = vld [vmem:[%s3535_s1 + $0x238] sm:$0xff] }
  0x3c   : > { %834 = vmatpush.bf16.msrb.mxu0 %v2685_v3  ;;  %v2727_v3 = vld [vmem:[%s3535_s1 + $0x278] sm:$0xff]  ;;  %v728_v15 = vsel %vm725_vm1, %v726_v0, %v727_v1 }
  0x3d   : > { %852 = vmatpush.bf16.msrb.mxu1 %v2693_v4  ;;  %v729_v4 = vrot.slane %v3172_v36, 1  ;;  %v2731_v0 = vld [vmem:[%s3537_s3 + $0x18] sm:$0xff] }
  0x3e   : > { %1047 = vmatpush.bf16.msrb.mxu2 %v2701_v5  ;;  %v730_v5 = vrot.slane %v3065_v35, 1  ;;  %v1121_v35 = vpack.c.b16 %v3039_v21, %v1119_v12  ;;  %v2726_v21 = vld [vmem:[%s3535_s1 + $0x270] sm:$0xff] }
  0x3f   : > { %1065 = vmatpush.bf16.msrb.mxu3 %v2709_v6  ;;  %v918_v6 = vor.u32 %v917_v53, %v914_v52  ;;  %v2750_v12 = vld [vmem:[%s3537_s3 + $0xb0] sm:$0xff] }
  0x40   : > { %835 = vmatpush.bf16.msrb.mxu0 %v2684_v10  ;;  %v935_v10 = vor.u32 %v934_v59, %v931_v58  ;;  %v731_v16 = vsel %vm725_vm1, %v729_v4, %v730_v5  ;;  %v1124_v36 = vrot.slane %v1121_v35, 2  ;;  %v2730_v4 = vld [vmem:[%s3537_s3 + $0x10] sm:$0xff]  ;;  %v2728_v35 = vld [vmem:[%s3537_s3] sm:$0xff] }
  0x41   : > { %853 = vmatpush.bf16.msrb.mxu1 %v2692_v11  ;;  %v943_v11 = vor.u32 %v942_v61, %v939_v60  ;;  %v927_v17 = vsel %vm910_vm2, %v918_v6, %v926_v7  ;;  %v2732_v60 = vld [vmem:[%s3537_s3 + $0x20] sm:$0xff] }
  0x42   : > { %1048 = vmatpush.bf16.msrb.mxu2 %v2700_v18 }
  0x43   : > { %1066 = vmatpush.bf16.msrb.mxu3 %v2708_v19  ;;  %522 = vmatmul.bf16.gmra.mxu0 %v405_v26  ;;  %v944_v18 = vsel %vm910_vm2, %v935_v10, %v943_v11  ;;  %v2718_v19 = vld [vmem:[%s3535_s1 + $0x230] sm:$0xff]  ;;  %v2723_v26 = vld [vmem:[%s3535_s1 + $0x258] sm:$0xff] }
  0x44   : > { %836 = vmatpush.bf16.msrb.mxu0 %v2683_v24  ;;  %540 = vmatmul.bf16.gmra.mxu1 %v408_v27  ;;  %v2724_v24 = vld [vmem:[%s3535_s1 + $0x260] sm:$0xff]  ;;  %v2714_v27 = vld [vmem:[%s3535_s1 + $0x210] sm:$0xff] }
  0x45   : > { %854 = vmatpush.bf16.msrb.mxu1 %v2691_v25  ;;  %663 = vmatmul.bf16.gmra.mxu2 %v548_v28  ;;  %v2715_v25 = vld [vmem:[%s3535_s1 + $0x218] sm:$0xff]  ;;  %v2722_v28 = vld [vmem:[%s3535_s1 + $0x250] sm:$0xff] }
  0x46   : > { %681 = vmatmul.bf16.gmra.mxu3 %v549_v29  ;;  %1049 = vmatpush.bf16.msrb.mxu2 %v2699_v33  ;;  %v2713_v29 = vld [vmem:[%s3535_s1 + $0x208] sm:$0xff]  ;;  %v2712_v33 = vld [vmem:[%s3535_s1 + $0x200] sm:$0xff] }
  0x47   : > { %1067 = vmatpush.bf16.msrb.mxu3 %v2707_v34  ;;  %v2720_v34 = vld [vmem:[%s3535_s1 + $0x240] sm:$0xff] }
  0x48   : > { %837 = vmatpush.bf16.msrb.mxu0 %v2682_v38  ;;  %v1125_v38 = vrot.slane %v3163_v32, 2 }
  0x49   : > { %855 = vmatpush.bf16.msrb.mxu1 %v2690_v39  ;;  %v1127_v39 = vrot.slane %v1122_v14, 2 }
  0x4a   : > { %1050 = vmatpush.bf16.msrb.mxu2 %v2698_v44  ;;  %v1126_v41 = vsel %vm1123_vm3, %v1124_v36, %v1125_v38  ;;  %v2767_v36 = vld [vmem:[%s3537_s3 + $0x138] sm:$0xff] }
  0x4b   : > { %1068 = vmatpush.bf16.msrb.mxu3 %v2706_v45  ;;  %v1129_v42 = vsel %vm1123_vm3, %v1127_v39, %v1128_v40  ;;  %v2755_v39 = vld [vmem:[%s3537_s3 + $0xd8] sm:$0xff] }
  0x4c   : > { %838 = vmatpush.bf16.msrb.mxu0 %v2681_v50 }
  0x4d   : > { %856 = vmatpush.bf16.msrb.mxu1 %v2689_v51  ;;  %v2735_v51 = vld [vmem:[%s3537_s3 + $0x38] sm:$0xff] }
  0x4e   : > { %1051 = vmatpush.bf16.msrb.mxu2 %v2697_v56 }
  0x4f   : > { %1069 = vmatpush.bf16.msrb.mxu3 %v2705_v57  ;;  %v2733_v57 = vld [vmem:[%s3537_s3 + $0x28] sm:$0xff] }
  0x50   : > { %839 = vmatpush.bf16.msrb.mxu0 %v2680_v62 }
  0x51   : > { %857 = vmatpush.bf16.msrb.mxu1 %v2688_v63  ;;  %v2743_v63 = vld [vmem:[%s3537_s3 + $0x78] sm:$0xff] }
  0x52   : > { %1052 = vmatpush.bf16.msrb.mxu2 %v2696_v31  ;;  %v2729_v31 = vld [vmem:[%s3537_s3 + $0x8] sm:$0xff] }
  0x53   : > { %1070 = vmatpush.bf16.msrb.mxu3 %v2704_v9  ;;  %840 = vmatmul.bf16.vlgmr.msrb.gmra.mxu0 %v728_v15  ;;  %v2740_v9 = vld [vmem:[%s3537_s3 + $0x60] sm:$0xff] }
  0x54   : > { %1230 = vmatpush.bf16.msra.mxu0 %v2719_v2  ;;  %858 = vmatmul.bf16.vlgmr.msrb.gmra.mxu1 %v731_v16  ;;  %v2739_v16 = vld [vmem:[%s3537_s3 + $0x58] sm:$0xff] }
  0x55   : > { %1248 = vmatpush.bf16.msra.mxu1 %v2727_v3  ;;  %1053 = vmatmul.bf16.vlgmr.msrb.gmra.mxu2 %v927_v17  ;;  %v2749_v17 = vld [vmem:[%s3537_s3 + $0xa8] sm:$0xff] }
  0x56   : > { %1071 = vmatmul.bf16.vlgmr.msrb.gmra.mxu3 %v944_v18  ;;  %1414 = vmatpush.bf16.msra.mxu2 %v2743_v63  ;;  %v2758_v18 = vld [vmem:[%s3537_s3 + $0xf0] sm:$0xff] }
  0x57   : > { %1477 = vmatpush.bf16.msra.mxu3 %v2735_v51 }
  0x58   : > { %1231 = vmatpush.bf16.msra.mxu0 %v2718_v19  ;;  %v2738_v19 = vld [vmem:[%s3537_s3 + $0x50] sm:$0xff] }
  0x59   : > { %1249 = vmatpush.bf16.msra.mxu1 %v2726_v21 }
  0x5b   : > { %1478 = vmatpush.bf16.msra.mxu3 %v2734_v54 }
  0x5c   : > { %1232 = vmatpush.bf16.msra.mxu0 %v2717_v22 }
  0x5d   : > { %1250 = vmatpush.bf16.msra.mxu1 %v2725_v20  ;;  %v2748_v20 = vld [vmem:[%s3537_s3 + $0xa0] sm:$0xff] }
  0x5f   : > { %1479 = vmatpush.bf16.msra.mxu3 %v2733_v57 }
  0x60   : > { %1233 = vmatpush.bf16.msra.mxu0 %v2716_v23  ;;  %v2757_v23 = vld [vmem:[%s3537_s3 + $0xe8] sm:$0xff] }
  0x61   : > { %1251 = vmatpush.bf16.msra.mxu1 %v2724_v24 }
  0x63   : > { %845 = vmatmul.bf16.gmra.mxu0 %v727_v1  ;;  %1480 = vmatpush.bf16.msra.mxu3 %v2732_v60  ;;  %v2742_v1 = vld [vmem:[%s3537_s3 + $0x70] sm:$0xff] }
  0x64   : > { %1234 = vmatpush.bf16.msra.mxu0 %v2715_v25  ;;  %863 = vmatmul.bf16.gmra.mxu1 %v730_v5 }
  0x65   : > { %1252 = vmatpush.bf16.msra.mxu1 %v2723_v26  ;;  %1058 = vmatmul.bf16.gmra.mxu2 %v926_v7  ;;  %v2741_v7 = vld [vmem:[%s3537_s3 + $0x68] sm:$0xff] }
  0x66   : > { %1076 = vmatmul.bf16.gmra.mxu3 %v943_v11  ;;  %1415 = vmatpush.bf16.msra.mxu2 %v2742_v1  ;;  %v2744_v1 = vld [vmem:[%s3537_s3 + $0x80] sm:$0xff] }
  0x67   : > { %1481 = vmatpush.bf16.msra.mxu3 %v2731_v0 }
  0x68   : > { %1235 = vmatpush.bf16.msra.mxu0 %v2714_v27  ;;  %v2737_v27 = vld [vmem:[%s3537_s3 + $0x48] sm:$0xff] }
  0x69   : > { %1253 = vmatpush.bf16.msra.mxu1 %v2722_v28 }
  0x6a   : > { %1416 = vmatpush.bf16.msra.mxu2 %v2741_v7 }
  0x6b   : > { %1482 = vmatpush.bf16.msra.mxu3 %v2730_v4 }
  0x6c   : > { %1236 = vmatpush.bf16.msra.mxu0 %v2713_v29  ;;  %v2747_v29 = vld [vmem:[%s3537_s3 + $0x98] sm:$0xff] }
  0x6d   : > { %1254 = vmatpush.bf16.msra.mxu1 %v2721_v30  ;;  %v2756_v30 = vld [vmem:[%s3537_s3 + $0xe0] sm:$0xff] }
  0x6e   : > { %1417 = vmatpush.bf16.msra.mxu2 %v2740_v9 }
  0x6f   : > { %1483 = vmatpush.bf16.msra.mxu3 %v2729_v31 }
  0x70   : > { %1237 = vmatpush.bf16.msra.mxu0 %v2712_v33 }
  0x71   : > { %1255 = vmatpush.bf16.msra.mxu1 %v2720_v34  ;;  %v2736_v34 = vld [vmem:[%s3537_s3 + $0x40] sm:$0xff] }
  0x72   : > { %1418 = vmatpush.bf16.msra.mxu2 %v2739_v16  ;;  %v2763_v16 = vld [vmem:[%s3537_s3 + $0x118] sm:$0xff] }
  0x73   : > { %1238 = vmatmul.bf16.vlgmr.msra.gmra.mxu0 %v1126_v41  ;;  %1484 = vmatpush.bf16.msra.mxu3 %v2728_v35 }
  0x74   : > { %1256 = vmatmul.bf16.vlgmr.msra.gmra.mxu1 %v1129_v42  ;;  %1564 = vmatpush.bf16.msrb.mxu0 %v2751_v8 }
  0x75   : > { %1667 = vmatpush.bf16.msrb.mxu1 %v2759_v13 }
  0x76   : > { %1419 = vmatpush.bf16.msra.mxu2 %v2738_v19 }
  0x78   : > { %1565 = vmatpush.bf16.msrb.mxu0 %v2750_v12 }
  0x79   : > { %1668 = vmatpush.bf16.msrb.mxu1 %v2758_v18  ;;  %v2762_v18 = vld [vmem:[%s3537_s3 + $0x110] sm:$0xff] }
  0x7a   : > { %1420 = vmatpush.bf16.msra.mxu2 %v2737_v27  ;;  %v2761_v27 = vld [vmem:[%s3537_s3 + $0x108] sm:$0xff] }
  0x7c   : > { %1566 = vmatpush.bf16.msrb.mxu0 %v2749_v17 }
  0x7d   : > { %1669 = vmatpush.bf16.msrb.mxu1 %v2757_v23 }
  0x7e   : > { %1421 = vmatpush.bf16.msra.mxu2 %v2736_v34 }
  0x80   : > { %1567 = vmatpush.bf16.msrb.mxu0 %v2748_v20 }
  0x81   : > { %1670 = vmatpush.bf16.msrb.mxu1 %v2756_v30  ;;  %v2760_v30 = vld [vmem:[%s3537_s3 + $0x100] sm:$0xff] }
  0x82   : > { %1756 = vmatpush.bf16.msrb.mxu2 %v2767_v36 }
  0x83   : > { %1243 = vmatmul.bf16.gmra.mxu0 %v1125_v38  ;;  %v2746_v38 = vld [vmem:[%s3537_s3 + $0x90] sm:$0xff] }
  0x84   : > { %1261 = vmatmul.bf16.gmra.mxu1 %v1128_v40  ;;  %1568 = vmatpush.bf16.msrb.mxu0 %v2747_v29 }
  0x85   : > { %1671 = vmatpush.bf16.msrb.mxu1 %v2755_v39 }
  0x88   : > { %1569 = vmatpush.bf16.msrb.mxu0 %v2746_v38 }
  0xb0   : > { %v3283_v43 = vpop.f32.mrf.mxu0 }
  0xb1   : > { %v3285_v44 = vpop.f32.mrf.mxu1 }
  0xb2   : > { %v537_v24 = vadd.f32 %v3285_v44, %v3283_v43 }
  0xb8   : > { %v3287_v45 = vpop.f32.mrf.mxu2  ;;  %v3291_v37 = vpop.f32.mrf.mxu0 }
  0xb9   : > { %v3289_v32 = vpop.f32.mrf.mxu3  ;;  %v3293_v46 = vpop.f32.mrf.mxu1  ;;  %v660_v28 = vadd.f32 %v3287_v45, %v537_v24  ;;  %v2766_v45 = vld [vmem:[%s3537_s3 + $0x130] sm:$0xff] }
  0xba   : > { %v539_v42 = vadd.f32 %v3293_v46, %v3291_v37  ;;  %v2754_v37 = vld [vmem:[%s3537_s3 + $0xd0] sm:$0xff]  ;;  %1757 = vmatpush.bf16.msrb.mxu2 %v2766_v45 }
  0xbb   : > { %v678_v40 = vadd.f32 %v3289_v32, %v660_v28  ;;  %v2745_v32 = vld [vmem:[%s3537_s3 + $0x88] sm:$0xff]  ;;  %1672 = vmatpush.bf16.msrb.mxu1 %v2754_v37 }
  0xbc   : > { %1570 = vmatpush.bf16.msrb.mxu0 %v2745_v32 }
  0xc0   : > { %v3295_v47 = vpop.f32.mrf.mxu2  ;;  %v3299_v49 = vpop.f32.mrf.mxu0  ;;  %1571 = vmatpush.bf16.msrb.mxu0 %v2744_v1 }
  0xc1   : > { %v3297_v48 = vpop.f32.mrf.mxu3  ;;  %v3301_v50 = vpop.f32.mrf.mxu1 }
  0xc8   : > { %v3306_v52 = vpop.f32.mrf.mxu2  ;;  %v525_v55 = vpop.f32.mrf.mxu0 }
  0xc9   : > { %v3308_v53 = vpop.f32.mrf.mxu3  ;;  %v543_v56 = vpop.f32.mrf.mxu1 }
  0xca   : > { %v662_v56 = vadd.f32 %v3295_v47, %v539_v42  ;;  %v2765_v47 = vld [vmem:[%s3537_s3 + $0x128] sm:$0xff] }
  0xcb   : > { %1758 = vmatpush.bf16.msrb.mxu2 %v2765_v47 }
  0xd0   : > { %v666_v58 = vpop.f32.mrf.mxu2  ;;  %v841_v61 = vpop.f32.mrf.mxu0 }
  0xd1   : > { %v684_v59 = vpop.f32.mrf.mxu3  ;;  %v859_v62 = vpop.f32.mrf.mxu1  ;;  %v1278_v58 = vlaneseq }
  0xd2   : > { %v860_v33 = vadd.f32 %v859_v62, %v841_v61  ;;  %v2820_v61 = vld [vmem:[%s3536_s2] ss:$0 sm:$0xff]  ;;  %v680_v62 = vadd.f32 %v3297_v48, %v662_v56 }
  0xd3   : > { %v1279_v0 = vshrl.u32 %v1278_v58, 7  ;;  %v2764_v48 = vld [vmem:[%s3537_s3 + $0x120] sm:$0xff] }
  0xd4   : > { %v868_v51 = vadd.f32 %v860_v33, %v678_v40  ;;  %1759 = vmatpush.bf16.msrb.mxu2 %v2764_v48 }
  0xd5   : > { %v1282_v9 = vadd.s32 4294967294, %v1279_v0 }
  0xd7   : > { %vm1285_vm4 = vcmp.ge.s32.totalorder %v1282_v9, 0 }
  0xd8   : > { %v1054_v2 = vpop.f32.mrf.mxu2  ;;  %v3331_v5 = vpop.f32.mrf.mxu0  ;;  %1760 = vmatpush.bf16.msrb.mxu2 %v2763_v16  ;;  %vm2823_vm6 = vmpackc.low %vm2890_vm5, %vm1285_vm4  ;;  %v2642_v16 = vld [vmem:[%s3539_s5 + $0x10] sm:$0xff] }
  0xd9   : > { %v1072_v3 = vpop.f32.mrf.mxu3  ;;  %v3333_v6 = vpop.f32.mrf.mxu1 }
  0xda   : > { %v1073_v41 = vadd.f32 %v1072_v3, %v1054_v2  ;;  %v862_v59 = vadd.f32 %v3333_v6, %v3331_v5  ;;  %v2753_v2 = vld [vmem:[%s3537_s3 + $0xc8] sm:$0xff]  ;;  %v542_v3 = vadd.f32 %v3301_v50, %v3299_v49  ;;  %v2752_v50 = vld [vmem:[%s3537_s3 + $0xc0] sm:$0xff] }
  0xdb   : > { %1673 = vmatpush.bf16.msrb.mxu1 %v2753_v2 }
  0xdc   : > { %v1081_v46 = vadd.f32 %v1073_v41, %v868_v51  ;;  %v869_v4 = vadd.f32 %v862_v59, %v680_v62  ;;  %v665_v8 = vadd.f32 %v3306_v52, %v542_v3  ;;  %1761 = vmatpush.bf16.msrb.mxu2 %v2762_v18 }
  0xde   : > { %v683_v13 = vadd.f32 %v3308_v53, %v665_v8 }
  0xdf   : > { %1674 = vmatpush.bf16.msrb.mxu1 %v2752_v50  ;;  %v2647_v50 = vld [vmem:[%s3539_s5 + $0x38] sm:$0xff] }
  0xe0   : > { %v3347_v10 = vpop.f32.mrf.mxu2  ;;  %v3360_v14 = vpop.f32.mrf.mxu0  ;;  %1762 = vmatpush.bf16.msrb.mxu2 %v2761_v27  ;;  %1831 = vmatpush.bf16.msrb.mxu3 %v2647_v50 }
  0xe1   : > { %v3349_v11 = vpop.f32.mrf.mxu3  ;;  %v3362_v15 = vpop.f32.mrf.mxu1 }
  0xe2   : > { %v1075_v63 = vadd.f32 %v3349_v11, %v3347_v10  ;;  %v865_v11 = vadd.f32 %v3362_v15, %v3360_v14  ;;  %v1281_v14 = vadd.s32 16, %v1279_v0 }
  0xe4   : > { %v1082_v31 = vadd.f32 %v1075_v63, %v869_v4  ;;  %v870_v15 = vadd.f32 %v865_v11, %v683_v13  ;;  %v1284_v24 = vadd.s32 4294967294, %v1281_v14  ;;  %1763 = vmatpush.bf16.msrb.mxu2 %v2760_v30  ;;  %v2645_v13 = vld [vmem:[%s3539_s5 + $0x28] sm:$0xff]  ;;  %v2821_v30 = vld [vmem:[%s3538_s4] ss:$0 sm:$0xff] }
  0xe5   : > { %v2641_v14 = vld [vmem:[%s3539_s5 + $0x8] sm:$0xff] }
  0xe6   : > { %vm1290_vm7 = vcmp.lt.s32.totalorder %v1284_v24, 16 }
  0xe8   : > { %v3376_v21 = vpop.f32.mrf.mxu2  ;;  %v848_v25 = vpop.f32.mrf.mxu0 }
  0xe9   : > { %v3378_v22 = vpop.f32.mrf.mxu3  ;;  %v866_v26 = vpop.f32.mrf.mxu1 }
  0xea   : > { %v1078_v52 = vadd.f32 %v3378_v22, %v3376_v21 }
  0xec   : > { %v1083_v21 = vadd.f32 %v1078_v52, %v870_v15  ;;  %v2644_v52 = vld [vmem:[%s3539_s5 + $0x20] sm:$0xff] }
  0xed   : > { %v2640_v15 = vld [vmem:[%s3539_s5] sm:$0xff] }
  0xf0   : > { %v1061_v43 = vpop.f32.mrf.mxu2  ;;  %v1239_v54 = vpop.f32.mrf.mxu0 }
  0xf1   : > { %v1079_v44 = vpop.f32.mrf.mxu3  ;;  %v1257_v55 = vpop.f32.mrf.mxu1 }
  0xf2   : > { %v1258_v57 = vadd.f32 %v1257_v55, %v1239_v54 }
  0xf4   : > { %v1266_v60 = vadd.f32 %v1258_v57, %v1081_v46 }
  0xf6   : > { %v1272_v5 = vadd.f32 %v2820_v61, %v1266_v60 }
  0xf8   : > { %v1241_v6 = vpop.f32.mrf.mxu0  ;;  %v1275_v12 = vmax.f32 %v1272_v5, 0.0 }
  0xf9   : > { %v1259_v7 = vpop.f32.mrf.mxu1 }
  0xfa   : > { %v1260_v10 = vadd.f32 %v1259_v7, %v1241_v6  ;;  %v1300_v53 = vsel %vm1285_vm4, %v1275_v12, 0.0 }
  0xfc   : > { %v1267_v49 = vadd.f32 %v1260_v10, %v1082_v31 }
  0xfe   : > { %v1273_v35 = vadd.f32 %v2820_v61, %v1267_v49 }
 0x100   : > { %v1276_v17 = vmax.f32 %v1273_v35, 0.0  ;;  %v1244_v19 = vpop.f32.mrf.mxu0  ;;  %v2643_v35 = vld [vmem:[%s3539_s5 + $0x18] sm:$0xff] }
 0x101   : > { %v1262_v20 = vpop.f32.mrf.mxu1 }
 0x102   : > { %v2772_v22 = vpack.c.bf16 %v1276_v17, %v1300_v53  ;;  %v1263_v23 = vadd.f32 %v1262_v20, %v1244_v19  ;;  %v2824_v26 = vpack.c.bf16 %v1276_v17, %v1275_v12  ;;  %v2646_v12 = vld [vmem:[%s3539_s5 + $0x30] sm:$0xff] }
 0x103   : > { %1832 = vmatpush.bf16.msrb.mxu3 %v2646_v12 }
 0x104   : > { %2773 = vst [vmem:[#allocation2] sm:$0xff] %v2772_v22   ;;  %v1268_v25 = vadd.f32 %v1263_v23, %v1083_v21  ;;  %2825 = vmatmul.msk.bf16.vlgmr.msra.gmra.mxu3 %vm2823_vm6, %v2824_v26  ;;  %v2777_v41 = vunpack.c.h.b16 %v2772_v22  ;;  %v1356_v43 = vshll.u32 %v2772_v22, 16  ;;  %v1354_v37 = vshrl.u32 %v2772_v22, 16 }
 0x106   : > { %v1274_v28 = vadd.f32 %v2820_v61, %v1268_v25  ;;  %v1358_v57 = vrot.slane %v1356_v43, 1 }
 0x107   : > { %1833 = vmatpush.bf16.msrb.mxu3 %v2645_v13 }
 0x108   : > { %v1277_v29 = vmax.f32 %v1274_v28, 0.0  ;;  %v1246_v33 = vpop.f32.mrf.mxu0  ;;  %v1359_v0 = vor.u32 %v1358_v57, %v1354_v37 }
 0x109   : > { %v1264_v34 = vpop.f32.mrf.mxu1 }
 0x10a   : > { %v1302_v36 = vsel %vm1290_vm7, %v1277_v29, 0.0 }
 0x10b   : > { %v1305_v38 = vpack.c.bf16 %v1302_v36, %v1302_v36  ;;  %v1491_v39 = vld [vmem:[#allocation2] sm:$0xe]  ;;  %1834 = vmatpush.bf16.msrb.mxu3 %v2644_v52 }
 0x10c   : > { %v1510_v40 = vunpack.c.l.b16 %v1491_v39  ;;  %v1683_v8 = vld [vmem:[#allocation2] sm:$0xc] }
 0x10d   : > { %1308 = vst [vmem:[#allocation2 + $0x8] sm:$0x3] %v1305_v38  ;;  %v1702_v31 = vunpack.c.l.b16 %v1683_v8 }
 0x10e   : > { %v1511_v42 = vpack.c.b16 %v2777_v41, %v1510_v40 }
 0x10f   : > { %v1703_v9 = vpack.c.b16 %v2777_v41, %v1702_v31  ;;  %1835 = vmatpush.bf16.msrb.mxu3 %v2643_v35 }
 0x110   : > { %v1602_v51 = vshrl.u32 %v1511_v42, 16  ;;  %v1605_v54 = vshll.u32 %v1511_v42, 16  ;;  %v1512_v46 = vrot.slane %v1511_v42, 1 }
 0x111   : > { %v1704_v11 = vrot.slane %v1703_v9, 2 }
 0x112   : > { %v1604_v59 = vrot.slane %v1602_v51, 1  ;;  %v1607_v47 = vrot.slane %v1605_v54, 2 }
 0x113   : > { %1836 = vmatpush.bf16.msrb.mxu3 %v2642_v16 }
 0x114   : > { %v1327_v44 = vld [vmem:[#allocation2 + $0x8] sm:$0x1]  ;;  %v1608_v5 = vor.u32 %v1607_v47, %v1604_v59 }
 0x115   : > { %v1580_v45 = vld [vmem:[#allocation2 + $0x8] sm:$0x3]  ;;  %v1350_v55 = vunpack.c.l.b16 %v1327_v44  ;;  %v2822_v44 = vld [vmem:[%s3540_s6] ss:$0 sm:$0xff] }
 0x116   : > { %v1599_v56 = vunpack.c.l.b16 %v1580_v45 }
 0x117   : > { %v1352_v58 = vpack.c.b16 %v1350_v55, %v1350_v55  ;;  %1837 = vmatpush.bf16.msrb.mxu3 %v2641_v14 }
 0x118   : > { %v1600_v32 = vpack.c.b16 %v1599_v56, %v1599_v56 }
 0x119   : > { %v1513_v60 = vrot.slane %v1352_v58, 1  ;;  %v1361_v61 = vshll.u32 %v1352_v58, 16 }
 0x11a   : > { %v1610_v62 = vshrl.u32 %v1600_v32, 16  ;;  %v1613_v63 = vshll.u32 %v1600_v32, 16  ;;  %v1705_v10 = vrot.slane %v1600_v32, 2 }
 0x11b   : > { %v1514_v1 = vsel %vm725_vm1, %v1512_v46, %v1513_v60  ;;  %v1363_v2 = vrot.slane %v1361_v61, 1  ;;  %1838 = vmatpush.bf16.msrb.mxu3 %v2640_v15 }
 0x11c   : > { %v1612_v3 = vrot.slane %v1610_v62, 1  ;;  %v1615_v4 = vrot.slane %v1613_v63, 2  ;;  %1572 = vmatmul.bf16.vlgmr.msrb.gmra.mxu0 %v1514_v1  ;;  %v1706_v49 = vsel %vm1123_vm3, %v1704_v11, %v1705_v10 }
 0x11d   : > { %v1364_v48 = vsel %vm378_vm0, %v1359_v0, %v1363_v2 }
 0x11e   : > { %v1616_v6 = vor.u32 %v1615_v4, %v1612_v3  ;;  %1422 = vmatmul.bf16.vlgmr.msra.gmra.mxu2 %v1364_v48 }
 0x120   : > { %v1617_v7 = vsel %vm910_vm2, %v1608_v5, %v1616_v6 }
 0x121   : > { %1675 = vmatmul.bf16.vlgmr.msrb.gmra.mxu1 %v1617_v7 }
 0x12e   : > { %1764 = vmatmul.bf16.vlgmr.msrb.gmra.mxu2 %v1706_v49 }
 0x187   : > { %v1486_v18 = vpop.f32.mrf.mxu3 }
 0x18f   : > { %v1488_v22 = vpop.f32.mrf.mxu3 }
 0x199   : > { %v1573_v53 = vpop.f32.mrf.mxu0 }
 0x19e   : > { %v1676_v21 = vpop.f32.mrf.mxu1 }
 0x1a1   : > { %v1423_v17 = vpop.f32.mrf.mxu2  ;;  %v1575_v26 = vpop.f32.mrf.mxu0 }
 0x1a2   : > { %v1487_v20 = vadd.f32 %v1486_v18, %v1423_v17 }
 0x1a4   : > { %v1578_v23 = vadd.f32 %v1573_v53, %v1487_v20 }
 0x1a6   : > { %v1681_v28 = vadd.f32 %v1676_v21, %v1578_v23  ;;  %v1678_v33 = vpop.f32.mrf.mxu1 }
 0x1a9   : > { %v1425_v19 = vpop.f32.mrf.mxu2 }
 0x1aa   : > { %v1489_v24 = vadd.f32 %v1488_v22, %v1425_v19 }
 0x1ac   : > { %v1579_v27 = vadd.f32 %v1575_v26, %v1489_v24 }
 0x1ae   : > { %v1682_v34 = vadd.f32 %v1678_v33, %v1579_v27 }
 0x1b1   : > { %v1765_v25 = vpop.f32.mrf.mxu2 }
 0x1b2   : > { %v1770_v29 = vadd.f32 %v1765_v25, %v1681_v28 }
 0x1b4   : > { %v1775_v38 = vadd.f32 %v2821_v30, %v1770_v29 }
 0x1b6   : > { %v1777_v41 = vmax.f32 %v1775_v38, 0.0 }
 0x1b9   : > { %v1767_v36 = vpop.f32.mrf.mxu2 }
 0x1ba   : > { %v1771_v39 = vadd.f32 %v1767_v36, %v1682_v34 }
 0x1bc   : > { %v1776_v40 = vadd.f32 %v2821_v30, %v1771_v39 }
 0x1be   : > { %v1778_v42 = vmax.f32 %v1776_v40, 0.0 }
 0x1c0   : > { %v1779_v43 = vpack.c.bf16 %v1778_v42, %v1777_v41 }
 0x1c2   : > { %1839 = vmatmul.bf16.vlgmr.msrb.gmra.mxu3 %v1779_v43 }
 0x245   : > { %v1840_v45 = vpop.f32.mrf.mxu3 }
 0x246   : > { %v1841_v51 = vadd.f32 %v2822_v44, %v1840_v45 }
 0x248   : > { %1845 = vst [vmem:[%s271_s29] sm:$0xff] %v1841_v51 }
 0x24d   : > { %v1842_v54 = vpop.f32.mrf.mxu3 }
 0x24e   : > { %v1843_v55 = vadd.f32 %v2822_v44, %v1842_v54 }
 0x250   : > { %1846 = vst [vmem:[%s271_s29 + $0x8] sm:$0xff] %v1843_v55 }
 0x251   : > { %2853 = shalt.err (!%p2850_p3)
}
 0x252   : > { %s2891_s20 = smov 128   ;;  %s2892_s29 = smov 8  }
 0x253   : > { %2779 = dma.vmem_to_hbm [thread:$0]  (%p2971_p5), %s1861_s15, 256, %s1863_s17, %s1848_s18, %s2891_s20, %s2891_s20, %s2892_s29  }
 0x254 PF: > { %p2785_p4 = scmp.ge.s32.totalorder %s2888_s27, 2  ;;  %s1877_s8 = sand.u32 1, %s2876_s24  }
 0x255   : > { %s1878_s9 = scalar_lea.sflag [#allocation4], %s1877_s8 }
 0x256   : > { %p2782_p7 = pnand %p2785_p4, %p2975_p6 }
 0x258   : > { %p2783_p8 = pneg %p2782_p7 }
 0x25a   : > { %2871 = dma.done.wait (%p2783_p8), %s1878_s9, 256  }
 0x25b   : > { %2873 = vsyncadd (%p2783_p8), %s1878_s9, 4294967040  ;;  %p17_p9 = scmp.ge.s32.totalorder %s2958_s30, 4   ;;  %s3544_s24 = smov %s2880_s25 }
 0x25c   : > { %s3545_s25 = smov %s2884_s26  ;;  %s3546_s26 = smov %s2969_s10 }
 0x25d   : > { %s3547_s27 = smov %s2958_s30  ;;  %19 = sbr.rel (!%p17_p9) target bundleno = 3 (0x3), region = 91 }
 0x262   :  { %1884 = vsyncpa [#allocation4], 1 }
 0x263   :  { %1886 = vsyncpa [#allocation4 + $0x1], 1 }

// kernel: generator_cnn_forward.8
= control target key start
LH: loop header
LB: loop body
LE: loop exit
PB: predicated region body
PF: predicated region fallthrough
CT: control target
= control target key end

     0   :  { %s5957_s18 = smov 0   ;;  %s8752_s0 = inlined_call_operand.vmem [shape: bf16[2,24,256], index: 0, kind: input, shape index: {}]   ;;  %s8753_s1 = inlined_call_operand.vmem [shape: bf16[3,256,512], index: 1, kind: input, shape index: {}]   ;;  %s8754_s2 = inlined_call_operand.vmem [shape: f32[1,512], index: 2, kind: input, shape index: {}]   ;;  %s8755_s3 = inlined_call_operand.vmem [shape: bf16[3,512,256], index: 3, kind: input, shape index: {}]   ;;  %s8756_s4 = inlined_call_operand.vmem [shape: f32[1,256], index: 4, kind: input, shape index: {}]   ;;  %s8757_s5 = inlined_call_operand.vmem [shape: bf16[2,24,256], index: 5, kind: output, shape index: {}]  }
   0x1 LB: > { %s3723_s19 = sadd.s32 4294967295, %s5924_s18   ;;  %p3727_p0 = scmp.ge.s32.totalorder %s5924_s18, 1  ;;  %s5924_s18 = sphi %s5957_s18, %s15_s18  }
   0x2   : > { %p187_p1 = scmp.lt.s32.totalorder %s5924_s18, 3 }
   0x4   : > { %p188_p2 = pnand %p3727_p0, %p187_p1 }
   0x5   : > { %p215_p3 = scmp.lt.s32.totalorder (!%p188_p2), %s3723_s19, 1 }
   0x6   : > { %191 = sbr.rel (%p188_p2) target bundleno = 676 (0x2a4), region = 40 }
   0xb   : > { %v3908_v0 = vld [vmem:[%s8753_s1 + $0x2e0] sm:$0xf]  ;;  %v5618_v1 = vld [vmem:[%s8753_s1 + $0x2ec] sm:$0xf0]  ;;  %v5616_v5 = vld [vmem:[%s8753_s1 + $0x2e4] sm:$0xf] }
   0xc   : > { %v4036_v2 = vld [vmem:[%s8753_s1 + $0x3e0] sm:$0xf]  ;;  %v3909_v3 = vor.u32 %v5618_v1, %v3908_v0  ;;  %v5650_v4 = vld [vmem:[%s8753_s1 + $0x3ec] sm:$0xf0]  ;;  %v3910_v6 = vld [vmem:[%s8753_s1 + $0x2f0] sm:$0xf0] }
   0xd   : > { %v4037_v7 = vor.u32 %v5650_v4, %v4036_v2  ;;  %v3913_v8 = vor.u32 %v5616_v5, %v3910_v6  ;;  %v5648_v9 = vld [vmem:[%s8753_s1 + $0x3e4] sm:$0xf]  ;;  %v4038_v10 = vld [vmem:[%s8753_s1 + $0x3f0] sm:$0xf0]  ;;  %v3892_v11 = vld [vmem:[%s8753_s1 + $0x2c0] sm:$0xf] }
   0xe   : > { %735 = vmatpush.bf16.msra.mxu0 %v3909_v3  ;;  %v4041_v12 = vor.u32 %v5648_v9, %v4038_v10  ;;  %v5614_v13 = vld [vmem:[%s8753_s1 + $0x2cc] sm:$0xf0]  ;;  %v4020_v14 = vld [vmem:[%s8753_s1 + $0x3c0] sm:$0xf]  ;;  %v5612_v18 = vld [vmem:[%s8753_s1 + $0x2c4] sm:$0xf] }
   0xf   : > { %v5646_v15 = vld [vmem:[%s8753_s1 + $0x3cc] sm:$0xf0]  ;;  %753 = vmatpush.bf16.msra.mxu1 %v4037_v7  ;;  %771 = vmatpush.bf16.msra.mxu2 %v3913_v8  ;;  %v3893_v16 = vor.u32 %v5614_v13, %v3892_v11  ;;  %v3894_v19 = vld [vmem:[%s8753_s1 + $0x2d0] sm:$0xf0]  ;;  %v5644_v20 = vld [vmem:[%s8753_s1 + $0x3c4] sm:$0xf] }
  0x10   : > { %v4021_v17 = vor.u32 %v5646_v15, %v4020_v14  ;;  %789 = vmatpush.bf16.msra.mxu3 %v4041_v12  ;;  %v3897_v21 = vor.u32 %v5612_v18, %v3894_v19  ;;  %v4022_v22 = vld [vmem:[%s8753_s1 + $0x3d0] sm:$0xf0]  ;;  %v3876_v23 = vld [vmem:[%s8753_s1 + $0x2a0] sm:$0xf]  ;;  %v5610_v24 = vld [vmem:[%s8753_s1 + $0x2ac] sm:$0xf0] }
  0x11   : > { %v4025_v25 = vor.u32 %v5644_v20, %v4022_v22  ;;  %v4004_v26 = vld [vmem:[%s8753_s1 + $0x3a0] sm:$0xf]  ;;  %v5642_v27 = vld [vmem:[%s8753_s1 + $0x3ac] sm:$0xf0]  ;;  %v5608_v28 = vld [vmem:[%s8753_s1 + $0x2a4] sm:$0xf]  ;;  %v3877_v29 = vor.u32 %v5610_v24, %v3876_v23 }
  0x12   : > { %736 = vmatpush.bf16.msra.mxu0 %v3893_v16  ;;  %v3878_v30 = vld [vmem:[%s8753_s1 + $0x2b0] sm:$0xf0]  ;;  %v5640_v31 = vld [vmem:[%s8753_s1 + $0x3a4] sm:$0xf]  ;;  %v4005_v33 = vor.u32 %v5642_v27, %v4004_v26  ;;  %v3860_v35 = vld [vmem:[%s8753_s1 + $0x280] sm:$0xf] }
  0x13   : > { %v4006_v32 = vld [vmem:[%s8753_s1 + $0x3b0] sm:$0xf0]  ;;  %754 = vmatpush.bf16.msra.mxu1 %v4021_v17  ;;  %772 = vmatpush.bf16.msra.mxu2 %v3897_v21  ;;  %v3881_v34 = vor.u32 %v5608_v28, %v3878_v30  ;;  %v5606_v36 = vld [vmem:[%s8753_s1 + $0x28c] sm:$0xf0]  ;;  %v3988_v37 = vld [vmem:[%s8753_s1 + $0x380] sm:$0xf] }
  0x14   : > { %790 = vmatpush.bf16.msra.mxu3 %v4025_v25  ;;  %v4009_v38 = vor.u32 %v5640_v31, %v4006_v32  ;;  %v5638_v39 = vld [vmem:[%s8753_s1 + $0x38c] sm:$0xf0]  ;;  %v5604_v40 = vld [vmem:[%s8753_s1 + $0x284] sm:$0xf]  ;;  %v3862_v41 = vld [vmem:[%s8753_s1 + $0x290] sm:$0xf0]  ;;  %v3861_v44 = vor.u32 %v5606_v36, %v3860_v35 }
  0x15   : > { %v5636_v42 = vld [vmem:[%s8753_s1 + $0x384] sm:$0xf]  ;;  %v3990_v43 = vld [vmem:[%s8753_s1 + $0x390] sm:$0xf0]  ;;  %v3989_v45 = vor.u32 %v5638_v39, %v3988_v37  ;;  %v3865_v46 = vor.u32 %v5604_v40, %v3862_v41  ;;  %v3844_v47 = vld [vmem:[%s8753_s1 + $0x260] sm:$0xf] }
  0x16   : > { %737 = vmatpush.bf16.msra.mxu0 %v3877_v29  ;;  %v5602_v48 = vld [vmem:[%s8753_s1 + $0x26c] sm:$0xf0]  ;;  %v3972_v49 = vld [vmem:[%s8753_s1 + $0x360] sm:$0xf]  ;;  %v3993_v50 = vor.u32 %v5636_v42, %v3990_v43  ;;  %v5600_v52 = vld [vmem:[%s8753_s1 + $0x264] sm:$0xf] }
  0x17   : > { %755 = vmatpush.bf16.msra.mxu1 %v4005_v33  ;;  %773 = vmatpush.bf16.msra.mxu2 %v3881_v34  ;;  %v5634_v51 = vld [vmem:[%s8753_s1 + $0x36c] sm:$0xf0]  ;;  %v3846_v53 = vld [vmem:[%s8753_s1 + $0x270] sm:$0xf0]  ;;  %v5632_v54 = vld [vmem:[%s8753_s1 + $0x364] sm:$0xf]  ;;  %v3845_v56 = vor.u32 %v5602_v48, %v3844_v47 }
  0x18   : > { %791 = vmatpush.bf16.msra.mxu3 %v4009_v38  ;;  %v3974_v55 = vld [vmem:[%s8753_s1 + $0x370] sm:$0xf0]  ;;  %v3973_v57 = vor.u32 %v5634_v51, %v3972_v49  ;;  %v3849_v58 = vor.u32 %v5600_v52, %v3846_v53  ;;  %v3828_v59 = vld [vmem:[%s8753_s1 + $0x240] sm:$0xf]  ;;  %v5598_v60 = vld [vmem:[%s8753_s1 + $0x24c] sm:$0xf0] }
  0x19   : > { %v3956_v61 = vld [vmem:[%s8753_s1 + $0x340] sm:$0xf]  ;;  %v3977_v62 = vor.u32 %v5632_v54, %v3974_v55  ;;  %v5630_v63 = vld [vmem:[%s8753_s1 + $0x34c] sm:$0xf0]  ;;  %v5596_v0 = vld [vmem:[%s8753_s1 + $0x244] sm:$0xf]  ;;  %v3829_v4 = vor.u32 %v5598_v60, %v3828_v59 }
  0x1a   : > { %738 = vmatpush.bf16.msra.mxu0 %v3861_v44  ;;  %v3830_v1 = vld [vmem:[%s8753_s1 + $0x250] sm:$0xf0]  ;;  %v5628_v2 = vld [vmem:[%s8753_s1 + $0x344] sm:$0xf]  ;;  %v3812_v5 = vld [vmem:[%s8753_s1 + $0x220] sm:$0xf]  ;;  %v3957_v8 = vor.u32 %v5630_v63, %v3956_v61 }
  0x1b   : > { %756 = vmatpush.bf16.msra.mxu1 %v3989_v45  ;;  %774 = vmatpush.bf16.msra.mxu2 %v3865_v46  ;;  %v3958_v3 = vld [vmem:[%s8753_s1 + $0x350] sm:$0xf0]  ;;  %v5594_v6 = vld [vmem:[%s8753_s1 + $0x22c] sm:$0xf0]  ;;  %v3940_v7 = vld [vmem:[%s8753_s1 + $0x320] sm:$0xf]  ;;  %v3833_v9 = vor.u32 %v5596_v0, %v3830_v1 }
  0x1c   : > { %792 = vmatpush.bf16.msra.mxu3 %v3993_v50  ;;  %v5626_v10 = vld [vmem:[%s8753_s1 + $0x32c] sm:$0xf0]  ;;  %v5592_v11 = vld [vmem:[%s8753_s1 + $0x224] sm:$0xf]  ;;  %v3814_v12 = vld [vmem:[%s8753_s1 + $0x230] sm:$0xf0]  ;;  %v3961_v13 = vor.u32 %v5628_v2, %v3958_v3  ;;  %v3813_v24 = vor.u32 %v5594_v6, %v3812_v5 }
  0x1d   : > { %v5624_v14 = vld [vmem:[%s8753_s1 + $0x324] sm:$0xf]  ;;  %v3942_v15 = vld [vmem:[%s8753_s1 + $0x330] sm:$0xf0]  ;;  %v3796_v16 = vld [vmem:[%s8753_s1 + $0x200] sm:$0xf]  ;;  %v3941_v28 = vor.u32 %v5626_v10, %v3940_v7  ;;  %v3817_v29 = vor.u32 %v5592_v11, %v3814_v12 }
  0x1e   : > { %739 = vmatpush.bf16.msra.mxu0 %v3845_v56  ;;  %v5590_v17 = vld [vmem:[%s8753_s1 + $0x20c] sm:$0xf0]  ;;  %v3924_v18 = vld [vmem:[%s8753_s1 + $0x300] sm:$0xf]  ;;  %v5588_v20 = vld [vmem:[%s8753_s1 + $0x204] sm:$0xf]  ;;  %v3945_v33 = vor.u32 %v5624_v14, %v3942_v15 }
  0x1f   : > { %757 = vmatpush.bf16.msra.mxu1 %v3973_v57  ;;  %775 = vmatpush.bf16.msra.mxu2 %v3849_v58  ;;  %v5622_v19 = vld [vmem:[%s8753_s1 + $0x30c] sm:$0xf0]  ;;  %v3798_v21 = vld [vmem:[%s8753_s1 + $0x210] sm:$0xf0]  ;;  %v6156_v22 = vld [vmem:[%s8753_s1 + $0x304] sm:$0xf]  ;;  %v3797_v39 = vor.u32 %v5590_v17, %v3796_v16 }
  0x20   : > { %793 = vmatpush.bf16.msra.mxu3 %v3977_v62  ;;  %v6161_v23 = vld [vmem:[%s8753_s1 + $0x310] sm:$0xf0]  ;;  %s8759_s19 = smov (!%p215_p3, %s3723_s19), 1  ;;  %v6170_v25 = vld [vmem:[%s8753_s1 + $0x2e8] sm:$0xf]  ;;  %v3925_v40 = vor.u32 %v5622_v19, %v3924_v18  ;;  %v3801_v41 = vor.u32 %v5588_v20, %v3798_v21  ;;  %vm884_vm1 = vcmask 1046528  }
  0x21   : > { %v6175_v26 = vld [vmem:[%s8753_s1 + $0x2f4] sm:$0xf0]  ;;  %v6180_v27 = vld [vmem:[%s8753_s1 + $0x3e8] sm:$0xf]  ;;  %v6190_v31 = vld [vmem:[%s8753_s1 + $0x2ec] sm:$0xf]  ;;  %v3929_v42 = vor.u32 %v6156_v22, %v6161_v23 }
  0x22   : > { %740 = vmatpush.bf16.msra.mxu0 %v3829_v4  ;;  %v6185_v30 = vld [vmem:[%s8753_s1 + $0x3f4] sm:$0xf0]  ;;  %v6195_v32 = vld [vmem:[%s8753_s1 + $0x2f8] sm:$0xf0]  ;;  %s5908_s22 = smul.u32 24, %s8759_s19  ;;  %v3917_v49 = vor.u32 %v6175_v26, %v6170_v25  ;;  %vm1430_vm2 = vcmask 1045504  }
  0x23   : > { %758 = vmatpush.bf16.msra.mxu1 %v3957_v8  ;;  %776 = vmatpush.bf16.msra.mxu2 %v3833_v9  ;;  %v6201_v34 = vld [vmem:[%s8753_s1 + $0x3ec] sm:$0xf]  ;;  %v6206_v35 = vld [vmem:[%s8753_s1 + $0x3f8] sm:$0xf0]  ;;  %v6211_v36 = vld [vmem:[%s8753_s1 + $0x2c8] sm:$0xf]  ;;  %v4045_v50 = vor.u32 %v6185_v30, %v6180_v27  ;;  %v3921_v51 = vor.u32 %v6190_v31, %v6195_v32 }
  0x24   : > { %794 = vmatpush.bf16.msra.mxu3 %v3961_v13  ;;  %v6216_v37 = vld [vmem:[%s8753_s1 + $0x2d4] sm:$0xf0]  ;;  %v6221_v38 = vld [vmem:[%s8753_s1 + $0x3c8] sm:$0xf]  ;;  %s6230_s10 = scalar_lea.vmem %s8752_s0, %s5908_s22  ;;  %v6240_v44 = vld [vmem:[%s8753_s1 + $0x2cc] sm:$0xf]  ;;  %v4049_v60 = vor.u32 %v6201_v34, %v6206_v35  ;;  %s8724_s15 = scalar_lea.vmem %s8757_s5, %s5908_s22 }
  0x25   : > { %v6235_v43 = vld [vmem:[%s8753_s1 + $0x3d4] sm:$0xf0]  ;;  %v6245_v45 = vld [vmem:[%s8753_s1 + $0x2d8] sm:$0xf0]  ;;  %v230_v46 = vld [vmem:[%s6230_s10] sm:$0xee]  ;;  %v3901_v61 = vor.u32 %v6216_v37, %v6211_v36 }
  0x26   : > { %741 = vmatpush.bf16.msra.mxu0 %v3813_v24  ;;  %v6249_v47 = vld [vmem:[%s6230_s10 + $0x8] sm:$0xff]  ;;  %v297_v48 = vld [vmem:[%s6230_s10 + $0x10] sm:$0x77]  ;;  %v366_v52 = vunpack.c.l.b16 %v230_v46  ;;  %v367_v55 = vunpack.c.h.b16 %v230_v46  ;;  %v4030_v57 = vld [vmem:[%s8753_s1 + $0x3d8] sm:$0xf0]  ;;  %v4029_v0 = vor.u32 %v6235_v43, %v6221_v38  ;;  %v3905_v1 = vor.u32 %v6240_v44, %v6245_v45 }
  0x27   : > { %759 = vmatpush.bf16.msra.mxu1 %v3941_v28  ;;  %777 = vmatpush.bf16.msra.mxu2 %v3817_v29  ;;  %v368_v53 = vunpack.c.l.b16 %v6249_v47  ;;  %v370_v54 = vunpack.c.l.b16 %v297_v48  ;;  %v5645_v56 = vld [vmem:[%s8753_s1 + $0x3cc] sm:$0xf]  ;;  %v369_v58 = vunpack.c.h.b16 %v6249_v47  ;;  %v371_v59 = vunpack.c.h.b16 %v297_v48  ;;  %v3884_v5 = vld [vmem:[%s8753_s1 + $0x2a8] sm:$0xf]  ;;  %v5611_v6 = vld [vmem:[%s8753_s1 + $0x2b4] sm:$0xf0] }
  0x28   : > { %795 = vmatpush.bf16.msra.mxu3 %v3945_v33  ;;  %vm376_vm0 = vsmask.f32 6400  ;;  %v4033_v4 = vor.u32 %v5645_v56, %v4030_v57  ;;  %v4012_v11 = vld [vmem:[%s8753_s1 + $0x3a8] sm:$0xf]  ;;  %v5643_v12 = vld [vmem:[%s8753_s1 + $0x3b4] sm:$0xf0]  ;;  %v3885_v31 = vor.u32 %v5611_v6, %v3884_v5 }
  0x29   : > { %v6272_v62 = vpack.c.b16 %v368_v53, %v366_v52  ;;  %v6274_v63 = vpack.c.b16 %v370_v54, %v370_v54  ;;  %v6282_v2 = vpack.c.b16 %v369_v58, %v367_v55  ;;  %v6284_v3 = vpack.c.b16 %v371_v59, %v371_v59  ;;  %v5609_v17 = vld [vmem:[%s8753_s1 + $0x2ac] sm:$0xf]  ;;  %v3886_v18 = vld [vmem:[%s8753_s1 + $0x2b8] sm:$0xf0]  ;;  %v3868_v35 = vld [vmem:[%s8753_s1 + $0x288] sm:$0xf] }
  0x2a   : > { %742 = vmatpush.bf16.msra.mxu0 %v3797_v39  ;;  %v5641_v23 = vld [vmem:[%s8753_s1 + $0x3ac] sm:$0xf]  ;;  %v4014_v28 = vld [vmem:[%s8753_s1 + $0x3b8] sm:$0xf0]  ;;  %v4013_v34 = vor.u32 %v5643_v12, %v4012_v11  ;;  %v5607_v36 = vld [vmem:[%s8753_s1 + $0x294] sm:$0xf0]  ;;  %v3889_v38 = vor.u32 %v5609_v17, %v3886_v18 }
  0x2b   : > { %760 = vmatpush.bf16.msra.mxu1 %v3925_v40  ;;  %778 = vmatpush.bf16.msra.mxu2 %v3801_v41  ;;  %v378_v7 = vshrl.u32 %v6272_v62, 16  ;;  %v381_v8 = vshll.u32 %v6272_v62, 16  ;;  %v386_v9 = vshrl.u32 %v6274_v63, 16  ;;  %v389_v10 = vshll.u32 %v6274_v63, 16  ;;  %v3996_v40 = vld [vmem:[%s8753_s1 + $0x388] sm:$0xf] }
  0x2c   : > { %796 = vmatpush.bf16.msra.mxu3 %v3929_v42  ;;  %v395_v13 = vshrl.u32 %v6282_v2, 16  ;;  %v398_v14 = vshll.u32 %v6282_v2, 16  ;;  %v403_v15 = vshrl.u32 %v6284_v3, 16  ;;  %v406_v16 = vshll.u32 %v6284_v3, 16  ;;  %v5639_v41 = vld [vmem:[%s8753_s1 + $0x394] sm:$0xf0] }
  0x2d   : > { %v380_v19 = vrot.slane %v378_v7, 1  ;;  %v383_v20 = vrot.slane %v381_v8, 2  ;;  %v388_v21 = vrot.slane %v386_v9, 1  ;;  %v391_v22 = vrot.slane %v389_v10, 2  ;;  %v5605_v42 = vld [vmem:[%s8753_s1 + $0x28c] sm:$0xf] }
  0x2e   : > { %807 = vmatpush.bf16.msrb.mxu0 %v3917_v49  ;;  %v397_v24 = vrot.slane %v395_v13, 1  ;;  %v400_v25 = vrot.slane %v398_v14, 2  ;;  %v405_v26 = vrot.slane %v403_v15, 1  ;;  %v408_v27 = vrot.slane %v406_v16, 2  ;;  %v3870_v44 = vld [vmem:[%s8753_s1 + $0x298] sm:$0xf0] }
  0x2f   : > { %825 = vmatpush.bf16.msrb.mxu1 %v4045_v50  ;;  %843 = vmatpush.bf16.msrb.mxu2 %v3921_v51  ;;  %v384_v29 = vor.u32 %v383_v20, %v380_v19  ;;  %v6318_v30 = vor.u32 %v391_v22, %v388_v21  ;;  %v4017_v39 = vor.u32 %v5641_v23, %v4014_v28  ;;  %v5637_v45 = vld [vmem:[%s8753_s1 + $0x38c] sm:$0xf]  ;;  %v3998_v46 = vld [vmem:[%s8753_s1 + $0x398] sm:$0xf0]  ;;  %v3852_v50 = vld [vmem:[%s8753_s1 + $0x268] sm:$0xf] }
  0x30   : > { %861 = vmatpush.bf16.msrb.mxu3 %v4049_v60  ;;  %v401_v32 = vor.u32 %v400_v25, %v397_v24  ;;  %v6320_v33 = vor.u32 %v408_v27, %v405_v26  ;;  %v3869_v48 = vor.u32 %v5607_v36, %v3868_v35  ;;  %v3997_v49 = vor.u32 %v5639_v41, %v3996_v40  ;;  %v5603_v51 = vld [vmem:[%s8753_s1 + $0x274] sm:$0xf0]  ;;  %v3980_v55 = vld [vmem:[%s8753_s1 + $0x368] sm:$0xf]  ;;  %v5601_v57 = vld [vmem:[%s8753_s1 + $0x26c] sm:$0xf] }
  0x31   : > { %v6330_v37 = vsel %vm376_vm0, %v384_v29, %v6318_v30  ;;  %v3873_v52 = vor.u32 %v5605_v42, %v3870_v44  ;;  %v4001_v54 = vor.u32 %v5637_v45, %v3998_v46  ;;  %v5635_v56 = vld [vmem:[%s8753_s1 + $0x374] sm:$0xf0]  ;;  %v3854_v59 = vld [vmem:[%s8753_s1 + $0x278] sm:$0xf0]  ;;  %v5633_v60 = vld [vmem:[%s8753_s1 + $0x36c] sm:$0xf] }
  0x32   : > { %808 = vmatpush.bf16.msrb.mxu0 %v3901_v61  ;;  %v6344_v43 = vsel %vm376_vm0, %v401_v32, %v6320_v33  ;;  %779 = vmatmul.bf16.vlgmr.msra.gmra.mxu2 %v6330_v37  ;;  %v3982_v61 = vld [vmem:[%s8753_s1 + $0x378] sm:$0xf0]  ;;  %v5599_v5 = vld [vmem:[%s8753_s1 + $0x254] sm:$0xf0]  ;;  %v3857_v6 = vor.u32 %v5601_v57, %v3854_v59  ;;  %v3964_v8 = vld [vmem:[%s8753_s1 + $0x348] sm:$0xf] }
  0x33   : > { %826 = vmatpush.bf16.msrb.mxu1 %v4029_v0  ;;  %844 = vmatpush.bf16.msrb.mxu2 %v3905_v1  ;;  %v3853_v0 = vor.u32 %v5603_v51, %v3852_v50  ;;  %v3981_v1 = vor.u32 %v5635_v56, %v3980_v55  ;;  %v3985_v7 = vor.u32 %v5633_v60, %v3982_v61  ;;  %v5631_v9 = vld [vmem:[%s8753_s1 + $0x354] sm:$0xf0]  ;;  %v5597_v10 = vld [vmem:[%s8753_s1 + $0x24c] sm:$0xf]  ;;  %v3838_v11 = vld [vmem:[%s8753_s1 + $0x258] sm:$0xf0] }
  0x34   : > { %862 = vmatpush.bf16.msrb.mxu3 %v4033_v4  ;;  %743 = vmatmul.bf16.vlgmr.msra.gmra.mxu0 %v6330_v37  ;;  %v3836_v4 = vld [vmem:[%s8753_s1 + $0x248] sm:$0xf]  ;;  %v5629_v12 = vld [vmem:[%s8753_s1 + $0x34c] sm:$0xf]  ;;  %v3966_v13 = vld [vmem:[%s8753_s1 + $0x358] sm:$0xf0]  ;;  %v3965_v15 = vor.u32 %v5631_v9, %v3964_v8  ;;  %v3841_v18 = vor.u32 %v5597_v10, %v3838_v11 }
  0x35   : > { %761 = vmatmul.bf16.vlgmr.msra.gmra.mxu1 %v6344_v43  ;;  %797 = vmatmul.bf16.vlgmr.msra.gmra.mxu3 %v6344_v43  ;;  %v3837_v14 = vor.u32 %v5599_v5, %v3836_v4  ;;  %v3820_v16 = vld [vmem:[%s8753_s1 + $0x228] sm:$0xf]  ;;  %v5595_v17 = vld [vmem:[%s8753_s1 + $0x234] sm:$0xf0]  ;;  %v3969_v19 = vor.u32 %v5629_v12, %v3966_v13  ;;  %v5593_v22 = vld [vmem:[%s8753_s1 + $0x22c] sm:$0xf] }
  0x36   : > { %809 = vmatpush.bf16.msrb.mxu0 %v3885_v31  ;;  %v3948_v20 = vld [vmem:[%s8753_s1 + $0x328] sm:$0xf]  ;;  %v5627_v21 = vld [vmem:[%s8753_s1 + $0x334] sm:$0xf0]  ;;  %v3822_v23 = vld [vmem:[%s8753_s1 + $0x238] sm:$0xf0]  ;;  %v3821_v27 = vor.u32 %v5595_v17, %v3820_v16 }
  0x37   : > { %827 = vmatpush.bf16.msrb.mxu1 %v4013_v34  ;;  %845 = vmatpush.bf16.msrb.mxu2 %v3889_v38  ;;  %v5625_v24 = vld [vmem:[%s8753_s1 + $0x32c] sm:$0xf]  ;;  %v3950_v25 = vld [vmem:[%s8753_s1 + $0x338] sm:$0xf0]  ;;  %v3804_v26 = vld [vmem:[%s8753_s1 + $0x208] sm:$0xf]  ;;  %v3949_v28 = vor.u32 %v5627_v21, %v3948_v20  ;;  %v3825_v34 = vor.u32 %v5593_v22, %v3822_v23 }
  0x38   : > { %863 = vmatpush.bf16.msrb.mxu3 %v4017_v39  ;;  %v5591_v29 = vld [vmem:[%s8753_s1 + $0x214] sm:$0xf0]  ;;  %v3932_v31 = vld [vmem:[%s8753_s1 + $0x308] sm:$0xf]  ;;  %v3953_v35 = vor.u32 %v5625_v24, %v3950_v25  ;;  %v5589_v36 = vld [vmem:[%s8753_s1 + $0x20c] sm:$0xf] }
  0x39   : > { %v5623_v32 = vld [vmem:[%s8753_s1 + $0x314] sm:$0xf0]  ;;  %v3806_v38 = vld [vmem:[%s8753_s1 + $0x218] sm:$0xf0]  ;;  %v5621_v39 = vld [vmem:[%s8753_s1 + $0x30c] sm:$0xf] }
  0x3a   : > { %810 = vmatpush.bf16.msrb.mxu0 %v3869_v48  ;;  %v3934_v40 = vld [vmem:[%s8753_s1 + $0x318] sm:$0xf0]  ;;  %v4164_v41 = vld [vmem:[%s8753_s1 + $0xe0] sm:$0xf]  ;;  %v5554_v42 = vld [vmem:[%s8753_s1 + $0xec] sm:$0xf0]  ;;  %v3805_v48 = vor.u32 %v5591_v29, %v3804_v26 }
  0x3b   : > { %828 = vmatpush.bf16.msrb.mxu1 %v3997_v49  ;;  %846 = vmatpush.bf16.msrb.mxu2 %v3873_v52  ;;  %v4292_v44 = vld [vmem:[%s8753_s1 + $0x1e0] sm:$0xf]  ;;  %v5586_v45 = vld [vmem:[%s8753_s1 + $0x1ec] sm:$0xf0]  ;;  %v5552_v46 = vld [vmem:[%s8753_s1 + $0xe4] sm:$0xf]  ;;  %v3933_v49 = vor.u32 %v5623_v32, %v3932_v31  ;;  %v3937_v55 = vor.u32 %v5621_v39, %v3934_v40  ;;  %v4165_v56 = vor.u32 %v5554_v42, %v4164_v41 }
  0x3c   : > { %864 = vmatpush.bf16.msrb.mxu3 %v4001_v54  ;;  %v4166_v50 = vld [vmem:[%s8753_s1 + $0xf0] sm:$0xf0]  ;;  %v5584_v51 = vld [vmem:[%s8753_s1 + $0x1e4] sm:$0xf]  ;;  %v3809_v54 = vor.u32 %v5589_v36, %v3806_v38  ;;  %v4293_v57 = vor.u32 %v5586_v45, %v4292_v44  ;;  %v4148_v59 = vld [vmem:[%s8753_s1 + $0xc0] sm:$0xf] }
  0x3d   : > { %v4294_v52 = vld [vmem:[%s8753_s1 + $0x1f0] sm:$0xf0]  ;;  %v5550_v60 = vld [vmem:[%s8753_s1 + $0xcc] sm:$0xf0]  ;;  %v4169_v61 = vor.u32 %v5552_v46, %v4166_v50  ;;  %v5548_v5 = vld [vmem:[%s8753_s1 + $0xc4] sm:$0xf] }
  0x3e   : > { %811 = vmatpush.bf16.msrb.mxu0 %v3853_v0  ;;  %v4297_v0 = vor.u32 %v5584_v51, %v4294_v52  ;;  %v5582_v4 = vld [vmem:[%s8753_s1 + $0x1cc] sm:$0xf0]  ;;  %v4278_v8 = vld [vmem:[%s8753_s1 + $0x1d0] sm:$0xf0]  ;;  %v4149_v9 = vor.u32 %v5550_v60, %v4148_v59  ;;  %v4132_v13 = vld [vmem:[%s8753_s1 + $0xa0] sm:$0xf] }
  0x3f   : > { %829 = vmatpush.bf16.msrb.mxu1 %v3981_v1  ;;  %847 = vmatpush.bf16.msrb.mxu2 %v3857_v6  ;;  %v4276_v1 = vld [vmem:[%s8753_s1 + $0x1c0] sm:$0xf]  ;;  %v4150_v6 = vld [vmem:[%s8753_s1 + $0xd0] sm:$0xf0]  ;;  %v5578_v16 = vld [vmem:[%s8753_s1 + $0x1ac] sm:$0xf0] }
  0x40   : > { %865 = vmatpush.bf16.msrb.mxu3 %v3985_v7  ;;  %v5580_v7 = vld [vmem:[%s8753_s1 + $0x1c4] sm:$0xf]  ;;  %v4277_v10 = vor.u32 %v5582_v4, %v4276_v1  ;;  %v4153_v11 = vor.u32 %v5548_v5, %v4150_v6  ;;  %v4262_v20 = vld [vmem:[%s8753_s1 + $0x1b0] sm:$0xf0]  ;;  %v4116_v23 = vld [vmem:[%s8753_s1 + $0x80] sm:$0xf] }
  0x41   : > { %v4281_v12 = vor.u32 %v5580_v7, %v4278_v8  ;;  %v5544_v17 = vld [vmem:[%s8753_s1 + $0xa4] sm:$0xf]  ;;  %v5542_v24 = vld [vmem:[%s8753_s1 + $0x8c] sm:$0xf0]  ;;  %v4118_v31 = vld [vmem:[%s8753_s1 + $0x90] sm:$0xf0] }
  0x42   : > { %812 = vmatpush.bf16.msrb.mxu0 %v3837_v14  ;;  %784 = vmatmul.bf16.gmra.mxu2 %v6318_v30  ;;  %v5546_v14 = vld [vmem:[%s8753_s1 + $0xac] sm:$0xf0]  ;;  %v5540_v29 = vld [vmem:[%s8753_s1 + $0x84] sm:$0xf]  ;;  %v4100_v36 = vld [vmem:[%s8753_s1 + $0x60] sm:$0xf] }
  0x43   : > { %830 = vmatpush.bf16.msrb.mxu1 %v3965_v15  ;;  %848 = vmatpush.bf16.msrb.mxu2 %v3841_v18  ;;  %v4260_v15 = vld [vmem:[%s8753_s1 + $0x1a0] sm:$0xf]  ;;  %v4134_v18 = vld [vmem:[%s8753_s1 + $0xb0] sm:$0xf0]  ;;  %v4133_v21 = vor.u32 %v5546_v14, %v4132_v13  ;;  %v5572_v32 = vld [vmem:[%s8753_s1 + $0x184] sm:$0xf]  ;;  %v4121_v39 = vor.u32 %v5540_v29, %v4118_v31 }
  0x44   : > { %866 = vmatpush.bf16.msrb.mxu3 %v3969_v19  ;;  %748 = vmatmul.bf16.gmra.mxu0 %v6318_v30  ;;  %v5576_v19 = vld [vmem:[%s8753_s1 + $0x1a4] sm:$0xf]  ;;  %v4261_v22 = vor.u32 %v5578_v16, %v4260_v15  ;;  %v4137_v25 = vor.u32 %v5544_v17, %v4134_v18  ;;  %v5538_v38 = vld [vmem:[%s8753_s1 + $0x6c] sm:$0xf0]  ;;  %v4102_v44 = vld [vmem:[%s8753_s1 + $0x70] sm:$0xf0] }
  0x45   : > { %766 = vmatmul.bf16.gmra.mxu1 %v6320_v33  ;;  %802 = vmatmul.bf16.gmra.mxu3 %v6320_v33  ;;  %v4265_v26 = vor.u32 %v5576_v19, %v4262_v20  ;;  %v5570_v41 = vld [vmem:[%s8753_s1 + $0x16c] sm:$0xf0]  ;;  %v5536_v42 = vld [vmem:[%s8753_s1 + $0x64] sm:$0xf]  ;;  %v4230_v46 = vld [vmem:[%s8753_s1 + $0x170] sm:$0xf0] }
  0x46   : > { %813 = vmatpush.bf16.msrb.mxu0 %v3821_v27  ;;  %v4244_v27 = vld [vmem:[%s8753_s1 + $0x180] sm:$0xf]  ;;  %v5568_v45 = vld [vmem:[%s8753_s1 + $0x164] sm:$0xf]  ;;  %v5534_v51 = vld [vmem:[%s8753_s1 + $0x4c] sm:$0xf0]  ;;  %v4105_v52 = vor.u32 %v5536_v42, %v4102_v44 }
  0x47   : > { %831 = vmatpush.bf16.msrb.mxu1 %v3949_v28  ;;  %849 = vmatpush.bf16.msrb.mxu2 %v3825_v34  ;;  %v5574_v28 = vld [vmem:[%s8753_s1 + $0x18c] sm:$0xf0]  ;;  %v4246_v34 = vld [vmem:[%s8753_s1 + $0x190] sm:$0xf0]  ;;  %v4084_v50 = vld [vmem:[%s8753_s1 + $0x40] sm:$0xf] }
  0x48   : > { %867 = vmatpush.bf16.msrb.mxu3 %v3953_v35  ;;  %v4117_v35 = vor.u32 %v5542_v24, %v4116_v23  ;;  %v4249_v40 = vor.u32 %v5572_v32, %v4246_v34  ;;  %v4086_v59 = vld [vmem:[%s8753_s1 + $0x50] sm:$0xf0]  ;;  %v5564_v60 = vld [vmem:[%s8753_s1 + $0x144] sm:$0xf]  ;;  %v4068_v4 = vld [vmem:[%s8753_s1 + $0x20] sm:$0xf] }
  0x49   : > { %v5530_v5 = vld [vmem:[%s8753_s1 + $0x2c] sm:$0xf0]  ;;  %v4196_v8 = vld [vmem:[%s8753_s1 + $0x120] sm:$0xf]  ;;  %v4198_v13 = vld [vmem:[%s8753_s1 + $0x130] sm:$0xf0] }
  0x4a   : > { %814 = vmatpush.bf16.msrb.mxu0 %v3805_v48  ;;  %v4101_v48 = vor.u32 %v5538_v38, %v4100_v36  ;;  %v4052_v14 = vld [vmem:[%s8753_s1] sm:$0xf]  ;;  %v5526_v15 = vld [vmem:[%s8753_s1 + $0xc] sm:$0xf0]  ;;  %v4069_v16 = vor.u32 %v5530_v5, %v4068_v4  ;;  %v5524_v23 = vld [vmem:[%s8753_s1 + $0x4] sm:$0xf] }
  0x4b   : > { %832 = vmatpush.bf16.msrb.mxu1 %v3933_v49  ;;  %850 = vmatpush.bf16.msrb.mxu2 %v3809_v54  ;;  %v4233_v54 = vor.u32 %v5568_v45, %v4230_v46  ;;  %v4180_v18 = vld [vmem:[%s8753_s1 + $0x100] sm:$0xf]  ;;  %v5558_v19 = vld [vmem:[%s8753_s1 + $0x10c] sm:$0xf0]  ;;  %v4054_v24 = vld [vmem:[%s8753_s1 + $0x10] sm:$0xf0]  ;;  %v4053_v34 = vor.u32 %v5526_v15, %v4052_v14 }
  0x4c   : > { %868 = vmatpush.bf16.msrb.mxu3 %v3937_v55  ;;  %v4212_v55 = vld [vmem:[%s8753_s1 + $0x140] sm:$0xf]  ;;  %v232_v20 = vld [vmem:[%s6230_s10 + $0x10] sm:$0x33]  ;;  %v5587_v31 = vld [vmem:[%s8753_s1 + $0x1f4] sm:$0xf0] }
  0x4d   : > { %v880_v29 = vunpack.c.l.b16 %v232_v20  ;;  %v5553_v32 = vld [vmem:[%s8753_s1 + $0xec] sm:$0xf]  ;;  %v4302_v38 = vld [vmem:[%s8753_s1 + $0x1f8] sm:$0xf0]  ;;  %v4156_v42 = vld [vmem:[%s8753_s1 + $0xc8] sm:$0xf] }
  0x4e   : > { %1215 = vmatpush.bf16.msra.mxu0 %v4165_v56  ;;  %v5566_v56 = vld [vmem:[%s8753_s1 + $0x14c] sm:$0xf0]  ;;  %v5585_v36 = vld [vmem:[%s8753_s1 + $0x1ec] sm:$0xf]  ;;  %v5551_v44 = vld [vmem:[%s8753_s1 + $0xd4] sm:$0xf0] }
  0x4f   : > { %1233 = vmatpush.bf16.msra.mxu1 %v4293_v57  ;;  %1251 = vmatpush.bf16.msra.mxu2 %v4169_v61  ;;  %v5532_v57 = vld [vmem:[%s8753_s1 + $0x44] sm:$0xf]  ;;  %v4214_v61 = vld [vmem:[%s8753_s1 + $0x150] sm:$0xf0]  ;;  %v4213_v1 = vor.u32 %v5566_v56, %v4212_v55  ;;  %v882_v45 = vpack.c.b16 %v880_v29, %v880_v29  ;;  %v5581_v55 = vld [vmem:[%s8753_s1 + $0x1cc] sm:$0xf] }
  0x50   : > { %1269 = vmatpush.bf16.msra.mxu3 %v4297_v0  ;;  %v4085_v0 = vor.u32 %v5534_v51, %v4084_v50  ;;  %v4089_v6 = vor.u32 %v5532_v57, %v4086_v59  ;;  %v4217_v7 = vor.u32 %v5564_v60, %v4214_v61  ;;  %v5583_v50 = vld [vmem:[%s8753_s1 + $0x1d4] sm:$0xf0]  ;;  %v5549_v51 = vld [vmem:[%s8753_s1 + $0xcc] sm:$0xf]  ;;  %v4286_v56 = vld [vmem:[%s8753_s1 + $0x1d8] sm:$0xf0]  ;;  %v4157_v57 = vor.u32 %v5551_v44, %v4156_v42 }
  0x51   : > { %v885_v60 = vrot.slane %v6272_v62, 1  ;;  %v6708_v61 = vrot.slane %v882_v45, 1  ;;  %v888_v4 = vrot.slane %v6282_v2, 1  ;;  %v4268_v62 = vld [vmem:[%s8753_s1 + $0x1a8] sm:$0xf]  ;;  %vm3631_vm6 = vcmask 1043456  }
  0x52   : > { %1216 = vmatpush.bf16.msra.mxu0 %v4149_v9  ;;  %851 = vmatmul.bf16.vlgmr.msrb.gmra.mxu2 %v6330_v37  ;;  %v5562_v9 = vld [vmem:[%s8753_s1 + $0x12c] sm:$0xf0]  ;;  %v5545_v2 = vld [vmem:[%s8753_s1 + $0xac] sm:$0xf]  ;;  %v5539_v29 = vld [vmem:[%s8753_s1 + $0x74] sm:$0xf0] }
  0x53   : > { %1234 = vmatpush.bf16.msra.mxu1 %v4277_v10  ;;  %1252 = vmatpush.bf16.msra.mxu2 %v4153_v11  ;;  %v5528_v10 = vld [vmem:[%s8753_s1 + $0x24] sm:$0xf]  ;;  %v4070_v11 = vld [vmem:[%s8753_s1 + $0x30] sm:$0xf0]  ;;  %v4197_v17 = vor.u32 %v5562_v9, %v4196_v8  ;;  %v5579_v8 = vld [vmem:[%s8753_s1 + $0x1b4] sm:$0xf0] }
  0x54   : > { %1270 = vmatpush.bf16.msra.mxu3 %v4281_v12  ;;  %815 = vmatmul.bf16.vlgmr.msrb.gmra.mxu0 %v6330_v37  ;;  %v4245_v37 = vor.u32 %v5574_v28, %v4244_v27  ;;  %v5560_v12 = vld [vmem:[%s8753_s1 + $0x124] sm:$0xf]  ;;  %v4172_v27 = vld [vmem:[%s8753_s1 + $0xe8] sm:$0xf]  ;;  %v5555_v28 = vld [vmem:[%s8753_s1 + $0xf4] sm:$0xf0]  ;;  %v4269_v15 = vor.u32 %v5579_v8, %v4268_v62 }
  0x55   : > { %833 = vmatmul.bf16.vlgmr.msrb.gmra.mxu1 %v6344_v43  ;;  %869 = vmatmul.bf16.vlgmr.msrb.gmra.mxu3 %v6344_v43  ;;  %v4228_v43 = vld [vmem:[%s8753_s1 + $0x160] sm:$0xf]  ;;  %v4142_v9 = vld [vmem:[%s8753_s1 + $0xb8] sm:$0xf0]  ;;  %v4220_v44 = vld [vmem:[%s8753_s1 + $0x148] sm:$0xf] }
  0x56   : > { %1217 = vmatpush.bf16.msra.mxu0 %v4133_v21  ;;  %v4229_v49 = vor.u32 %v5570_v41, %v4228_v43  ;;  %v4073_v21 = vor.u32 %v5528_v10, %v4070_v11  ;;  %v4173_v43 = vor.u32 %v5555_v28, %v4172_v27  ;;  %v5577_v10 = vld [vmem:[%s8753_s1 + $0x1ac] sm:$0xf]  ;;  %v4270_v11 = vld [vmem:[%s8753_s1 + $0x1b8] sm:$0xf0]  ;;  %v4108_v28 = vld [vmem:[%s8753_s1 + $0x68] sm:$0xf] }
  0x57   : > { %1235 = vmatpush.bf16.msra.mxu1 %v4261_v22  ;;  %1253 = vmatpush.bf16.msra.mxu2 %v4137_v25  ;;  %v4201_v22 = vor.u32 %v5560_v12, %v4198_v13  ;;  %v5556_v25 = vld [vmem:[%s8753_s1 + $0x104] sm:$0xf]  ;;  %v6739_v12 = vsel %vm884_vm1, %v885_v60, %v6708_v61  ;;  %v5567_v45 = vld [vmem:[%s8753_s1 + $0x154] sm:$0xf0]  ;;  %v4478_v47 = vld [vmem:[%s8753_s1 + $0x4d8] sm:$0xf0] }
  0x58   : > { %1271 = vmatpush.bf16.msra.mxu3 %v4265_v26  ;;  %v4182_v26 = vld [vmem:[%s8753_s1 + $0x110] sm:$0xf0]  ;;  %v5563_v60 = vld [vmem:[%s8753_s1 + $0x134] sm:$0xf0]  ;;  %vm2157_vm5 = vsmask.f32 7424 }
  0x59   : > { %vm3654_vm7 = vcmask 1041408   ;;  %vm3655_vm8 = vcmask 1045508  }
  0x5a   : > { %1218 = vmatpush.bf16.msra.mxu0 %v4117_v35  ;;  %v4181_v35 = vor.u32 %v5558_v19, %v4180_v18  ;;  %v4145_v18 = vor.u32 %v5545_v2, %v4142_v9  ;;  %v4273_v19 = vor.u32 %v5577_v10, %v4270_v11  ;;  %v5527_v2 = vld [vmem:[%s8753_s1 + $0x14] sm:$0xf0]  ;;  %v4188_v9 = vld [vmem:[%s8753_s1 + $0x108] sm:$0xf]  ;;  %vm3656_vm9 = vmor %vm3654_vm7, %vm3655_vm8 }
  0x5b   : > { %1236 = vmatpush.bf16.msra.mxu1 %v4245_v37  ;;  %1254 = vmatpush.bf16.msra.mxu2 %v4121_v39  ;;  %v881_v37 = vunpack.c.h.b16 %v232_v20  ;;  %v4057_v39 = vor.u32 %v5524_v23, %v4054_v24  ;;  %v4252_v20 = vld [vmem:[%s8753_s1 + $0x188] sm:$0xf]  ;;  %v4126_v23 = vld [vmem:[%s8753_s1 + $0x98] sm:$0xf0]  ;;  %v5573_v24 = vld [vmem:[%s8753_s1 + $0x18c] sm:$0xf] }
  0x5c   : > { %1272 = vmatpush.bf16.msra.mxu3 %v4249_v40  ;;  %v4185_v40 = vor.u32 %v5556_v25, %v4182_v26  ;;  %v4254_v25 = vld [vmem:[%s8753_s1 + $0x198] sm:$0xf0]  ;;  %v5559_v10 = vld [vmem:[%s8753_s1 + $0x114] sm:$0xf0] }
  0x5e   : > { %1219 = vmatpush.bf16.msra.mxu0 %v4101_v48  ;;  %v4305_v48 = vor.u32 %v5585_v36, %v4302_v38  ;;  %v4238_v36 = vld [vmem:[%s8753_s1 + $0x178] sm:$0xf0]  ;;  %v4109_v38 = vor.u32 %v5539_v29, %v4108_v28  ;;  %v4614_v28 = vld [vmem:[%s8753_s1 + $0x5f0] sm:$0xf0] }
  0x5f   : > { %1237 = vmatpush.bf16.msra.mxu1 %v4229_v49  ;;  %1255 = vmatpush.bf16.msra.mxu2 %v4105_v52  ;;  %v4284_v49 = vld [vmem:[%s8753_s1 + $0x1c8] sm:$0xf]  ;;  %v883_v52 = vpack.c.b16 %v881_v37, %v881_v37  ;;  %v4110_v37 = vld [vmem:[%s8753_s1 + $0x78] sm:$0xf0] }
  0x60   : > { %1273 = vmatpush.bf16.msra.mxu3 %v4233_v54  ;;  %v4158_v54 = vld [vmem:[%s8753_s1 + $0xd8] sm:$0xf0]  ;;  %v4285_v59 = vor.u32 %v5583_v50, %v4284_v49  ;;  %v5565_v49 = vld [vmem:[%s8753_s1 + $0x14c] sm:$0xf] }
  0x61   : > { %v6711_v5 = vrot.slane %v883_v52, 1  ;;  %v4222_v50 = vld [vmem:[%s8753_s1 + $0x158] sm:$0xf0]  ;;  %v4221_v52 = vor.u32 %v5567_v45, %v4220_v44 }
  0x62   : > { %1220 = vmatpush.bf16.msra.mxu0 %v4085_v0  ;;  %856 = vmatmul.bf16.gmra.mxu2 %v6318_v30  ;;  %v4161_v0 = vor.u32 %v5549_v51, %v4158_v54  ;;  %v4076_v54 = vld [vmem:[%s8753_s1 + $0x28] sm:$0xf] }
  0x63   : > { %1238 = vmatpush.bf16.msra.mxu1 %v4213_v1  ;;  %1256 = vmatpush.bf16.msra.mxu2 %v4089_v6  ;;  %v4289_v1 = vor.u32 %v5581_v55, %v4286_v56  ;;  %v4140_v6 = vld [vmem:[%s8753_s1 + $0xa8] sm:$0xf]  ;;  %v6743_v13 = vsel %vm884_vm1, %v888_v4, %v6711_v5  ;;  %v5531_v55 = vld [vmem:[%s8753_s1 + $0x34] sm:$0xf0]  ;;  %v5561_v4 = vld [vmem:[%s8753_s1 + $0x12c] sm:$0xf] }
  0x64   : > { %1274 = vmatpush.bf16.msra.mxu3 %v4217_v7  ;;  %820 = vmatmul.bf16.gmra.mxu0 %v6318_v30  ;;  %v4300_v30 = vld [vmem:[%s8753_s1 + $0x1e8] sm:$0xf]  ;;  %v5547_v7 = vld [vmem:[%s8753_s1 + $0xb4] sm:$0xf0]  ;;  %v4077_v62 = vor.u32 %v5531_v55, %v4076_v54  ;;  %v4454_v54 = vld [vmem:[%s8753_s1 + $0x4b0] sm:$0xf0] }
  0x65   : > { %838 = vmatmul.bf16.gmra.mxu1 %v6320_v33  ;;  %874 = vmatmul.bf16.gmra.mxu3 %v6320_v33  ;;  %v4174_v33 = vld [vmem:[%s8753_s1 + $0xf8] sm:$0xf0]  ;;  %v4301_v41 = vor.u32 %v5587_v31, %v4300_v30  ;;  %v4141_v14 = vor.u32 %v5547_v7, %v4140_v6  ;;  %v4257_v31 = vor.u32 %v5573_v24, %v4254_v25  ;;  %v4060_v7 = vld [vmem:[%s8753_s1 + $0x8] sm:$0xf]  ;;  %v5704_v55 = vld [vmem:[%s8753_s1 + $0x5a4] sm:$0xf] }
  0x66   : > { %1221 = vmatpush.bf16.msra.mxu0 %v4069_v16  ;;  %v4177_v46 = vor.u32 %v5553_v32, %v4174_v33  ;;  %v4124_v16 = vld [vmem:[%s8753_s1 + $0x88] sm:$0xf]  ;;  %v5569_v33 = vld [vmem:[%s8753_s1 + $0x16c] sm:$0xf]  ;;  %v4206_v6 = vld [vmem:[%s8753_s1 + $0x138] sm:$0xf0]  ;;  %v4061_v24 = vor.u32 %v5527_v2, %v4060_v7  ;;  %v4189_v25 = vor.u32 %v5559_v10, %v4188_v9 }
  0x67   : > { %1239 = vmatpush.bf16.msra.mxu1 %v4197_v17  ;;  %1257 = vmatpush.bf16.msra.mxu2 %v4073_v21  ;;  %v5543_v17 = vld [vmem:[%s8753_s1 + $0x94] sm:$0xf0]  ;;  %v4236_v32 = vld [vmem:[%s8753_s1 + $0x168] sm:$0xf]  ;;  %v4241_v42 = vor.u32 %v5569_v33, %v4238_v36  ;;  %v4596_v36 = vld [vmem:[%s8753_s1 + $0x5c0] sm:$0xf] }
  0x68   : > { %1275 = vmatpush.bf16.msra.mxu3 %v4201_v22  ;;  %v5575_v21 = vld [vmem:[%s8753_s1 + $0x194] sm:$0xf0]  ;;  %v5541_v22 = vld [vmem:[%s8753_s1 + $0x8c] sm:$0xf]  ;;  %v4125_v26 = vor.u32 %v5543_v17, %v4124_v16  ;;  %v4062_v16 = vld [vmem:[%s8753_s1 + $0x18] sm:$0xf0] }
  0x69   : > { %v4253_v27 = vor.u32 %v5575_v21, %v4252_v20  ;;  %v4129_v30 = vor.u32 %v5541_v22, %v4126_v23  ;;  %v5557_v17 = vld [vmem:[%s8753_s1 + $0x10c] sm:$0xf]  ;;  %v5682_v20 = vld [vmem:[%s8753_s1 + $0x4ec] sm:$0xf0]  ;;  %v4612_v21 = vld [vmem:[%s8753_s1 + $0x5e0] sm:$0xf] }
  0x6a   : > { %1222 = vmatpush.bf16.msra.mxu0 %v4053_v34  ;;  %v5571_v34 = vld [vmem:[%s8753_s1 + $0x174] sm:$0xf0]  ;;  %v5714_v22 = vld [vmem:[%s8753_s1 + $0x5ec] sm:$0xf0]  ;;  %v5680_v23 = vld [vmem:[%s8753_s1 + $0x4e4] sm:$0xf] }
  0x6b   : > { %1240 = vmatpush.bf16.msra.mxu1 %v4181_v35  ;;  %1258 = vmatpush.bf16.msra.mxu2 %v4057_v39  ;;  %v5537_v35 = vld [vmem:[%s8753_s1 + $0x6c] sm:$0xf]  ;;  %v4237_v39 = vor.u32 %v5571_v34, %v4236_v32  ;;  %v4613_v32 = vor.u32 %v5714_v22, %v4612_v21  ;;  %v4468_v34 = vld [vmem:[%s8753_s1 + $0x4c0] sm:$0xf]  ;;  %v5702_v7 = vld [vmem:[%s8753_s1 + $0x58c] sm:$0xf0] }
  0x6c   : > { %1276 = vmatpush.bf16.msra.mxu3 %v4185_v40  ;;  %v4092_v40 = vld [vmem:[%s8753_s1 + $0x48] sm:$0xf]  ;;  %v5700_v2 = vld [vmem:[%s8753_s1 + $0x584] sm:$0xf]  ;;  %v4566_v9 = vld [vmem:[%s8753_s1 + $0x590] sm:$0xf0] }
  0x6d   : > { %v4550_v21 = vld [vmem:[%s8753_s1 + $0x570] sm:$0xf0] }
  0x6e   : > { %1287 = vmatpush.bf16.msrb.mxu0 %v4173_v43  ;;  %v5535_v43 = vld [vmem:[%s8753_s1 + $0x54] sm:$0xf0] }
  0x6f   : > { %1305 = vmatpush.bf16.msrb.mxu1 %v4301_v41  ;;  %1323 = vmatpush.bf16.msrb.mxu2 %v4177_v46  ;;  %v4113_v41 = vor.u32 %v5537_v35, %v4110_v37  ;;  %v5533_v46 = vld [vmem:[%s8753_s1 + $0x4c] sm:$0xf]  ;;  %v4093_v51 = vor.u32 %v5535_v43, %v4092_v40  ;;  %v5678_v35 = vld [vmem:[%s8753_s1 + $0x4cc] sm:$0xf0]  ;;  %v4470_v40 = vld [vmem:[%s8753_s1 + $0x4d0] sm:$0xf0] }
  0x70   : > { %1341 = vmatpush.bf16.msrb.mxu3 %v4305_v48  ;;  %v4094_v48 = vld [vmem:[%s8753_s1 + $0x58] sm:$0xf0]  ;;  %v5708_v43 = vld [vmem:[%s8753_s1 + $0x5c4] sm:$0xf] }
  0x71   : > { %v4097_v56 = vor.u32 %v5533_v46, %v4094_v48  ;;  %v4452_v48 = vld [vmem:[%s8753_s1 + $0x4a0] sm:$0xf] }
  0x72   : > { %1288 = vmatpush.bf16.msrb.mxu0 %v4157_v57  ;;  %1259 = vmatmul.bf16.vlgmr.msra.gmra.mxu2 %v6739_v12  ;;  %v4225_v57 = vor.u32 %v5565_v49, %v4222_v50  ;;  %v5674_v49 = vld [vmem:[%s8753_s1 + $0x4ac] sm:$0xf0]  ;;  %v4580_v50 = vld [vmem:[%s8753_s1 + $0x5a0] sm:$0xf] }
  0x73   : > { %1306 = vmatpush.bf16.msrb.mxu1 %v4285_v59  ;;  %1324 = vmatpush.bf16.msrb.mxu2 %v4161_v0  ;;  %v4204_v59 = vld [vmem:[%s8753_s1 + $0x128] sm:$0xf]  ;;  %v5529_v0 = vld [vmem:[%s8753_s1 + $0x2c] sm:$0xf] }
  0x74   : > { %1342 = vmatpush.bf16.msrb.mxu3 %v4289_v1  ;;  %1223 = vmatmul.bf16.vlgmr.msra.gmra.mxu0 %v6739_v12  ;;  %v4078_v1 = vld [vmem:[%s8753_s1 + $0x38] sm:$0xf0]  ;;  %v4205_v8 = vor.u32 %v5563_v60, %v4204_v59  ;;  %v4436_v60 = vld [vmem:[%s8753_s1 + $0x480] sm:$0xf] }
  0x75   : > { %1241 = vmatmul.bf16.vlgmr.msra.gmra.mxu1 %v6743_v13  ;;  %1277 = vmatmul.bf16.vlgmr.msra.gmra.mxu3 %v6743_v13  ;;  %v4081_v11 = vor.u32 %v5529_v0, %v4078_v1  ;;  %v5670_v0 = vld [vmem:[%s8753_s1 + $0x48c] sm:$0xf0] }
  0x76   : > { %1289 = vmatpush.bf16.msrb.mxu0 %v4141_v14  ;;  %v4209_v14 = vor.u32 %v5561_v4, %v4206_v6  ;;  %v4564_v6 = vld [vmem:[%s8753_s1 + $0x580] sm:$0xf]  ;;  %v4437_v10 = vor.u32 %v5670_v0, %v4436_v60  ;;  %v5684_v60 = vld [vmem:[%s8753_s1 + $0x504] sm:$0xf]  ;;  %v4502_v0 = vld [vmem:[%s8753_s1 + $0x510] sm:$0xf0] }
  0x77   : > { %1307 = vmatpush.bf16.msrb.mxu1 %v4269_v15  ;;  %1325 = vmatpush.bf16.msrb.mxu2 %v4145_v18  ;;  %v5525_v15 = vld [vmem:[%s8753_s1 + $0xc] sm:$0xf]  ;;  %v4190_v18 = vld [vmem:[%s8753_s1 + $0x118] sm:$0xf0] }
  0x78   : > { %1343 = vmatpush.bf16.msrb.mxu3 %v4273_v19  ;;  %v4484_v19 = vld [vmem:[%s8753_s1 + $0x4e0] sm:$0xf]  ;;  %v4065_v29 = vor.u32 %v5525_v15, %v4062_v16  ;;  %v4569_v16 = vor.u32 %v5700_v2, %v4566_v9 }
  0x7a   : > { %1290 = vmatpush.bf16.msrb.mxu0 %v4125_v26  ;;  %v4486_v26 = vld [vmem:[%s8753_s1 + $0x4f0] sm:$0xf0] }
  0x7b   : > { %1308 = vmatpush.bf16.msrb.mxu1 %v4253_v27  ;;  %1326 = vmatpush.bf16.msrb.mxu2 %v4129_v30  ;;  %v5712_v27 = vld [vmem:[%s8753_s1 + $0x5e4] sm:$0xf]  ;;  %v4193_v30 = vor.u32 %v5557_v17, %v4190_v18  ;;  %v4489_v37 = vor.u32 %v5680_v23, %v4486_v26  ;;  %v5698_v17 = vld [vmem:[%s8753_s1 + $0x56c] sm:$0xf0] }
  0x7c   : > { %1344 = vmatpush.bf16.msrb.mxu3 %v4257_v31  ;;  %v4485_v31 = vor.u32 %v5682_v20, %v4484_v19  ;;  %v4617_v33 = vor.u32 %v5712_v27, %v4614_v28  ;;  %v5664_v18 = vld [vmem:[%s8753_s1 + $0x464] sm:$0xf]  ;;  %v4422_v19 = vld [vmem:[%s8753_s1 + $0x470] sm:$0xf0]  ;;  %v4532_v28 = vld [vmem:[%s8753_s1 + $0x540] sm:$0xf] }
  0x7d   : > { %v5696_v20 = vld [vmem:[%s8753_s1 + $0x564] sm:$0xf]  ;;  %v4425_v26 = vor.u32 %v5664_v18, %v4422_v19  ;;  %v5679_v18 = vld [vmem:[%s8753_s1 + $0x4d4] sm:$0xf0] }
  0x7e   : > { %1291 = vmatpush.bf16.msrb.mxu0 %v4109_v38  ;;  %v5710_v38 = vld [vmem:[%s8753_s1 + $0x5cc] sm:$0xf0]  ;;  %v4553_v27 = vor.u32 %v5696_v20, %v4550_v21 }
  0x7f   : > { %1309 = vmatpush.bf16.msrb.mxu1 %v4237_v39  ;;  %1327 = vmatpush.bf16.msrb.mxu2 %v4113_v41  ;;  %v5676_v39 = vld [vmem:[%s8753_s1 + $0x4c4] sm:$0xf]  ;;  %v4598_v41 = vld [vmem:[%s8753_s1 + $0x5d0] sm:$0xf0]  ;;  %v4597_v44 = vor.u32 %v5710_v38, %v4596_v36  ;;  %v5658_v36 = vld [vmem:[%s8753_s1 + $0x42c] sm:$0xf0] }
  0x80   : > { %1345 = vmatpush.bf16.msrb.mxu3 %v4241_v42  ;;  %v4469_v42 = vor.u32 %v5678_v35, %v4468_v34  ;;  %v4473_v45 = vor.u32 %v5676_v39, %v4470_v40  ;;  %v4601_v46 = vor.u32 %v5708_v43, %v4598_v41  ;;  %v4534_v34 = vld [vmem:[%s8753_s1 + $0x550] sm:$0xf0]  ;;  %v4516_v40 = vld [vmem:[%s8753_s1 + $0x520] sm:$0xf]  ;;  %v5690_v43 = vld [vmem:[%s8753_s1 + $0x52c] sm:$0xf0] }
  0x81   : > { %v5656_v41 = vld [vmem:[%s8753_s1 + $0x424] sm:$0xf] }
  0x82   : > { %1292 = vmatpush.bf16.msrb.mxu0 %v4093_v51  ;;  %1264 = vmatmul.bf16.gmra.mxu2 %v6708_v61  ;;  %v5706_v51 = vld [vmem:[%s8753_s1 + $0x5ac] sm:$0xf0] }
  0x83   : > { %1310 = vmatpush.bf16.msrb.mxu1 %v4221_v52  ;;  %1328 = vmatpush.bf16.msrb.mxu2 %v4097_v56  ;;  %v5672_v52 = vld [vmem:[%s8753_s1 + $0x4a4] sm:$0xf]  ;;  %v4582_v56 = vld [vmem:[%s8753_s1 + $0x5b0] sm:$0xf0]  ;;  %v4581_v59 = vor.u32 %v5706_v51, %v4580_v50  ;;  %v4517_v50 = vor.u32 %v5690_v43, %v4516_v40  ;;  %v5654_v51 = vld [vmem:[%s8753_s1 + $0x40c] sm:$0xf0] }
  0x84   : > { %1346 = vmatpush.bf16.msrb.mxu3 %v4225_v57  ;;  %1228 = vmatmul.bf16.gmra.mxu0 %v6708_v61  ;;  %v4453_v57 = vor.u32 %v5674_v49, %v4452_v48  ;;  %v4457_v1 = vor.u32 %v5672_v52, %v4454_v54  ;;  %v4585_v4 = vor.u32 %v5704_v55, %v4582_v56  ;;  %v1359_v48 = vld [vmem:[%s6230_s10] sm:$0xcc]  ;;  %v5686_v54 = vld [vmem:[%s8753_s1 + $0x50c] sm:$0xf0] }
  0x85   : > { %1246 = vmatmul.bf16.gmra.mxu1 %v6711_v5  ;;  %1282 = vmatmul.bf16.gmra.mxu3 %v6711_v5  ;;  %v4500_v52 = vld [vmem:[%s8753_s1 + $0x500] sm:$0xf] }
  0x86   : > { %1293 = vmatpush.bf16.msrb.mxu0 %v4077_v62  ;;  %v5668_v62 = vld [vmem:[%s8753_s1 + $0x484] sm:$0xf]  ;;  %v4501_v9 = vor.u32 %v5686_v54, %v4500_v52  ;;  %v5703_v52 = vld [vmem:[%s8753_s1 + $0x594] sm:$0xf0]  ;;  %v5669_v54 = vld [vmem:[%s8753_s1 + $0x48c] sm:$0xf] }
  0x87   : > { %1311 = vmatpush.bf16.msrb.mxu1 %v4205_v8  ;;  %1329 = vmatpush.bf16.msrb.mxu2 %v4081_v11  ;;  %v4438_v8 = vld [vmem:[%s8753_s1 + $0x490] sm:$0xf0]  ;;  %v4420_v11 = vld [vmem:[%s8753_s1 + $0x460] sm:$0xf] }
  0x88   : > { %1347 = vmatpush.bf16.msrb.mxu3 %v4209_v14  ;;  %v5666_v14 = vld [vmem:[%s8753_s1 + $0x46c] sm:$0xf0]  ;;  %v4441_v15 = vor.u32 %v5668_v62, %v4438_v8  ;;  %v5715_v62 = vld [vmem:[%s8753_s1 + $0x5f4] sm:$0xf0]  ;;  %v5681_v8 = vld [vmem:[%s8753_s1 + $0x4ec] sm:$0xf] }
  0x89   : > { %v4421_v22 = vor.u32 %v5666_v14, %v4420_v11  ;;  %v4505_v14 = vor.u32 %v5684_v60, %v4502_v0  ;;  %v4428_v0 = vld [vmem:[%s8753_s1 + $0x468] sm:$0xf] }
  0x8a   : > { %1294 = vmatpush.bf16.msrb.mxu0 %v4061_v24  ;;  %v4404_v24 = vld [vmem:[%s8753_s1 + $0x440] sm:$0xf] }
  0x8b   : > { %1312 = vmatpush.bf16.msrb.mxu1 %v4189_v25  ;;  %1330 = vmatpush.bf16.msrb.mxu2 %v4065_v29  ;;  %v5662_v25 = vld [vmem:[%s8753_s1 + $0x44c] sm:$0xf0] }
  0x8c   : > { %1348 = vmatpush.bf16.msrb.mxu3 %v4193_v30  ;;  %v5694_v29 = vld [vmem:[%s8753_s1 + $0x54c] sm:$0xf0]  ;;  %v5660_v30 = vld [vmem:[%s8753_s1 + $0x444] sm:$0xf]  ;;  %v4405_v35 = vor.u32 %v5662_v25, %v4404_v24  ;;  %v4606_v24 = vld [vmem:[%s8753_s1 + $0x5d8] sm:$0xf0] }
  0x8e   : > { %1761 = vmatpush.bf16.msra.mxu0 %v4485_v31  ;;  %v4406_v31 = vld [vmem:[%s8753_s1 + $0x450] sm:$0xf0] }
  0x8f   : > { %1779 = vmatpush.bf16.msra.mxu1 %v4613_v32  ;;  %1797 = vmatpush.bf16.msra.mxu2 %v4489_v37  ;;  %v5692_v32 = vld [vmem:[%s8753_s1 + $0x544] sm:$0xf]  ;;  %v4533_v37 = vor.u32 %v5694_v29, %v4532_v28  ;;  %v4409_v38 = vor.u32 %v5660_v30, %v4406_v31  ;;  %v7127_v28 = vrot.slane %v6274_v63, 2  ;;  %v4588_v63 = vld [vmem:[%s8753_s1 + $0x5a8] sm:$0xf] }
  0x90   : > { %1815 = vmatpush.bf16.msra.mxu3 %v4617_v33  ;;  %v4388_v33 = vld [vmem:[%s8753_s1 + $0x420] sm:$0xf]  ;;  %v4537_v39 = vor.u32 %v5692_v32, %v4534_v34  ;;  %v7130_v32 = vrot.slane %v6284_v3, 2  ;;  %v4460_v34 = vld [vmem:[%s8753_s1 + $0x4a8] sm:$0xf] }
  0x91   : > { %v4389_v49 = vor.u32 %v5658_v36, %v4388_v33  ;;  %v5673_v3 = vld [vmem:[%s8753_s1 + $0x4ac] sm:$0xf]  ;;  %v4462_v33 = vld [vmem:[%s8753_s1 + $0x4b8] sm:$0xf0] }
  0x92   : > { %1762 = vmatpush.bf16.msra.mxu0 %v4469_v42  ;;  %1331 = vmatmul.bf16.vlgmr.msrb.gmra.mxu2 %v6739_v12  ;;  %v4390_v42 = vld [vmem:[%s8753_s1 + $0x430] sm:$0xf0]  ;;  %v5705_v36 = vld [vmem:[%s8753_s1 + $0x5ac] sm:$0xf] }
  0x93   : > { %1780 = vmatpush.bf16.msra.mxu1 %v4597_v44  ;;  %1798 = vmatpush.bf16.msra.mxu2 %v4473_v45  ;;  %v5688_v44 = vld [vmem:[%s8753_s1 + $0x524] sm:$0xf]  ;;  %v4518_v45 = vld [vmem:[%s8753_s1 + $0x530] sm:$0xf0]  ;;  %v4393_v55 = vor.u32 %v5656_v41, %v4390_v42 }
  0x94   : > { %1816 = vmatpush.bf16.msra.mxu3 %v4601_v46  ;;  %1295 = vmatmul.bf16.vlgmr.msrb.gmra.mxu0 %v6739_v12  ;;  %v4565_v12 = vor.u32 %v5702_v7, %v4564_v6  ;;  %v4372_v46 = vld [vmem:[%s8753_s1 + $0x400] sm:$0xf]  ;;  %v4521_v56 = vor.u32 %v5688_v44, %v4518_v45  ;;  %v5683_v6 = vld [vmem:[%s8753_s1 + $0x4f4] sm:$0xf0]  ;;  %v1427_v7 = vunpack.c.h.b16 %v1359_v48  ;;  %v4444_v45 = vld [vmem:[%s8753_s1 + $0x488] sm:$0xf] }
  0x95   : > { %1313 = vmatmul.bf16.vlgmr.msrb.gmra.mxu1 %v6743_v13  ;;  %1349 = vmatmul.bf16.vlgmr.msrb.gmra.mxu3 %v6743_v13  ;;  %v4548_v13 = vld [vmem:[%s8753_s1 + $0x560] sm:$0xf]  ;;  %v4373_v2 = vor.u32 %v5654_v51, %v4372_v46  ;;  %v5671_v46 = vld [vmem:[%s8753_s1 + $0x494] sm:$0xf0]  ;;  %v4572_v51 = vld [vmem:[%s8753_s1 + $0x588] sm:$0xf] }
  0x96   : > { %1763 = vmatpush.bf16.msra.mxu0 %v4453_v57  ;;  %v4549_v23 = vor.u32 %v5698_v17, %v4548_v13  ;;  %v5652_v57 = vld [vmem:[%s8753_s1 + $0x404] sm:$0xf]  ;;  %v4476_v17 = vld [vmem:[%s8753_s1 + $0x4c8] sm:$0xf]  ;;  %v1429_v19 = vpack.c.b16 %v369_v58, %v1427_v7  ;;  %v5709_v58 = vld [vmem:[%s8753_s1 + $0x5cc] sm:$0xf]  ;;  %v4573_v60 = vor.u32 %v5703_v52, %v4572_v51 }
  0x97   : > { %1781 = vmatpush.bf16.msra.mxu1 %v4581_v59  ;;  %1799 = vmatpush.bf16.msra.mxu2 %v4457_v1  ;;  %v4374_v59 = vld [vmem:[%s8753_s1 + $0x410] sm:$0xf0]  ;;  %v1426_v1 = vunpack.c.l.b16 %v1359_v48  ;;  %v4609_v31 = vor.u32 %v5709_v58, %v4606_v24  ;;  %v5687_v51 = vld [vmem:[%s8753_s1 + $0x514] sm:$0xf0]  ;;  %v5653_v52 = vld [vmem:[%s8753_s1 + $0x40c] sm:$0xf] }
  0x98   : > { %1817 = vmatpush.bf16.msra.mxu3 %v4585_v4  ;;  %v4492_v4 = vld [vmem:[%s8753_s1 + $0x4e8] sm:$0xf]  ;;  %v4377_v11 = vor.u32 %v5652_v57, %v4374_v59  ;;  %v1434_v29 = vrot.slane %v1429_v19, 2  ;;  %v4574_v57 = vld [vmem:[%s8753_s1 + $0x598] sm:$0xf0]  ;;  %v4445_v59 = vor.u32 %v5671_v46, %v4444_v45 }
  0x9a   : > { %1764 = vmatpush.bf16.msra.mxu0 %v4437_v10  ;;  %v5713_v10 = vld [vmem:[%s8753_s1 + $0x5ec] sm:$0xf]  ;;  %v7162_v41 = vsel %vm1430_vm2, %v1434_v29, %v7130_v32 }
  0x9b   : > { %1782 = vmatpush.bf16.msra.mxu1 %v4565_v12  ;;  %1800 = vmatpush.bf16.msra.mxu2 %v4441_v15  ;;  %v4622_v12 = vld [vmem:[%s8753_s1 + $0x5f8] sm:$0xf0]  ;;  %v1428_v15 = vpack.c.b16 %v368_v53, %v1426_v1  ;;  %v5711_v53 = vld [vmem:[%s8753_s1 + $0x5d4] sm:$0xf0] }
  0x9c   : > { %1818 = vmatpush.bf16.msra.mxu3 %v4569_v16  ;;  %v4493_v16 = vor.u32 %v5683_v6, %v4492_v4  ;;  %v4625_v21 = vor.u32 %v5713_v10, %v4622_v12  ;;  %v5667_v1 = vld [vmem:[%s8753_s1 + $0x474] sm:$0xf0]  ;;  %v4558_v10 = vld [vmem:[%s8753_s1 + $0x578] sm:$0xf0] }
  0x9d   : > { %v1431_v25 = vrot.slane %v1428_v15, 2  ;;  %v4429_v15 = vor.u32 %v5667_v1, %v4428_v0 }
  0x9e   : > { %1765 = vmatpush.bf16.msra.mxu0 %v4421_v22  ;;  %v4604_v22 = vld [vmem:[%s8753_s1 + $0x5c8] sm:$0xf] }
  0x9f   : > { %1783 = vmatpush.bf16.msra.mxu1 %v4549_v23  ;;  %1801 = vmatpush.bf16.msra.mxu2 %v4425_v26  ;;  %v5677_v23 = vld [vmem:[%s8753_s1 + $0x4cc] sm:$0xf]  ;;  %v4477_v26 = vor.u32 %v5679_v18, %v4476_v17  ;;  %v7158_v40 = vsel %vm1430_vm2, %v1431_v25, %v7127_v28  ;;  %v5663_v17 = vld [vmem:[%s8753_s1 + $0x454] sm:$0xf0]  ;;  %v4396_v25 = vld [vmem:[%s8753_s1 + $0x428] sm:$0xf] }
  0xa0   : > { %1819 = vmatpush.bf16.msra.mxu3 %v4553_v27  ;;  %v4605_v27 = vor.u32 %v5711_v53, %v4604_v22  ;;  %v4481_v30 = vor.u32 %v5677_v23, %v4478_v47  ;;  %v5661_v22 = vld [vmem:[%s8753_s1 + $0x44c] sm:$0xf]  ;;  %v4414_v53 = vld [vmem:[%s8753_s1 + $0x458] sm:$0xf0] }
  0xa1   : > { %v5693_v23 = vld [vmem:[%s8753_s1 + $0x54c] sm:$0xf]  ;;  %v4542_v47 = vld [vmem:[%s8753_s1 + $0x558] sm:$0xf0]  ;;  %v4417_v29 = vor.u32 %v5661_v22, %v4414_v53 }
  0xa2   : > { %1766 = vmatpush.bf16.msra.mxu0 %v4405_v35  ;;  %1336 = vmatmul.bf16.gmra.mxu2 %v6708_v61  ;;  %v5675_v35 = vld [vmem:[%s8753_s1 + $0x4b4] sm:$0xf0] }
  0xa3   : > { %1784 = vmatpush.bf16.msra.mxu1 %v4533_v37  ;;  %1802 = vmatpush.bf16.msra.mxu2 %v4409_v38  ;;  %v5707_v37 = vld [vmem:[%s8753_s1 + $0x5b4] sm:$0xf0]  ;;  %v4590_v38 = vld [vmem:[%s8753_s1 + $0x5b8] sm:$0xf0]  ;;  %v4461_v42 = vor.u32 %v5675_v35, %v4460_v34  ;;  %v5657_v35 = vld [vmem:[%s8753_s1 + $0x42c] sm:$0xf] }
  0xa4   : > { %1820 = vmatpush.bf16.msra.mxu3 %v4537_v39  ;;  %1300 = vmatmul.bf16.gmra.mxu0 %v6708_v61  ;;  %v4620_v61 = vld [vmem:[%s8753_s1 + $0x5e8] sm:$0xf]  ;;  %v4589_v44 = vor.u32 %v5707_v37, %v4588_v63  ;;  %v5691_v34 = vld [vmem:[%s8753_s1 + $0x534] sm:$0xf0]  ;;  %v4398_v37 = vld [vmem:[%s8753_s1 + $0x438] sm:$0xf0] }
  0xa5   : > { %1318 = vmatmul.bf16.gmra.mxu1 %v6711_v5  ;;  %1354 = vmatmul.bf16.gmra.mxu3 %v6711_v5  ;;  %v4494_v5 = vld [vmem:[%s8753_s1 + $0x4f8] sm:$0xf0]  ;;  %v4621_v13 = vor.u32 %v5715_v62, %v4620_v61  ;;  %v4556_v61 = vld [vmem:[%s8753_s1 + $0x568] sm:$0xf]  ;;  %v5699_v62 = vld [vmem:[%s8753_s1 + $0x574] sm:$0xf0]  ;;  %v4401_v46 = vor.u32 %v5657_v35, %v4398_v37 }
  0xa6   : > { %1767 = vmatpush.bf16.msra.mxu0 %v4389_v49  ;;  %v4497_v20 = vor.u32 %v5681_v8, %v4494_v5  ;;  %v4465_v49 = vor.u32 %v5673_v3, %v4462_v33  ;;  %v5665_v8 = vld [vmem:[%s8753_s1 + $0x46c] sm:$0xf]  ;;  %v4526_v33 = vld [vmem:[%s8753_s1 + $0x538] sm:$0xf0] }
  0xa7   : > { %1785 = vmatpush.bf16.msra.mxu1 %v4517_v50  ;;  %1803 = vmatpush.bf16.msra.mxu2 %v4393_v55  ;;  %v4593_v50 = vor.u32 %v5705_v36, %v4590_v38  ;;  %v4446_v55 = vld [vmem:[%s8753_s1 + $0x498] sm:$0xf0]  ;;  %v5697_v5 = vld [vmem:[%s8753_s1 + $0x56c] sm:$0xf] }
  0xa8   : > { %1821 = vmatpush.bf16.msra.mxu3 %v4521_v56  ;;  %v5701_v56 = vld [vmem:[%s8753_s1 + $0x58c] sm:$0xf]  ;;  %v4449_v6 = vor.u32 %v5669_v54, %v4446_v55  ;;  %v4561_v19 = vor.u32 %v5697_v5, %v4558_v10  ;;  %v4382_v54 = vld [vmem:[%s8753_s1 + $0x418] sm:$0xf0] }
  0xa9   : > { %v4577_v7 = vor.u32 %v5701_v56, %v4574_v57  ;;  %v5689_v3 = vld [vmem:[%s8753_s1 + $0x52c] sm:$0xf]  ;;  %v4510_v56 = vld [vmem:[%s8753_s1 + $0x518] sm:$0xf0]  ;;  %v4385_v0 = vor.u32 %v5653_v52, %v4382_v54 }
  0xaa   : > { %1768 = vmatpush.bf16.msra.mxu0 %v4373_v2  ;;  %v5685_v55 = vld [vmem:[%s8753_s1 + $0x50c] sm:$0xf] }
  0xab   : > { %1786 = vmatpush.bf16.msra.mxu1 %v4501_v9  ;;  %1804 = vmatpush.bf16.msra.mxu2 %v4377_v11  ;;  %v4430_v9 = vld [vmem:[%s8753_s1 + $0x478] sm:$0xf0]  ;;  %v4513_v1 = vor.u32 %v5685_v55, %v4510_v56  ;;  %v4740_v56 = vld [vmem:[%s8755_s3 + $0x260] sm:$0xf] }
  0xac   : > { %1822 = vmatpush.bf16.msra.mxu3 %v4505_v14  ;;  %v4433_v18 = vor.u32 %v5665_v8, %v4430_v9 }
  0xae   : > { %1833 = vmatpush.bf16.msrb.mxu0 %v4493_v16  ;;  %v4557_v16 = vor.u32 %v5699_v62, %v4556_v61 }
  0xaf   : > { %1851 = vmatpush.bf16.msrb.mxu1 %v4621_v13  ;;  %1869 = vmatpush.bf16.msrb.mxu2 %v4497_v20  ;;  %v4412_v13 = vld [vmem:[%s8753_s1 + $0x448] sm:$0xf] }
  0xb0   : > { %1887 = vmatpush.bf16.msrb.mxu3 %v4625_v21  ;;  %v4540_v20 = vld [vmem:[%s8753_s1 + $0x548] sm:$0xf]  ;;  %v5695_v21 = vld [vmem:[%s8753_s1 + $0x554] sm:$0xf0]  ;;  %v4413_v58 = vor.u32 %v5663_v17, %v4412_v13 }
  0xb1   : > { %v744_v39 = vpop.f32.mrf.mxu0  ;;  %v4541_v24 = vor.u32 %v5695_v21, %v4540_v20 }
  0xb2   : > { %1834 = vmatpush.bf16.msrb.mxu0 %v4477_v26  ;;  %v762_v43 = vpop.f32.mrf.mxu1  ;;  %1805 = vmatmul.bf16.vlgmr.msra.gmra.mxu2 %v7158_v40  ;;  %v5659_v26 = vld [vmem:[%s8753_s1 + $0x434] sm:$0xf0] }
  0xb3   : > { %1852 = vmatpush.bf16.msrb.mxu1 %v4605_v27  ;;  %1870 = vmatpush.bf16.msrb.mxu2 %v4481_v30  ;;  %v7170_v48 = vadd.f32 %v762_v43, %v744_v39  ;;  %v4545_v30 = vor.u32 %v5693_v23, %v4542_v47  ;;  %v4397_v39 = vor.u32 %v5659_v26, %v4396_v25 }
  0xb4   : > { %1888 = vmatpush.bf16.msrb.mxu3 %v4609_v31  ;;  %1769 = vmatmul.bf16.vlgmr.msra.gmra.mxu0 %v7158_v40  ;;  %v4524_v31 = vld [vmem:[%s8753_s1 + $0x528] sm:$0xf] }
  0xb5   : > { %1787 = vmatmul.bf16.vlgmr.msra.gmra.mxu1 %v7162_v41  ;;  %1823 = vmatmul.bf16.vlgmr.msra.gmra.mxu3 %v7162_v41  ;;  %v780_v4 = vpop.f32.mrf.mxu2  ;;  %v4525_v43 = vor.u32 %v5691_v34, %v4524_v31 }
  0xb6   : > { %1835 = vmatpush.bf16.msrb.mxu0 %v4461_v42  ;;  %v4380_v42 = vld [vmem:[%s8753_s1 + $0x408] sm:$0xf] }
  0xb7   : > { %1853 = vmatpush.bf16.msrb.mxu1 %v4589_v44  ;;  %1871 = vmatpush.bf16.msrb.mxu2 %v4465_v49  ;;  %v5655_v44 = vld [vmem:[%s8753_s1 + $0x414] sm:$0xf0]  ;;  %v4529_v49 = vor.u32 %v5689_v3, %v4526_v33 }
  0xb8   : > { %1889 = vmatpush.bf16.msrb.mxu3 %v4593_v50  ;;  %v798_v2 = vpop.f32.mrf.mxu3  ;;  %v4508_v50 = vld [vmem:[%s8753_s1 + $0x508] sm:$0xf]  ;;  %v4381_v57 = vor.u32 %v5655_v44, %v4380_v42  ;;  %v4748_v44 = vld [vmem:[%s8755_s3 + $0x270] sm:$0xf] }
  0xb9   : > { %v7218_v12 = vadd.f32 %v798_v2, %v780_v4  ;;  %v7220_v11 = vpop.f32.mrf.mxu0 }
  0xba   : > { %v7222_v14 = vpop.f32.mrf.mxu1  ;;  %1836 = vmatpush.bf16.msrb.mxu0 %v4445_v59  ;;  %v4509_v59 = vor.u32 %v5687_v51, %v4508_v50  ;;  %v5811_v51 = vld [vmem:[%s8755_s3 + $0x2f4] sm:$0xf0] }
  0xbb   : > { %1854 = vmatpush.bf16.msrb.mxu1 %v4573_v60  ;;  %1872 = vmatpush.bf16.msrb.mxu2 %v4449_v6 }
  0xbc   : > { %1890 = vmatpush.bf16.msrb.mxu3 %v4577_v7 }
  0xbd   : > { %v7254_v27 = vpop.f32.mrf.mxu2 }
  0xbe   : > { %1837 = vmatpush.bf16.msrb.mxu0 %v4429_v15 }
  0xbf   : > { %1855 = vmatpush.bf16.msrb.mxu1 %v4557_v16  ;;  %1873 = vmatpush.bf16.msrb.mxu2 %v4433_v18 }
  0xc0   : > { %1891 = vmatpush.bf16.msrb.mxu3 %v4561_v19  ;;  %v7265_v63 = vpop.f32.mrf.mxu3 }
  0xc1   : > { %v749_v36 = vpop.f32.mrf.mxu0 }
  0xc2   : > { %v767_v38 = vpop.f32.mrf.mxu1  ;;  %1838 = vmatpush.bf16.msrb.mxu0 %v4413_v58  ;;  %1810 = vmatmul.bf16.gmra.mxu2 %v7127_v28 }
  0xc3   : > { %1856 = vmatpush.bf16.msrb.mxu1 %v4541_v24  ;;  %v7282_v45 = vadd.f32 %v767_v38, %v749_v36  ;;  %1874 = vmatpush.bf16.msrb.mxu2 %v4417_v29 }
  0xc4   : > { %1892 = vmatpush.bf16.msrb.mxu3 %v4545_v30  ;;  %1774 = vmatmul.bf16.gmra.mxu0 %v7127_v28 }
  0xc5   : > { %1792 = vmatmul.bf16.gmra.mxu1 %v7130_v32  ;;  %1828 = vmatmul.bf16.gmra.mxu3 %v7130_v32  ;;  %v785_v60 = vpop.f32.mrf.mxu2 }
  0xc6   : > { %1839 = vmatpush.bf16.msrb.mxu0 %v4397_v39 }
  0xc7   : > { %1857 = vmatpush.bf16.msrb.mxu1 %v4525_v43  ;;  %1875 = vmatpush.bf16.msrb.mxu2 %v4401_v46  ;;  %v5795_v46 = vld [vmem:[%s8755_s3 + $0x274] sm:$0xf0] }
  0xc8   : > { %1893 = vmatpush.bf16.msrb.mxu3 %v4529_v49  ;;  %v803_v4 = vpop.f32.mrf.mxu3  ;;  %v4812_v49 = vld [vmem:[%s8755_s3 + $0x2f0] sm:$0xf] }
  0xc9   : > { %v804_v6 = vadd.f32 %v803_v4, %v785_v60  ;;  %v751_v7 = vpop.f32.mrf.mxu0  ;;  %v4813_v55 = vor.u32 %v5811_v51, %v4812_v49 }
  0xca   : > { %v769_v61 = vpop.f32.mrf.mxu1  ;;  %1840 = vmatpush.bf16.msrb.mxu0 %v4381_v57  ;;  %v5793_v57 = vld [vmem:[%s8755_s3 + $0x264] sm:$0xf0]  ;;  %v4732_v7 = vld [vmem:[%s8755_s3 + $0x250] sm:$0xf] }
  0xcb   : > { %1858 = vmatpush.bf16.msrb.mxu1 %v4509_v59  ;;  %1876 = vmatpush.bf16.msrb.mxu2 %v4385_v0  ;;  %v4804_v59 = vld [vmem:[%s8755_s3 + $0x2e0] sm:$0xf]  ;;  %v4741_v60 = vor.u32 %v5793_v57, %v4740_v56  ;;  %v5809_v0 = vld [vmem:[%s8755_s3 + $0x2e4] sm:$0xf0]  ;;  %v5791_v61 = vld [vmem:[%s8755_s3 + $0x254] sm:$0xf0] }
  0xcc   : > { %1894 = vmatpush.bf16.msrb.mxu3 %v4513_v1  ;;  %v4805_v1 = vor.u32 %v5809_v0, %v4804_v59  ;;  %v5783_v56 = vld [vmem:[%s8755_s3 + $0x214] sm:$0xf0]  ;;  %v4764_v57 = vld [vmem:[%s8755_s3 + $0x290] sm:$0xf] }
  0xcd   : > { %v787_v62 = vpop.f32.mrf.mxu2  ;;  %v5799_v0 = vld [vmem:[%s8755_s3 + $0x294] sm:$0xf0] }
  0xce   : > { %v4796_v62 = vld [vmem:[%s8755_s3 + $0x2d0] sm:$0xf] }
  0xcf   : > { %2544 = vmatpush.bf16.msra.mxu1 %v4813_v55  ;;  %v4700_v55 = vld [vmem:[%s8755_s3 + $0x210] sm:$0xf] }
  0xd0   : > { %v805_v8 = vpop.f32.mrf.mxu3 }
  0xd1   : > { %v816_v2 = vpop.f32.mrf.mxu0 }
  0xd2   : > { %v834_v9 = vpop.f32.mrf.mxu1  ;;  %1877 = vmatmul.bf16.vlgmr.msrb.gmra.mxu2 %v7158_v40 }
  0xd3   : > { %v7306_v5 = vadd.f32 %v834_v9, %v816_v2  ;;  %2545 = vmatpush.bf16.msra.mxu1 %v4805_v1  ;;  %v4733_v2 = vor.u32 %v5791_v61, %v4732_v7  ;;  %v5807_v9 = vld [vmem:[%s8755_s3 + $0x2d4] sm:$0xf0]  ;;  %v4692_v61 = vld [vmem:[%s8755_s3 + $0x200] sm:$0xf] }
  0xd4   : > { %1841 = vmatmul.bf16.vlgmr.msrb.gmra.mxu0 %v7158_v40 }
  0xd5   : > { %1859 = vmatmul.bf16.vlgmr.msrb.gmra.mxu1 %v7162_v41  ;;  %1895 = vmatmul.bf16.vlgmr.msrb.gmra.mxu3 %v7162_v41  ;;  %v852_v10 = vpop.f32.mrf.mxu2 }
  0xd8   : > { %v870_v15 = vpop.f32.mrf.mxu3 }
  0xd9   : > { %v7312_v16 = vadd.f32 %v870_v15, %v852_v10  ;;  %v7314_v13 = vpop.f32.mrf.mxu0 }
  0xda   : > { %v7316_v17 = vpop.f32.mrf.mxu1 }
  0xdd   : > { %v7318_v18 = vpop.f32.mrf.mxu2 }
  0xe0   : > { %v7320_v19 = vpop.f32.mrf.mxu3 }
  0xe1   : > { %v821_v20 = vpop.f32.mrf.mxu0 }
  0xe2   : > { %v839_v21 = vpop.f32.mrf.mxu1  ;;  %1882 = vmatmul.bf16.gmra.mxu2 %v7127_v28 }
  0xe3   : > { %v7322_v22 = vadd.f32 %v839_v21, %v821_v20  ;;  %v4797_v20 = vor.u32 %v5807_v9, %v4796_v62  ;;  %v5781_v62 = vld [vmem:[%s8755_s3 + $0x204] sm:$0xf0]  ;;  %v5794_v9 = vld [vmem:[%s8755_s3 + $0x274] sm:$0xf] }
  0xe4   : > { %1846 = vmatmul.bf16.gmra.mxu0 %v7127_v28 }
  0xe5   : > { %1864 = vmatmul.bf16.gmra.mxu1 %v7130_v32  ;;  %1900 = vmatmul.bf16.gmra.mxu3 %v7130_v32  ;;  %v857_v40 = vpop.f32.mrf.mxu2 }
  0xe6   : > { %2546 = vmatpush.bf16.msra.mxu1 %v4797_v20 }
  0xe8   : > { %v875_v41 = vpop.f32.mrf.mxu3 }
  0xe9   : > { %v7328_v53 = vadd.f32 %v875_v41, %v857_v40  ;;  %v823_v23 = vpop.f32.mrf.mxu0  ;;  %v4724_v40 = vld [vmem:[%s8755_s3 + $0x240] sm:$0xf]  ;;  %v5789_v41 = vld [vmem:[%s8755_s3 + $0x244] sm:$0xf0] }
  0xea   : > { %v841_v47 = vpop.f32.mrf.mxu1  ;;  %v4788_v23 = vld [vmem:[%s8755_s3 + $0x2c0] sm:$0xf] }
  0xeb   : > { %v4725_v47 = vor.u32 %v5789_v41, %v4724_v40  ;;  %v5810_v40 = vld [vmem:[%s8755_s3 + $0x2f4] sm:$0xf]  ;;  %v4814_v41 = vld [vmem:[%s8755_s3 + $0x2f8] sm:$0xf0] }
  0xed   : > { %v859_v58 = vpop.f32.mrf.mxu2 }
  0xf0   : > { %v877_v24 = vpop.f32.mrf.mxu3 }
  0xf1   : > { %v1224_v25 = vpop.f32.mrf.mxu0 }
  0xf2   : > { %v1225_v26 = vadd.f32 %v1224_v25, %v7170_v48  ;;  %v1242_v29 = vpop.f32.mrf.mxu1  ;;  %v837_v25 = vadd.f32 %v7316_v17, %v7314_v13 }
  0xf4   : > { %v7331_v30 = vadd.f32 %v1242_v29, %v1225_v26 }
  0xf5   : > { %v1260_v31 = vpop.f32.mrf.mxu2 }
  0xf6   : > { %v1261_v28 = vadd.f32 %v1260_v31, %v7218_v12  ;;  %v4716_v31 = vld [vmem:[%s8755_s3 + $0x230] sm:$0xf] }
  0xf8   : > { %v1278_v34 = vpop.f32.mrf.mxu3 }
  0xf9   : > { %v7334_v35 = vpop.f32.mrf.mxu0  ;;  %v7336_v32 = vadd.f32 %v1278_v34, %v1261_v28  ;;  %v5787_v28 = vld [vmem:[%s8755_s3 + $0x234] sm:$0xf0] }
  0xfa   : > { %v7338_v37 = vpop.f32.mrf.mxu1 }
  0xfd   : > { %v7340_v3 = vpop.f32.mrf.mxu2 }
 0x100   : > { %v7342_v33 = vpop.f32.mrf.mxu3 }
 0x101   : > { %v1229_v36 = vpop.f32.mrf.mxu0 }
 0x102   : > { %v1230_v48 = vadd.f32 %v1229_v36, %v7282_v45  ;;  %v1247_v38 = vpop.f32.mrf.mxu1  ;;  %v4749_v45 = vor.u32 %v5795_v46, %v4748_v44  ;;  %v4717_v36 = vor.u32 %v5787_v28, %v4716_v31  ;;  %v5785_v44 = vld [vmem:[%s8755_s3 + $0x224] sm:$0xf0]  ;;  %v4772_v46 = vld [vmem:[%s8755_s3 + $0x2a0] sm:$0xf]  ;;  %v4940_v31 = vld [vmem:[%s8755_s3 + $0x3f0] sm:$0xf] }
 0x103   : > { %v5792_v28 = vld [vmem:[%s8755_s3 + $0x264] sm:$0xf] }
 0x104   : > { %v7345_v39 = vadd.f32 %v1247_v38, %v1230_v48  ;;  %2530 = vmatpush.bf16.msra.mxu0 %v4749_v45  ;;  %v4780_v48 = vld [vmem:[%s8755_s3 + $0x2b0] sm:$0xf] }
 0x105   : > { %v1265_v43 = vpop.f32.mrf.mxu2 }
 0x106   : > { %v1266_v42 = vadd.f32 %v1265_v43, %v804_v6 }
 0x108   : > { %v1283_v12 = vpop.f32.mrf.mxu3  ;;  %2531 = vmatpush.bf16.msra.mxu0 %v4741_v60  ;;  %v4701_v60 = vor.u32 %v5783_v56, %v4700_v55  ;;  %v5790_v55 = vld [vmem:[%s8755_s3 + $0x254] sm:$0xf]  ;;  %v4734_v56 = vld [vmem:[%s8755_s3 + $0x258] sm:$0xf0] }
 0x109   : > { %v1231_v50 = vpop.f32.mrf.mxu0  ;;  %v7359_v52 = vadd.f32 %v1283_v12, %v1266_v42  ;;  %v4708_v12 = vld [vmem:[%s8755_s3 + $0x220] sm:$0xf] }
 0x10a   : > { %v1249_v54 = vpop.f32.mrf.mxu1  ;;  %v4709_v49 = vor.u32 %v5785_v44, %v4708_v12  ;;  %v5801_v50 = vld [vmem:[%s8755_s3 + $0x2a4] sm:$0xf0]  ;;  %v4868_v44 = vld [vmem:[%s8755_s3 + $0x360] sm:$0xf] }
 0x10b   : > { %v4773_v45 = vor.u32 %v5801_v50, %v4772_v46  ;;  %v5825_v46 = vld [vmem:[%s8755_s3 + $0x364] sm:$0xf0] }
 0x10c   : > { %2532 = vmatpush.bf16.msra.mxu0 %v4733_v2  ;;  %v4693_v2 = vor.u32 %v5781_v62, %v4692_v61  ;;  %v4869_v50 = vor.u32 %v5825_v46, %v4868_v44  ;;  %v4860_v62 = vld [vmem:[%s8755_s3 + $0x350] sm:$0xf]  ;;  %v4782_v44 = vld [vmem:[%s8755_s3 + $0x2b8] sm:$0xf0] }
 0x10d   : > { %v1267_v4 = vpop.f32.mrf.mxu2 }
 0x110   : > { %v1285_v6 = vpop.f32.mrf.mxu3  ;;  %2533 = vmatpush.bf16.msra.mxu0 %v4725_v47  ;;  %v4817_v47 = vor.u32 %v5810_v40, %v4814_v41  ;;  %v4726_v40 = vld [vmem:[%s8755_s3 + $0x248] sm:$0xf0] }
 0x111   : > { %v1296_v8 = vpop.f32.mrf.mxu0  ;;  %v4765_v6 = vor.u32 %v5799_v0, %v4764_v57  ;;  %v4798_v0 = vld [vmem:[%s8755_s3 + $0x2d8] sm:$0xf0] }
 0x112   : > { %v1297_v10 = vadd.f32 %v1296_v8, %v7306_v5  ;;  %v1314_v15 = vpop.f32.mrf.mxu1  ;;  %v5805_v5 = vld [vmem:[%s8755_s3 + $0x2c4] sm:$0xf0]  ;;  %v4756_v8 = vld [vmem:[%s8755_s3 + $0x280] sm:$0xf] }
 0x113   : > { %v4789_v58 = vor.u32 %v5805_v5, %v4788_v23 }
 0x114   : > { %v7386_v21 = vadd.f32 %v1314_v15, %v1297_v10  ;;  %2534 = vmatpush.bf16.msra.mxu0 %v4717_v36  ;;  %v4750_v10 = vld [vmem:[%s8755_s3 + $0x278] sm:$0xf0] }
 0x115   : > { %v1332_v24 = vpop.f32.mrf.mxu2  ;;  %2547 = vmatpush.bf16.msra.mxu1 %v4789_v58  ;;  %v4753_v20 = vor.u32 %v5794_v9, %v4750_v10  ;;  %v1950_v9 = vlaneseq }
 0x116   : > { %v1333_v26 = vadd.f32 %v1332_v24, %v7312_v16  ;;  %v5803_v16 = vld [vmem:[%s8755_s3 + $0x2b4] sm:$0xf0]  ;;  %v4876_v24 = vld [vmem:[%s8755_s3 + $0x370] sm:$0xf] }
 0x117   : > { %v4781_v43 = vor.u32 %v5803_v16, %v4780_v48  ;;  %v4742_v16 = vld [vmem:[%s8755_s3 + $0x268] sm:$0xf0] }
 0x118   : > { %v1350_v29 = vpop.f32.mrf.mxu3  ;;  %2535 = vmatpush.bf16.msra.mxu0 %v4709_v49  ;;  %v4932_v49 = vld [vmem:[%s8755_s3 + $0x3e0] sm:$0xf] }
 0x119   : > { %v1298_v34 = vpop.f32.mrf.mxu0  ;;  %v7415_v13 = vadd.f32 %v1350_v29, %v1333_v26  ;;  %2548 = vmatpush.bf16.msra.mxu1 %v4781_v43  ;;  %v4806_v43 = vld [vmem:[%s8755_s3 + $0x2e8] sm:$0xf0] }
 0x11a   : > { %v1299_v17 = vadd.f32 %v1298_v34, %v837_v25  ;;  %v1316_v38 = vpop.f32.mrf.mxu1  ;;  %v5827_v25 = vld [vmem:[%s8755_s3 + $0x374] sm:$0xf0] }
 0x11b   : > { %v4877_v29 = vor.u32 %v5827_v25, %v4876_v24 }
 0x11c   : > { %v7417_v42 = vadd.f32 %v1316_v38, %v1299_v17  ;;  %2536 = vmatpush.bf16.msra.mxu0 %v4701_v60  ;;  %v5808_v17 = vld [vmem:[%s8755_s3 + $0x2e4] sm:$0xf]  ;;  %v4745_v38 = vor.u32 %v5792_v28, %v4742_v16  ;;  %v5806_v60 = vld [vmem:[%s8755_s3 + $0x2d4] sm:$0xf]  ;;  %v5837_v16 = vld [vmem:[%s8755_s3 + $0x3c4] sm:$0xf0] }
 0x11d   : > { %v7431_v51 = vpop.f32.mrf.mxu2  ;;  %2549 = vmatpush.bf16.msra.mxu1 %v4773_v45  ;;  %2558 = vmatpush.bf16.msra.mxu2 %v4877_v29  ;;  %v4809_v12 = vor.u32 %v5808_v17, %v4806_v43  ;;  %v5841_v45 = vld [vmem:[%s8755_s3 + $0x3e4] sm:$0xf0]  ;;  %v4852_v29 = vld [vmem:[%s8755_s3 + $0x340] sm:$0xf]  ;;  %v5786_v17 = vld [vmem:[%s8755_s3 + $0x234] sm:$0xf] }
 0x11e   : > { %v4933_v57 = vor.u32 %v5841_v45, %v4932_v49 }
 0x120   : > { %v7433_v54 = vpop.f32.mrf.mxu3  ;;  %2537 = vmatpush.bf16.msra.mxu0 %v4693_v2  ;;  %v4924_v2 = vld [vmem:[%s8755_s3 + $0x3d0] sm:$0xf] }
 0x121   : > { %v1301_v59 = vpop.f32.mrf.mxu0  ;;  %2550 = vmatpush.bf16.msra.mxu1 %v4765_v6  ;;  %2559 = vmatpush.bf16.msra.mxu2 %v4869_v50  ;;  %v4801_v6 = vor.u32 %v5806_v60, %v4798_v0 }
 0x122   : > { %v1302_v1 = vadd.f32 %v1301_v59, %v7322_v22  ;;  %v1319_v4 = vpop.f32.mrf.mxu1  ;;  %v5797_v22 = vld [vmem:[%s8755_s3 + $0x284] sm:$0xf0]  ;;  %v4737_v59 = vor.u32 %v5790_v55, %v4734_v56  ;;  %v4844_v55 = vld [vmem:[%s8755_s3 + $0x330] sm:$0xf]  ;;  %v5819_v56 = vld [vmem:[%s8755_s3 + $0x334] sm:$0xf0] }
 0x123   : > { %v4757_v15 = vor.u32 %v5797_v22, %v4756_v8  ;;  %v5823_v8 = vld [vmem:[%s8755_s3 + $0x354] sm:$0xf0] }
 0x124   : > { %v7448_v7 = vadd.f32 %v1319_v4, %v1302_v1  ;;  %2586 = vmatpush.bf16.msrb.mxu0 %v4753_v20  ;;  %v7528_v4 = vld [vmem:[%s8754_s2] sm:$0xf]  ;;  %v4861_v10 = vor.u32 %v5823_v8, %v4860_v62  ;;  %v5788_v20 = vld [vmem:[%s8755_s3 + $0x244] sm:$0xf]  ;;  %v801_v62 = vadd.f32 %v7265_v63, %v7254_v27 }
 0x125   : > { %v1337_v23 = vpop.f32.mrf.mxu2  ;;  %2551 = vmatpush.bf16.msra.mxu1 %v4757_v15  ;;  %v5839_v15 = vld [vmem:[%s8755_s3 + $0x3d4] sm:$0xf0]  ;;  %v7555_v25 = vperm.slane %v7528_v4, 0 }
 0x126   : > { %v1338_v5 = vadd.f32 %v1337_v23, %v7328_v53  ;;  %v5843_v53 = vld [vmem:[%s8755_s3 + $0x3f4] sm:$0xf0]  ;;  %v4925_v23 = vor.u32 %v5839_v15, %v4924_v2  ;;  %2560 = vmatpush.bf16.msra.mxu2 %v4861_v10  ;;  %v4774_v10 = vld [vmem:[%s8755_s3 + $0x2a8] sm:$0xf0]  ;;  %v1263_v63 = vadd.f32 %v7340_v3, %v801_v62  ;;  %v5833_v3 = vld [vmem:[%s8755_s3 + $0x3a4] sm:$0xf0] }
 0x127   : > { %v4941_v48 = vor.u32 %v5843_v53, %v4940_v31  ;;  %v5821_v31 = vld [vmem:[%s8755_s3 + $0x344] sm:$0xf0]  ;;  %v4916_v53 = vld [vmem:[%s8755_s3 + $0x3c0] sm:$0xf] }
 0x128   : > { %v1355_v58 = vpop.f32.mrf.mxu3  ;;  %2587 = vmatpush.bf16.msrb.mxu0 %v4745_v38  ;;  %v765_v38 = vadd.f32 %v7222_v14, %v7220_v11  ;;  %v4917_v43 = vor.u32 %v5837_v16, %v4916_v53 }
 0x129   : > { %v1303_v26 = vpop.f32.mrf.mxu0  ;;  %2600 = vmatpush.bf16.msrb.mxu1 %v4817_v47  ;;  %v7490_v34 = vadd.f32 %v1355_v58, %v1338_v5  ;;  %2572 = vmatpush.bf16.msra.mxu3 %v4941_v48  ;;  %v4729_v47 = vor.u32 %v5788_v20, %v4726_v40  ;;  %v5804_v5 = vld [vmem:[%s8755_s3 + $0x2c4] sm:$0xf]  ;;  %v4790_v58 = vld [vmem:[%s8755_s3 + $0x2c8] sm:$0xf0]  ;;  %v4853_v48 = vor.u32 %v5821_v31, %v4852_v29 }
 0x12a   : > { %v1321_v36 = vpop.f32.mrf.mxu1  ;;  %v4793_v26 = vor.u32 %v5804_v5, %v4790_v58  ;;  %v1227_v14 = vadd.f32 %v7334_v35, %v765_v38  ;;  %v7601_v35 = vperm.slane %v7528_v4, 1  ;;  %v5817_v5 = vld [vmem:[%s8755_s3 + $0x324] sm:$0xf0] }
 0x12b   : > { %v7567_v36 = vshrl.u32 %v1950_v9, 7  ;;  %2561 = vmatpush.bf16.msra.mxu2 %v4853_v48  ;;  %v5800_v9 = vld [vmem:[%s8755_s3 + $0x2a4] sm:$0xf]  ;;  %v4766_v48 = vld [vmem:[%s8755_s3 + $0x298] sm:$0xf0] }
 0x12c   : > { %2588 = vmatpush.bf16.msrb.mxu0 %v4737_v59  ;;  %v1245_v27 = vadd.f32 %v7338_v37, %v1227_v14 }
 0x12d   : > { %2601 = vmatpush.bf16.msrb.mxu1 %v4809_v12  ;;  %v1339_v1 = vpop.f32.mrf.mxu2  ;;  %2573 = vmatpush.bf16.msra.mxu3 %v4933_v57  ;;  %v5802_v12 = vld [vmem:[%s8755_s3 + $0x2b4] sm:$0xf]  ;;  %v4908_v57 = vld [vmem:[%s8755_s3 + $0x3b0] sm:$0xf]  ;;  %v7598_v59 = vadd.s32 4294967295, %v7567_v36 }
 0x12e   : > { %v4785_v11 = vor.u32 %v5802_v12, %v4782_v44  ;;  %v4845_v1 = vor.u32 %v5819_v56, %v4844_v55  ;;  %v4828_v12 = vld [vmem:[%s8755_s3 + $0x310] sm:$0xf]  ;;  %v5815_v44 = vld [vmem:[%s8755_s3 + $0x314] sm:$0xf0]  ;;  %v5780_v55 = vld [vmem:[%s8755_s3 + $0x204] sm:$0xf] }
 0x12f   : > { %vm1957_vm3 = vcmp.ge.s32.totalorder %v7598_v59, 0  ;;  %v4829_v14 = vor.u32 %v5815_v44, %v4828_v12  ;;  %v5060_v59 = vld [vmem:[%s8755_s3 + $0xe0] sm:$0xf] }
 0x130   : > { %v1357_v61 = vpop.f32.mrf.mxu3  ;;  %2589 = vmatpush.bf16.msrb.mxu0 %v4729_v47  ;;  %2562 = vmatpush.bf16.msra.mxu2 %v4845_v1  ;;  %v4836_v47 = vld [vmem:[%s8755_s3 + $0x320] sm:$0xf]  ;;  %v4694_v1 = vld [vmem:[%s8755_s3 + $0x208] sm:$0xf0] }
 0x131   : > { %v1770_v22 = vpop.f32.mrf.mxu0  ;;  %2602 = vmatpush.bf16.msrb.mxu1 %v4801_v6  ;;  %2574 = vmatpush.bf16.msra.mxu3 %v4925_v23  ;;  %v5835_v6 = vld [vmem:[%s8755_s3 + $0x3b4] sm:$0xf0]  ;;  %v5784_v61 = vld [vmem:[%s8755_s3 + $0x224] sm:$0xf]  ;;  %v4777_v23 = vor.u32 %v5800_v9, %v4774_v10  ;;  %v4837_v37 = vor.u32 %v5817_v5, %v4836_v47  ;;  %v1953_v9 = vadd.s32 16, %v7567_v36 }
 0x132   : > { %v1788_v41 = vpop.f32.mrf.mxu1  ;;  %v4909_v2 = vor.u32 %v5835_v6, %v4908_v57  ;;  %v5796_v6 = vld [vmem:[%s8755_s3 + $0x284] sm:$0xf] }
 0x133   : > { %v1789_v24 = vadd.f32 %v1788_v41, %v1770_v22  ;;  %v4710_v22 = vld [vmem:[%s8755_s3 + $0x228] sm:$0xf0] }
 0x134   : > { %v4713_v41 = vor.u32 %v5784_v61, %v4710_v22  ;;  %2563 = vmatpush.bf16.msra.mxu2 %v4837_v37  ;;  %v4758_v61 = vld [vmem:[%s8755_s3 + $0x288] sm:$0xf0]  ;;  %v5842_v37 = vld [vmem:[%s8755_s3 + $0x3f4] sm:$0xf] }
 0x135   : > { %v1905_v28 = vadd.f32 %v1789_v24, %v7331_v30  ;;  %2603 = vmatpush.bf16.msrb.mxu1 %v4793_v26  ;;  %v4718_v30 = vld [vmem:[%s8755_s3 + $0x238] sm:$0xf0]  ;;  %v1806_v49 = vpop.f32.mrf.mxu2  ;;  %2575 = vmatpush.bf16.msra.mxu3 %v4917_v43  ;;  %v5782_v24 = vld [vmem:[%s8755_s3 + $0x214] sm:$0xf]  ;;  %v1281_v43 = vadd.f32 %v7342_v33, %v1263_v63  ;;  %v4761_v22 = vor.u32 %v5796_v6, %v4758_v61  ;;  %v5829_v63 = vld [vmem:[%s8755_s3 + $0x384] sm:$0xf0] }
 0x136   : > { %v4721_v50 = vor.u32 %v5786_v17, %v4718_v30  ;;  %v4702_v26 = vld [vmem:[%s8755_s3 + $0x218] sm:$0xf0] }
 0x137   : > { %v1926_v46 = vadd.f32 %v7555_v25, %v1905_v28  ;;  %v4705_v53 = vor.u32 %v5782_v24, %v4702_v26  ;;  %v5798_v28 = vld [vmem:[%s8755_s3 + $0x294] sm:$0xf] }
 0x138   : > { %v1824_v45 = vpop.f32.mrf.mxu3  ;;  %2590 = vmatpush.bf16.msrb.mxu0 %v4721_v50  ;;  %v4769_v38 = vor.u32 %v5798_v28, %v4766_v48  ;;  %2564 = vmatpush.bf16.msra.mxu2 %v4829_v14 }
 0x139   : > { %v1825_v60 = vadd.f32 %v1824_v45, %v1806_v49  ;;  %v1772_v0 = vpop.f32.mrf.mxu0  ;;  %2604 = vmatpush.bf16.msrb.mxu1 %v4785_v11  ;;  %v1938_v15 = vmax.f32 %v1926_v46, 0.0  ;;  %2576 = vmatpush.bf16.msra.mxu3 %v4909_v2  ;;  %v4892_v46 = vld [vmem:[%s8755_s3 + $0x390] sm:$0xf]  ;;  %v5831_v45 = vld [vmem:[%s8755_s3 + $0x394] sm:$0xf0]  ;;  %v4697_v2 = vor.u32 %v5780_v55, %v4694_v1 }
 0x13a   : > { %v1790_v8 = vpop.f32.mrf.mxu1 }
 0x13b   : > { %v1906_v20 = vadd.f32 %v1825_v60, %v7336_v32  ;;  %v1791_v40 = vadd.f32 %v1790_v8, %v1772_v0  ;;  %v4900_v32 = vld [vmem:[%s8755_s3 + $0x3a0] sm:$0xf]  ;;  %v1972_v49 = vsel %vm1957_vm3, %v1938_v15, 0.0  ;;  %v4893_v0 = vor.u32 %v5831_v45, %v4892_v46 }
 0x13c   : > { %2591 = vmatpush.bf16.msrb.mxu0 %v4713_v41  ;;  %v4901_v31 = vor.u32 %v5833_v3, %v4900_v32  ;;  %v4878_v41 = vld [vmem:[%s8755_s3 + $0x378] sm:$0xf0] }
 0x13d   : > { %v1927_v58 = vadd.f32 %v7601_v35, %v1906_v20  ;;  %v1909_v29 = vadd.f32 %v1791_v40, %v1245_v27  ;;  %2605 = vmatpush.bf16.msrb.mxu1 %v4777_v23  ;;  %v1808_v17 = vpop.f32.mrf.mxu2  ;;  %v4820_v20 = vld [vmem:[%s8755_s3 + $0x300] sm:$0xf]  ;;  %v5813_v40 = vld [vmem:[%s8755_s3 + $0x304] sm:$0xf0]  ;;  %v4942_v3 = vld [vmem:[%s8755_s3 + $0x3f8] sm:$0xf0] }
 0x13e   : > { %2577 = vmatpush.bf16.msra.mxu3 %v4901_v31  ;;  %v4884_v27 = vld [vmem:[%s8755_s3 + $0x380] sm:$0xf]  ;;  %v4821_v36 = vor.u32 %v5813_v40, %v4820_v20  ;;  %v4945_v26 = vor.u32 %v5842_v37, %v4942_v3  ;;  %v5836_v40 = vld [vmem:[%s8755_s3 + $0x3c4] sm:$0xf]  ;;  %v7789_v3 = vperm.slane %v7528_v4, 3 }
 0x13f   : > { %v1939_v16 = vmax.f32 %v1927_v58, 0.0  ;;  %v1930_v57 = vadd.f32 %v7555_v25, %v1909_v29  ;;  %v4885_v32 = vor.u32 %v5829_v63, %v4884_v27  ;;  %v4918_v27 = vld [vmem:[%s8755_s3 + $0x3c8] sm:$0xf0] }
 0x140   : > { %v1826_v30 = vpop.f32.mrf.mxu3  ;;  %2592 = vmatpush.bf16.msrb.mxu0 %v4705_v53  ;;  %2565 = vmatpush.bf16.msra.mxu2 %v4821_v36  ;;  %v7712_v53 = vadd.s32 4294967295, %v1953_v9  ;;  %v873_v36 = vadd.f32 %v7320_v19, %v7318_v18  ;;  %v4921_v63 = vor.u32 %v5836_v40, %v4918_v27  ;;  %v5818_v18 = vld [vmem:[%s8755_s3 + $0x334] sm:$0xf]  ;;  %v4846_v19 = vld [vmem:[%s8755_s3 + $0x338] sm:$0xf0] }
 0x141   : > { %v1973_v33 = vsel %vm1957_vm3, %v1939_v16, 0.0  ;;  %v1827_v50 = vadd.f32 %v1826_v30, %v1808_v17  ;;  %v1775_v11 = vpop.f32.mrf.mxu0  ;;  %2606 = vmatpush.bf16.msrb.mxu1 %v4769_v38  ;;  %v1942_v23 = vmax.f32 %v1930_v57, 0.0  ;;  %v5824_v17 = vld [vmem:[%s8755_s3 + $0x364] sm:$0xf]  ;;  %v4870_v38 = vld [vmem:[%s8755_s3 + $0x368] sm:$0xf0] }
 0x142   : > { %v7669_v56 = vpack.c.bf16 %v1973_v33, %v1972_v49  ;;  %v1793_v60 = vpop.f32.mrf.mxu1  ;;  %2578 = vmatpush.bf16.msra.mxu3 %v4893_v0  ;;  %v4934_v30 = vld [vmem:[%s8755_s3 + $0x3e8] sm:$0xf0]  ;;  %v4873_v12 = vor.u32 %v5824_v17, %v4870_v38  ;;  %vm1962_vm4 = vcmp.lt.s32.totalorder %v7712_v53, 16  ;;  %v5822_v33 = vld [vmem:[%s8755_s3 + $0x354] sm:$0xf] }
 0x143   : > { %v1910_v62 = vadd.f32 %v1827_v50, %v1281_v43  ;;  %v1794_v8 = vadd.f32 %v1793_v60, %v1775_v11  ;;  %v5838_v50 = vld [vmem:[%s8755_s3 + $0x3d4] sm:$0xf]  ;;  %v7807_v17 = vld [vmem:[%s8755_s3 + $0xf0] sm:$0xf]  ;;  %v4894_v40 = vld [vmem:[%s8755_s3 + $0x398] sm:$0xf0] }
 0x144   : > { %1990 = vst [vmem:[#allocation2 + $0x28] sm:$0xff] %v7669_v56  ;;  %2593 = vmatpush.bf16.msrb.mxu0 %v4697_v2  ;;  %v5820_v2 = vld [vmem:[%s8755_s3 + $0x344] sm:$0xf]  ;;  %v5737_v53 = vld [vmem:[%s8755_s3 + $0xa4] sm:$0xf0] }
 0x145   : > { %v1931_v10 = vadd.f32 %v7601_v35, %v1910_v62  ;;  %v1913_v15 = vadd.f32 %v1794_v8, %v7345_v39  ;;  %2607 = vmatpush.bf16.msrb.mxu1 %v4761_v22  ;;  %v5826_v39 = vld [vmem:[%s8755_s3 + $0x374] sm:$0xf]  ;;  %v1811_v5 = vpop.f32.mrf.mxu2  ;;  %v4854_v22 = vld [vmem:[%s8755_s3 + $0x348] sm:$0xf0] }
 0x146   : > { %v4881_v58 = vor.u32 %v5826_v39, %v4878_v41  ;;  %2579 = vmatpush.bf16.msra.mxu3 %v4885_v32  ;;  %v4857_v20 = vor.u32 %v5820_v2, %v4854_v22  ;;  %v7765_v41 = vperm.slane %v7528_v4, 2  ;;  %v4849_v32 = vor.u32 %v5818_v18, %v4846_v19  ;;  %v7802_v4 = vld [vmem:[%s8755_s3 + $0x74] sm:$0xf0]  ;;  %v5830_v2 = vld [vmem:[%s8755_s3 + $0x394] sm:$0xf] }
 0x147   : > { %v1943_v47 = vmax.f32 %v1931_v10, 0.0  ;;  %v1934_v31 = vadd.f32 %v7555_v25, %v1913_v15  ;;  %v5840_v25 = vld [vmem:[%s8755_s3 + $0x3e4] sm:$0xf]  ;;  %v2137_v10 = vunpack.c.l.b16 %v7669_v56  ;;  %v2138_v15 = vunpack.c.h.b16 %v7669_v56 }
 0x148   : > { %v1829_v24 = vpop.f32.mrf.mxu3  ;;  %2614 = vmatpush.bf16.msrb.mxu2 %v4881_v58  ;;  %v4937_v44 = vor.u32 %v5840_v25, %v4934_v30  ;;  %v4910_v58 = vld [vmem:[%s8755_s3 + $0x3b8] sm:$0xf0]  ;;  %v5816_v25 = vld [vmem:[%s8755_s3 + $0x324] sm:$0xf]  ;;  %v4897_v18 = vor.u32 %v5830_v2, %v4894_v40  ;;  %v5044_v40 = vld [vmem:[%s8755_s3 + $0xc0] sm:$0xf] }
 0x149   : > { %v7709_v29 = vpack.c.bf16 %v1943_v47, %v1942_v23  ;;  %v1830_v28 = vadd.f32 %v1829_v24, %v1811_v5  ;;  %v1777_v48 = vpop.f32.mrf.mxu0  ;;  %v1946_v46 = vmax.f32 %v1934_v31, 0.0  ;;  %v1335_v47 = vadd.f32 %v7431_v51, %v873_v36  ;;  %v7794_v24 = vld [vmem:[%s8755_s3 + $0x70] sm:$0xf]  ;;  %v5832_v30 = vld [vmem:[%s8755_s3 + $0x3a4] sm:$0xf] }
 0x14a   : > { %v1795_v16 = vpop.f32.mrf.mxu1  ;;  %2628 = vmatpush.bf16.msrb.mxu3 %v4945_v26 }
 0x14b   : > { %v1914_v43 = vadd.f32 %v1830_v28, %v7359_v52  ;;  %v4862_v52 = vld [vmem:[%s8755_s3 + $0x358] sm:$0xf0]  ;;  %v1980_v60 = vsel %vm1962_vm4, %v1946_v46, 0.0  ;;  %v2141_v6 = vunpack.c.l.b16 %v7709_v29  ;;  %v2142_v61 = vunpack.c.h.b16 %v7709_v29 }
 0x14c   : > { %2615 = vmatpush.bf16.msrb.mxu2 %v4873_v12  ;;  %v4865_v55 = vor.u32 %v5822_v33, %v4862_v52  ;;  %v1353_v12 = vadd.f32 %v7433_v54, %v1335_v47  ;;  %v7823_v33 = vld [vmem:[%s8755_s3 + $0xf4] sm:$0xf0] }
 0x14d   : > { %v1935_v49 = vadd.f32 %v7601_v35, %v1914_v43  ;;  %v1813_v14 = vpop.f32.mrf.mxu2  ;;  %v4926_v35 = vld [vmem:[%s8755_s3 + $0x3d8] sm:$0xf0]  ;;  %v7769_v56 = vpack.c.b16 %v2141_v6, %v2137_v10  ;;  %v7773_v23 = vpack.c.b16 %v2142_v61, %v2138_v15  ;;  %v4838_v43 = vld [vmem:[%s8755_s3 + $0x328] sm:$0xf0] }
 0x14e   : > { %2629 = vmatpush.bf16.msrb.mxu3 %v4937_v44  ;;  %v4929_v57 = vor.u32 %v5838_v50, %v4926_v35  ;;  %v4841_v52 = vor.u32 %v5816_v25, %v4838_v43  ;;  %v4902_v50 = vld [vmem:[%s8755_s3 + $0x3a8] sm:$0xf0]  ;;  %v5005_v35 = vor.u32 %v7802_v4, %v7794_v24 }
 0x14f   : > { %v1947_v11 = vmax.f32 %v1935_v49, 0.0  ;;  %v2161_v48 = vshll.u32 %v7769_v56, 16  ;;  %v2173_v16 = vshll.u32 %v7773_v23, 16  ;;  %v4905_v54 = vor.u32 %v5832_v30, %v4902_v50  ;;  %v3078_v25 = vld [vmem:[#allocation2 + $0x28] sm:$0xee] }
 0x150   : > { %v1831_v45 = vpop.f32.mrf.mxu3  ;;  %2616 = vmatpush.bf16.msrb.mxu2 %v4865_v55  ;;  %v2159_v15 = vshrl.u32 %v7769_v56, 16 }
 0x151   : > { %v1981_v0 = vsel %vm1962_vm4, %v1947_v11, 0.0  ;;  %v1842_v1 = vpop.f32.mrf.mxu0  ;;  %v2163_v55 = vrot.slane %v2161_v48, 1 }
 0x152   : > { %v1988_v62 = vpack.c.bf16 %v1981_v0, %v1980_v60  ;;  %v1860_v8 = vpop.f32.mrf.mxu1  ;;  %2630 = vmatpush.bf16.msrb.mxu3 %v4929_v57  ;;  %v2175_v57 = vrot.slane %v2173_v16, 1 }
 0x153   : > { %v1861_v9 = vadd.f32 %v1860_v8, %v1842_v1  ;;  %v5069_v1 = vor.u32 %v7823_v33, %v7807_v17  ;;  %v4830_v8 = vld [vmem:[%s8755_s3 + $0x318] sm:$0xf0]  ;;  %v5812_v17 = vld [vmem:[%s8755_s3 + $0x304] sm:$0xf] }
 0x154   : > { %1994 = vst [vmem:[#allocation2 + $0x18] sm:$0x11] %v1988_v62  ;;  %2617 = vmatpush.bf16.msrb.mxu2 %v4857_v20  ;;  %v5814_v62 = vld [vmem:[%s8755_s3 + $0x314] sm:$0xf] }
 0x155   : > { %v1907_v39 = vadd.f32 %v1861_v9, %v7386_v21  ;;  %v5834_v21 = vld [vmem:[%s8755_s3 + $0x3b4] sm:$0xf]  ;;  %v1878_v5 = vpop.f32.mrf.mxu2  ;;  %v4833_v20 = vor.u32 %v5814_v62, %v4830_v8  ;;  %v4980_v8 = vld [vmem:[%s8755_s3 + $0x40] sm:$0xf] }
 0x156   : > { %2631 = vmatpush.bf16.msrb.mxu3 %v4921_v63  ;;  %v4913_v26 = vor.u32 %v5834_v21, %v4910_v58  ;;  %v2171_v63 = vshrl.u32 %v7773_v23, 16  ;;  %v5729_v58 = vld [vmem:[%s8755_s3 + $0x64] sm:$0xf0] }
 0x157   : > { %v1928_v31 = vadd.f32 %v7765_v41, %v1907_v39 }
 0x158   : > { %v1896_v37 = vpop.f32.mrf.mxu3  ;;  %2618 = vmatpush.bf16.msrb.mxu2 %v4849_v32  ;;  %v4996_v32 = vld [vmem:[%s8755_s3 + $0x60] sm:$0xf] }
 0x159   : > { %v1897_v28 = vadd.f32 %v1896_v37, %v1878_v5  ;;  %v1844_v51 = vpop.f32.mrf.mxu0  ;;  %v1940_v45 = vmax.f32 %v1928_v31, 0.0  ;;  %v2164_v5 = vor.u32 %v2163_v55, %v2159_v15  ;;  %v2176_v31 = vor.u32 %v2175_v57, %v2171_v63 }
 0x15a   : > { %v1862_v38 = vpop.f32.mrf.mxu1  ;;  %2632 = vmatpush.bf16.msrb.mxu3 %v4913_v26  ;;  %v4997_v50 = vor.u32 %v5729_v58, %v4996_v32 }
 0x15b   : > { %v1908_v44 = vadd.f32 %v1897_v28, %v7415_v13  ;;  %v1863_v46 = vadd.f32 %v1862_v38, %v1844_v51  ;;  %v2064_v49 = vld [vmem:[#allocation2 + $0x18] sm:$0x11]  ;;  %v1974_v19 = vsel %vm1957_vm3, %v1940_v45, 0.0  ;;  %v5745_v51 = vld [vmem:[%s8755_s3 + $0xe4] sm:$0xf0]  ;;  %v3147_v45 = vunpack.c.l.b16 %v3078_v25 }
 0x15c   : > { %v2145_v11 = vunpack.c.l.b16 %v2064_v49  ;;  %v2146_v14 = vunpack.c.h.b16 %v2064_v49  ;;  %2619 = vmatpush.bf16.msrb.mxu2 %v4841_v52  ;;  %v4822_v38 = vld [vmem:[%s8755_s3 + $0x308] sm:$0xf0] }
 0x15d   : > { %v1929_v13 = vadd.f32 %v7789_v3, %v1908_v44  ;;  %v1911_v9 = vadd.f32 %v1863_v46, %v7417_v42  ;;  %v1880_v10 = vpop.f32.mrf.mxu2  ;;  %v4825_v44 = vor.u32 %v5812_v17, %v4822_v38  ;;  %v4886_v46 = vld [vmem:[%s8755_s3 + $0x388] sm:$0xf0] }
 0x15e   : > { %v7831_v60 = vpack.c.b16 %v2145_v11, %v2145_v11  ;;  %v7833_v0 = vpack.c.b16 %v2146_v14, %v2146_v14  ;;  %2633 = vmatpush.bf16.msrb.mxu3 %v4905_v54  ;;  %v5061_v11 = vor.u32 %v5745_v51, %v5060_v59  ;;  %v4988_v14 = vld [vmem:[%s8755_s3 + $0x50] sm:$0xf]  ;;  %v5727_v54 = vld [vmem:[%s8755_s3 + $0x54] sm:$0xf0] }
 0x15f   : > { %v1941_v22 = vmax.f32 %v1929_v13, 0.0  ;;  %v1932_v48 = vadd.f32 %v7765_v41, %v1911_v9  ;;  %v3148_v13 = vunpack.c.h.b16 %v3078_v25  ;;  %v4989_v15 = vor.u32 %v5727_v54, %v4988_v14  ;;  %v5036_v51 = vld [vmem:[%s8755_s3 + $0xb0] sm:$0xf]  ;;  %v5719_v14 = vld [vmem:[%s8755_s3 + $0x14] sm:$0xf0] }
 0x160   : > { %v1898_v27 = vpop.f32.mrf.mxu3  ;;  %v2166_v36 = vshll.u32 %v7831_v60, 16  ;;  %v2178_v39 = vshll.u32 %v7833_v0, 16  ;;  %2620 = vmatpush.bf16.msrb.mxu2 %v4833_v20  ;;  %v5725_v20 = vld [vmem:[%s8755_s3 + $0x44] sm:$0xf0]  ;;  %v5020_v54 = vld [vmem:[%s8755_s3 + $0x90] sm:$0xf] }
 0x161   : > { %v1975_v42 = vsel %vm1957_vm3, %v1941_v22, 0.0  ;;  %v1899_v21 = vadd.f32 %v1898_v27, %v1880_v10  ;;  %v1847_v47 = vpop.f32.mrf.mxu0  ;;  %v5741_v27 = vld [vmem:[%s8755_s3 + $0xc4] sm:$0xf0] }
 0x162   : > { %v7864_v37 = vpack.c.bf16 %v1975_v42, %v1974_v19  ;;  %v1865_v24 = vpop.f32.mrf.mxu1  ;;  %v2168_v26 = vrot.slane %v2166_v36, 1  ;;  %v2180_v28 = vrot.slane %v2178_v39, 1  ;;  %2634 = vmatpush.bf16.msrb.mxu3 %v4897_v18  ;;  %v3151_v39 = vpack.c.b16 %v2141_v6, %v3147_v45  ;;  %v4972_v6 = vld [vmem:[%s8755_s3 + $0x30] sm:$0xf]  ;;  %v5717_v45 = vld [vmem:[%s8755_s3 + $0x4] sm:$0xf0] }
 0x163   : > { %v1912_v16 = vadd.f32 %v1899_v21, %v1353_v12  ;;  %v1866_v4 = vadd.f32 %v1865_v24, %v1847_v47  ;;  %v5828_v12 = vld [vmem:[%s8755_s3 + $0x384] sm:$0xf]  ;;  %v3152_v18 = vpack.c.b16 %v2142_v61, %v3148_v13  ;;  %v5045_v32 = vor.u32 %v5741_v27, %v5044_v40  ;;  %v5723_v61 = vld [vmem:[%s8755_s3 + $0x34] sm:$0xf0]  ;;  %v5012_v13 = vld [vmem:[%s8755_s3 + $0x80] sm:$0xf] }
 0x164   : > { %1991 = vst [vmem:[#allocation2 + $0x10] sm:$0xff] %v7864_v37  ;;  %v7881_v43 = vsel %vm2157_vm5, %v2164_v5, %v2168_v26  ;;  %v7884_v30 = vsel %vm2157_vm5, %v2176_v31, %v2180_v28  ;;  %v4889_v52 = vor.u32 %v5828_v12, %v4886_v46  ;;  %2621 = vmatpush.bf16.msrb.mxu2 %v4825_v44  ;;  %v2140_v21 = vunpack.c.h.b16 %v7864_v37  ;;  %v4964_v12 = vld [vmem:[%s8755_s3 + $0x20] sm:$0xf]  ;;  %v5721_v46 = vld [vmem:[%s8755_s3 + $0x24] sm:$0xf0] }
 0x165   : > { %v1933_v49 = vadd.f32 %v7789_v3, %v1912_v16  ;;  %v1915_v33 = vadd.f32 %v1866_v4, %v7448_v7  ;;  %2538 = vmatmul.bf16.vlgmr.msra.gmra.mxu0 %v7881_v43  ;;  %2552 = vmatmul.bf16.vlgmr.msra.gmra.mxu1 %v7884_v30  ;;  %v1944_v7 = vmax.f32 %v1932_v48, 0.0  ;;  %v1883_v57 = vpop.f32.mrf.mxu2  ;;  %v4981_v5 = vor.u32 %v5725_v20, %v4980_v8  ;;  %v5739_v48 = vld [vmem:[%s8755_s3 + $0xb4] sm:$0xf0]  ;;  %v5070_v20 = vld [vmem:[%s8755_s3 + $0xf8] sm:$0xf0] }
 0x166   : > { %2966 = vmatpush.bf16.msra.mxu0 %v5005_v35  ;;  %2980 = vmatpush.bf16.msra.mxu1 %v5069_v1  ;;  %v5052_v35 = vld [vmem:[%s8755_s3 + $0xd0] sm:$0xf]  ;;  %v5743_v1 = vld [vmem:[%s8755_s3 + $0xd4] sm:$0xf0]  ;;  %v3158_v26 = vrot.slane %v3152_v18, 1  ;;  %v3159_v31 = vrot.slane %v7833_v0, 1  ;;  %v4973_v25 = vor.u32 %v5723_v61, %v4972_v6  ;;  %v5037_v44 = vor.u32 %v5739_v48, %v5036_v51 }
 0x167   : > { %v1945_v55 = vmax.f32 %v1933_v49, 0.0  ;;  %2635 = vmatpush.bf16.msrb.mxu3 %v4889_v52  ;;  %v1936_v22 = vadd.f32 %v7765_v41, %v1915_v33  ;;  %v5053_v63 = vor.u32 %v5743_v1, %v5052_v35  ;;  %v2139_v41 = vunpack.c.l.b16 %v7864_v37  ;;  %v5028_v49 = vld [vmem:[%s8755_s3 + $0xa0] sm:$0xf]  ;;  %v5733_v1 = vld [vmem:[%s8755_s3 + $0x84] sm:$0xf0] }
 0x168   : > { %v1901_v62 = vpop.f32.mrf.mxu3  ;;  %v3155_v37 = vrot.slane %v3151_v39, 1  ;;  %v7959_v17 = vsel %vm884_vm1, %v3158_v26, %v3159_v31  ;;  %v4965_v33 = vor.u32 %v5721_v46, %v4964_v12  ;;  %v5029_v52 = vor.u32 %v5737_v53, %v5028_v49  ;;  %v5062_v51 = vld [vmem:[%s8755_s3 + $0xe8] sm:$0xf0]  ;;  %v5124_v49 = vld [vmem:[%s8755_s3 + $0x160] sm:$0xf] }
 0x169   : > { %v7911_v2 = vpack.c.bf16 %v1945_v55, %v1944_v7  ;;  %v1902_v9 = vadd.f32 %v1901_v62, %v1883_v57  ;;  %v1849_v10 = vpop.f32.mrf.mxu0  ;;  %v1948_v58 = vmax.f32 %v1936_v22, 0.0  ;;  %v5730_v62 = vld [vmem:[%s8755_s3 + $0x74] sm:$0xf]  ;;  %v5013_v39 = vor.u32 %v5733_v1, %v5012_v13  ;;  %v5761_v53 = vld [vmem:[%s8755_s3 + $0x164] sm:$0xf0] }
 0x16a   : > { %2967 = vmatpush.bf16.msra.mxu0 %v4997_v50  ;;  %2981 = vmatpush.bf16.msra.mxu1 %v5061_v11  ;;  %v1867_v36 = vpop.f32.mrf.mxu1  ;;  %v4956_v50 = vld [vmem:[%s8755_s3 + $0x10] sm:$0xf]  ;;  %v5746_v10 = vld [vmem:[%s8755_s3 + $0xf4] sm:$0xf]  ;;  %v4990_v13 = vld [vmem:[%s8755_s3 + $0x58] sm:$0xf0] }
 0x16b   : > { %v1916_v19 = vadd.f32 %v1902_v9, %v7490_v34  ;;  %v2143_v42 = vunpack.c.l.b16 %v7911_v2  ;;  %v2144_v47 = vunpack.c.h.b16 %v7911_v2  ;;  %v3079_v11 = vld [vmem:[#allocation2 + $0x10] sm:$0xee]  ;;  %v4957_v57 = vor.u32 %v5719_v14, %v4956_v50  ;;  %v5006_v9 = vld [vmem:[%s8755_s3 + $0x78] sm:$0xf0]  ;;  %v5728_v2 = vld [vmem:[%s8755_s3 + $0x64] sm:$0xf] }
 0x16c   : > { %v3149_v7 = vunpack.c.l.b16 %v3079_v11  ;;  %v3150_v55 = vunpack.c.h.b16 %v3079_v11  ;;  %v5132_v36 = vld [vmem:[%s8755_s3 + $0x170] sm:$0xf]  ;;  %v5009_v6 = vor.u32 %v5730_v62, %v5006_v9  ;;  %v5073_v61 = vor.u32 %v5746_v10, %v5070_v20  ;;  %v5759_v62 = vld [vmem:[%s8755_s3 + $0x154] sm:$0xf0]  ;;  %v4982_v20 = vld [vmem:[%s8755_s3 + $0x48] sm:$0xf0] }
 0x16d   : > { %v1937_v24 = vadd.f32 %v7789_v3, %v1916_v19  ;;  %v7938_v29 = vpack.c.b16 %v2143_v42, %v2139_v41  ;;  %v7942_v34 = vpack.c.b16 %v2144_v47, %v2140_v21  ;;  %v3156_v3 = vrot.slane %v7831_v60, 1  ;;  %v1885_v59 = vpop.f32.mrf.mxu2  ;;  %v5116_v1 = vld [vmem:[%s8755_s3 + $0x150] sm:$0xf]  ;;  %v5775_v10 = vld [vmem:[%s8755_s3 + $0x1d4] sm:$0xf0] }
 0x16e   : > { %2968 = vmatpush.bf16.msra.mxu0 %v4989_v15  ;;  %2982 = vmatpush.bf16.msra.mxu1 %v5053_v63  ;;  %v1982_v60 = vsel %vm1962_vm4, %v1948_v58, 0.0  ;;  %v5763_v63 = vld [vmem:[%s8755_s3 + $0x174] sm:$0xf0]  ;;  %v3153_v18 = vpack.c.b16 %v2143_v42, %v3149_v7  ;;  %v3154_v19 = vpack.c.b16 %v2144_v47, %v3150_v55  ;;  %v4998_v47 = vld [vmem:[%s8755_s3 + $0x68] sm:$0xf0] }
 0x16f   : > { %v1949_v28 = vmax.f32 %v1937_v24, 0.0  ;;  %v7956_v4 = vsel %vm884_vm1, %v3155_v37, %v3156_v3  ;;  %v2185_v8 = vshll.u32 %v7938_v29, 16  ;;  %v2197_v22 = vshll.u32 %v7942_v34, 16  ;;  %v5196_v24 = vld [vmem:[%s8755_s3 + $0x1f0] sm:$0xf] }
 0x170   : > { %v1903_v16 = vpop.f32.mrf.mxu3  ;;  %v5133_v37 = vor.u32 %v5763_v63, %v5132_v36  ;;  %v5779_v42 = vld [vmem:[%s8755_s3 + $0x1f4] sm:$0xf0]  ;;  %v2183_v3 = vshrl.u32 %v7938_v29, 16  ;;  %v2195_v31 = vshrl.u32 %v7942_v34, 16  ;;  %v5744_v59 = vld [vmem:[%s8755_s3 + $0xe4] sm:$0xf]  ;;  %v5001_v14 = vor.u32 %v5728_v2, %v4998_v47 }
 0x171   : > { %v1983_v0 = vsel %vm1962_vm4, %v1949_v28, 0.0  ;;  %v2199_v58 = vrot.slane %v2197_v22, 1  ;;  %v3161_v48 = vrot.slane %v3153_v18, 1  ;;  %v5197_v46 = vor.u32 %v5779_v42, %v5196_v24  ;;  %v5742_v7 = vld [vmem:[%s8755_s3 + $0xd4] sm:$0xf] }
 0x172   : > { %v1989_v38 = vpack.c.bf16 %v1983_v0, %v1982_v60  ;;  %2969 = vmatpush.bf16.msra.mxu0 %v4981_v5  ;;  %2983 = vmatpush.bf16.msra.mxu1 %v5045_v32  ;;  %v2187_v5 = vrot.slane %v2185_v8, 1  ;;  %v3164_v60 = vrot.slane %v3154_v19, 1  ;;  %v5054_v55 = vld [vmem:[%s8755_s3 + $0xd8] sm:$0xf0]  ;;  %v5180_v9 = vld [vmem:[%s8755_s3 + $0x1d0] sm:$0xf]  ;;  %v5117_v36 = vor.u32 %v5759_v62, %v5116_v1 }
 0x173   : > { %v5057_v22 = vor.u32 %v5742_v7, %v5054_v55  ;;  %v5181_v63 = vor.u32 %v5775_v10, %v5180_v9  ;;  %v5738_v24 = vld [vmem:[%s8755_s3 + $0xb4] sm:$0xf]  ;;  %v5100_v42 = vld [vmem:[%s8755_s3 + $0x130] sm:$0xf]  ;;  %v5755_v2 = vld [vmem:[%s8755_s3 + $0x134] sm:$0xf0] }
 0x174   : > { %1995 = vst [vmem:[#allocation2 + $0x20] sm:$0x11] %v1989_v38  ;;  %v2188_v38 = vor.u32 %v2187_v5, %v2183_v3  ;;  %v5773_v5 = vld [vmem:[%s8755_s3 + $0x1c4] sm:$0xf0]  ;;  %v5767_v55 = vld [vmem:[%s8755_s3 + $0x194] sm:$0xf0] }
 0x175   : > { %2594 = vmatmul.bf16.vlgmr.msrb.gmra.mxu0 %v7881_v43  ;;  %2608 = vmatmul.bf16.vlgmr.msrb.gmra.mxu1 %v7884_v30  ;;  %v5735_v43 = vld [vmem:[%s8755_s3 + $0x94] sm:$0xf0]  ;;  %v4948_v30 = vld [vmem:[%s8755_s3] sm:$0xf]  ;;  %v5732_v1 = vld [vmem:[%s8755_s3 + $0x84] sm:$0xf] }
 0x176   : > { %2970 = vmatpush.bf16.msra.mxu0 %v4973_v25  ;;  %2984 = vmatpush.bf16.msra.mxu1 %v5037_v44  ;;  %v5021_v35 = vor.u32 %v5735_v43, %v5020_v54  ;;  %v4949_v41 = vor.u32 %v5717_v45, %v4948_v30  ;;  %v2200_v44 = vor.u32 %v2199_v58, %v2195_v31  ;;  %v5188_v43 = vld [vmem:[%s8755_s3 + $0x1e0] sm:$0xf]  ;;  %v5777_v30 = vld [vmem:[%s8755_s3 + $0x1e4] sm:$0xf0]  ;;  %v5726_v45 = vld [vmem:[%s8755_s3 + $0x54] sm:$0xf] }
 0x177   : > { %v5065_v54 = vor.u32 %v5744_v59, %v5062_v51  ;;  %v4993_v8 = vor.u32 %v5726_v45, %v4990_v13  ;;  %v4974_v58 = vld [vmem:[%s8755_s3 + $0x38] sm:$0xf0]  ;;  %v5771_v31 = vld [vmem:[%s8755_s3 + $0x1b4] sm:$0xf0]  ;;  %v4966_v59 = vld [vmem:[%s8755_s3 + $0x28] sm:$0xf0] }
 0x178   : > { %v5736_v51 = vld [vmem:[%s8755_s3 + $0xa4] sm:$0xf]  ;;  %v5148_v45 = vld [vmem:[%s8755_s3 + $0x190] sm:$0xf]  ;;  %v5014_v62 = vld [vmem:[%s8755_s3 + $0x88] sm:$0xf0] }
 0x179   : > { %v5388_v9 = vld [vmem:[%s8755_s3 + $0x4f0] sm:$0xf]  ;;  %v5875_v10 = vld [vmem:[%s8755_s3 + $0x4f4] sm:$0xf0] }
 0x17a   : > { %2971 = vmatpush.bf16.msra.mxu0 %v4965_v33  ;;  %2985 = vmatpush.bf16.msra.mxu1 %v5029_v52 }
 0x17b   : > { %v2065_v15 = vld [vmem:[#allocation2 + $0x20] sm:$0x11] }
 0x17c   : > { %v2147_v40 = vunpack.c.l.b16 %v2065_v15  ;;  %v2148_v27 = vunpack.c.h.b16 %v2065_v15  ;;  %v5724_v15 = vld [vmem:[%s8755_s3 + $0x44] sm:$0xf] }
 0x17d   : > { %v4985_v18 = vor.u32 %v5724_v15, %v4982_v20  ;;  %v5149_v20 = vor.u32 %v5767_v55, %v5148_v45  ;;  %v5756_v45 = vld [vmem:[%s8755_s3 + $0x144] sm:$0xf] }
 0x17e   : > { %2972 = vmatpush.bf16.msra.mxu0 %v4957_v57  ;;  %2986 = vmatpush.bf16.msra.mxu1 %v5021_v35  ;;  %v2155_v21 = vpack.c.b16 %v2147_v40, %v2147_v40  ;;  %v2156_v32 = vpack.c.b16 %v2148_v27, %v2148_v27  ;;  %v5125_v57 = vor.u32 %v5761_v53, %v5124_v49  ;;  %v5740_v40 = vld [vmem:[%s8755_s3 + $0xc4] sm:$0xf]  ;;  %v5046_v27 = vld [vmem:[%s8755_s3 + $0xc8] sm:$0xf0]  ;;  %v5718_v49 = vld [vmem:[%s8755_s3 + $0x14] sm:$0xf] }
 0x17f   : > { %v5189_v35 = vor.u32 %v5777_v30, %v5188_v43  ;;  %v5049_v19 = vor.u32 %v5740_v40, %v5046_v27  ;;  %v4958_v53 = vld [vmem:[%s8755_s3 + $0x18] sm:$0xf0]  ;;  %v5076_v40 = vld [vmem:[%s8755_s3 + $0x100] sm:$0xf] }
 0x180   : > { %v2190_v26 = vshll.u32 %v2155_v21, 16  ;;  %v2202_v28 = vshll.u32 %v2156_v32, 16  ;;  %v3162_v16 = vrot.slane %v2155_v21, 1  ;;  %v3165_v0 = vrot.slane %v2156_v32, 1  ;;  %v5172_v21 = vld [vmem:[%s8755_s3 + $0x1c0] sm:$0xf] }
 0x181   : > { %v5722_v32 = vld [vmem:[%s8755_s3 + $0x34] sm:$0xf]  ;;  %v4961_v13 = vor.u32 %v5718_v49, %v4958_v53 }
 0x182   : > { %2973 = vmatpush.bf16.msra.mxu0 %v4949_v41  ;;  %2987 = vmatpush.bf16.msra.mxu1 %v5013_v39  ;;  %v2192_v25 = vrot.slane %v2190_v26, 1  ;;  %v2204_v12 = vrot.slane %v2202_v28, 1  ;;  %v8054_v33 = vsel %vm884_vm1, %v3161_v48, %v3162_v16  ;;  %v8057_v52 = vsel %vm884_vm1, %v3164_v60, %v3165_v0  ;;  %v5108_v41 = vld [vmem:[%s8755_s3 + $0x140] sm:$0xf]  ;;  %v5757_v39 = vld [vmem:[%s8755_s3 + $0x144] sm:$0xf0] }
 0x183   : > { %v4977_v47 = vor.u32 %v5722_v32, %v4974_v58  ;;  %v5164_v26 = vld [vmem:[%s8755_s3 + $0x1b0] sm:$0xf]  ;;  %v5720_v28 = vld [vmem:[%s8755_s3 + $0x24] sm:$0xf]  ;;  %v5030_v48 = vld [vmem:[%s8755_s3 + $0xa8] sm:$0xf0]  ;;  %v5101_v16 = vor.u32 %v5755_v2, %v5100_v42 }
 0x184   : > { %v8060_v50 = vsel %vm2157_vm5, %v2188_v38, %v2192_v25  ;;  %v8063_v11 = vsel %vm2157_vm5, %v2200_v44, %v2204_v12  ;;  %v5165_v60 = vor.u32 %v5771_v31, %v5164_v26  ;;  %v5092_v0 = vld [vmem:[%s8755_s3 + $0x120] sm:$0xf]  ;;  %v5753_v38 = vld [vmem:[%s8755_s3 + $0x124] sm:$0xf0]  ;;  %v4969_v25 = vor.u32 %v5720_v28, %v4966_v59  ;;  %v5778_v32 = vld [vmem:[%s8755_s3 + $0x1f4] sm:$0xf] }
 0x185   : > { %2566 = vmatmul.bf16.vlgmr.msra.gmra.mxu2 %v8060_v50  ;;  %2580 = vmatmul.bf16.vlgmr.msra.gmra.mxu3 %v8063_v11  ;;  %v5033_v44 = vor.u32 %v5736_v51, %v5030_v48  ;;  %v5156_v12 = vld [vmem:[%s8755_s3 + $0x1a0] sm:$0xf]  ;;  %v5093_v43 = vor.u32 %v5753_v38, %v5092_v0  ;;  %v5198_v58 = vld [vmem:[%s8755_s3 + $0x1f8] sm:$0xf0]  ;;  %v5873_v2 = vld [vmem:[%s8755_s3 + $0x4e4] sm:$0xf0] }
 0x186   : > { %3022 = vmatpush.bf16.msrb.mxu0 %v5009_v6  ;;  %3036 = vmatpush.bf16.msrb.mxu1 %v5073_v61  ;;  %v5038_v6 = vld [vmem:[%s8755_s3 + $0xb8] sm:$0xf0]  ;;  %v5109_v61 = vor.u32 %v5757_v39, %v5108_v41  ;;  %v5140_v41 = vld [vmem:[%s8755_s3 + $0x180] sm:$0xf]  ;;  %v5765_v39 = vld [vmem:[%s8755_s3 + $0x184] sm:$0xf0] }
 0x187   : > { %2974 = vmatmul.bf16.vlgmr.msra.gmra.mxu0 %v7769_v56  ;;  %2988 = vmatmul.bf16.vlgmr.msra.gmra.mxu1 %v7773_v23  ;;  %v5041_v3 = vor.u32 %v5738_v24, %v5038_v6  ;;  %v5316_v24 = vld [vmem:[%s8755_s3 + $0x460] sm:$0xf]  ;;  %v5760_v26 = vld [vmem:[%s8755_s3 + $0x164] sm:$0xf]  ;;  %v5126_v31 = vld [vmem:[%s8755_s3 + $0x168] sm:$0xf0] }
 0x188   : > { %2994 = vmatpush.bf16.msra.mxu2 %v5133_v37  ;;  %3008 = vmatpush.bf16.msra.mxu3 %v5197_v46  ;;  %v5173_v37 = vor.u32 %v5773_v5, %v5172_v21  ;;  %v5769_v46 = vld [vmem:[%s8755_s3 + $0x1a4] sm:$0xf0]  ;;  %v5762_v21 = vld [vmem:[%s8755_s3 + $0x174] sm:$0xf]  ;;  %v5134_v5 = vld [vmem:[%s8755_s3 + $0x178] sm:$0xf0] }
 0x189   : > { %v5157_v30 = vor.u32 %v5769_v46, %v5156_v12  ;;  %v5380_v42 = vld [vmem:[%s8755_s3 + $0x4e0] sm:$0xf]  ;;  %v5776_v51 = vld [vmem:[%s8755_s3 + $0x1e4] sm:$0xf]  ;;  %v5190_v48 = vld [vmem:[%s8755_s3 + $0x1e8] sm:$0xf0] }
 0x18a   : > { %3023 = vmatpush.bf16.msrb.mxu0 %v5001_v14  ;;  %3037 = vmatpush.bf16.msrb.mxu1 %v5065_v54  ;;  %v5734_v14 = vld [vmem:[%s8755_s3 + $0x94] sm:$0xf]  ;;  %v5022_v54 = vld [vmem:[%s8755_s3 + $0x98] sm:$0xf0]  ;;  %v5381_v59 = vor.u32 %v5873_v2, %v5380_v42  ;;  %v5372_v0 = vld [vmem:[%s8755_s3 + $0x4d0] sm:$0xf] }
 0x18b   : > { %v5025_v7 = vor.u32 %v5734_v14, %v5022_v54  ;;  %v5871_v38 = vld [vmem:[%s8755_s3 + $0x4d4] sm:$0xf0]  ;;  %v5758_v12 = vld [vmem:[%s8755_s3 + $0x154] sm:$0xf]  ;;  %v5118_v46 = vld [vmem:[%s8755_s3 + $0x158] sm:$0xf0] }
 0x18c   : > { %2995 = vmatpush.bf16.msra.mxu2 %v5125_v57  ;;  %3009 = vmatpush.bf16.msra.mxu3 %v5189_v35  ;;  %v5716_v57 = vld [vmem:[%s8755_s3 + $0x4] sm:$0xf]  ;;  %v4950_v35 = vld [vmem:[%s8755_s3 + $0x8] sm:$0xf0]  ;;  %v5373_v53 = vor.u32 %v5871_v38, %v5372_v0  ;;  %v5300_v14 = vld [vmem:[%s8755_s3 + $0x440] sm:$0xf] }
 0x18d   : > { %v4953_v27 = vor.u32 %v5716_v57, %v4950_v35  ;;  %v5853_v54 = vld [vmem:[%s8755_s3 + $0x444] sm:$0xf0]  ;;  %v5772_v57 = vld [vmem:[%s8755_s3 + $0x1c4] sm:$0xf]  ;;  %v5174_v35 = vld [vmem:[%s8755_s3 + $0x1c8] sm:$0xf0] }
 0x18e   : > { %3024 = vmatpush.bf16.msrb.mxu0 %v4993_v8  ;;  %3038 = vmatpush.bf16.msrb.mxu1 %v5057_v22  ;;  %v5324_v8 = vld [vmem:[%s8755_s3 + $0x470] sm:$0xf]  ;;  %v5859_v22 = vld [vmem:[%s8755_s3 + $0x474] sm:$0xf0]  ;;  %v5268_v0 = vld [vmem:[%s8755_s3 + $0x400] sm:$0xf] }
 0x18f   : > { %v5276_v42 = vld [vmem:[%s8755_s3 + $0x410] sm:$0xf]  ;;  %v5847_v2 = vld [vmem:[%s8755_s3 + $0x414] sm:$0xf0]  ;;  %v5845_v38 = vld [vmem:[%s8755_s3 + $0x404] sm:$0xf0] }
 0x190   : > { %2996 = vmatpush.bf16.msra.mxu2 %v5117_v36  ;;  %3010 = vmatpush.bf16.msra.mxu3 %v5181_v63  ;;  %v5017_v36 = vor.u32 %v5732_v1, %v5014_v62  ;;  %v5749_v63 = vld [vmem:[%s8755_s3 + $0x104] sm:$0xf0]  ;;  %v5292_v1 = vld [vmem:[%s8755_s3 + $0x430] sm:$0xf]  ;;  %v5851_v62 = vld [vmem:[%s8755_s3 + $0x434] sm:$0xf0] }
 0x191   : > { %v5077_v6 = vor.u32 %v5749_v63, %v5076_v40  ;;  %v5293_v40 = vor.u32 %v5851_v62, %v5292_v1  ;;  %v5166_v63 = vld [vmem:[%s8755_s3 + $0x1b8] sm:$0xf0]  ;;  %v5856_v1 = vld [vmem:[%s8755_s3 + $0x464] sm:$0xf] }
 0x192   : > { %3025 = vmatpush.bf16.msrb.mxu0 %v4985_v18  ;;  %3039 = vmatpush.bf16.msrb.mxu1 %v5049_v19  ;;  %v5325_v18 = vor.u32 %v5859_v22, %v5324_v8  ;;  %v5389_v19 = vor.u32 %v5875_v10, %v5388_v9  ;;  %v5356_v8 = vld [vmem:[%s8755_s3 + $0x4b0] sm:$0xf]  ;;  %v5867_v22 = vld [vmem:[%s8755_s3 + $0x4b4] sm:$0xf0]  ;;  %v5177_v10 = vor.u32 %v5772_v57, %v5174_v35 }
 0x193   : > { %v5516_v57 = vld [vmem:[%s8755_s3 + $0x5f0] sm:$0xf]  ;;  %v5907_v35 = vld [vmem:[%s8755_s3 + $0x5f4] sm:$0xf0] }
 0x194   : > { %2997 = vmatpush.bf16.msra.mxu2 %v5109_v61  ;;  %3011 = vmatpush.bf16.msra.mxu3 %v5173_v37  ;;  %v5141_v61 = vor.u32 %v5765_v39, %v5140_v41  ;;  %v5857_v37 = vld [vmem:[%s8755_s3 + $0x464] sm:$0xf0]  ;;  %v5284_v41 = vld [vmem:[%s8755_s3 + $0x420] sm:$0xf] }
 0x195   : > { %2622 = vmatmul.bf16.vlgmr.msrb.gmra.mxu2 %v8060_v50  ;;  %2636 = vmatmul.bf16.vlgmr.msrb.gmra.mxu3 %v8063_v11  ;;  %v5084_v50 = vld [vmem:[%s8755_s3 + $0x110] sm:$0xf]  ;;  %v5751_v11 = vld [vmem:[%s8755_s3 + $0x114] sm:$0xf0]  ;;  %v5317_v28 = vor.u32 %v5857_v37, %v5316_v24  ;;  %v5849_v39 = vld [vmem:[%s8755_s3 + $0x424] sm:$0xf0] }
 0x196   : > { %3026 = vmatpush.bf16.msrb.mxu0 %v4977_v47  ;;  %3040 = vmatpush.bf16.msrb.mxu1 %v5041_v3  ;;  %v5085_v15 = vor.u32 %v5751_v11, %v5084_v50  ;;  %v5137_v47 = vor.u32 %v5762_v21, %v5134_v5  ;;  %v5201_v3 = vor.u32 %v5778_v32, %v5198_v58  ;;  %v5752_v32 = vld [vmem:[%s8755_s3 + $0x124] sm:$0xf]  ;;  %v5094_v58 = vld [vmem:[%s8755_s3 + $0x128] sm:$0xf0] }
 0x197   : > { %v5121_v50 = vor.u32 %v5758_v12, %v5118_v46  ;;  %v5285_v24 = vor.u32 %v5849_v39, %v5284_v41  ;;  %v5158_v37 = vld [vmem:[%s8755_s3 + $0x1a8] sm:$0xf0]  ;;  %v5858_v12 = vld [vmem:[%s8755_s3 + $0x474] sm:$0xf]  ;;  %v5326_v46 = vld [vmem:[%s8755_s3 + $0x478] sm:$0xf0] }
 0x198   : > { %2998 = vmatpush.bf16.msra.mxu2 %v5101_v16  ;;  %3012 = vmatpush.bf16.msra.mxu3 %v5165_v60  ;;  %v5308_v16 = vld [vmem:[%s8755_s3 + $0x450] sm:$0xf]  ;;  %v5855_v60 = vld [vmem:[%s8755_s3 + $0x454] sm:$0xf0]  ;;  %v5508_v41 = vld [vmem:[%s8755_s3 + $0x5e0] sm:$0xf] }
 0x199   : > { %v5309_v49 = vor.u32 %v5855_v60, %v5308_v16  ;;  %v5150_v60 = vld [vmem:[%s8755_s3 + $0x198] sm:$0xf0]  ;;  %v5905_v39 = vld [vmem:[%s8755_s3 + $0x5e4] sm:$0xf0] }
 0x19a   : > { %3027 = vmatpush.bf16.msrb.mxu0 %v4969_v25  ;;  %3041 = vmatpush.bf16.msrb.mxu1 %v5033_v44  ;;  %v5129_v25 = vor.u32 %v5760_v26, %v5126_v31  ;;  %v5193_v44 = vor.u32 %v5776_v51, %v5190_v48  ;;  %v5097_v26 = vor.u32 %v5752_v32, %v5094_v58  ;;  %v5766_v51 = vld [vmem:[%s8755_s3 + $0x194] sm:$0xf] }
 0x19b   : > { %v5277_v48 = vor.u32 %v5847_v2, %v5276_v42  ;;  %v5509_v58 = vor.u32 %v5905_v39, %v5508_v41  ;;  %v5500_v42 = vld [vmem:[%s8755_s3 + $0x5d0] sm:$0xf]  ;;  %v5903_v2 = vld [vmem:[%s8755_s3 + $0x5d4] sm:$0xf0] }
 0x19c   : > { %2999 = vmatpush.bf16.msra.mxu2 %v5093_v43  ;;  %3013 = vmatpush.bf16.msra.mxu3 %v5157_v30  ;;  %v5364_v43 = vld [vmem:[%s8755_s3 + $0x4c0] sm:$0xf]  ;;  %v5869_v30 = vld [vmem:[%s8755_s3 + $0x4c4] sm:$0xf0]  ;;  %v5468_v41 = vld [vmem:[%s8755_s3 + $0x590] sm:$0xf] }
 0x19d   : > { %v5365_v55 = vor.u32 %v5869_v30, %v5364_v43  ;;  %v5078_v30 = vld [vmem:[%s8755_s3 + $0x108] sm:$0xf0]  ;;  %v5895_v39 = vld [vmem:[%s8755_s3 + $0x594] sm:$0xf0] }
 0x19e   : > { %3028 = vmatpush.bf16.msrb.mxu0 %v4961_v13  ;;  %3042 = vmatpush.bf16.msrb.mxu1 %v5025_v7  ;;  %v5110_v13 = vld [vmem:[%s8755_s3 + $0x148] sm:$0xf0]  ;;  %v5301_v7 = vor.u32 %v5853_v54, %v5300_v14  ;;  %v5748_v14 = vld [vmem:[%s8755_s3 + $0x104] sm:$0xf]  ;;  %v5269_v54 = vor.u32 %v5845_v38, %v5268_v0  ;;  %v5850_v0 = vld [vmem:[%s8755_s3 + $0x434] sm:$0xf] }
 0x19f   : > { %v5113_v9 = vor.u32 %v5756_v45, %v5110_v13  ;;  %v5329_v45 = vor.u32 %v5858_v12, %v5326_v46  ;;  %v5081_v62 = vor.u32 %v5748_v14, %v5078_v30  ;;  %v5294_v38 = vld [vmem:[%s8755_s3 + $0x438] sm:$0xf0]  ;;  %v5484_v14 = vld [vmem:[%s8755_s3 + $0x5b0] sm:$0xf]  ;;  %v5286_v30 = vld [vmem:[%s8755_s3 + $0x428] sm:$0xf0] }
 0x1a0   : > { %3000 = vmatpush.bf16.msra.mxu2 %v5085_v15  ;;  %3014 = vmatpush.bf16.msra.mxu3 %v5149_v20  ;;  %v5754_v15 = vld [vmem:[%s8755_s3 + $0x134] sm:$0xf]  ;;  %v5102_v20 = vld [vmem:[%s8755_s3 + $0x138] sm:$0xf0] }
 0x1a1   : > { %v5105_v21 = vor.u32 %v5754_v15, %v5102_v20  ;;  %v5517_v20 = vor.u32 %v5907_v35, %v5516_v57 }
 0x1a2   : > { %3029 = vmatpush.bf16.msrb.mxu0 %v4953_v27  ;;  %3043 = vmatpush.bf16.msrb.mxu1 %v5017_v36  ;;  %v5357_v27 = vor.u32 %v5867_v22, %v5356_v8  ;;  %v5770_v36 = vld [vmem:[%s8755_s3 + $0x1b4] sm:$0xf]  ;;  %v5318_v22 = vld [vmem:[%s8755_s3 + $0x468] sm:$0xf0] }
 0x1a3   : > { %v5169_v5 = vor.u32 %v5770_v36, %v5166_v63  ;;  %v5321_v36 = vor.u32 %v5856_v1, %v5318_v22  ;;  %v5476_v1 = vld [vmem:[%s8755_s3 + $0x5a0] sm:$0xf]  ;;  %v5278_v22 = vld [vmem:[%s8755_s3 + $0x418] sm:$0xf0] }
 0x1a4   : > { %3001 = vmatpush.bf16.msra.mxu2 %v5077_v6  ;;  %3015 = vmatpush.bf16.msra.mxu3 %v5141_v61  ;;  %v5768_v61 = vld [vmem:[%s8755_s3 + $0x1a4] sm:$0xf] }
 0x1a5   : > { %3030 = vmatmul.bf16.vlgmr.msrb.gmra.mxu0 %v7769_v56  ;;  %3044 = vmatmul.bf16.vlgmr.msrb.gmra.mxu1 %v7773_v23  ;;  %v5774_v56 = vld [vmem:[%s8755_s3 + $0x1d4] sm:$0xf]  ;;  %v5182_v23 = vld [vmem:[%s8755_s3 + $0x1d8] sm:$0xf0]  ;;  %v5161_v31 = vor.u32 %v5768_v61, %v5158_v37 }
 0x1a6   : > { %3491 = vmatpush.bf16.msra.mxu0 %v5325_v18  ;;  %3505 = vmatpush.bf16.msra.mxu1 %v5389_v19  ;;  %v5185_v11 = vor.u32 %v5774_v56, %v5182_v23  ;;  %v5348_v18 = vld [vmem:[%s8755_s3 + $0x4a0] sm:$0xf]  ;;  %v5865_v19 = vld [vmem:[%s8755_s3 + $0x4a4] sm:$0xf0]  ;;  %v5153_v23 = vor.u32 %v5766_v51, %v5150_v60 }
 0x1a7   : > { %3002 = vmatmul.bf16.vlgmr.msra.gmra.mxu2 %v7938_v29  ;;  %3016 = vmatmul.bf16.vlgmr.msra.gmra.mxu3 %v7942_v34  ;;  %v5349_v6 = vor.u32 %v5865_v19, %v5348_v18  ;;  %v5854_v18 = vld [vmem:[%s8755_s3 + $0x454] sm:$0xf]  ;;  %v5310_v19 = vld [vmem:[%s8755_s3 + $0x458] sm:$0xf0]  ;;  %v5901_v60 = vld [vmem:[%s8755_s3 + $0x5c4] sm:$0xf0] }
 0x1a8   : > { %3050 = vmatpush.bf16.msrb.mxu2 %v5137_v47  ;;  %3064 = vmatpush.bf16.msrb.mxu3 %v5201_v3  ;;  %v5340_v47 = vld [vmem:[%s8755_s3 + $0x490] sm:$0xf]  ;;  %v5863_v3 = vld [vmem:[%s8755_s3 + $0x494] sm:$0xf0]  ;;  %v5313_v61 = vor.u32 %v5854_v18, %v5310_v19  ;;  %v5844_v18 = vld [vmem:[%s8755_s3 + $0x404] sm:$0xf] }
 0x1a9   : > { %v5341_v16 = vor.u32 %v5863_v3, %v5340_v47  ;;  %v5852_v47 = vld [vmem:[%s8755_s3 + $0x444] sm:$0xf]  ;;  %v5302_v3 = vld [vmem:[%s8755_s3 + $0x448] sm:$0xf0] }
 0x1aa   : > { %3492 = vmatpush.bf16.msra.mxu0 %v5317_v28  ;;  %3506 = vmatpush.bf16.msra.mxu1 %v5381_v59  ;;  %v5750_v28 = vld [vmem:[%s8755_s3 + $0x114] sm:$0xf]  ;;  %v5086_v59 = vld [vmem:[%s8755_s3 + $0x118] sm:$0xf0]  ;;  %v5305_v51 = vor.u32 %v5852_v47, %v5302_v3  ;;  %v5270_v19 = vld [vmem:[%s8755_s3 + $0x408] sm:$0xf0] }
 0x1ab   : > { %v5089_v56 = vor.u32 %v5750_v28, %v5086_v59  ;;  %v5501_v59 = vor.u32 %v5903_v2, %v5500_v42  ;;  %v5460_v42 = vld [vmem:[%s8755_s3 + $0x580] sm:$0xf]  ;;  %v5893_v2 = vld [vmem:[%s8755_s3 + $0x584] sm:$0xf0]  ;;  %v5890_v47 = vld [vmem:[%s8755_s3 + $0x574] sm:$0xf] }
 0x1ac   : > { %3051 = vmatpush.bf16.msrb.mxu2 %v5129_v25  ;;  %3065 = vmatpush.bf16.msrb.mxu3 %v5193_v44  ;;  %v5332_v25 = vld [vmem:[%s8755_s3 + $0x480] sm:$0xf]  ;;  %v5861_v44 = vld [vmem:[%s8755_s3 + $0x484] sm:$0xf0]  ;;  %v5454_v3 = vld [vmem:[%s8755_s3 + $0x578] sm:$0xf0] }
 0x1ad   : > { %v5333_v43 = vor.u32 %v5861_v44, %v5332_v25  ;;  %v5866_v25 = vld [vmem:[%s8755_s3 + $0x4b4] sm:$0xf]  ;;  %v5358_v44 = vld [vmem:[%s8755_s3 + $0x4b8] sm:$0xf0] }
 0x1ae   : > { %3493 = vmatpush.bf16.msra.mxu0 %v5309_v49  ;;  %3507 = vmatpush.bf16.msra.mxu1 %v5373_v53  ;;  %v5874_v49 = vld [vmem:[%s8755_s3 + $0x4f4] sm:$0xf]  ;;  %v5390_v53 = vld [vmem:[%s8755_s3 + $0x4f8] sm:$0xf0] }
 0x1af   : > { %v5393_v13 = vor.u32 %v5874_v49, %v5390_v53  ;;  %v5420_v49 = vld [vmem:[%s8755_s3 + $0x530] sm:$0xf]  ;;  %v5883_v53 = vld [vmem:[%s8755_s3 + $0x534] sm:$0xf0] }
 0x1b0   : > { %3052 = vmatpush.bf16.msrb.mxu2 %v5121_v50  ;;  %3066 = vmatpush.bf16.msrb.mxu3 %v5185_v11  ;;  %v5764_v50 = vld [vmem:[%s8755_s3 + $0x184] sm:$0xf]  ;;  %v5142_v11 = vld [vmem:[%s8755_s3 + $0x188] sm:$0xf0] }
 0x1b1   : > { %v5145_v8 = vor.u32 %v5764_v50, %v5142_v11  ;;  %v5864_v50 = vld [vmem:[%s8755_s3 + $0x4a4] sm:$0xf]  ;;  %v5350_v11 = vld [vmem:[%s8755_s3 + $0x4a8] sm:$0xf0] }
 0x1b2   : > { %3494 = vmatpush.bf16.msra.mxu0 %v5301_v7  ;;  %3508 = vmatpush.bf16.msra.mxu1 %v5365_v55  ;;  %v5452_v7 = vld [vmem:[%s8755_s3 + $0x570] sm:$0xf]  ;;  %v5891_v55 = vld [vmem:[%s8755_s3 + $0x574] sm:$0xf0]  ;;  %v5353_v35 = vor.u32 %v5864_v50, %v5350_v11  ;;  %v5882_v11 = vld [vmem:[%s8755_s3 + $0x534] sm:$0xf] }
 0x1b3   : > { %v5453_v15 = vor.u32 %v5891_v55, %v5452_v7  ;;  %v5412_v7 = vld [vmem:[%s8755_s3 + $0x520] sm:$0xf]  ;;  %v5881_v55 = vld [vmem:[%s8755_s3 + $0x524] sm:$0xf0] }
 0x1b4   : > { %3053 = vmatpush.bf16.msrb.mxu2 %v5113_v9  ;;  %3067 = vmatpush.bf16.msrb.mxu3 %v5177_v10  ;;  %v5872_v9 = vld [vmem:[%s8755_s3 + $0x4e4] sm:$0xf]  ;;  %v5382_v10 = vld [vmem:[%s8755_s3 + $0x4e8] sm:$0xf0] }
 0x1b5   : > { %v5385_v63 = vor.u32 %v5872_v9, %v5382_v10  ;;  %v5862_v9 = vld [vmem:[%s8755_s3 + $0x494] sm:$0xf]  ;;  %v5342_v10 = vld [vmem:[%s8755_s3 + $0x498] sm:$0xf0] }
 0x1b6   : > { %3495 = vmatpush.bf16.msra.mxu0 %v5293_v40  ;;  %3509 = vmatpush.bf16.msra.mxu1 %v5357_v27  ;;  %v5444_v40 = vld [vmem:[%s8755_s3 + $0x560] sm:$0xf]  ;;  %v5889_v27 = vld [vmem:[%s8755_s3 + $0x564] sm:$0xf0] }
 0x1b7   : > { %v5445_v32 = vor.u32 %v5889_v27, %v5444_v40  ;;  %v5404_v40 = vld [vmem:[%s8755_s3 + $0x510] sm:$0xf]  ;;  %v5879_v27 = vld [vmem:[%s8755_s3 + $0x514] sm:$0xf0] }
 0x1b8   : > { %3054 = vmatpush.bf16.msrb.mxu2 %v5105_v21  ;;  %3068 = vmatpush.bf16.msrb.mxu3 %v5169_v5  ;;  %v5870_v21 = vld [vmem:[%s8755_s3 + $0x4d4] sm:$0xf]  ;;  %v5374_v5 = vld [vmem:[%s8755_s3 + $0x4d8] sm:$0xf0] }
 0x1b9   : > { %v5377_v37 = vor.u32 %v5870_v21, %v5374_v5  ;;  %v5860_v21 = vld [vmem:[%s8755_s3 + $0x484] sm:$0xf]  ;;  %v5334_v5 = vld [vmem:[%s8755_s3 + $0x488] sm:$0xf0] }
 0x1ba   : > { %3496 = vmatpush.bf16.msra.mxu0 %v5285_v24  ;;  %3510 = vmatpush.bf16.msra.mxu1 %v5349_v6  ;;  %v5436_v24 = vld [vmem:[%s8755_s3 + $0x550] sm:$0xf]  ;;  %v5887_v6 = vld [vmem:[%s8755_s3 + $0x554] sm:$0xf0] }
 0x1bb   : > { %v5437_v28 = vor.u32 %v5887_v6, %v5436_v24  ;;  %v5396_v24 = vld [vmem:[%s8755_s3 + $0x500] sm:$0xf]  ;;  %v5273_v6 = vor.u32 %v5844_v18, %v5270_v19  ;;  %v5876_v18 = vld [vmem:[%s8755_s3 + $0x504] sm:$0xf]  ;;  %v5398_v19 = vld [vmem:[%s8755_s3 + $0x508] sm:$0xf0] }
 0x1bc   : > { %3055 = vmatpush.bf16.msrb.mxu2 %v5097_v26  ;;  %3069 = vmatpush.bf16.msrb.mxu3 %v5161_v31  ;;  %v5868_v26 = vld [vmem:[%s8755_s3 + $0x4c4] sm:$0xf]  ;;  %v5366_v31 = vld [vmem:[%s8755_s3 + $0x4c8] sm:$0xf0] }
 0x1be   : > { %3497 = vmatpush.bf16.msra.mxu0 %v5277_v48  ;;  %3511 = vmatpush.bf16.msra.mxu1 %v5341_v16  ;;  %v5369_v48 = vor.u32 %v5868_v26, %v5366_v31  ;;  %v5492_v16 = vld [vmem:[%s8755_s3 + $0x5c0] sm:$0xf]  ;;  %v5906_v26 = vld [vmem:[%s8755_s3 + $0x5f4] sm:$0xf]  ;;  %v5518_v31 = vld [vmem:[%s8755_s3 + $0x5f8] sm:$0xf0] }
 0x1bf   : > { %v5493_v46 = vor.u32 %v5901_v60, %v5492_v16  ;;  %v5904_v16 = vld [vmem:[%s8755_s3 + $0x5e4] sm:$0xf]  ;;  %v5510_v60 = vld [vmem:[%s8755_s3 + $0x5e8] sm:$0xf0] }
 0x1c0   : > { %3056 = vmatpush.bf16.msrb.mxu2 %v5089_v56  ;;  %3070 = vmatpush.bf16.msrb.mxu3 %v5153_v23  ;;  %v5297_v56 = vor.u32 %v5850_v0, %v5294_v38  ;;  %v5361_v23 = vor.u32 %v5866_v25, %v5358_v44  ;;  %v5513_v38 = vor.u32 %v5904_v16, %v5510_v60  ;;  %v5886_v25 = vld [vmem:[%s8755_s3 + $0x554] sm:$0xf] }
 0x1c2   : > { %3498 = vmatpush.bf16.msra.mxu0 %v5269_v54  ;;  %3512 = vmatpush.bf16.msra.mxu1 %v5333_v43  ;;  %v5899_v54 = vld [vmem:[%s8755_s3 + $0x5b4] sm:$0xf0]  ;;  %v5848_v43 = vld [vmem:[%s8755_s3 + $0x424] sm:$0xf] }
 0x1c3   : > { %v5289_v57 = vor.u32 %v5848_v43, %v5286_v30  ;;  %v5494_v43 = vld [vmem:[%s8755_s3 + $0x5c8] sm:$0xf0] }
 0x1c4   : > { %3057 = vmatpush.bf16.msrb.mxu2 %v5081_v62  ;;  %3071 = vmatpush.bf16.msrb.mxu3 %v5145_v8  ;;  %v5897_v62 = vld [vmem:[%s8755_s3 + $0x5a4] sm:$0xf0]  ;;  %v5846_v8 = vld [vmem:[%s8755_s3 + $0x414] sm:$0xf] }
 0x1c5   : > { %3499 = vmatmul.bf16.vlgmr.msra.gmra.mxu0 %v7956_v4  ;;  %3513 = vmatmul.bf16.vlgmr.msra.gmra.mxu1 %v7959_v17 }
 0x1c6   : > { %3547 = vmatpush.bf16.msrb.mxu0 %v5329_v45  ;;  %3561 = vmatpush.bf16.msrb.mxu1 %v5393_v13  ;;  %v5421_v45 = vor.u32 %v5883_v53, %v5420_v49  ;;  %v5485_v13 = vor.u32 %v5899_v54, %v5484_v14  ;;  %v5430_v14 = vld [vmem:[%s8755_s3 + $0x548] sm:$0xf0]  ;;  %v5900_v54 = vld [vmem:[%s8755_s3 + $0x5c4] sm:$0xf] }
 0x1c7   : > { %3058 = vmatmul.bf16.vlgmr.msrb.gmra.mxu2 %v7938_v29  ;;  %3072 = vmatmul.bf16.vlgmr.msrb.gmra.mxu3 %v7942_v34  ;;  %v5428_v29 = vld [vmem:[%s8755_s3 + $0x540] sm:$0xf]  ;;  %v5885_v34 = vld [vmem:[%s8755_s3 + $0x544] sm:$0xf0]  ;;  %v5497_v50 = vor.u32 %v5900_v54, %v5494_v43 }
 0x1c8   : > { %3519 = vmatpush.bf16.msra.mxu2 %v5453_v15  ;;  %3533 = vmatpush.bf16.msra.mxu3 %v5517_v20  ;;  %v5429_v12 = vor.u32 %v5885_v34, %v5428_v29  ;;  %v5413_v15 = vor.u32 %v5881_v55, %v5412_v7  ;;  %v5477_v20 = vor.u32 %v5897_v62, %v5476_v1  ;;  %v5422_v7 = vld [vmem:[%s8755_s3 + $0x538] sm:$0xf0]  ;;  %v5898_v55 = vld [vmem:[%s8755_s3 + $0x5b4] sm:$0xf] }
 0x1c9   : > { %v5457_v29 = vor.u32 %v5890_v47, %v5454_v3  ;;  %v5521_v34 = vor.u32 %v5906_v26, %v5518_v31  ;;  %v5425_v1 = vor.u32 %v5882_v11, %v5422_v7 }
 0x1ca   : > { %3548 = vmatpush.bf16.msrb.mxu0 %v5321_v36  ;;  %3562 = vmatpush.bf16.msrb.mxu1 %v5385_v63  ;;  %v5281_v36 = vor.u32 %v5846_v8, %v5278_v22  ;;  %v5345_v63 = vor.u32 %v5862_v9, %v5342_v10  ;;  %v5880_v8 = vld [vmem:[%s8755_s3 + $0x524] sm:$0xf]  ;;  %v5414_v22 = vld [vmem:[%s8755_s3 + $0x528] sm:$0xf0] }
 0x1cb   : > { %v5896_v9 = vld [vmem:[%s8755_s3 + $0x5a4] sm:$0xf]  ;;  %v5478_v10 = vld [vmem:[%s8755_s3 + $0x5a8] sm:$0xf0] }
 0x1cc   : > { %3520 = vmatpush.bf16.msra.mxu2 %v5445_v32  ;;  %3534 = vmatpush.bf16.msra.mxu3 %v5509_v58  ;;  %v5405_v32 = vor.u32 %v5879_v27, %v5404_v40  ;;  %v5469_v58 = vor.u32 %v5895_v39, %v5468_v41  ;;  %v5878_v40 = vld [vmem:[%s8755_s3 + $0x514] sm:$0xf]  ;;  %v5406_v27 = vld [vmem:[%s8755_s3 + $0x518] sm:$0xf0] }
 0x1cd   : > { %v5409_v41 = vor.u32 %v5878_v40, %v5406_v27 }
 0x1ce   : > { %3549 = vmatpush.bf16.msrb.mxu0 %v5313_v61  ;;  %3563 = vmatpush.bf16.msrb.mxu1 %v5377_v37  ;;  %v5337_v61 = vor.u32 %v5860_v21, %v5334_v5  ;;  %v5877_v37 = vld [vmem:[%s8755_s3 + $0x504] sm:$0xf0]  ;;  %v5892_v21 = vld [vmem:[%s8755_s3 + $0x584] sm:$0xf]  ;;  %v5462_v5 = vld [vmem:[%s8755_s3 + $0x588] sm:$0xf0] }
 0x1d0   : > { %3521 = vmatpush.bf16.msra.mxu2 %v5437_v28  ;;  %3535 = vmatpush.bf16.msra.mxu3 %v5501_v59  ;;  %v5397_v28 = vor.u32 %v5877_v37, %v5396_v24  ;;  %v5461_v59 = vor.u32 %v5893_v2, %v5460_v42 }
 0x1d2   : > { %3550 = vmatpush.bf16.msrb.mxu0 %v5305_v51  ;;  %3564 = vmatpush.bf16.msrb.mxu1 %v5369_v48  ;;  %v5888_v51 = vld [vmem:[%s8755_s3 + $0x564] sm:$0xf]  ;;  %v5446_v48 = vld [vmem:[%s8755_s3 + $0x568] sm:$0xf0] }
 0x1d3   : > { %v5449_v0 = vor.u32 %v5888_v51, %v5446_v48 }
 0x1d4   : > { %3522 = vmatpush.bf16.msra.mxu2 %v5429_v12  ;;  %3536 = vmatpush.bf16.msra.mxu3 %v5493_v46  ;;  %v5502_v46 = vld [vmem:[%s8755_s3 + $0x5d8] sm:$0xf0] }
 0x1d6   : > { %3551 = vmatpush.bf16.msrb.mxu0 %v5297_v56  ;;  %3565 = vmatpush.bf16.msrb.mxu1 %v5361_v23  ;;  %v5884_v23 = vld [vmem:[%s8755_s3 + $0x544] sm:$0xf] }
 0x1d7   : > { %v5433_v30 = vor.u32 %v5884_v23, %v5430_v14 }
 0x1d8   : > { %3523 = vmatpush.bf16.msra.mxu2 %v5421_v45  ;;  %3537 = vmatpush.bf16.msra.mxu3 %v5485_v13 }
 0x1da   : > { %3552 = vmatpush.bf16.msrb.mxu0 %v5289_v57  ;;  %3566 = vmatpush.bf16.msrb.mxu1 %v5353_v35  ;;  %v5486_v57 = vld [vmem:[%s8755_s3 + $0x5b8] sm:$0xf0] }
 0x1db   : > { %v5489_v62 = vor.u32 %v5898_v55, %v5486_v57 }
 0x1dc   : > { %3524 = vmatpush.bf16.msra.mxu2 %v5413_v15  ;;  %3538 = vmatpush.bf16.msra.mxu3 %v5477_v20  ;;  %v5417_v15 = vor.u32 %v5880_v8, %v5414_v22  ;;  %v5481_v20 = vor.u32 %v5896_v9, %v5478_v10 }
 0x1de   : > { %3553 = vmatpush.bf16.msrb.mxu0 %v5281_v36  ;;  %3567 = vmatpush.bf16.msrb.mxu1 %v5345_v63  ;;  %v5894_v36 = vld [vmem:[%s8755_s3 + $0x594] sm:$0xf]  ;;  %v5470_v63 = vld [vmem:[%s8755_s3 + $0x598] sm:$0xf0] }
 0x1df   : > { %v5473_v39 = vor.u32 %v5894_v36, %v5470_v63  ;;  %v3616_v63 = vld [vmem:[%s6230_s10] sm:$0xcc] }
 0x1e0   : > { %3525 = vmatpush.bf16.msra.mxu2 %v5405_v32  ;;  %3539 = vmatpush.bf16.msra.mxu3 %v5469_v58  ;;  %v5401_v32 = vor.u32 %v5876_v18, %v5398_v19  ;;  %v5465_v58 = vor.u32 %v5892_v21, %v5462_v5  ;;  %v229_v5 = vld [vmem:[%s8756_s4] sm:$0x3] }
 0x1e2   : > { %3554 = vmatpush.bf16.msrb.mxu0 %v5273_v6  ;;  %3568 = vmatpush.bf16.msrb.mxu1 %v5337_v61  ;;  %v2539_v44 = vpop.f32.mrf.mxu0  ;;  %v2553_v12 = vpop.f32.mrf.mxu1 }
 0x1e3   : > { %v2554_v49 = vadd.f32 %v2553_v12, %v2539_v44 }
 0x1e4   : > { %3526 = vmatpush.bf16.msra.mxu2 %v5397_v28  ;;  %3540 = vmatpush.bf16.msra.mxu3 %v5461_v59 }
 0x1e5   : > { %3555 = vmatmul.bf16.vlgmr.msrb.gmra.mxu0 %v7956_v4  ;;  %3569 = vmatmul.bf16.vlgmr.msrb.gmra.mxu1 %v7959_v17  ;;  %v5438_v4 = vld [vmem:[%s8755_s3 + $0x558] sm:$0xf0]  ;;  %v5902_v17 = vld [vmem:[%s8755_s3 + $0x5d4] sm:$0xf] }
 0x1e6   : > { %v5441_v53 = vor.u32 %v5886_v25, %v5438_v4  ;;  %v5505_v56 = vor.u32 %v5902_v17, %v5502_v46 }
 0x1e7   : > { %3527 = vmatmul.bf16.vlgmr.msra.gmra.mxu2 %v8054_v33  ;;  %3541 = vmatmul.bf16.vlgmr.msra.gmra.mxu3 %v8057_v52 }
 0x1e8   : > { %3575 = vmatpush.bf16.msrb.mxu2 %v5457_v29  ;;  %3589 = vmatpush.bf16.msrb.mxu3 %v5521_v34 }
 0x1ea   : > { %v2541_v45 = vpop.f32.mrf.mxu0  ;;  %v2555_v13 = vpop.f32.mrf.mxu1 }
 0x1eb   : > { %v2556_v35 = vadd.f32 %v2555_v13, %v2541_v45 }
 0x1ec   : > { %3576 = vmatpush.bf16.msrb.mxu2 %v5449_v0  ;;  %3590 = vmatpush.bf16.msrb.mxu3 %v5513_v38 }
 0x1f0   : > { %3577 = vmatpush.bf16.msrb.mxu2 %v5441_v53  ;;  %3591 = vmatpush.bf16.msrb.mxu3 %v5505_v56  ;;  %v5926_v56 = vmov 0  }
 0x1f1   : > { %226 = vst [vmem:[%s8724_s15] sm:$0x33] %v5926_v56 }
 0x1f2   : > { %v2595_v26 = vpop.f32.mrf.mxu0  ;;  %v2609_v31 = vpop.f32.mrf.mxu1  ;;  %227 = vst [vmem:[%s8724_s15 + $0x10] sm:$0xcc] %v5926_v56 }
 0x1f3   : > { %v2610_v11 = vadd.f32 %v2609_v31, %v2595_v26 }
 0x1f4   : > { %3578 = vmatpush.bf16.msrb.mxu2 %v5433_v30  ;;  %3592 = vmatpush.bf16.msrb.mxu3 %v5497_v50 }
 0x1f8   : > { %3579 = vmatpush.bf16.msrb.mxu2 %v5425_v1  ;;  %3593 = vmatpush.bf16.msrb.mxu3 %v5489_v62 }
 0x1fa   : > { %v2597_v29 = vpop.f32.mrf.mxu0  ;;  %v2611_v34 = vpop.f32.mrf.mxu1 }
 0x1fb   : > { %v2612_v57 = vadd.f32 %v2611_v34, %v2597_v29 }
 0x1fc   : > { %3580 = vmatpush.bf16.msrb.mxu2 %v5417_v15  ;;  %3594 = vmatpush.bf16.msrb.mxu3 %v5481_v20 }
 0x200   : > { %3581 = vmatpush.bf16.msrb.mxu2 %v5409_v41  ;;  %3595 = vmatpush.bf16.msrb.mxu3 %v5473_v39  ;;  %v3617_v41 = vld [vmem:[%s6230_s10 + $0x8] sm:$0xff] }
 0x204   : > { %3582 = vmatpush.bf16.msrb.mxu2 %v5401_v32  ;;  %3596 = vmatpush.bf16.msrb.mxu3 %v5465_v58  ;;  %v2989_v16 = vpop.f32.mrf.mxu1  ;;  %v3619_v32 = vunpack.c.l.bf16 %v3616_v63  ;;  %v3621_v58 = vunpack.c.l.bf16 %v3617_v41 }
 0x207   : > { %3583 = vmatmul.bf16.vlgmr.msrb.gmra.mxu2 %v8054_v33  ;;  %3597 = vmatmul.bf16.vlgmr.msrb.gmra.mxu3 %v8057_v52  ;;  %v2975_v33 = vpop.f32.mrf.mxu0 }
 0x208   : > { %v2567_v24 = vpop.f32.mrf.mxu2  ;;  %v2581_v6 = vpop.f32.mrf.mxu3 }
 0x209   : > { %v2568_v61 = vadd.f32 %v2567_v24, %v2554_v49  ;;  %v3620_v24 = vunpack.c.h.bf16 %v3616_v63 }
 0x20b   : > { %v2582_v37 = vadd.f32 %v2581_v6, %v2568_v61  ;;  %v3622_v6 = vunpack.c.h.bf16 %v3617_v41 }
 0x20c   : > { %v2991_v38 = vpop.f32.mrf.mxu1 }
 0x20d   : > { %v2976_v55 = vadd.f32 %v2975_v33, %v2582_v37  ;;  %v3635_v33 = vrot.slane %v3620_v24, 4 }
 0x20f   : > { %v2977_v0 = vpop.f32.mrf.mxu0  ;;  %v2990_v62 = vadd.f32 %v2989_v16, %v2976_v55  ;;  %v3636_v16 = vrot.slane %v3622_v6, 4 }
 0x210   : > { %v2569_v42 = vpop.f32.mrf.mxu2  ;;  %v2583_v47 = vpop.f32.mrf.mxu3 }
 0x211   : > { %v2570_v2 = vadd.f32 %v2569_v42, %v2556_v35 }
 0x213   : > { %v2584_v3 = vadd.f32 %v2583_v47, %v2570_v2 }
 0x215   : > { %v2978_v9 = vadd.f32 %v2977_v0, %v2584_v3  ;;  %v3618_v0 = vld [vmem:[%s6230_s10 + $0x10] sm:$0x33] }
 0x217   : > { %v2992_v19 = vadd.f32 %v2991_v38, %v2978_v9  ;;  %v3609_v38 = vperm.slane %v229_v5, 1 }
 0x218   : > { %v2623_v28 = vpop.f32.mrf.mxu2  ;;  %v2637_v59 = vpop.f32.mrf.mxu3 }
 0x219   : > { %v2624_v7 = vadd.f32 %v2623_v28, %v2610_v11 }
 0x21b   : > { %v2638_v35 = vadd.f32 %v2637_v59, %v2624_v7  ;;  %v3608_v59 = vperm.slane %v229_v5, 0 }
 0x220   : > { %v2625_v51 = vpop.f32.mrf.mxu2  ;;  %v2639_v48 = vpop.f32.mrf.mxu3 }
 0x221   : > { %v2626_v15 = vadd.f32 %v2625_v51, %v2612_v57  ;;  %v3632_v51 = vrot.slane %v3619_v32, 4 }
 0x222   : > { %v3031_v12 = vpop.f32.mrf.mxu0  ;;  %v3045_v4 = vpop.f32.mrf.mxu1 }
 0x223   : > { %v3032_v10 = vadd.f32 %v3031_v12, %v2638_v35  ;;  %v2640_v18 = vadd.f32 %v2639_v48, %v2626_v15  ;;  %v3633_v48 = vrot.slane %v3621_v58, 4 }
 0x225   : > { %v3046_v39 = vadd.f32 %v3045_v4, %v3032_v10 }
 0x22a   : > { %v3003_v52 = vpop.f32.mrf.mxu2  ;;  %v3017_v60 = vpop.f32.mrf.mxu3 }
 0x22b   : > { %v3033_v49 = vpop.f32.mrf.mxu0  ;;  %v8717_v53 = vpop.f32.mrf.mxu1  ;;  %v3004_v36 = vadd.f32 %v3003_v52, %v2990_v62 }
 0x22c   : > { %v3034_v47 = vadd.f32 %v3033_v49, %v2640_v18 }
 0x22d   : > { %v3018_v61 = vadd.f32 %v3017_v60, %v3004_v36 }
 0x232   : > { %v3005_v25 = vpop.f32.mrf.mxu2  ;;  %v8715_v44 = vpop.f32.mrf.mxu3 }
 0x233   : > { %v3006_v3 = vadd.f32 %v3005_v25, %v2992_v19 }
 0x235   : > { %v3020_v11 = vadd.f32 %v8715_v44, %v3006_v3 }
 0x242   : > { %v3500_v54 = vpop.f32.mrf.mxu0  ;;  %v3514_v43 = vpop.f32.mrf.mxu1 }
 0x243   : > { %v3515_v1 = vadd.f32 %v3514_v43, %v3500_v54  ;;  %v3634_v54 = vsel %vm3631_vm6, %v3632_v51, %v3633_v48  ;;  %v3623_v43 = vunpack.c.l.bf16 %v3618_v0 }
 0x24a   : > { %v3059_v17 = vpop.f32.mrf.mxu2  ;;  %v3073_v46 = vpop.f32.mrf.mxu3 }
 0x24b   : > { %v3502_v45 = vpop.f32.mrf.mxu0  ;;  %v3516_v13 = vpop.f32.mrf.mxu1  ;;  %v3060_v42 = vadd.f32 %v3059_v17, %v3046_v39  ;;  %v3048_v17 = vadd.f32 %v8717_v53, %v3034_v47 }
 0x24c   : > { %v3517_v37 = vadd.f32 %v3516_v13, %v3502_v45 }
 0x24d   : > { %v3074_v52 = vadd.f32 %v3073_v46, %v3060_v42 }
 0x252   : > { %v8728_v23 = vpop.f32.mrf.mxu2  ;;  %v8730_v14 = vpop.f32.mrf.mxu3 }
 0x253   : > { %v3062_v46 = vadd.f32 %v8728_v23, %v3048_v17 }
 0x262   : > { %v3556_v40 = vpop.f32.mrf.mxu0  ;;  %v3570_v27 = vpop.f32.mrf.mxu1 }
 0x263   : > { %v3571_v2 = vadd.f32 %v3570_v27, %v3556_v40 }
 0x26a   : > { %v3528_v30 = vpop.f32.mrf.mxu2  ;;  %v3542_v50 = vpop.f32.mrf.mxu3 }
 0x26b   : > { %v3529_v20 = vadd.f32 %v3528_v30, %v3515_v1  ;;  %v3558_v12 = vpop.f32.mrf.mxu0  ;;  %v3572_v4 = vpop.f32.mrf.mxu1  ;;  %v3637_v30 = vsel %vm3631_vm6, %v3635_v33, %v3636_v16  ;;  %v3638_v1 = vrot.slane %v3623_v43, 4 }
 0x26c   : > { %v3573_v45 = vadd.f32 %v3572_v4, %v3558_v12 }
 0x26d   : > { %v3543_v21 = vadd.f32 %v3542_v50, %v3529_v20  ;;  %v3624_v50 = vunpack.c.h.bf16 %v3618_v0  ;;  %v3639_v23 = vsel %vm3631_vm6, %v3633_v48, %v3638_v1 }
 0x26f   : > { %v3603_v28 = vadd.f32 %v3543_v21, %v3018_v61 }
 0x271   : > { %v3612_v25 = vadd.f32 %v3608_v59, %v3603_v28 }
 0x272   : > { %v3530_v8 = vpop.f32.mrf.mxu2  ;;  %v3544_v22 = vpop.f32.mrf.mxu3 }
 0x273   : > { %v3531_v29 = vadd.f32 %v3530_v8, %v3517_v37  ;;  %v3646_v55 = vadd.f32 %v3634_v54, %v3612_v25  ;;  %v3640_v8 = vrot.slane %v3624_v50, 4 }
 0x275   : > { %v3545_v49 = vadd.f32 %v3544_v22, %v3531_v29  ;;  %v3076_v22 = vadd.f32 %v8730_v14, %v3062_v46  ;;  %v3641_v40 = vsel %vm3631_vm6, %v3636_v16, %v3640_v8 }
 0x277   : > { %v3605_v57 = vadd.f32 %v3545_v49, %v3020_v11 }
 0x279   : > { %v3614_v15 = vadd.f32 %v3608_v59, %v3605_v57 }
 0x27b   : > { %v3648_v36 = vadd.f32 %v3639_v23, %v3614_v15 }
 0x28a   : > { %v3584_v26 = vpop.f32.mrf.mxu2  ;;  %v3598_v31 = vpop.f32.mrf.mxu3 }
 0x28b   : > { %v3585_v34 = vadd.f32 %v3584_v26, %v3571_v2 }
 0x28d   : > { %v3599_v60 = vadd.f32 %v3598_v31, %v3585_v34 }
 0x28f   : > { %v3604_v56 = vadd.f32 %v3599_v60, %v3074_v52 }
 0x291   : > { %v3613_v13 = vadd.f32 %v3609_v38, %v3604_v56 }
 0x292   : > { %v3586_v7 = vpop.f32.mrf.mxu2  ;;  %v3600_v62 = vpop.f32.mrf.mxu3 }
 0x293   : > { %v3647_v53 = vadd.f32 %v3637_v30, %v3613_v13  ;;  %v3587_v35 = vadd.f32 %v3586_v7, %v3573_v45 }
 0x295   : > { %v3650_v9 = vpack.c.bf16 %v3647_v53, %v3646_v55  ;;  %v3601_v10 = vadd.f32 %v3600_v62, %v3587_v35 }
 0x297   : > { %v3657_v20 = vrot.slane %v3650_v9, 6  ;;  %v3606_v44 = vadd.f32 %v3601_v10, %v3076_v22 }
 0x299   : > { %3665 = vst [vmem:[%s8724_s15] sm:$0xcc] %v3657_v20  ;;  %v3615_v27 = vadd.f32 %v3609_v38, %v3606_v44  ;;  %v3658_v14 = vrot.slane %v3657_v20, 4 }
 0x29b   : > { %v3649_v63 = vadd.f32 %v3641_v40, %v3615_v27 }
 0x29d   : > { %v3651_v41 = vpack.c.bf16 %v3649_v63, %v3648_v36 }
 0x29f   : > { %v3659_v39 = vrot.slane %v3651_v41, 6 }
 0x2a1   : > { %v3660_v18 = vsel %vm3656_vm9, %v3658_v14, %v3659_v39  ;;  %v3661_v19 = vrot.slane %v3659_v39, 4 }
 0x2a2   : > { %3666 = vst [vmem:[%s8724_s15 + $0x8] sm:$0xff] %v3660_v18 }
 0x2a3   : > { %3667 = vst [vmem:[%s8724_s15 + $0x10] sm:$0x33] %v3661_v19 }
 0x2a4 PF: > { %s15_s18 = sadd.s32 1, %s5924_s18  }
 0x2a5   : > { %p12_p4 = scmp.ge.s32.totalorder %s15_s18, 4  }
 0x2a7   :  { %14 = sbr.rel (!%p12_p4) target bundleno = 1 (0x1), region = 74 }

// kernel: generator_cnn_forward.7
= control target key start
LH: loop header
LB: loop body
LE: loop exit
PB: predicated region body
PF: predicated region fallthrough
CT: control target
= control target key end

     0   :  { %10 = vsyncpa [#allocation4], 0  ;;  %s6348_s0 = inlined_call_operand.vmem [shape: bf16[2,24,256], index: 0, kind: input, shape index: {}]   ;;  %s6349_s1 = inlined_call_operand.hbm [shape: bf16[3,256,512], index: 1, kind: input, shape index: {}]   ;;  %s6350_s2 = inlined_call_operand.vmem [shape: f32[1,512], index: 2, kind: input, shape index: {}]   ;;  %s6351_s3 = inlined_call_operand.hbm [shape: bf16[3,512,256], index: 3, kind: input, shape index: {}]   ;;  %s6352_s4 = inlined_call_operand.vmem [shape: f32[1,256], index: 4, kind: input, shape index: {}]   ;;  %s6353_s5 = inlined_call_operand.vmem [shape: bf16[2,24,256], index: 5, kind: output, shape index: {}]  }
   0x1   :  { %11 = vsyncpa [#allocation6], 0  ;;  %s5860_s18 = smov 0  }
   0x2 LB: > { %s169_s21 = sshll.u32 %s6349_s1, 4  ;;  %s3779_s22 = sadd.s32 4294967295, %s5821_s18   ;;  %s5821_s18 = sphi %s5860_s18, %s17_s18   ;;  %s170_s21 = int_to_ptr.hbm [resolvable:$true] %s169_s21 }
   0x3   : > { %p3781_p0 = scmp.ge.s32.totalorder %s5821_s18, 1  ;;  %p158_p1 = scmp.lt.s32.totalorder %s5821_s18, 3 }
   0x4   : > { %p5728_p2 = scmp.eq.s32.totalorder %s3779_s22, 0  ;;  %s5823_s24 = smov [#allocation3]  }
   0x5   : > { %p5871_p3 = pnand %p3781_p0, %p158_p1  ;;  %s171_s25 = sshll.u32 %s5823_s24, 4  ;;  %s172_s25 = int_to_ptr.vmem [resolvable:$true] %s171_s25 }
   0x6   : > { %s186_s28 = sshll.u32 %s6351_s3, 4  ;;  %s5824_s29 = smov [#allocation5]   ;;  %s187_s28 = int_to_ptr.hbm [resolvable:$true] %s186_s28 }
   0x7   : > { %p5721_p4 = pneg %p5871_p3  ;;  %s188_s30 = sshll.u32 %s5824_s29, 4  ;;  %s189_s30 = int_to_ptr.vmem [resolvable:$true] %s188_s30 }
   0x8   : > { %s5825_s6 = smov 256   ;;  %s5826_s7 = smov 16  }
   0x9   : > { %p5722_p5 = pnand %p5728_p2, %p5721_p4  ;;  %s5827_s8 = smov 128  }
   0xa   : > { %s5828_s9 = smov 8   ;;  %215 = sbr.rel (%p5871_p3) target bundleno = 679 (0x2a7), region = 40 }
   0xb   : > { %5724 = dma.hbm_to_vmem [thread:$0]  (!%p5722_p5), %s170_s21, 24576, %s172_s25, [#allocation4], %s5825_s6, %s5825_s6, %s5826_s7  }
   0xc   : > { %5727 = dma.hbm_to_vmem [thread:$0]  (!%p5722_p5), %s187_s28, 24576, %s189_s30, [#allocation6], %s5827_s8, %s5827_s8, %s5828_s9  }
   0xf   : > { %5812 = dma.done.wait (%p5728_p2), [#allocation4], 24576  }
  0x10   : > { %5814 = vsyncadd (%p5728_p2), [#allocation4], 4294942720 }
  0x11   : > { %5816 = dma.done.wait (%p5728_p2), [#allocation6], 24576  }
  0x12   : > { %5818 = vsyncadd (%p5728_p2), [#allocation6], 4294942720  ;;  %p249_p6 = scmp.lt.s32.totalorder %s3779_s22, 1  ;;  %v3904_v0 = vld [vmem:[#allocation3 + $0x2e0] sm:$0xf]  ;;  %vm918_vm1 = vcmask 1046528  }
  0x13   : > { %v5422_v1 = vld [vmem:[#allocation3 + $0x2ec] sm:$0xf0]  ;;  %v4032_v2 = vld [vmem:[#allocation3 + $0x3e0] sm:$0xf]  ;;  %v5420_v5 = vld [vmem:[#allocation3 + $0x2e4] sm:$0xf] }
  0x14   : > { %s6356_s22 = smov (!%p249_p6, %s3779_s22), 1  ;;  %v3905_v3 = vor.u32 %v5422_v1, %v3904_v0  ;;  %v5454_v4 = vld [vmem:[#allocation3 + $0x3ec] sm:$0xf0]  ;;  %v3906_v6 = vld [vmem:[#allocation3 + $0x2f0] sm:$0xf0]  ;;  %vm1464_vm2 = vcmask 1045504  }
  0x15   : > { %v4033_v7 = vor.u32 %v5454_v4, %v4032_v2  ;;  %v3909_v8 = vor.u32 %v5420_v5, %v3906_v6  ;;  %v5452_v9 = vld [vmem:[#allocation3 + $0x3e4] sm:$0xf]  ;;  %v4034_v10 = vld [vmem:[#allocation3 + $0x3f0] sm:$0xf0]  ;;  %v3888_v11 = vld [vmem:[#allocation3 + $0x2c0] sm:$0xf] }
  0x16   : > { %769 = vmatpush.bf16.msra.mxu0 %v3905_v3  ;;  %v4037_v12 = vor.u32 %v5452_v9, %v4034_v10  ;;  %v5418_v13 = vld [vmem:[#allocation3 + $0x2cc] sm:$0xf0]  ;;  %v4016_v14 = vld [vmem:[#allocation3 + $0x3c0] sm:$0xf]  ;;  %v5416_v18 = vld [vmem:[#allocation3 + $0x2c4] sm:$0xf] }
  0x17   : > { %v5450_v15 = vld [vmem:[#allocation3 + $0x3cc] sm:$0xf0]  ;;  %787 = vmatpush.bf16.msra.mxu1 %v4033_v7  ;;  %805 = vmatpush.bf16.msra.mxu2 %v3909_v8  ;;  %v3889_v16 = vor.u32 %v5418_v13, %v3888_v11  ;;  %v3890_v19 = vld [vmem:[#allocation3 + $0x2d0] sm:$0xf0]  ;;  %v5448_v20 = vld [vmem:[#allocation3 + $0x3c4] sm:$0xf] }
  0x18   : > { %v4017_v17 = vor.u32 %v5450_v15, %v4016_v14  ;;  %823 = vmatpush.bf16.msra.mxu3 %v4037_v12  ;;  %v3893_v21 = vor.u32 %v5416_v18, %v3890_v19  ;;  %v4018_v22 = vld [vmem:[#allocation3 + $0x3d0] sm:$0xf0]  ;;  %v3872_v23 = vld [vmem:[#allocation3 + $0x2a0] sm:$0xf]  ;;  %v5414_v24 = vld [vmem:[#allocation3 + $0x2ac] sm:$0xf0] }
  0x19   : > { %v4021_v25 = vor.u32 %v5448_v20, %v4018_v22  ;;  %v4000_v26 = vld [vmem:[#allocation3 + $0x3a0] sm:$0xf]  ;;  %v5446_v27 = vld [vmem:[#allocation3 + $0x3ac] sm:$0xf0]  ;;  %v5412_v28 = vld [vmem:[#allocation3 + $0x2a4] sm:$0xf]  ;;  %v3873_v29 = vor.u32 %v5414_v24, %v3872_v23 }
  0x1a   : > { %770 = vmatpush.bf16.msra.mxu0 %v3889_v16  ;;  %v3874_v30 = vld [vmem:[#allocation3 + $0x2b0] sm:$0xf0]  ;;  %v5444_v31 = vld [vmem:[#allocation3 + $0x3a4] sm:$0xf]  ;;  %v4001_v33 = vor.u32 %v5446_v27, %v4000_v26  ;;  %v3856_v35 = vld [vmem:[#allocation3 + $0x280] sm:$0xf] }
  0x1b   : > { %v4002_v32 = vld [vmem:[#allocation3 + $0x3b0] sm:$0xf0]  ;;  %788 = vmatpush.bf16.msra.mxu1 %v4017_v17  ;;  %806 = vmatpush.bf16.msra.mxu2 %v3893_v21  ;;  %v3877_v34 = vor.u32 %v5412_v28, %v3874_v30  ;;  %v5410_v36 = vld [vmem:[#allocation3 + $0x28c] sm:$0xf0]  ;;  %v3984_v37 = vld [vmem:[#allocation3 + $0x380] sm:$0xf] }
  0x1c   : > { %824 = vmatpush.bf16.msra.mxu3 %v4021_v25  ;;  %v4005_v38 = vor.u32 %v5444_v31, %v4002_v32  ;;  %v5442_v39 = vld [vmem:[#allocation3 + $0x38c] sm:$0xf0]  ;;  %v5408_v40 = vld [vmem:[#allocation3 + $0x284] sm:$0xf]  ;;  %v3858_v41 = vld [vmem:[#allocation3 + $0x290] sm:$0xf0]  ;;  %v3857_v44 = vor.u32 %v5410_v36, %v3856_v35 }
  0x1d   : > { %v5440_v42 = vld [vmem:[#allocation3 + $0x384] sm:$0xf]  ;;  %v3986_v43 = vld [vmem:[#allocation3 + $0x390] sm:$0xf0]  ;;  %v3840_v45 = vld [vmem:[#allocation3 + $0x260] sm:$0xf]  ;;  %v3985_v46 = vor.u32 %v5442_v39, %v3984_v37  ;;  %v3861_v47 = vor.u32 %v5408_v40, %v3858_v41 }
  0x1e   : > { %771 = vmatpush.bf16.msra.mxu0 %v3873_v29  ;;  %s5712_s10 = smul.u32 24, %s6356_s22  ;;  %v5406_v48 = vld [vmem:[#allocation3 + $0x26c] sm:$0xf0]  ;;  %v3968_v49 = vld [vmem:[#allocation3 + $0x360] sm:$0xf]  ;;  %v3989_v51 = vor.u32 %v5440_v42, %v3986_v43  ;;  %vm3665_vm6 = vcmask 1043456  }
  0x1f   : > { %789 = vmatpush.bf16.msra.mxu1 %v4001_v33  ;;  %807 = vmatpush.bf16.msra.mxu2 %v3877_v34  ;;  %v5438_v50 = vld [vmem:[#allocation3 + $0x36c] sm:$0xf0]  ;;  %v5404_v52 = vld [vmem:[#allocation3 + $0x264] sm:$0xf]  ;;  %v3842_v53 = vld [vmem:[#allocation3 + $0x270] sm:$0xf0]  ;;  %v3841_v58 = vor.u32 %v5406_v48, %v3840_v45 }
  0x20   : > { %825 = vmatpush.bf16.msra.mxu3 %v4005_v38  ;;  %v5436_v54 = vld [vmem:[#allocation3 + $0x364] sm:$0xf]  ;;  %v3970_v55 = vld [vmem:[#allocation3 + $0x370] sm:$0xf0]  ;;  %v3824_v56 = vld [vmem:[#allocation3 + $0x240] sm:$0xf]  ;;  %v3969_v63 = vor.u32 %v5438_v50, %v3968_v49  ;;  %v3845_v0 = vor.u32 %v5404_v52, %v3842_v53  ;;  %s5899_s13 = scalar_lea.vmem %s6348_s0, %s5712_s10  ;;  %s6320_s19 = scalar_lea.vmem %s6353_s5, %s5712_s10 }
  0x21   : > { %v5402_v57 = vld [vmem:[#allocation3 + $0x24c] sm:$0xf0]  ;;  %v3952_v59 = vld [vmem:[#allocation3 + $0x340] sm:$0xf]  ;;  %v5400_v61 = vld [vmem:[#allocation3 + $0x244] sm:$0xf]  ;;  %v3973_v4 = vor.u32 %v5436_v54, %v3970_v55 }
  0x22   : > { %772 = vmatpush.bf16.msra.mxu0 %v3857_v44  ;;  %v5434_v60 = vld [vmem:[#allocation3 + $0x34c] sm:$0xf0]  ;;  %v3826_v62 = vld [vmem:[#allocation3 + $0x250] sm:$0xf0]  ;;  %v5432_v1 = vld [vmem:[#allocation3 + $0x344] sm:$0xf]  ;;  %v3825_v11 = vor.u32 %v5402_v57, %v3824_v56 }
  0x23   : > { %790 = vmatpush.bf16.msra.mxu1 %v3985_v46  ;;  %808 = vmatpush.bf16.msra.mxu2 %v3861_v47  ;;  %v3954_v2 = vld [vmem:[#allocation3 + $0x350] sm:$0xf0]  ;;  %v3808_v3 = vld [vmem:[#allocation3 + $0x220] sm:$0xf]  ;;  %v5398_v5 = vld [vmem:[#allocation3 + $0x22c] sm:$0xf0]  ;;  %v3953_v15 = vor.u32 %v5434_v60, %v3952_v59  ;;  %v3829_v16 = vor.u32 %v5400_v61, %v3826_v62 }
  0x24   : > { %826 = vmatpush.bf16.msra.mxu3 %v3989_v51  ;;  %v5890_v6 = vld [vmem:[#allocation3 + $0x320] sm:$0xf]  ;;  %v5430_v7 = vld [vmem:[#allocation3 + $0x32c] sm:$0xf0]  ;;  %v5396_v8 = vld [vmem:[#allocation3 + $0x224] sm:$0xf]  ;;  %v3957_v20 = vor.u32 %v5432_v1, %v3954_v2  ;;  %v3809_v21 = vor.u32 %v5398_v5, %v3808_v3 }
  0x25   : > { %v3810_v9 = vld [vmem:[#allocation3 + $0x230] sm:$0xf0]  ;;  %v5892_v10 = vld [vmem:[#allocation3 + $0x324] sm:$0xf]  ;;  %v5901_v13 = vld [vmem:[#allocation3 + $0x200] sm:$0xf]  ;;  %v3937_v22 = vor.u32 %v5430_v7, %v5890_v6 }
  0x26   : > { %773 = vmatpush.bf16.msra.mxu0 %v3841_v58  ;;  %v3938_v12 = vld [vmem:[#allocation3 + $0x330] sm:$0xf0]  ;;  %v5903_v14 = vld [vmem:[#allocation3 + $0x20c] sm:$0xf0]  ;;  %v5905_v17 = vld [vmem:[#allocation3 + $0x300] sm:$0xf]  ;;  %v3813_v23 = vor.u32 %v5396_v8, %v3810_v9 }
  0x27   : > { %791 = vmatpush.bf16.msra.mxu1 %v3969_v63  ;;  %809 = vmatpush.bf16.msra.mxu2 %v3845_v0  ;;  %v5907_v18 = vld [vmem:[#allocation3 + $0x30c] sm:$0xf0]  ;;  %v5909_v19 = vld [vmem:[#allocation3 + $0x204] sm:$0xf]  ;;  %v5912_v24 = vld [vmem:[#allocation3 + $0x210] sm:$0xf0]  ;;  %v3941_v27 = vor.u32 %v5892_v10, %v3938_v12  ;;  %v3793_v28 = vor.u32 %v5903_v14, %v5901_v13 }
  0x28   : > { %827 = vmatpush.bf16.msra.mxu3 %v3973_v4  ;;  %v264_v25 = vld [vmem:[%s5899_s13] sm:$0xee]  ;;  %v5916_v26 = vld [vmem:[%s5899_s13 + $0x8] sm:$0xff]  ;;  %v5921_v29 = vld [vmem:[#allocation3 + $0x304] sm:$0xf]  ;;  %v3921_v40 = vor.u32 %v5907_v18, %v5905_v17  ;;  %v3797_v41 = vor.u32 %v5909_v19, %v5912_v24  ;;  %vm3688_vm7 = vcmask 1041408  }
  0x29   : > { %v331_v30 = vld [vmem:[%s5899_s13 + $0x10] sm:$0x77]  ;;  %v400_v31 = vunpack.c.l.b16 %v264_v25  ;;  %v402_v32 = vunpack.c.l.b16 %v5916_v26  ;;  %v3922_v33 = vld [vmem:[#allocation3 + $0x310] sm:$0xf0]  ;;  %v401_v35 = vunpack.c.h.b16 %v264_v25  ;;  %v403_v36 = vunpack.c.h.b16 %v5916_v26  ;;  %v3912_v38 = vld [vmem:[#allocation3 + $0x2e8] sm:$0xf] }
  0x2a   : > { %774 = vmatpush.bf16.msra.mxu0 %v3825_v11  ;;  %v404_v34 = vunpack.c.l.b16 %v331_v30  ;;  %v405_v37 = vunpack.c.h.b16 %v331_v30  ;;  %v5423_v39 = vld [vmem:[#allocation3 + $0x2f4] sm:$0xf0]  ;;  %vm410_vm0 = vsmask.f32 6400  ;;  %v3925_v46 = vor.u32 %v5921_v29, %v3922_v33  ;;  %v4040_v50 = vld [vmem:[#allocation3 + $0x3e8] sm:$0xf] }
  0x2b   : > { %792 = vmatpush.bf16.msra.mxu1 %v3953_v15  ;;  %810 = vmatpush.bf16.msra.mxu2 %v3829_v16  ;;  %v5932_v42 = vpack.c.b16 %v402_v32, %v400_v31  ;;  %v5938_v44 = vpack.c.b16 %v403_v36, %v401_v35  ;;  %v3913_v49 = vor.u32 %v5423_v39, %v3912_v38  ;;  %v5455_v51 = vld [vmem:[#allocation3 + $0x3f4] sm:$0xf0]  ;;  %v5421_v56 = vld [vmem:[#allocation3 + $0x2ec] sm:$0xf]  ;;  %v3914_v57 = vld [vmem:[#allocation3 + $0x2f8] sm:$0xf0] }
  0x2c   : > { %828 = vmatpush.bf16.msra.mxu3 %v3957_v20  ;;  %v5934_v43 = vpack.c.b16 %v404_v34, %v404_v34  ;;  %v5940_v45 = vpack.c.b16 %v405_v37, %v405_v37  ;;  %v5453_v62 = vld [vmem:[#allocation3 + $0x3ec] sm:$0xf]  ;;  %v4042_v3 = vld [vmem:[#allocation3 + $0x3f8] sm:$0xf0]  ;;  %v4041_v7 = vor.u32 %v5455_v51, %v4040_v50  ;;  %v3896_v8 = vld [vmem:[#allocation3 + $0x2c8] sm:$0xf]  ;;  %v3917_v15 = vor.u32 %v5421_v56, %v3914_v57 }
  0x2d   : > { %v412_v47 = vshrl.u32 %v5932_v42, 16  ;;  %v415_v48 = vshll.u32 %v5932_v42, 16  ;;  %v429_v54 = vshrl.u32 %v5938_v44, 16  ;;  %v432_v55 = vshll.u32 %v5938_v44, 16  ;;  %v5419_v9 = vld [vmem:[#allocation3 + $0x2d4] sm:$0xf0] }
  0x2e   : > { %775 = vmatpush.bf16.msra.mxu0 %v3809_v21  ;;  %v420_v52 = vshrl.u32 %v5934_v43, 16  ;;  %v423_v53 = vshll.u32 %v5934_v43, 16  ;;  %v437_v60 = vshrl.u32 %v5940_v45, 16  ;;  %v440_v61 = vshll.u32 %v5940_v45, 16  ;;  %v4024_v12 = vld [vmem:[#allocation3 + $0x3c8] sm:$0xf] }
  0x2f   : > { %793 = vmatpush.bf16.msra.mxu1 %v3937_v22  ;;  %811 = vmatpush.bf16.msra.mxu2 %v3813_v23  ;;  %v414_v58 = vrot.slane %v412_v47, 1  ;;  %v417_v59 = vrot.slane %v415_v48, 2  ;;  %v431_v1 = vrot.slane %v429_v54, 1  ;;  %v434_v2 = vrot.slane %v432_v55, 2  ;;  %v5451_v13 = vld [vmem:[#allocation3 + $0x3d4] sm:$0xf0] }
  0x30   : > { %829 = vmatpush.bf16.msra.mxu3 %v3941_v27  ;;  %v422_v63 = vrot.slane %v420_v52, 1  ;;  %v425_v0 = vrot.slane %v423_v53, 2  ;;  %v439_v5 = vrot.slane %v437_v60, 1  ;;  %v442_v6 = vrot.slane %v440_v61, 2  ;;  %v5417_v19 = vld [vmem:[#allocation3 + $0x2cc] sm:$0xf] }
  0x31   : > { %v418_v4 = vor.u32 %v417_v59, %v414_v58  ;;  %v435_v11 = vor.u32 %v434_v2, %v431_v1  ;;  %v4045_v17 = vor.u32 %v5453_v62, %v4042_v3  ;;  %v3897_v18 = vor.u32 %v5419_v9, %v3896_v8  ;;  %v3898_v20 = vld [vmem:[#allocation3 + $0x2d8] sm:$0xf0]  ;;  %v5449_v21 = vld [vmem:[#allocation3 + $0x3cc] sm:$0xf]  ;;  %v3880_v25 = vld [vmem:[#allocation3 + $0x2a8] sm:$0xf] }
  0x32   : > { %776 = vmatpush.bf16.msra.mxu0 %v3793_v28  ;;  %v5951_v10 = vor.u32 %v425_v0, %v422_v63  ;;  %v5953_v14 = vor.u32 %v442_v6, %v439_v5  ;;  %v4025_v23 = vor.u32 %v5451_v13, %v4024_v12  ;;  %v4026_v24 = vld [vmem:[#allocation3 + $0x3d8] sm:$0xf0]  ;;  %v5415_v27 = vld [vmem:[#allocation3 + $0x2b4] sm:$0xf0]  ;;  %v4008_v28 = vld [vmem:[#allocation3 + $0x3a8] sm:$0xf]  ;;  %v3901_v30 = vor.u32 %v5417_v19, %v3898_v20 }
  0x33   : > { %794 = vmatpush.bf16.msra.mxu1 %v3921_v40  ;;  %812 = vmatpush.bf16.msra.mxu2 %v3797_v41  ;;  %v5447_v29 = vld [vmem:[#allocation3 + $0x3b4] sm:$0xf0]  ;;  %v4029_v31 = vor.u32 %v5449_v21, %v4026_v24  ;;  %v3881_v33 = vor.u32 %v5415_v27, %v3880_v25  ;;  %v5413_v34 = vld [vmem:[#allocation3 + $0x2ac] sm:$0xf]  ;;  %v3882_v35 = vld [vmem:[#allocation3 + $0x2b8] sm:$0xf0] }
  0x34   : > { %830 = vmatpush.bf16.msra.mxu3 %v3925_v46  ;;  %v5957_v16 = vsel %vm410_vm0, %v418_v4, %v5951_v10  ;;  %v5962_v22 = vsel %vm410_vm0, %v435_v11, %v5953_v14  ;;  %v5445_v37 = vld [vmem:[#allocation3 + $0x3ac] sm:$0xf]  ;;  %v4009_v38 = vor.u32 %v5447_v29, %v4008_v28  ;;  %v4010_v39 = vld [vmem:[#allocation3 + $0x3b8] sm:$0xf0]  ;;  %v3864_v40 = vld [vmem:[#allocation3 + $0x288] sm:$0xf]  ;;  %v3885_v48 = vor.u32 %v5413_v34, %v3882_v35 }
  0x35   : > { %777 = vmatmul.bf16.vlgmr.msra.gmra.mxu0 %v5957_v16  ;;  %v5411_v41 = vld [vmem:[#allocation3 + $0x294] sm:$0xf0]  ;;  %v3992_v46 = vld [vmem:[#allocation3 + $0x388] sm:$0xf]  ;;  %v5409_v51 = vld [vmem:[#allocation3 + $0x28c] sm:$0xf] }
  0x36   : > { %841 = vmatpush.bf16.msrb.mxu0 %v3913_v49  ;;  %795 = vmatmul.bf16.vlgmr.msra.gmra.mxu1 %v5962_v22  ;;  %v5443_v47 = vld [vmem:[#allocation3 + $0x394] sm:$0xf0]  ;;  %v4013_v49 = vor.u32 %v5445_v37, %v4010_v39  ;;  %v3865_v50 = vor.u32 %v5411_v41, %v3864_v40  ;;  %v3866_v52 = vld [vmem:[#allocation3 + $0x298] sm:$0xf0]  ;;  %v5441_v53 = vld [vmem:[#allocation3 + $0x38c] sm:$0xf] }
  0x37   : > { %859 = vmatpush.bf16.msrb.mxu1 %v4041_v7  ;;  %813 = vmatmul.bf16.vlgmr.msra.gmra.mxu2 %v5957_v16  ;;  %v3993_v54 = vor.u32 %v5443_v47, %v3992_v46  ;;  %v3994_v55 = vld [vmem:[#allocation3 + $0x398] sm:$0xf0]  ;;  %v3848_v56 = vld [vmem:[#allocation3 + $0x268] sm:$0xf]  ;;  %v5407_v57 = vld [vmem:[#allocation3 + $0x274] sm:$0xf0]  ;;  %v3869_v60 = vor.u32 %v5409_v51, %v3866_v52 }
  0x38   : > { %831 = vmatmul.bf16.vlgmr.msra.gmra.mxu3 %v5962_v22  ;;  %877 = vmatpush.bf16.msrb.mxu2 %v3917_v15  ;;  %v3976_v58 = vld [vmem:[#allocation3 + $0x368] sm:$0xf]  ;;  %v5439_v59 = vld [vmem:[#allocation3 + $0x374] sm:$0xf0]  ;;  %v3997_v61 = vor.u32 %v5441_v53, %v3994_v55  ;;  %v3849_v62 = vor.u32 %v5407_v57, %v3848_v56  ;;  %v5405_v63 = vld [vmem:[#allocation3 + $0x26c] sm:$0xf] }
  0x39   : > { %895 = vmatpush.bf16.msrb.mxu3 %v4045_v17  ;;  %v3850_v0 = vld [vmem:[#allocation3 + $0x278] sm:$0xf0]  ;;  %v5437_v1 = vld [vmem:[#allocation3 + $0x36c] sm:$0xf]  ;;  %v3977_v2 = vor.u32 %v5439_v59, %v3976_v58  ;;  %v3832_v4 = vld [vmem:[#allocation3 + $0x248] sm:$0xf] }
  0x3a   : > { %842 = vmatpush.bf16.msrb.mxu0 %v3897_v18  ;;  %v3978_v3 = vld [vmem:[#allocation3 + $0x378] sm:$0xf0]  ;;  %v5403_v5 = vld [vmem:[#allocation3 + $0x254] sm:$0xf0]  ;;  %v3960_v6 = vld [vmem:[#allocation3 + $0x348] sm:$0xf]  ;;  %v3853_v8 = vor.u32 %v5405_v63, %v3850_v0 }
  0x3b   : > { %860 = vmatpush.bf16.msrb.mxu1 %v4025_v23  ;;  %v5435_v7 = vld [vmem:[#allocation3 + $0x354] sm:$0xf0]  ;;  %v3981_v9 = vor.u32 %v5437_v1, %v3978_v3  ;;  %v3833_v11 = vor.u32 %v5403_v5, %v3832_v4  ;;  %v5401_v12 = vld [vmem:[#allocation3 + $0x24c] sm:$0xf]  ;;  %v3834_v13 = vld [vmem:[#allocation3 + $0x258] sm:$0xf0] }
  0x3c   : > { %878 = vmatpush.bf16.msrb.mxu2 %v3901_v30  ;;  %v5433_v15 = vld [vmem:[#allocation3 + $0x34c] sm:$0xf]  ;;  %v3961_v17 = vor.u32 %v5435_v7, %v3960_v6  ;;  %v3962_v18 = vld [vmem:[#allocation3 + $0x358] sm:$0xf0]  ;;  %v3816_v19 = vld [vmem:[#allocation3 + $0x228] sm:$0xf]  ;;  %v3837_v24 = vor.u32 %v5401_v12, %v3834_v13 }
  0x3d   : > { %896 = vmatpush.bf16.msrb.mxu3 %v4029_v31  ;;  %v5399_v20 = vld [vmem:[#allocation3 + $0x234] sm:$0xf0]  ;;  %v3944_v21 = vld [vmem:[#allocation3 + $0x328] sm:$0xf]  ;;  %v5397_v25 = vld [vmem:[#allocation3 + $0x22c] sm:$0xf]  ;;  %v3965_v27 = vor.u32 %v5433_v15, %v3962_v18 }
  0x3e   : > { %843 = vmatpush.bf16.msrb.mxu0 %v3881_v33  ;;  %v5431_v23 = vld [vmem:[#allocation3 + $0x334] sm:$0xf0]  ;;  %v3817_v28 = vor.u32 %v5399_v20, %v3816_v19  ;;  %v3818_v29 = vld [vmem:[#allocation3 + $0x238] sm:$0xf0]  ;;  %v5429_v30 = vld [vmem:[#allocation3 + $0x32c] sm:$0xf] }
  0x3f   : > { %861 = vmatpush.bf16.msrb.mxu1 %v4009_v38  ;;  %v3946_v31 = vld [vmem:[#allocation3 + $0x338] sm:$0xf0]  ;;  %v3945_v33 = vor.u32 %v5431_v23, %v3944_v21  ;;  %v3800_v34 = vld [vmem:[#allocation3 + $0x208] sm:$0xf]  ;;  %v5395_v35 = vld [vmem:[#allocation3 + $0x214] sm:$0xf0]  ;;  %v3821_v41 = vor.u32 %v5397_v25, %v3818_v29 }
  0x40   : > { %879 = vmatpush.bf16.msrb.mxu2 %v3885_v48  ;;  %v3928_v37 = vld [vmem:[#allocation3 + $0x308] sm:$0xf]  ;;  %v5427_v38 = vld [vmem:[#allocation3 + $0x314] sm:$0xf0]  ;;  %v4160_v39 = vld [vmem:[#allocation3 + $0xe0] sm:$0xf]  ;;  %v3949_v48 = vor.u32 %v5429_v30, %v3946_v31 }
  0x41   : > { %897 = vmatpush.bf16.msrb.mxu3 %v4013_v49  ;;  %v5358_v40 = vld [vmem:[#allocation3 + $0xec] sm:$0xf0]  ;;  %v4288_v46 = vld [vmem:[#allocation3 + $0x1e0] sm:$0xf]  ;;  %v3801_v49 = vor.u32 %v5395_v35, %v3800_v34  ;;  %v3802_v51 = vld [vmem:[#allocation3 + $0x218] sm:$0xf0]  ;;  %v3929_v53 = vor.u32 %v5427_v38, %v3928_v37 }
  0x42   : > { %844 = vmatpush.bf16.msrb.mxu0 %v3865_v50  ;;  %v5390_v47 = vld [vmem:[#allocation3 + $0x1ec] sm:$0xf0]  ;;  %v5393_v50 = vld [vmem:[#allocation3 + $0x20c] sm:$0xf]  ;;  %v4161_v55 = vor.u32 %v5358_v40, %v4160_v39  ;;  %v5356_v56 = vld [vmem:[#allocation3 + $0xe4] sm:$0xf] }
  0x43   : > { %862 = vmatpush.bf16.msrb.mxu1 %v3993_v54  ;;  %v5425_v52 = vld [vmem:[#allocation3 + $0x30c] sm:$0xf]  ;;  %v3930_v54 = vld [vmem:[#allocation3 + $0x318] sm:$0xf0]  ;;  %v4162_v57 = vld [vmem:[#allocation3 + $0xf0] sm:$0xf0]  ;;  %v4289_v58 = vor.u32 %v5390_v47, %v4288_v46 }
  0x44   : > { %880 = vmatpush.bf16.msrb.mxu2 %v3869_v60  ;;  %v5388_v59 = vld [vmem:[#allocation3 + $0x1e4] sm:$0xf]  ;;  %v4290_v60 = vld [vmem:[#allocation3 + $0x1f0] sm:$0xf0]  ;;  %v4165_v63 = vor.u32 %v5356_v56, %v4162_v57  ;;  %v4144_v0 = vld [vmem:[#allocation3 + $0xc0] sm:$0xf] }
  0x45   : > { %898 = vmatpush.bf16.msrb.mxu3 %v3997_v61  ;;  %782 = vmatmul.bf16.gmra.mxu0 %v5951_v10  ;;  %v3805_v61 = vor.u32 %v5393_v50, %v3802_v51  ;;  %v5354_v1 = vld [vmem:[#allocation3 + $0xcc] sm:$0xf0]  ;;  %v4293_v3 = vor.u32 %v5388_v59, %v4290_v60  ;;  %v5352_v5 = vld [vmem:[#allocation3 + $0xc4] sm:$0xf]  ;;  %v4146_v6 = vld [vmem:[#allocation3 + $0xd0] sm:$0xf0] }
  0x46   : > { %845 = vmatpush.bf16.msrb.mxu0 %v3849_v62  ;;  %800 = vmatmul.bf16.gmra.mxu1 %v5953_v14  ;;  %v3933_v62 = vor.u32 %v5425_v52, %v3930_v54  ;;  %v5386_v4 = vld [vmem:[#allocation3 + $0x1cc] sm:$0xf0]  ;;  %v5384_v7 = vld [vmem:[#allocation3 + $0x1c4] sm:$0xf]  ;;  %v4149_v12 = vor.u32 %v5352_v5, %v4146_v6  ;;  %v4128_v13 = vld [vmem:[#allocation3 + $0xa0] sm:$0xf] }
  0x47   : > { %863 = vmatpush.bf16.msrb.mxu1 %v3977_v2  ;;  %818 = vmatmul.bf16.gmra.mxu2 %v5951_v10  ;;  %v4272_v2 = vld [vmem:[#allocation3 + $0x1c0] sm:$0xf]  ;;  %v5350_v15 = vld [vmem:[#allocation3 + $0xac] sm:$0xf0]  ;;  %v5348_v20 = vld [vmem:[#allocation3 + $0xa4] sm:$0xf] }
  0x48   : > { %836 = vmatmul.bf16.gmra.mxu3 %v5953_v14  ;;  %881 = vmatpush.bf16.msrb.mxu2 %v3853_v8  ;;  %v4274_v8 = vld [vmem:[#allocation3 + $0x1d0] sm:$0xf0]  ;;  %v5382_v19 = vld [vmem:[#allocation3 + $0x1ac] sm:$0xf0]  ;;  %v5380_v23 = vld [vmem:[#allocation3 + $0x1a4] sm:$0xf]  ;;  %v4129_v25 = vor.u32 %v5350_v15, %v4128_v13 }
  0x49   : > { %899 = vmatpush.bf16.msrb.mxu3 %v3981_v9  ;;  %v4145_v9 = vor.u32 %v5354_v1, %v4144_v0  ;;  %v4277_v18 = vor.u32 %v5384_v7, %v4274_v8  ;;  %v4130_v21 = vld [vmem:[#allocation3 + $0xb0] sm:$0xf0]  ;;  %v4112_v29 = vld [vmem:[#allocation3 + $0x80] sm:$0xf]  ;;  %v5346_v30 = vld [vmem:[#allocation3 + $0x8c] sm:$0xf0] }
  0x4a   : > { %846 = vmatpush.bf16.msrb.mxu0 %v3833_v11  ;;  %v4273_v11 = vor.u32 %v5386_v4, %v4272_v2  ;;  %v4240_v31 = vld [vmem:[#allocation3 + $0x180] sm:$0xf]  ;;  %v5378_v34 = vld [vmem:[#allocation3 + $0x18c] sm:$0xf0]  ;;  %v5344_v35 = vld [vmem:[#allocation3 + $0x84] sm:$0xf]  ;;  %v4113_v39 = vor.u32 %v5346_v30, %v4112_v29 }
  0x4b   : > { %864 = vmatpush.bf16.msrb.mxu1 %v3961_v17  ;;  %v4256_v17 = vld [vmem:[#allocation3 + $0x1a0] sm:$0xf]  ;;  %v4114_v37 = vld [vmem:[#allocation3 + $0x90] sm:$0xf0]  ;;  %v5376_v38 = vld [vmem:[#allocation3 + $0x184] sm:$0xf] }
  0x4c   : > { %882 = vmatpush.bf16.msrb.mxu2 %v3837_v24  ;;  %v4258_v24 = vld [vmem:[#allocation3 + $0x1b0] sm:$0xf0]  ;;  %v4117_v40 = vor.u32 %v5344_v35, %v4114_v37  ;;  %v5342_v46 = vld [vmem:[#allocation3 + $0x6c] sm:$0xf0]  ;;  %v4224_v47 = vld [vmem:[#allocation3 + $0x160] sm:$0xf] }
  0x4d   : > { %900 = vmatpush.bf16.msrb.mxu3 %v3965_v27  ;;  %v4257_v27 = vor.u32 %v5382_v19, %v4256_v17  ;;  %v5340_v50 = vld [vmem:[#allocation3 + $0x64] sm:$0xf]  ;;  %v4098_v51 = vld [vmem:[#allocation3 + $0x70] sm:$0xf0]  ;;  %v4080_v57 = vld [vmem:[#allocation3 + $0x40] sm:$0xf] }
  0x4e   : > { %847 = vmatpush.bf16.msrb.mxu0 %v3817_v28  ;;  %v4133_v28 = vor.u32 %v5348_v20, %v4130_v21  ;;  %v5372_v52 = vld [vmem:[#allocation3 + $0x164] sm:$0xf]  ;;  %v4101_v56 = vor.u32 %v5340_v50, %v4098_v51  ;;  %v4208_v59 = vld [vmem:[#allocation3 + $0x140] sm:$0xf]  ;;  %v4210_v1 = vld [vmem:[#allocation3 + $0x150] sm:$0xf0] }
  0x4f   : > { %865 = vmatpush.bf16.msrb.mxu1 %v3945_v33  ;;  %v4261_v33 = vor.u32 %v5380_v23, %v4258_v24  ;;  %v5368_v0 = vld [vmem:[#allocation3 + $0x144] sm:$0xf]  ;;  %v4064_v6 = vld [vmem:[#allocation3 + $0x20] sm:$0xf]  ;;  %v5334_v7 = vld [vmem:[#allocation3 + $0x2c] sm:$0xf0] }
  0x50   : > { %883 = vmatpush.bf16.msrb.mxu2 %v3821_v41  ;;  %v4096_v41 = vld [vmem:[#allocation3 + $0x60] sm:$0xf]  ;;  %v4066_v13 = vld [vmem:[#allocation3 + $0x30] sm:$0xf0]  ;;  %v5364_v15 = vld [vmem:[#allocation3 + $0x124] sm:$0xf]  ;;  %v4065_v19 = vor.u32 %v5334_v7, %v4064_v6 }
  0x51   : > { %901 = vmatpush.bf16.msrb.mxu3 %v3949_v48  ;;  %v4097_v54 = vor.u32 %v5342_v46, %v4096_v41  ;;  %v4192_v8 = vld [vmem:[#allocation3 + $0x120] sm:$0xf]  ;;  %v4194_v17 = vld [vmem:[#allocation3 + $0x130] sm:$0xf0]  ;;  %v5330_v21 = vld [vmem:[#allocation3 + $0xc] sm:$0xf0] }
  0x52   : > { %848 = vmatpush.bf16.msrb.mxu0 %v3801_v49  ;;  %v5374_v49 = vld [vmem:[#allocation3 + $0x16c] sm:$0xf0]  ;;  %v4048_v20 = vld [vmem:[#allocation3] sm:$0xf]  ;;  %v5328_v29 = vld [vmem:[#allocation3 + $0x4] sm:$0xf]  ;;  %v4197_v30 = vor.u32 %v5364_v15, %v4194_v17 }
  0x53   : > { %866 = vmatpush.bf16.msrb.mxu1 %v3929_v53  ;;  %v4226_v53 = vld [vmem:[#allocation3 + $0x170] sm:$0xf0]  ;;  %v4168_v35 = vld [vmem:[#allocation3 + $0xe8] sm:$0xf]  ;;  %v919_v51 = vrot.slane %v5932_v42, 1  ;;  %vm3689_vm8 = vcmask 1045508  }
  0x54   : > { %884 = vmatpush.bf16.msrb.mxu2 %v3805_v61  ;;  %v4229_v60 = vor.u32 %v5372_v52, %v4226_v53  ;;  %v5370_v61 = vld [vmem:[#allocation3 + $0x14c] sm:$0xf0]  ;;  %v4296_v37 = vld [vmem:[#allocation3 + $0x1e8] sm:$0xf]  ;;  %v5353_v42 = vld [vmem:[#allocation3 + $0xcc] sm:$0xf] }
  0x55   : > { %902 = vmatpush.bf16.msrb.mxu3 %v3933_v62  ;;  %849 = vmatmul.bf16.vlgmr.msrb.gmra.mxu0 %v5957_v16  ;;  %v5336_v62 = vld [vmem:[#allocation3 + $0x44] sm:$0xf]  ;;  %v4209_v4 = vor.u32 %v5370_v61, %v4208_v59  ;;  %v5355_v59 = vld [vmem:[#allocation3 + $0xd4] sm:$0xf0]  ;;  %v4264_v7 = vld [vmem:[#allocation3 + $0x1a8] sm:$0xf] }
  0x56   : > { %1249 = vmatpush.bf16.msra.mxu0 %v4161_v55  ;;  %867 = vmatmul.bf16.vlgmr.msrb.gmra.mxu1 %v5962_v22  ;;  %v4225_v55 = vor.u32 %v5374_v49, %v4224_v47  ;;  %v5389_v47 = vld [vmem:[#allocation3 + $0x1ec] sm:$0xf]  ;;  %v5387_v61 = vld [vmem:[#allocation3 + $0x1d4] sm:$0xf0]  ;;  %v4266_v15 = vld [vmem:[#allocation3 + $0x1b8] sm:$0xf0] }
  0x57   : > { %1267 = vmatpush.bf16.msra.mxu1 %v4289_v58  ;;  %885 = vmatmul.bf16.vlgmr.msrb.gmra.mxu2 %v5957_v16  ;;  %v4242_v16 = vld [vmem:[#allocation3 + $0x190] sm:$0xf0]  ;;  %v5338_v58 = vld [vmem:[#allocation3 + $0x4c] sm:$0xf0]  ;;  %v5351_v6 = vld [vmem:[#allocation3 + $0xb4] sm:$0xf0] }
  0x58   : > { %1285 = vmatpush.bf16.msra.mxu2 %v4165_v63  ;;  %903 = vmatmul.bf16.vlgmr.msrb.gmra.mxu3 %v5962_v22  ;;  %v4241_v22 = vor.u32 %v5378_v34, %v4240_v31  ;;  %v4245_v48 = vor.u32 %v5376_v38, %v4242_v16  ;;  %v4082_v63 = vld [vmem:[#allocation3 + $0x50] sm:$0xf0]  ;;  %v4081_v2 = vor.u32 %v5338_v58, %v4080_v57  ;;  %v5360_v31 = vld [vmem:[#allocation3 + $0x104] sm:$0xf]  ;;  %v4152_v58 = vld [vmem:[#allocation3 + $0xc8] sm:$0xf] }
  0x59   : > { %1303 = vmatpush.bf16.msra.mxu3 %v4293_v3  ;;  %v266_v3 = vld [vmem:[%s5899_s13 + $0x10] sm:$0x33]  ;;  %v4085_v5 = vor.u32 %v5336_v62, %v4082_v63  ;;  %v4049_v38 = vor.u32 %v5330_v21, %v4048_v20  ;;  %v4154_v62 = vld [vmem:[#allocation3 + $0xd8] sm:$0xf0]  ;;  %v4120_v20 = vld [vmem:[#allocation3 + $0x88] sm:$0xf] }
  0x5a   : > { %1250 = vmatpush.bf16.msra.mxu0 %v4145_v9  ;;  %v4213_v9 = vor.u32 %v5368_v0, %v4210_v1  ;;  %v915_v23 = vunpack.c.h.b16 %v266_v3  ;;  %v4282_v0 = vld [vmem:[#allocation3 + $0x1d8] sm:$0xf0]  ;;  %v5347_v21 = vld [vmem:[#allocation3 + $0x94] sm:$0xf0]  ;;  %vm2191_vm5 = vsmask.f32 7424  ;;  %vm3690_vm9 = vmor %vm3688_vm7, %vm3689_vm8 }
  0x5b   : > { %1268 = vmatpush.bf16.msra.mxu1 %v4273_v11  ;;  %v5366_v11 = vld [vmem:[#allocation3 + $0x12c] sm:$0xf0] }
  0x5c   : > { %1286 = vmatpush.bf16.msra.mxu2 %v4149_v12  ;;  %v5332_v12 = vld [vmem:[#allocation3 + $0x24] sm:$0xf]  ;;  %v4193_v24 = vor.u32 %v5366_v11, %v4192_v8  ;;  %v917_v16 = vpack.c.b16 %v915_v23, %v915_v23  ;;  %v5349_v11 = vld [vmem:[#allocation3 + $0xac] sm:$0xf]  ;;  %v4248_v23 = vld [vmem:[#allocation3 + $0x188] sm:$0xf] }
  0x5d   : > { %1304 = vmatpush.bf16.msra.mxu3 %v4277_v18  ;;  %v914_v18 = vunpack.c.l.b16 %v266_v3 }
  0x5e   : > { %1251 = vmatpush.bf16.msra.mxu0 %v4129_v25  ;;  %v4069_v25 = vor.u32 %v5332_v12, %v4066_v13  ;;  %v4138_v12 = vld [vmem:[#allocation3 + $0xb8] sm:$0xf0]  ;;  %v5381_v13 = vld [vmem:[#allocation3 + $0x1ac] sm:$0xf] }
  0x5f   : > { %1269 = vmatpush.bf16.msra.mxu1 %v4257_v27  ;;  %v4176_v27 = vld [vmem:[#allocation3 + $0x100] sm:$0xf]  ;;  %v916_v34 = vpack.c.b16 %v914_v18, %v914_v18 }
  0x60   : > { %1287 = vmatpush.bf16.msra.mxu2 %v4133_v28  ;;  %v5362_v28 = vld [vmem:[#allocation3 + $0x10c] sm:$0xf0] }
  0x61   : > { %1305 = vmatpush.bf16.msra.mxu3 %v4261_v33  ;;  %v4178_v33 = vld [vmem:[#allocation3 + $0x110] sm:$0xf0]  ;;  %v4177_v41 = vor.u32 %v5362_v28, %v4176_v27  ;;  %v5981_v52 = vrot.slane %v916_v34, 1  ;;  %v5345_v27 = vld [vmem:[#allocation3 + $0x8c] sm:$0xf] }
  0x62   : > { %1252 = vmatpush.bf16.msra.mxu0 %v4113_v39  ;;  %v5391_v39 = vld [vmem:[#allocation3 + $0x1f4] sm:$0xf0]  ;;  %v4181_v49 = vor.u32 %v5360_v31, %v4178_v33  ;;  %v4122_v28 = vld [vmem:[#allocation3 + $0x98] sm:$0xf0]  ;;  %v4104_v34 = vld [vmem:[#allocation3 + $0x68] sm:$0xf] }
  0x63   : > { %1270 = vmatpush.bf16.msra.mxu1 %v4241_v22  ;;  %v5357_v22 = vld [vmem:[#allocation3 + $0xec] sm:$0xf]  ;;  %v4297_v53 = vor.u32 %v5391_v39, %v4296_v37  ;;  %v5988_v63 = vsel %vm918_vm1, %v919_v51, %v5981_v52  ;;  %v4125_v33 = vor.u32 %v5345_v27, %v4122_v28  ;;  %v4106_v39 = vld [vmem:[#allocation3 + $0x78] sm:$0xf0]  ;;  %v5518_v28 = vld [vmem:[#allocation3 + $0x5ec] sm:$0xf0] }
  0x64   : > { %1288 = vmatpush.bf16.msra.mxu2 %v4117_v40  ;;  %v4170_v40 = vld [vmem:[#allocation3 + $0xf8] sm:$0xf0] }
  0x65   : > { %1306 = vmatpush.bf16.msra.mxu3 %v4245_v48  ;;  %854 = vmatmul.bf16.gmra.mxu0 %v5951_v10  ;;  %v4298_v48 = vld [vmem:[#allocation3 + $0x1f8] sm:$0xf0] }
  0x66   : > { %1253 = vmatpush.bf16.msra.mxu0 %v4097_v54  ;;  %872 = vmatmul.bf16.gmra.mxu1 %v5953_v14  ;;  %v4173_v54 = vor.u32 %v5357_v22, %v4170_v40  ;;  %v4301_v57 = vor.u32 %v5389_v47, %v4298_v48  ;;  %v5373_v22 = vld [vmem:[#allocation3 + $0x16c] sm:$0xf]  ;;  %v4234_v40 = vld [vmem:[#allocation3 + $0x178] sm:$0xf0]  ;;  %v4088_v48 = vld [vmem:[#allocation3 + $0x48] sm:$0xf] }
  0x67   : > { %1271 = vmatpush.bf16.msra.mxu1 %v4225_v55  ;;  %890 = vmatmul.bf16.gmra.mxu2 %v5951_v10  ;;  %v4050_v10 = vld [vmem:[#allocation3 + $0x10] sm:$0xf0]  ;;  %v922_v55 = vrot.slane %v5938_v44, 1  ;;  %v5385_v44 = vld [vmem:[#allocation3 + $0x1cc] sm:$0xf]  ;;  %v4237_v51 = vor.u32 %v5373_v22, %v4234_v40 }
  0x68   : > { %1289 = vmatpush.bf16.msra.mxu2 %v4101_v56  ;;  %908 = vmatmul.bf16.gmra.mxu3 %v5953_v14  ;;  %v5359_v14 = vld [vmem:[#allocation3 + $0xf4] sm:$0xf0]  ;;  %v4053_v46 = vor.u32 %v5328_v29, %v4050_v10  ;;  %v5984_v56 = vrot.slane %v917_v16, 1  ;;  %v4285_v8 = vor.u32 %v5385_v44, %v4282_v0  ;;  %v5377_v29 = vld [vmem:[#allocation3 + $0x18c] sm:$0xf]  ;;  %v4121_v10 = vor.u32 %v5347_v21, %v4120_v20 }
  0x69   : > { %1307 = vmatpush.bf16.msra.mxu3 %v4229_v60  ;;  %v4169_v50 = vor.u32 %v5359_v14, %v4168_v35  ;;  %v4280_v60 = vld [vmem:[#allocation3 + $0x1c8] sm:$0xf]  ;;  %v5343_v35 = vld [vmem:[#allocation3 + $0x74] sm:$0xf0]  ;;  %v5341_v16 = vld [vmem:[#allocation3 + $0x6c] sm:$0xf] }
  0x6a   : > { %1254 = vmatpush.bf16.msra.mxu0 %v4081_v2  ;;  %v5992_v1 = vsel %vm918_vm1, %v922_v55, %v5984_v56  ;;  %v4153_v2 = vor.u32 %v5355_v59, %v4152_v58  ;;  %v4281_v3 = vor.u32 %v5387_v61, %v4280_v60  ;;  %v4232_v14 = vld [vmem:[#allocation3 + $0x168] sm:$0xf]  ;;  %v4109_v47 = vor.u32 %v5341_v16, %v4106_v39  ;;  %v4090_v55 = vld [vmem:[#allocation3 + $0x58] sm:$0xf0]  ;;  %v5361_v20 = vld [vmem:[#allocation3 + $0x10c] sm:$0xf] }
  0x6b   : > { %1272 = vmatpush.bf16.msra.mxu1 %v4209_v4  ;;  %v4157_v4 = vor.u32 %v5353_v42, %v4154_v62  ;;  %v4218_v58 = vld [vmem:[#allocation3 + $0x158] sm:$0xf0]  ;;  %v4072_v42 = vld [vmem:[#allocation3 + $0x28] sm:$0xf]  ;;  %v5335_v62 = vld [vmem:[#allocation3 + $0x34] sm:$0xf0] }
  0x6c   : > { %1290 = vmatpush.bf16.msra.mxu2 %v4085_v5  ;;  %v4136_v5 = vld [vmem:[#allocation3 + $0xa8] sm:$0xf]  ;;  %v4186_v21 = vld [vmem:[#allocation3 + $0x118] sm:$0xf0]  ;;  %v4400_v39 = vld [vmem:[#allocation3 + $0x4c0] sm:$0xf] }
  0x6d   : > { %1308 = vmatpush.bf16.msra.mxu3 %v4213_v9  ;;  %v5383_v9 = vld [vmem:[#allocation3 + $0x1b4] sm:$0xf0]  ;;  %v4137_v17 = vor.u32 %v5351_v6, %v4136_v5  ;;  %v4200_v44 = vld [vmem:[#allocation3 + $0x128] sm:$0xf]  ;;  %v5365_v5 = vld [vmem:[#allocation3 + $0x12c] sm:$0xf] }
  0x6e   : > { %1255 = vmatpush.bf16.msra.mxu0 %v4065_v19  ;;  %v4265_v18 = vor.u32 %v5383_v9, %v4264_v7  ;;  %v4141_v19 = vor.u32 %v5349_v11, %v4138_v12  ;;  %v4202_v6 = vld [vmem:[#allocation3 + $0x138] sm:$0xf0]  ;;  %v4073_v7 = vor.u32 %v5335_v62, %v4072_v42  ;;  %v5331_v9 = vld [vmem:[#allocation3 + $0x14] sm:$0xf0]  ;;  %v5482_v22 = vld [vmem:[#allocation3 + $0x4cc] sm:$0xf0] }
  0x6f   : > { %1273 = vmatpush.bf16.msra.mxu1 %v4193_v24  ;;  %v4269_v24 = vor.u32 %v5381_v13, %v4266_v15  ;;  %v4184_v13 = vld [vmem:[#allocation3 + $0x108] sm:$0xf]  ;;  %v5363_v15 = vld [vmem:[#allocation3 + $0x114] sm:$0xf0]  ;;  %v4528_v40 = vld [vmem:[#allocation3 + $0x5c0] sm:$0xf] }
  0x70   : > { %1291 = vmatpush.bf16.msra.mxu2 %v4069_v25  ;;  %v5379_v25 = vld [vmem:[#allocation3 + $0x194] sm:$0xf0]  ;;  %v5508_v42 = vld [vmem:[#allocation3 + $0x5a4] sm:$0xf]  ;;  %v4514_v62 = vld [vmem:[#allocation3 + $0x5b0] sm:$0xf0] }
  0x71   : > { %1309 = vmatpush.bf16.msra.mxu3 %v4197_v30  ;;  %v4250_v30 = vld [vmem:[#allocation3 + $0x198] sm:$0xf0]  ;;  %v4249_v31 = vor.u32 %v5379_v25, %v4248_v23  ;;  %v4416_v23 = vld [vmem:[#allocation3 + $0x4e0] sm:$0xf] }
  0x72   : > { %1256 = vmatpush.bf16.msra.mxu0 %v4049_v38  ;;  %v4253_v37 = vor.u32 %v5377_v29, %v4250_v30  ;;  %v5375_v38 = vld [vmem:[#allocation3 + $0x174] sm:$0xf0]  ;;  %v4544_v25 = vld [vmem:[#allocation3 + $0x5e0] sm:$0xf]  ;;  %v5484_v29 = vld [vmem:[#allocation3 + $0x4e4] sm:$0xf] }
  0x73   : > { %1274 = vmatpush.bf16.msra.mxu1 %v4177_v41  ;;  %v4105_v41 = vor.u32 %v5343_v35, %v4104_v34  ;;  %v4418_v30 = vld [vmem:[#allocation3 + $0x4f0] sm:$0xf0]  ;;  %v4189_v35 = vor.u32 %v5361_v20, %v4186_v21  ;;  %v5502_v20 = vld [vmem:[#allocation3 + $0x56c] sm:$0xf0]  ;;  %v5468_v21 = vld [vmem:[#allocation3 + $0x464] sm:$0xf] }
  0x74   : > { %1292 = vmatpush.bf16.msra.mxu2 %v4053_v46  ;;  %v4233_v46 = vor.u32 %v5375_v38, %v4232_v14  ;;  %v4546_v34 = vld [vmem:[#allocation3 + $0x5f0] sm:$0xf0]  ;;  %v4421_v38 = vor.u32 %v5484_v29, %v4418_v30  ;;  %v4336_v30 = vld [vmem:[#allocation3 + $0x440] sm:$0xf] }
  0x75   : > { %1310 = vmatpush.bf16.msra.mxu3 %v4181_v49  ;;  %1257 = vmatmul.bf16.vlgmr.msra.gmra.mxu0 %v5988_v63  ;;  %v5339_v49 = vld [vmem:[#allocation3 + $0x54] sm:$0xf0] }
  0x76   : > { %1321 = vmatpush.bf16.msrb.mxu0 %v4169_v50  ;;  %1275 = vmatmul.bf16.vlgmr.msra.gmra.mxu1 %v5992_v1  ;;  %v4216_v50 = vld [vmem:[#allocation3 + $0x148] sm:$0xf]  ;;  %v4089_v59 = vor.u32 %v5339_v49, %v4088_v48  ;;  %v5512_v48 = vld [vmem:[#allocation3 + $0x5c4] sm:$0xf]  ;;  %v4530_v49 = vld [vmem:[#allocation3 + $0x5d0] sm:$0xf0] }
  0x77   : > { %1339 = vmatpush.bf16.msrb.mxu1 %v4297_v53  ;;  %1293 = vmatmul.bf16.vlgmr.msra.gmra.mxu2 %v5988_v63  ;;  %v5371_v53 = vld [vmem:[#allocation3 + $0x154] sm:$0xf0] }
  0x78   : > { %1357 = vmatpush.bf16.msrb.mxu2 %v4173_v54  ;;  %1311 = vmatmul.bf16.vlgmr.msra.gmra.mxu3 %v5992_v1  ;;  %v5337_v54 = vld [vmem:[#allocation3 + $0x4c] sm:$0xf]  ;;  %v4217_v60 = vor.u32 %v5371_v53, %v4216_v50  ;;  %v4401_v50 = vor.u32 %v5482_v22, %v4400_v39  ;;  %v1393_v39 = vld [vmem:[%s5899_s13] sm:$0xcc] }
  0x79   : > { %1375 = vmatpush.bf16.msrb.mxu3 %v4301_v57  ;;  %v5369_v57 = vld [vmem:[#allocation3 + $0x14c] sm:$0xf]  ;;  %v4093_v61 = vor.u32 %v5337_v54, %v4090_v55  ;;  %v4384_v54 = vld [vmem:[#allocation3 + $0x4a0] sm:$0xf]  ;;  %v5478_v55 = vld [vmem:[#allocation3 + $0x4ac] sm:$0xf0] }
  0x7a   : > { %1322 = vmatpush.bf16.msrb.mxu0 %v4153_v2  ;;  %v4221_v0 = vor.u32 %v5369_v57, %v4218_v58  ;;  %v5367_v2 = vld [vmem:[#allocation3 + $0x134] sm:$0xf0]  ;;  %v4512_v57 = vld [vmem:[#allocation3 + $0x5a0] sm:$0xf]  ;;  %v4533_v58 = vor.u32 %v5512_v48, %v4530_v49  ;;  %v5494_v49 = vld [vmem:[#allocation3 + $0x52c] sm:$0xf0] }
  0x7b   : > { %1340 = vmatpush.bf16.msrb.mxu1 %v4281_v3  ;;  %v5333_v3 = vld [vmem:[#allocation3 + $0x2c] sm:$0xf]  ;;  %v4201_v11 = vor.u32 %v5367_v2, %v4200_v44  ;;  %v4385_v44 = vor.u32 %v5478_v55, %v4384_v54  ;;  %v4450_v54 = vld [vmem:[#allocation3 + $0x530] sm:$0xf0]  ;;  %v1460_v55 = vunpack.c.l.b16 %v1393_v39 }
  0x7c   : > { %1358 = vmatpush.bf16.msrb.mxu2 %v4157_v4  ;;  %v4074_v4 = vld [vmem:[#allocation3 + $0x38] sm:$0xf0] }
  0x7d   : > { %1376 = vmatpush.bf16.msrb.mxu3 %v4285_v8  ;;  %v4056_v8 = vld [vmem:[#allocation3 + $0x8] sm:$0xf]  ;;  %v4077_v12 = vor.u32 %v5333_v3, %v4074_v4  ;;  %v4368_v3 = vld [vmem:[#allocation3 + $0x480] sm:$0xf]  ;;  %v5474_v4 = vld [vmem:[#allocation3 + $0x48c] sm:$0xf0] }
  0x7e   : > { %1323 = vmatpush.bf16.msrb.mxu0 %v4137_v17  ;;  %v5329_v17 = vld [vmem:[#allocation3 + $0xc] sm:$0xf]  ;;  %v4057_v27 = vor.u32 %v5331_v9, %v4056_v8  ;;  %v5472_v8 = vld [vmem:[#allocation3 + $0x484] sm:$0xf]  ;;  %v4370_v9 = vld [vmem:[#allocation3 + $0x490] sm:$0xf0] }
  0x7f   : > { %1341 = vmatpush.bf16.msrb.mxu1 %v4265_v18  ;;  %v4205_v18 = vor.u32 %v5365_v5, %v4202_v6  ;;  %v4496_v5 = vld [vmem:[#allocation3 + $0x580] sm:$0xf]  ;;  %v4517_v6 = vor.u32 %v5508_v42, %v4514_v62 }
  0x80   : > { %1359 = vmatpush.bf16.msrb.mxu2 %v4141_v19  ;;  %v4058_v19 = vld [vmem:[#allocation3 + $0x18] sm:$0xf0]  ;;  %v4432_v62 = vld [vmem:[#allocation3 + $0x500] sm:$0xf] }
  0x81   : > { %1377 = vmatpush.bf16.msrb.mxu3 %v4269_v24  ;;  %v5486_v24 = vld [vmem:[#allocation3 + $0x4ec] sm:$0xf0] }
  0x82   : > { %1324 = vmatpush.bf16.msrb.mxu0 %v4121_v10  ;;  %v4185_v10 = vor.u32 %v5363_v15, %v4184_v13  ;;  %v4417_v14 = vor.u32 %v5486_v24, %v4416_v23  ;;  %v4373_v13 = vor.u32 %v5472_v8, %v4370_v9  ;;  %v4352_v15 = vld [vmem:[#allocation3 + $0x460] sm:$0xf]  ;;  %v4354_v23 = vld [vmem:[#allocation3 + $0x470] sm:$0xf0]  ;;  %v5500_v24 = vld [vmem:[#allocation3 + $0x564] sm:$0xf] }
  0x83   : > { %1342 = vmatpush.bf16.msrb.mxu1 %v4249_v31  ;;  %v4061_v31 = vor.u32 %v5329_v17, %v4058_v19  ;;  %v5470_v17 = vld [vmem:[#allocation3 + $0x46c] sm:$0xf0]  ;;  %v4357_v29 = vor.u32 %v5468_v21, %v4354_v23 }
  0x84   : > { %1360 = vmatpush.bf16.msrb.mxu2 %v4125_v33  ;;  %v5516_v33 = vld [vmem:[#allocation3 + $0x5e4] sm:$0xf] }
  0x85   : > { %1378 = vmatpush.bf16.msrb.mxu3 %v4253_v37  ;;  %1262 = vmatmul.bf16.gmra.mxu0 %v5981_v52  ;;  %v4545_v37 = vor.u32 %v5518_v28, %v4544_v25  ;;  %v4549_v16 = vor.u32 %v5516_v33, %v4546_v34  ;;  %v4482_v25 = vld [vmem:[#allocation3 + $0x570] sm:$0xf0]  ;;  %v5498_v34 = vld [vmem:[#allocation3 + $0x54c] sm:$0xf0] }
  0x86   : > { %1325 = vmatpush.bf16.msrb.mxu0 %v4105_v41  ;;  %1280 = vmatmul.bf16.gmra.mxu1 %v5984_v56  ;;  %v5514_v41 = vld [vmem:[#allocation3 + $0x5cc] sm:$0xf0]  ;;  %v4485_v33 = vor.u32 %v5500_v24, %v4482_v25  ;;  %v4408_v25 = vld [vmem:[#allocation3 + $0x4c8] sm:$0xf] }
  0x87   : > { %1343 = vmatpush.bf16.msrb.mxu1 %v4233_v46  ;;  %1298 = vmatmul.bf16.gmra.mxu2 %v5981_v52  ;;  %v5480_v46 = vld [vmem:[#allocation3 + $0x4c4] sm:$0xf] }
  0x88   : > { %1361 = vmatpush.bf16.msrb.mxu2 %v4109_v47  ;;  %1316 = vmatmul.bf16.gmra.mxu3 %v5984_v56  ;;  %v4402_v47 = vld [vmem:[#allocation3 + $0x4d0] sm:$0xf0] }
  0x89   : > { %1379 = vmatpush.bf16.msrb.mxu3 %v4237_v51  ;;  %v4529_v51 = vor.u32 %v5514_v41, %v4528_v40  ;;  %v4405_v53 = vor.u32 %v5480_v46, %v4402_v47  ;;  %v4320_v41 = vld [vmem:[#allocation3 + $0x420] sm:$0xf]  ;;  %v5462_v46 = vld [vmem:[#allocation3 + $0x42c] sm:$0xf0] }
  0x8a   : > { %1326 = vmatpush.bf16.msrb.mxu0 %v4089_v59  ;;  %v5510_v59 = vld [vmem:[#allocation3 + $0x5ac] sm:$0xf0]  ;;  %v4448_v47 = vld [vmem:[#allocation3 + $0x520] sm:$0xf] }
  0x8b   : > { %1344 = vmatpush.bf16.msrb.mxu1 %v4217_v60  ;;  %v5476_v60 = vld [vmem:[#allocation3 + $0x4a4] sm:$0xf] }
  0x8c   : > { %1362 = vmatpush.bf16.msrb.mxu2 %v4093_v61  ;;  %v4386_v61 = vld [vmem:[#allocation3 + $0x4b0] sm:$0xf0] }
  0x8d   : > { %1380 = vmatpush.bf16.msrb.mxu3 %v4221_v0  ;;  %v4513_v0 = vor.u32 %v5510_v59, %v4512_v57  ;;  %v4389_v2 = vor.u32 %v5476_v60, %v4386_v61  ;;  %v4321_v57 = vor.u32 %v5462_v46, %v4320_v41  ;;  %v5458_v59 = vld [vmem:[#allocation3 + $0x40c] sm:$0xf0]  ;;  %v1461_v60 = vunpack.c.h.b16 %v1393_v39  ;;  %v4392_v39 = vld [vmem:[#allocation3 + $0x4a8] sm:$0xf]  ;;  %v5511_v46 = vld [vmem:[#allocation3 + $0x5b4] sm:$0xf0] }
  0x8e   : > { %1327 = vmatpush.bf16.msrb.mxu0 %v4073_v7  ;;  %v5506_v7 = vld [vmem:[#allocation3 + $0x58c] sm:$0xf0]  ;;  %v4449_v61 = vor.u32 %v5494_v49, %v4448_v47  ;;  %v5477_v47 = vld [vmem:[#allocation3 + $0x4ac] sm:$0xf] }
  0x8f   : > { %1345 = vmatpush.bf16.msrb.mxu1 %v4201_v11  ;;  %v5504_v11 = vld [vmem:[#allocation3 + $0x584] sm:$0xf]  ;;  %v1463_v9 = vpack.c.b16 %v403_v36, %v1461_v60  ;;  %v6019_v36 = vrot.slane %v5940_v45, 2  ;;  %v5513_v45 = vld [vmem:[#allocation3 + $0x5cc] sm:$0xf] }
  0x90   : > { %1363 = vmatpush.bf16.msrb.mxu2 %v4077_v12  ;;  %v4369_v12 = vor.u32 %v5474_v4, %v4368_v3  ;;  %v5488_v3 = vld [vmem:[#allocation3 + $0x504] sm:$0xf]  ;;  %v4434_v4 = vld [vmem:[#allocation3 + $0x510] sm:$0xf0]  ;;  %v5509_v49 = vld [vmem:[#allocation3 + $0x5ac] sm:$0xf] }
  0x91   : > { %1381 = vmatpush.bf16.msrb.mxu3 %v4205_v18  ;;  %v4480_v18 = vld [vmem:[#allocation3 + $0x560] sm:$0xf]  ;;  %v1468_v26 = vrot.slane %v1463_v9, 2  ;;  %v4488_v9 = vld [vmem:[#allocation3 + $0x568] sm:$0xf] }
  0x92   : > { %1328 = vmatpush.bf16.msrb.mxu0 %v4057_v27  ;;  %v4353_v27 = vor.u32 %v5470_v17, %v4352_v15  ;;  %v4481_v28 = vor.u32 %v5502_v20, %v4480_v18  ;;  %v5517_v15 = vld [vmem:[#allocation3 + $0x5ec] sm:$0xf]  ;;  %v4554_v17 = vld [vmem:[#allocation3 + $0x5f8] sm:$0xf0]  ;;  %v4437_v18 = vor.u32 %v5488_v3, %v4434_v4  ;;  %v6016_v20 = vrot.slane %v5934_v43, 2 }
  0x93   : > { %1346 = vmatpush.bf16.msrb.mxu1 %v4185_v10  ;;  %v5466_v10 = vld [vmem:[#allocation3 + $0x44c] sm:$0xf0]  ;;  %v4557_v24 = vor.u32 %v5517_v15, %v4554_v17  ;;  %v4410_v43 = vld [vmem:[#allocation3 + $0x4d8] sm:$0xf0] }
  0x94   : > { %1364 = vmatpush.bf16.msrb.mxu2 %v4061_v31  ;;  %v4464_v31 = vld [vmem:[#allocation3 + $0x540] sm:$0xf]  ;;  %v4490_v15 = vld [vmem:[#allocation3 + $0x578] sm:$0xf0] }
  0x95   : > { %1382 = vmatpush.bf16.msrb.mxu3 %v4189_v35  ;;  %1329 = vmatmul.bf16.vlgmr.msrb.gmra.mxu0 %v5988_v63  ;;  %v5464_v35 = vld [vmem:[#allocation3 + $0x444] sm:$0xf]  ;;  %v4465_v22 = vor.u32 %v5498_v34, %v4464_v31 }
  0x96   : > { %1795 = vmatpush.bf16.msra.mxu0 %v4417_v14  ;;  %1347 = vmatmul.bf16.vlgmr.msrb.gmra.mxu1 %v5992_v1  ;;  %v4338_v14 = vld [vmem:[#allocation3 + $0x450] sm:$0xf0] }
  0x97   : > { %1813 = vmatpush.bf16.msra.mxu1 %v4545_v37  ;;  %1365 = vmatmul.bf16.vlgmr.msrb.gmra.mxu2 %v5988_v63  ;;  %v4498_v63 = vld [vmem:[#allocation3 + $0x590] sm:$0xf0]  ;;  %v5496_v37 = vld [vmem:[#allocation3 + $0x544] sm:$0xf]  ;;  %v4341_v40 = vor.u32 %v5464_v35, %v4338_v14  ;;  %v6027_v35 = vsel %vm1464_vm2, %v1468_v26, %v6019_v36 }
  0x98   : > { %1831 = vmatpush.bf16.msra.mxu2 %v4421_v38  ;;  %1383 = vmatmul.bf16.vlgmr.msrb.gmra.mxu3 %v5992_v1  ;;  %v4497_v1 = vor.u32 %v5506_v7, %v4496_v5  ;;  %v4501_v19 = vor.u32 %v5504_v11, %v4498_v63  ;;  %v4466_v38 = vld [vmem:[#allocation3 + $0x550] sm:$0xf0]  ;;  %v4424_v5 = vld [vmem:[#allocation3 + $0x4e8] sm:$0xf]  ;;  %v5519_v11 = vld [vmem:[#allocation3 + $0x5f4] sm:$0xf0] }
  0x99   : > { %1849 = vmatpush.bf16.msra.mxu3 %v4549_v16  ;;  %v4337_v16 = vor.u32 %v5466_v10, %v4336_v30  ;;  %v4469_v48 = vor.u32 %v5496_v37, %v4466_v38  ;;  %v4552_v7 = vld [vmem:[#allocation3 + $0x5e8] sm:$0xf]  ;;  %v5485_v63 = vld [vmem:[#allocation3 + $0x4ec] sm:$0xf] }
  0x9a   : > { %1796 = vmatpush.bf16.msra.mxu0 %v4401_v50  ;;  %v5460_v50 = vld [vmem:[#allocation3 + $0x424] sm:$0xf]  ;;  %v4553_v21 = vor.u32 %v5519_v11, %v4552_v7  ;;  %v5481_v30 = vld [vmem:[#allocation3 + $0x4cc] sm:$0xf]  ;;  %v4360_v7 = vld [vmem:[#allocation3 + $0x468] sm:$0xf] }
  0x9b   : > { %1814 = vmatpush.bf16.msra.mxu1 %v4529_v51  ;;  %v4322_v51 = vld [vmem:[#allocation3 + $0x430] sm:$0xf0] }
  0x9c   : > { %1832 = vmatpush.bf16.msra.mxu2 %v4405_v53  ;;  %v5492_v53 = vld [vmem:[#allocation3 + $0x524] sm:$0xf]  ;;  %v4325_v42 = vor.u32 %v5460_v50, %v4322_v51  ;;  %v4522_v50 = vld [vmem:[#allocation3 + $0x5b8] sm:$0xf0] }
  0x9d   : > { %1850 = vmatpush.bf16.msra.mxu3 %v4533_v58  ;;  %v4304_v58 = vld [vmem:[#allocation3 + $0x400] sm:$0xf]  ;;  %v4525_v60 = vor.u32 %v5509_v49, %v4522_v50  ;;  %v4458_v49 = vld [vmem:[#allocation3 + $0x538] sm:$0xf0] }
  0x9e   : > { %1797 = vmatpush.bf16.msra.mxu0 %v4385_v44  ;;  %v5490_v44 = vld [vmem:[#allocation3 + $0x50c] sm:$0xf0]  ;;  %v4305_v8 = vor.u32 %v5458_v59, %v4304_v58  ;;  %v4504_v58 = vld [vmem:[#allocation3 + $0x588] sm:$0xf] }
  0x9f   : > { %1815 = vmatpush.bf16.msra.mxu1 %v4513_v0  ;;  %v5456_v0 = vld [vmem:[#allocation3 + $0x404] sm:$0xf] }
  0xa0   : > { %1833 = vmatpush.bf16.msra.mxu2 %v4389_v2  ;;  %v4453_v2 = vor.u32 %v5492_v53, %v4450_v54 }
  0xa1   : > { %1851 = vmatpush.bf16.msra.mxu3 %v4517_v6  ;;  %v5487_v6 = vld [vmem:[#allocation3 + $0x4f4] sm:$0xf0] }
  0xa2   : > { %1798 = vmatpush.bf16.msra.mxu0 %v4369_v12  ;;  %v4426_v12 = vld [vmem:[#allocation3 + $0x4f8] sm:$0xf0] }
  0xa3   : > { %1816 = vmatpush.bf16.msra.mxu1 %v4497_v1  ;;  %v4433_v1 = vor.u32 %v5490_v44, %v4432_v62  ;;  %v4429_v23 = vor.u32 %v5485_v63, %v4426_v12  ;;  %v4378_v62 = vld [vmem:[#allocation3 + $0x498] sm:$0xf0]  ;;  %v5503_v63 = vld [vmem:[#allocation3 + $0x574] sm:$0xf0]  ;;  %v5469_v12 = vld [vmem:[#allocation3 + $0x46c] sm:$0xf] }
  0xa4   : > { %1834 = vmatpush.bf16.msra.mxu2 %v4373_v13 }
  0xa5   : > { %1852 = vmatpush.bf16.msra.mxu3 %v4501_v19  ;;  %1334 = vmatmul.bf16.gmra.mxu0 %v5981_v52 }
  0xa6   : > { %1799 = vmatpush.bf16.msra.mxu0 %v4353_v27  ;;  %1352 = vmatmul.bf16.gmra.mxu1 %v5984_v56  ;;  %v5483_v27 = vld [vmem:[#allocation3 + $0x4d4] sm:$0xf0] }
  0xa7   : > { %1817 = vmatpush.bf16.msra.mxu1 %v4481_v28  ;;  %1370 = vmatmul.bf16.gmra.mxu2 %v5981_v52  ;;  %v4306_v52 = vld [vmem:[#allocation3 + $0x410] sm:$0xf0]  ;;  %v4536_v28 = vld [vmem:[#allocation3 + $0x5c8] sm:$0xf]  ;;  %v4409_v14 = vor.u32 %v5483_v27, %v4408_v25  ;;  %v5499_v25 = vld [vmem:[#allocation3 + $0x554] sm:$0xf0] }
  0xa8   : > { %1835 = vmatpush.bf16.msra.mxu2 %v4357_v29  ;;  %1388 = vmatmul.bf16.gmra.mxu3 %v5984_v56  ;;  %v1462_v56 = vpack.c.b16 %v402_v32, %v1460_v55  ;;  %v4309_v13 = vor.u32 %v5456_v0, %v4306_v52  ;;  %v4425_v32 = vor.u32 %v5487_v6, %v4424_v5  ;;  %v5515_v29 = vld [vmem:[#allocation3 + $0x5d4] sm:$0xf0]  ;;  %v4376_v55 = vld [vmem:[#allocation3 + $0x488] sm:$0xf]  ;;  %v4506_v52 = vld [vmem:[#allocation3 + $0x598] sm:$0xf0] }
  0xa9   : > { %1853 = vmatpush.bf16.msra.mxu3 %v4485_v33  ;;  %v4538_v33 = vld [vmem:[#allocation3 + $0x5d8] sm:$0xf0]  ;;  %v4537_v38 = vor.u32 %v5515_v29, %v4536_v28  ;;  %v5465_v27 = vld [vmem:[#allocation3 + $0x44c] sm:$0xf] }
  0xaa   : > { %1800 = vmatpush.bf16.msra.mxu0 %v4337_v16  ;;  %v1465_v19 = vrot.slane %v1462_v56, 2  ;;  %v4413_v16 = vor.u32 %v5481_v30, %v4410_v43  ;;  %v4541_v41 = vor.u32 %v5513_v45, %v4538_v33  ;;  %v4346_v28 = vld [vmem:[#allocation3 + $0x458] sm:$0xf0]  ;;  %v5497_v43 = vld [vmem:[#allocation3 + $0x54c] sm:$0xf] }
  0xab   : > { %1818 = vmatpush.bf16.msra.mxu1 %v4465_v22  ;;  %v5479_v22 = vld [vmem:[#allocation3 + $0x4b4] sm:$0xf0] }
  0xac   : > { %1836 = vmatpush.bf16.msra.mxu2 %v4341_v40  ;;  %v6023_v31 = vsel %vm1464_vm2, %v1465_v19, %v6016_v20  ;;  %v4520_v40 = vld [vmem:[#allocation3 + $0x5a8] sm:$0xf]  ;;  %v4393_v51 = vor.u32 %v5479_v22, %v4392_v39  ;;  %v5463_v39 = vld [vmem:[#allocation3 + $0x434] sm:$0xf0] }
  0xad   : > { %1854 = vmatpush.bf16.msra.mxu3 %v4469_v48  ;;  %v4394_v48 = vld [vmem:[#allocation3 + $0x4b8] sm:$0xf0]  ;;  %v4521_v53 = vor.u32 %v5511_v46, %v4520_v40  ;;  %v4344_v19 = vld [vmem:[#allocation3 + $0x448] sm:$0xf]  ;;  %v5461_v46 = vld [vmem:[#allocation3 + $0x42c] sm:$0xf] }
  0xae   : > { %1801 = vmatpush.bf16.msra.mxu0 %v4321_v57  ;;  %v4397_v54 = vor.u32 %v5477_v47, %v4394_v48  ;;  %v5475_v57 = vld [vmem:[#allocation3 + $0x494] sm:$0xf0]  ;;  %v4456_v22 = vld [vmem:[#allocation3 + $0x528] sm:$0xf]  ;;  %v4330_v47 = vld [vmem:[#allocation3 + $0x438] sm:$0xf0] }
  0xaf   : > { %1819 = vmatpush.bf16.msra.mxu1 %v4449_v61  ;;  %v5507_v61 = vld [vmem:[#allocation3 + $0x594] sm:$0xf0]  ;;  %v4377_v56 = vor.u32 %v5475_v57, %v4376_v55  ;;  %v5493_v48 = vld [vmem:[#allocation3 + $0x52c] sm:$0xf]  ;;  %v4440_v57 = vld [vmem:[#allocation3 + $0x508] sm:$0xf] }
  0xb0   : > { %1837 = vmatpush.bf16.msra.mxu2 %v4325_v42  ;;  %v5473_v42 = vld [vmem:[#allocation3 + $0x48c] sm:$0xf]  ;;  %v4505_v5 = vor.u32 %v5507_v61, %v4504_v58  ;;  %v5459_v55 = vld [vmem:[#allocation3 + $0x414] sm:$0xf0] }
  0xb1   : > { %1855 = vmatpush.bf16.msra.mxu3 %v4453_v2  ;;  %v5505_v2 = vld [vmem:[#allocation3 + $0x58c] sm:$0xf]  ;;  %v4381_v6 = vor.u32 %v5473_v42, %v4378_v62  ;;  %v4314_v42 = vld [vmem:[#allocation3 + $0x418] sm:$0xf0] }
  0xb2   : > { %1802 = vmatpush.bf16.msra.mxu0 %v4305_v8  ;;  %v778_v10 = vpop.f32.mrf.mxu0  ;;  %v5471_v8 = vld [vmem:[#allocation3 + $0x474] sm:$0xf0]  ;;  %v4509_v11 = vor.u32 %v5505_v2, %v4506_v52  ;;  %v5457_v61 = vld [vmem:[#allocation3 + $0x40c] sm:$0xf]  ;;  %v4442_v52 = vld [vmem:[#allocation3 + $0x518] sm:$0xf0] }
  0xb3   : > { %1820 = vmatpush.bf16.msra.mxu1 %v4433_v1  ;;  %v796_v34 = vpop.f32.mrf.mxu1  ;;  %v4362_v1 = vld [vmem:[#allocation3 + $0x478] sm:$0xf0]  ;;  %v4361_v17 = vor.u32 %v5471_v8, %v4360_v7  ;;  %v5489_v2 = vld [vmem:[#allocation3 + $0x50c] sm:$0xf]  ;;  %v4317_v8 = vor.u32 %v5457_v61, %v4314_v42  ;;  %v5615_v61 = vld [vmem:[#allocation5 + $0x2f4] sm:$0xf0] }
  0xb4   : > { %1838 = vmatpush.bf16.msra.mxu2 %v4309_v13  ;;  %v6029_v37 = vadd.f32 %v796_v34, %v778_v10  ;;  %v5501_v13 = vld [vmem:[#allocation3 + $0x56c] sm:$0xf]  ;;  %v4474_v10 = vld [vmem:[#allocation3 + $0x558] sm:$0xf0] }
  0xb5   : > { %1856 = vmatpush.bf16.msra.mxu3 %v4437_v18  ;;  %1803 = vmatmul.bf16.vlgmr.msra.gmra.mxu0 %v6023_v31  ;;  %v4489_v18 = vor.u32 %v5503_v63, %v4488_v9  ;;  %v4477_v40 = vor.u32 %v5497_v43, %v4474_v10  ;;  %v4445_v9 = vor.u32 %v5489_v2, %v4442_v52  ;;  %v5597_v2 = vld [vmem:[#allocation5 + $0x264] sm:$0xf0]  ;;  %v4672_v52 = vld [vmem:[#allocation5 + $0x2e0] sm:$0xf] }
  0xb6   : > { %1867 = vmatpush.bf16.msrb.mxu0 %v4425_v32  ;;  %1821 = vmatmul.bf16.vlgmr.msra.gmra.mxu1 %v6027_v35  ;;  %v4365_v32 = vor.u32 %v5469_v12, %v4362_v1 }
  0xb7   : > { %1885 = vmatpush.bf16.msrb.mxu1 %v4553_v21  ;;  %1839 = vmatmul.bf16.vlgmr.msra.gmra.mxu2 %v6023_v31  ;;  %v5467_v21 = vld [vmem:[#allocation3 + $0x454] sm:$0xf0] }
  0xb8   : > { %1903 = vmatpush.bf16.msrb.mxu2 %v4429_v23  ;;  %1857 = vmatmul.bf16.vlgmr.msra.gmra.mxu3 %v6027_v35  ;;  %v4472_v23 = vld [vmem:[#allocation3 + $0x548] sm:$0xf]  ;;  %v4345_v33 = vor.u32 %v5467_v21, %v4344_v19 }
  0xb9   : > { %1921 = vmatpush.bf16.msrb.mxu3 %v4557_v24  ;;  %v4493_v24 = vor.u32 %v5501_v13, %v4490_v15 }
  0xba   : > { %1868 = vmatpush.bf16.msrb.mxu0 %v4409_v14  ;;  %v814_v59 = vpop.f32.mrf.mxu2  ;;  %v6035_v0 = vpop.f32.mrf.mxu0  ;;  %v4473_v14 = vor.u32 %v5499_v25, %v4472_v23 }
  0xbb   : > { %1886 = vmatpush.bf16.msrb.mxu1 %v4537_v38  ;;  %v832_v44 = vpop.f32.mrf.mxu3  ;;  %v6039_v4 = vpop.f32.mrf.mxu1  ;;  %v4349_v38 = vor.u32 %v5465_v27, %v4346_v28 }
  0xbc   : > { %1904 = vmatpush.bf16.msrb.mxu2 %v4413_v16  ;;  %v6037_v3 = vadd.f32 %v832_v44, %v814_v59  ;;  %v4328_v16 = vld [vmem:[#allocation3 + $0x428] sm:$0xf]  ;;  %v4461_v59 = vor.u32 %v5493_v48, %v4458_v49 }
  0xbd   : > { %1922 = vmatpush.bf16.msrb.mxu3 %v4541_v41  ;;  %v5495_v41 = vld [vmem:[#allocation3 + $0x534] sm:$0xf0]  ;;  %v4329_v50 = vor.u32 %v5463_v39, %v4328_v16 }
  0xbe   : > { %1869 = vmatpush.bf16.msrb.mxu0 %v4393_v51  ;;  %v4457_v51 = vor.u32 %v5495_v41, %v4456_v22 }
  0xbf   : > { %1887 = vmatpush.bf16.msrb.mxu1 %v4521_v53  ;;  %v4333_v53 = vor.u32 %v5461_v46, %v4330_v47 }
  0xc0   : > { %1905 = vmatpush.bf16.msrb.mxu2 %v4397_v54  ;;  %v4312_v54 = vld [vmem:[#allocation3 + $0x408] sm:$0xf] }
  0xc1   : > { %1923 = vmatpush.bf16.msrb.mxu3 %v4525_v60  ;;  %v5491_v60 = vld [vmem:[#allocation3 + $0x514] sm:$0xf0] }
  0xc2   : > { %1870 = vmatpush.bf16.msrb.mxu0 %v4377_v56  ;;  %v6041_v26 = vpop.f32.mrf.mxu2  ;;  %v783_v30 = vpop.f32.mrf.mxu0  ;;  %v4441_v7 = vor.u32 %v5491_v60, %v4440_v57  ;;  %v5599_v57 = vld [vmem:[#allocation5 + $0x274] sm:$0xf0] }
  0xc3   : > { %1888 = vmatpush.bf16.msrb.mxu1 %v4505_v5  ;;  %v6043_v29 = vpop.f32.mrf.mxu3  ;;  %v801_v45 = vpop.f32.mrf.mxu1 }
  0xc4   : > { %1906 = vmatpush.bf16.msrb.mxu2 %v4381_v6  ;;  %v6045_v34 = vadd.f32 %v801_v45, %v783_v30  ;;  %v4313_v6 = vor.u32 %v5459_v55, %v4312_v54  ;;  %v4616_v55 = vld [vmem:[#allocation5 + $0x270] sm:$0xf] }
  0xc5   : > { %1924 = vmatpush.bf16.msrb.mxu3 %v4509_v11  ;;  %1808 = vmatmul.bf16.gmra.mxu0 %v6016_v20  ;;  %v4617_v60 = vor.u32 %v5599_v57, %v4616_v55 }
  0xc6   : > { %1871 = vmatpush.bf16.msrb.mxu0 %v4361_v17  ;;  %1826 = vmatmul.bf16.gmra.mxu1 %v6019_v36 }
  0xc7   : > { %1889 = vmatpush.bf16.msrb.mxu1 %v4489_v18  ;;  %1844 = vmatmul.bf16.gmra.mxu2 %v6016_v20 }
  0xc8   : > { %1907 = vmatpush.bf16.msrb.mxu2 %v4365_v32  ;;  %1862 = vmatmul.bf16.gmra.mxu3 %v6019_v36 }
  0xc9   : > { %1925 = vmatpush.bf16.msrb.mxu3 %v4493_v24 }
  0xca   : > { %1872 = vmatpush.bf16.msrb.mxu0 %v4345_v33  ;;  %v819_v58 = vpop.f32.mrf.mxu2  ;;  %v785_v44 = vpop.f32.mrf.mxu0 }
  0xcb   : > { %1890 = vmatpush.bf16.msrb.mxu1 %v4473_v14  ;;  %v837_v62 = vpop.f32.mrf.mxu3  ;;  %v803_v5 = vpop.f32.mrf.mxu1  ;;  %v4608_v44 = vld [vmem:[#allocation5 + $0x260] sm:$0xf] }
  0xcc   : > { %1908 = vmatpush.bf16.msrb.mxu2 %v4349_v38  ;;  %v838_v56 = vadd.f32 %v837_v62, %v819_v58  ;;  %v4680_v58 = vld [vmem:[#allocation5 + $0x2f0] sm:$0xf]  ;;  %v5613_v5 = vld [vmem:[#allocation5 + $0x2e4] sm:$0xf0] }
  0xcd   : > { %1926 = vmatpush.bf16.msrb.mxu3 %v4477_v40  ;;  %v4681_v62 = vor.u32 %v5615_v61, %v4680_v58  ;;  %v5605_v58 = vld [vmem:[#allocation5 + $0x2a4] sm:$0xf0] }
  0xce   : > { %1873 = vmatpush.bf16.msrb.mxu0 %v4329_v50 }
  0xcf   : > { %1891 = vmatpush.bf16.msrb.mxu1 %v4457_v51 }
  0xd0   : > { %1909 = vmatpush.bf16.msrb.mxu2 %v4333_v53 }
  0xd1   : > { %1927 = vmatpush.bf16.msrb.mxu3 %v4461_v59 }
  0xd2   : > { %1874 = vmatpush.bf16.msrb.mxu0 %v4313_v6  ;;  %v821_v11 = vpop.f32.mrf.mxu2  ;;  %v850_v12 = vpop.f32.mrf.mxu0  ;;  %v4673_v6 = vor.u32 %v5613_v5, %v4672_v52  ;;  %v4632_v52 = vld [vmem:[#allocation5 + $0x290] sm:$0xf] }
  0xd3   : > { %1892 = vmatpush.bf16.msrb.mxu1 %v4441_v7  ;;  %v839_v63 = vpop.f32.mrf.mxu3  ;;  %v868_v1 = vpop.f32.mrf.mxu1  ;;  %v5595_v11 = vld [vmem:[#allocation5 + $0x254] sm:$0xf0] }
  0xd4   : > { %1910 = vmatpush.bf16.msrb.mxu2 %v4317_v8  ;;  %v6051_v13 = vadd.f32 %v868_v1, %v850_v12 }
  0xd5   : > { %1928 = vmatpush.bf16.msrb.mxu3 %v4445_v9  ;;  %1875 = vmatmul.bf16.vlgmr.msrb.gmra.mxu0 %v6023_v31  ;;  %v4600_v9 = vld [vmem:[#allocation5 + $0x250] sm:$0xf] }
  0xd6   : > { %1893 = vmatmul.bf16.vlgmr.msrb.gmra.mxu1 %v6027_v35  ;;  %2564 = vmatpush.bf16.msra.mxu0 %v4617_v60  ;;  %v4601_v1 = vor.u32 %v5595_v11, %v4600_v9  ;;  %v4560_v9 = vld [vmem:[#allocation5 + $0x200] sm:$0xf]  ;;  %v5585_v11 = vld [vmem:[#allocation5 + $0x204] sm:$0xf0] }
  0xd7   : > { %1911 = vmatmul.bf16.vlgmr.msrb.gmra.mxu2 %v6023_v31  ;;  %2578 = vmatpush.bf16.msra.mxu1 %v4681_v62 }
  0xd8   : > { %1929 = vmatmul.bf16.vlgmr.msrb.gmra.mxu3 %v6027_v35 }
  0xda   : > { %v886_v15 = vpop.f32.mrf.mxu2  ;;  %v6057_v18 = vpop.f32.mrf.mxu0 }
  0xdb   : > { %v904_v17 = vpop.f32.mrf.mxu3  ;;  %v6061_v19 = vpop.f32.mrf.mxu1  ;;  %2579 = vmatpush.bf16.msra.mxu1 %v4673_v6 }
  0xdc   : > { %v6059_v32 = vadd.f32 %v904_v17, %v886_v15  ;;  %v4664_v15 = vld [vmem:[#allocation5 + $0x2d0] sm:$0xf]  ;;  %v5611_v17 = vld [vmem:[#allocation5 + $0x2d4] sm:$0xf0] }
  0xe2   : > { %v6063_v21 = vpop.f32.mrf.mxu2  ;;  %v855_v24 = vpop.f32.mrf.mxu0 }
  0xe3   : > { %v6065_v23 = vpop.f32.mrf.mxu3  ;;  %v873_v25 = vpop.f32.mrf.mxu1 }
  0xe4   : > { %v6067_v27 = vadd.f32 %v873_v25, %v855_v24  ;;  %v4665_v24 = vor.u32 %v5611_v17, %v4664_v15  ;;  %v5598_v15 = vld [vmem:[#allocation5 + $0x274] sm:$0xf]  ;;  %v4618_v17 = vld [vmem:[#allocation5 + $0x278] sm:$0xf0] }
  0xe5   : > { %1880 = vmatmul.bf16.gmra.mxu0 %v6016_v20 }
  0xe6   : > { %1898 = vmatmul.bf16.gmra.mxu1 %v6019_v36 }
  0xe7   : > { %1916 = vmatmul.bf16.gmra.mxu2 %v6016_v20  ;;  %2580 = vmatpush.bf16.msra.mxu1 %v4665_v24 }
  0xe8   : > { %1934 = vmatmul.bf16.gmra.mxu3 %v6019_v36 }
  0xea   : > { %v891_v31 = vpop.f32.mrf.mxu2  ;;  %v857_v28 = vpop.f32.mrf.mxu0 }
  0xeb   : > { %v909_v35 = vpop.f32.mrf.mxu3  ;;  %v875_v43 = vpop.f32.mrf.mxu1 }
  0xec   : > { %v6073_v30 = vadd.f32 %v909_v35, %v891_v31  ;;  %v4592_v31 = vld [vmem:[#allocation5 + $0x240] sm:$0xf]  ;;  %v5593_v35 = vld [vmem:[#allocation5 + $0x244] sm:$0xf0] }
  0xed   : > { %v4593_v28 = vor.u32 %v5593_v35, %v4592_v31  ;;  %v4656_v43 = vld [vmem:[#allocation5 + $0x2c0] sm:$0xf]  ;;  %v4621_v31 = vor.u32 %v5598_v15, %v4618_v17  ;;  %v5614_v35 = vld [vmem:[#allocation5 + $0x2f4] sm:$0xf]  ;;  %v4792_v15 = vld [vmem:[#allocation5 + $0x3d0] sm:$0xf] }
  0xf2   : > { %v893_v10 = vpop.f32.mrf.mxu2  ;;  %v1258_v33 = vpop.f32.mrf.mxu0 }
  0xf3   : > { %v911_v45 = vpop.f32.mrf.mxu3  ;;  %v1259_v14 = vadd.f32 %v1258_v33, %v6029_v37  ;;  %v1276_v38 = vpop.f32.mrf.mxu1  ;;  %v5609_v10 = vld [vmem:[#allocation5 + $0x2c4] sm:$0xf0]  ;;  %v871_v33 = vadd.f32 %v6061_v19, %v6057_v18  ;;  %v4576_v18 = vld [vmem:[#allocation5 + $0x220] sm:$0xf] }
  0xf4   : > { %v4657_v45 = vor.u32 %v5609_v10, %v4656_v43  ;;  %v5589_v19 = vld [vmem:[#allocation5 + $0x224] sm:$0xf0] }
  0xf5   : > { %v6076_v16 = vadd.f32 %v1276_v38, %v1259_v14  ;;  %v4577_v57 = vor.u32 %v5589_v19, %v4576_v18  ;;  %v4736_v19 = vld [vmem:[#allocation5 + $0x360] sm:$0xf] }
  0xf6   : > { %2581 = vmatpush.bf16.msra.mxu1 %v4657_v45 }
  0xfa   : > { %v1294_v39 = vpop.f32.mrf.mxu2  ;;  %v6079_v40 = vpop.f32.mrf.mxu0 }
  0xfb   : > { %v1295_v22 = vadd.f32 %v1294_v39, %v6037_v3  ;;  %v1312_v20 = vpop.f32.mrf.mxu3  ;;  %v6081_v36 = vpop.f32.mrf.mxu1 }
  0xfd   : > { %v6083_v41 = vadd.f32 %v1312_v20, %v1295_v22  ;;  %v4584_v22 = vld [vmem:[#allocation5 + $0x230] sm:$0xf]  ;;  %v5591_v20 = vld [vmem:[#allocation5 + $0x234] sm:$0xf0] }
 0x102   : > { %v6085_v46 = vpop.f32.mrf.mxu2  ;;  %v1263_v48 = vpop.f32.mrf.mxu0 }
 0x103   : > { %v6087_v47 = vpop.f32.mrf.mxu3  ;;  %v1264_v37 = vadd.f32 %v1263_v48, %v6045_v34  ;;  %v1281_v49 = vpop.f32.mrf.mxu1  ;;  %v4609_v34 = vor.u32 %v5597_v2, %v4608_v44  ;;  %v4568_v44 = vld [vmem:[#allocation5 + $0x210] sm:$0xf]  ;;  %v5587_v2 = vld [vmem:[#allocation5 + $0x214] sm:$0xf0] }
 0x104   : > { %v4569_v6 = vor.u32 %v5587_v2, %v4568_v44  ;;  %v4602_v44 = vld [vmem:[#allocation5 + $0x258] sm:$0xf0] }
 0x105   : > { %v6090_v50 = vadd.f32 %v1281_v49, %v1264_v37  ;;  %2565 = vmatpush.bf16.msra.mxu0 %v4609_v34  ;;  %v4585_v49 = vor.u32 %v5591_v20, %v4584_v22  ;;  %v4808_v22 = vld [vmem:[#allocation5 + $0x3f0] sm:$0xf]  ;;  %v5647_v20 = vld [vmem:[#allocation5 + $0x3f4] sm:$0xf0] }
 0x109   : > { %2566 = vmatpush.bf16.msra.mxu0 %v4601_v1  ;;  %v5601_v1 = vld [vmem:[#allocation5 + $0x284] sm:$0xf0] }
 0x10a   : > { %v1299_v51 = vpop.f32.mrf.mxu2  ;;  %v1265_v54 = vpop.f32.mrf.mxu0 }
 0x10b   : > { %v1300_v53 = vadd.f32 %v1299_v51, %v838_v56  ;;  %v1317_v3 = vpop.f32.mrf.mxu3  ;;  %v1283_v59 = vpop.f32.mrf.mxu1  ;;  %v4648_v51 = vld [vmem:[#allocation5 + $0x2b0] sm:$0xf] }
 0x10d   : > { %v6092_v42 = vadd.f32 %v1317_v3, %v1300_v53  ;;  %2567 = vmatpush.bf16.msra.mxu0 %v4593_v28  ;;  %v5607_v53 = vld [vmem:[#allocation5 + $0x2b4] sm:$0xf0]  ;;  %v4682_v28 = vld [vmem:[#allocation5 + $0x2f8] sm:$0xf0] }
 0x10e   : > { %v4649_v54 = vor.u32 %v5607_v53, %v4648_v51  ;;  %v4685_v43 = vor.u32 %v5614_v35, %v4682_v28  ;;  %v4610_v51 = vld [vmem:[#allocation5 + $0x268] sm:$0xf0]  ;;  %v5612_v53 = vld [vmem:[#allocation5 + $0x2e4] sm:$0xf] }
 0x10f   : > { %v5592_v35 = vld [vmem:[#allocation5 + $0x244] sm:$0xf]  ;;  %v4594_v28 = vld [vmem:[#allocation5 + $0x248] sm:$0xf0] }
 0x110   : > { %2582 = vmatpush.bf16.msra.mxu1 %v4649_v54 }
 0x111   : > { %2568 = vmatpush.bf16.msra.mxu0 %v4585_v49  ;;  %v4809_v49 = vor.u32 %v5647_v20, %v4808_v22  ;;  %v4720_v22 = vld [vmem:[#allocation5 + $0x340] sm:$0xf]  ;;  %v5625_v20 = vld [vmem:[#allocation5 + $0x344] sm:$0xf0] }
 0x112   : > { %v1301_v56 = vpop.f32.mrf.mxu2  ;;  %v1330_v8 = vpop.f32.mrf.mxu0 }
 0x113   : > { %v1319_v7 = vpop.f32.mrf.mxu3  ;;  %v1331_v63 = vadd.f32 %v1330_v8, %v6051_v13  ;;  %v1348_v12 = vpop.f32.mrf.mxu1  ;;  %v5603_v56 = vld [vmem:[#allocation5 + $0x294] sm:$0xf0]  ;;  %2606 = vmatpush.bf16.msra.mxu3 %v4809_v49  ;;  %v4784_v49 = vld [vmem:[#allocation5 + $0x3c0] sm:$0xf] }
 0x114   : > { %v4633_v7 = vor.u32 %v5603_v56, %v4632_v52  ;;  %v6117_v56 = vld [vmem:[%s6350_s2] sm:$0xf] }
 0x115   : > { %v6095_v25 = vadd.f32 %v1348_v12, %v1331_v63  ;;  %2569 = vmatpush.bf16.msra.mxu0 %v4577_v57  ;;  %v4624_v63 = vld [vmem:[#allocation5 + $0x280] sm:$0xf]  ;;  %v4561_v12 = vor.u32 %v5585_v11, %v4560_v9 }
 0x116   : > { %v4625_v24 = vor.u32 %v5601_v1, %v4624_v63  ;;  %v4800_v57 = vld [vmem:[#allocation5 + $0x3e0] sm:$0xf]  ;;  %v1984_v63 = vlaneseq  ;;  %v5627_v1 = vld [vmem:[#allocation5 + $0x354] sm:$0xf0] }
 0x119   : > { %2570 = vmatpush.bf16.msra.mxu0 %v4569_v6 }
 0x11a   : > { %v1366_v14 = vpop.f32.mrf.mxu2  ;;  %v1332_v39 = vpop.f32.mrf.mxu0 }
 0x11b   : > { %v1367_v13 = vadd.f32 %v1366_v14, %v6059_v32  ;;  %v1384_v38 = vpop.f32.mrf.mxu3  ;;  %v1333_v48 = vadd.f32 %v1332_v39, %v871_v33  ;;  %v1350_v37 = vpop.f32.mrf.mxu1  ;;  %v4640_v32 = vld [vmem:[#allocation5 + $0x2a0] sm:$0xf]  ;;  %v4744_v14 = vld [vmem:[#allocation5 + $0x370] sm:$0xf] }
 0x11c   : > { %v4641_v59 = vor.u32 %v5605_v58, %v4640_v32  ;;  %v5629_v32 = vld [vmem:[#allocation5 + $0x364] sm:$0xf0] }
 0x11d   : > { %v6100_v3 = vadd.f32 %v1384_v38, %v1367_v13  ;;  %v6102_v55 = vadd.f32 %v1350_v37, %v1333_v48  ;;  %2571 = vmatpush.bf16.msra.mxu0 %v4561_v12  ;;  %v5631_v13 = vld [vmem:[#allocation5 + $0x374] sm:$0xf0]  ;;  %v5596_v48 = vld [vmem:[#allocation5 + $0x264] sm:$0xf]  ;;  %v4737_v58 = vor.u32 %v5629_v32, %v4736_v19  ;;  %v4728_v12 = vld [vmem:[#allocation5 + $0x350] sm:$0xf]  ;;  %v799_v32 = vadd.f32 %v6039_v4, %v6035_v0 }
 0x11e   : > { %2583 = vmatpush.bf16.msra.mxu1 %v4641_v59  ;;  %v4745_v39 = vor.u32 %v5631_v13, %v4744_v14  ;;  %v4613_v54 = vor.u32 %v5596_v48, %v4610_v51  ;;  %v5645_v59 = vld [vmem:[#allocation5 + $0x3e4] sm:$0xf0]  ;;  %v6120_v14 = vperm.slane %v6117_v56, 0  ;;  %v4721_v48 = vor.u32 %v5625_v20, %v4720_v22  ;;  %v4650_v19 = vld [vmem:[#allocation5 + $0x2b8] sm:$0xf0] }
 0x11f   : > { %v4801_v2 = vor.u32 %v5645_v59, %v4800_v57  ;;  %v5641_v51 = vld [vmem:[#allocation5 + $0x3c4] sm:$0xf0]  ;;  %v4776_v4 = vld [vmem:[#allocation5 + $0x3b0] sm:$0xf]  ;;  %v5586_v22 = vld [vmem:[#allocation5 + $0x214] sm:$0xf] }
 0x120   : > { %2592 = vmatpush.bf16.msra.mxu2 %v4745_v39  ;;  %v6123_v39 = vshrl.u32 %v1984_v63, 7  ;;  %v835_v63 = vadd.f32 %v6043_v29, %v6041_v26  ;;  %v5621_v26 = vld [vmem:[#allocation5 + $0x324] sm:$0xf0]  ;;  %v4768_v29 = vld [vmem:[#allocation5 + $0x3a0] sm:$0xf] }
 0x121   : > { %2620 = vmatpush.bf16.msrb.mxu0 %v4621_v31  ;;  %2607 = vmatpush.bf16.msra.mxu3 %v4801_v2  ;;  %v5643_v31 = vld [vmem:[#allocation5 + $0x3d4] sm:$0xf0] }
 0x122   : > { %v6104_v60 = vpop.f32.mrf.mxu2  ;;  %v1335_v62 = vpop.f32.mrf.mxu0  ;;  %2584 = vmatpush.bf16.msra.mxu1 %v4633_v7 }
 0x123   : > { %v6106_v61 = vpop.f32.mrf.mxu3  ;;  %v1336_v34 = vadd.f32 %v1335_v62, %v6067_v27  ;;  %v1353_v5 = vpop.f32.mrf.mxu1  ;;  %v5594_v62 = vld [vmem:[#allocation5 + $0x254] sm:$0xf] }
 0x124   : > { %v4605_v52 = vor.u32 %v5594_v62, %v4602_v44  ;;  %2593 = vmatpush.bf16.msra.mxu2 %v4737_v58  ;;  %v6129_v44 = vperm.slane %v6117_v56, 1 }
 0x125   : > { %v6109_v8 = vadd.f32 %v1353_v5, %v1336_v34  ;;  %2621 = vmatpush.bf16.msrb.mxu0 %v4613_v54  ;;  %v5610_v34 = vld [vmem:[#allocation5 + $0x2d4] sm:$0xf]  ;;  %v4666_v5 = vld [vmem:[#allocation5 + $0x2d8] sm:$0xf0]  ;;  %v4785_v54 = vor.u32 %v5641_v51, %v4784_v49 }
 0x126   : > { %2585 = vmatpush.bf16.msra.mxu1 %v4625_v24  ;;  %v4669_v7 = vor.u32 %v5610_v34, %v4666_v5  ;;  %v4729_v24 = vor.u32 %v5627_v1, %v4728_v12  ;;  %v5623_v34 = vld [vmem:[#allocation5 + $0x334] sm:$0xf0]  ;;  %v1261_v5 = vadd.f32 %v6079_v40, %v799_v32  ;;  %v6135_v12 = vadd.s32 4294967295, %v6123_v39  ;;  %v4634_v49 = vld [vmem:[#allocation5 + $0x298] sm:$0xf0] }
 0x127   : > { %v4696_v32 = vld [vmem:[#allocation5 + $0x310] sm:$0xf] }
 0x128   : > { %2594 = vmatpush.bf16.msra.mxu2 %v4729_v24  ;;  %vm1991_vm3 = vcmp.ge.s32.totalorder %v6135_v12, 0 }
 0x129   : > { %2622 = vmatpush.bf16.msrb.mxu0 %v4605_v52  ;;  %v4712_v52 = vld [vmem:[#allocation5 + $0x330] sm:$0xf] }
 0x12a   : > { %v1371_v27 = vpop.f32.mrf.mxu2  ;;  %v1337_v33 = vpop.f32.mrf.mxu0  ;;  %2634 = vmatpush.bf16.msrb.mxu1 %v4685_v43  ;;  %v4793_v43 = vor.u32 %v5643_v31, %v4792_v15  ;;  %v4713_v0 = vor.u32 %v5623_v34, %v4712_v52  ;;  %v4578_v15 = vld [vmem:[#allocation5 + $0x228] sm:$0xf0]  ;;  %v4760_v52 = vld [vmem:[#allocation5 + $0x390] sm:$0xf]  ;;  %v5635_v34 = vld [vmem:[#allocation5 + $0x394] sm:$0xf0] }
 0x12b   : > { %v1372_v10 = vadd.f32 %v1371_v27, %v6073_v30  ;;  %v1389_v45 = vpop.f32.mrf.mxu3  ;;  %v1355_v38 = vpop.f32.mrf.mxu1  ;;  %v4674_v30 = vld [vmem:[#allocation5 + $0x2e8] sm:$0xf0] }
 0x12c   : > { %v4677_v18 = vor.u32 %v5612_v53, %v4674_v30  ;;  %v4658_v33 = vld [vmem:[#allocation5 + $0x2c8] sm:$0xf0]  ;;  %2608 = vmatpush.bf16.msra.mxu3 %v4793_v43  ;;  %v5590_v53 = vld [vmem:[#allocation5 + $0x234] sm:$0xf]  ;;  %v4586_v30 = vld [vmem:[#allocation5 + $0x238] sm:$0xf0]  ;;  %2595 = vmatpush.bf16.msra.mxu2 %v4721_v48 }
 0x12d   : > { %v6112_v37 = vadd.f32 %v1389_v45, %v1372_v10  ;;  %v4597_v10 = vor.u32 %v5592_v35, %v4594_v28  ;;  %v5608_v45 = vld [vmem:[#allocation5 + $0x2c4] sm:$0xf]  ;;  %v4589_v58 = vor.u32 %v5590_v53, %v4586_v30  ;;  %v4642_v28 = vld [vmem:[#allocation5 + $0x2a8] sm:$0xf0] }
 0x12e   : > { %2635 = vmatpush.bf16.msrb.mxu1 %v4677_v18  ;;  %v4661_v13 = vor.u32 %v5608_v45, %v4658_v33  ;;  %v5606_v18 = vld [vmem:[#allocation5 + $0x2b4] sm:$0xf]  ;;  %v1279_v45 = vadd.f32 %v6081_v36, %v1261_v5 }
 0x12f   : > { %2623 = vmatpush.bf16.msrb.mxu0 %v4597_v10  ;;  %v4653_v59 = vor.u32 %v5606_v18, %v4650_v19  ;;  %v4704_v10 = vld [vmem:[#allocation5 + $0x320] sm:$0xf] }
 0x130   : > { %2609 = vmatpush.bf16.msra.mxu3 %v4785_v54  ;;  %2596 = vmatpush.bf16.msra.mxu2 %v4713_v0  ;;  %v4562_v0 = vld [vmem:[#allocation5 + $0x208] sm:$0xf0] }
 0x132   : > { %v1373_v6 = vpop.f32.mrf.mxu2  ;;  %v1804_v11 = vpop.f32.mrf.mxu0  ;;  %2636 = vmatpush.bf16.msrb.mxu1 %v4669_v7 }
 0x133   : > { %v1391_v9 = vpop.f32.mrf.mxu3  ;;  %v1822_v17 = vpop.f32.mrf.mxu1  ;;  %2624 = vmatpush.bf16.msrb.mxu0 %v4589_v58 }
 0x134   : > { %v1823_v27 = vadd.f32 %v1822_v17, %v1804_v11  ;;  %v5639_v9 = vld [vmem:[#allocation5 + $0x3b4] sm:$0xf0]  ;;  %v5588_v11 = vld [vmem:[#allocation5 + $0x224] sm:$0xf] }
 0x135   : > { %v4777_v1 = vor.u32 %v5639_v9, %v4776_v4  ;;  %v5604_v17 = vld [vmem:[#allocation5 + $0x2a4] sm:$0xf]  ;;  %v4581_v35 = vor.u32 %v5588_v11, %v4578_v15  ;;  %v1987_v15 = vadd.s32 16, %v6123_v39  ;;  %v5646_v39 = vld [vmem:[#allocation5 + $0x3f4] sm:$0xf] }
 0x136   : > { %v1939_v38 = vadd.f32 %v1823_v27, %v6076_v16  ;;  %2637 = vmatpush.bf16.msrb.mxu1 %v4661_v13  ;;  %v1297_v27 = vadd.f32 %v6085_v46, %v835_v63  ;;  %v4645_v43 = vor.u32 %v5604_v17, %v4642_v28  ;;  %v4705_v13 = vor.u32 %v5621_v26, %v4704_v10  ;;  %v5602_v46 = vld [vmem:[#allocation5 + $0x294] sm:$0xf]  ;;  %v5600_v4 = vld [vmem:[#allocation5 + $0x284] sm:$0xf] }
 0x137   : > { %2610 = vmatpush.bf16.msra.mxu3 %v4777_v1  ;;  %2625 = vmatpush.bf16.msrb.mxu0 %v4581_v35  ;;  %v4637_v30 = vor.u32 %v5602_v46, %v4634_v49  ;;  %v4626_v1 = vld [vmem:[#allocation5 + $0x288] sm:$0xf0]  ;;  %v5617_v35 = vld [vmem:[#allocation5 + $0x304] sm:$0xf0]  ;;  %v5630_v10 = vld [vmem:[#allocation5 + $0x374] sm:$0xf] }
 0x138   : > { %v1960_v16 = vadd.f32 %v6120_v14, %v1939_v38  ;;  %v5637_v38 = vld [vmem:[#allocation5 + $0x3a4] sm:$0xf0]  ;;  %2597 = vmatpush.bf16.msra.mxu2 %v4705_v13  ;;  %v1315_v36 = vadd.f32 %v6087_v47, %v1297_v27  ;;  %v4629_v17 = vor.u32 %v5600_v4, %v4626_v1  ;;  %v4752_v27 = vld [vmem:[#allocation5 + $0x380] sm:$0xf]  ;;  %v4746_v13 = vld [vmem:[#allocation5 + $0x378] sm:$0xf0] }
 0x139   : > { %v4769_v20 = vor.u32 %v5637_v38, %v4768_v29  ;;  %v6154_v38 = vadd.s32 4294967295, %v1987_v15 }
 0x13a   : > { %v1840_v57 = vpop.f32.mrf.mxu2  ;;  %v1806_v2 = vpop.f32.mrf.mxu0  ;;  %2638 = vmatpush.bf16.msrb.mxu1 %v4653_v59  ;;  %v1972_v24 = vmax.f32 %v1960_v16, 0.0  ;;  %v5619_v16 = vld [vmem:[#allocation5 + $0x314] sm:$0xf0] }
 0x13b   : > { %v1858_v62 = vpop.f32.mrf.mxu3  ;;  %v1824_v7 = vpop.f32.mrf.mxu1  ;;  %2611 = vmatpush.bf16.msra.mxu3 %v4769_v20  ;;  %v4810_v20 = vld [vmem:[#allocation5 + $0x3f8] sm:$0xf0]  ;;  %vm1996_vm4 = vcmp.lt.s32.totalorder %v6154_v38, 16  ;;  %v4824_v38 = vld [vmem:[#allocation5 + $0x10] sm:$0xf] }
 0x13c   : > { %v1859_v6 = vadd.f32 %v1858_v62, %v1840_v57  ;;  %v1825_v31 = vadd.f32 %v1824_v7, %v1806_v2  ;;  %v2006_v57 = vsel %vm1991_vm3, %v1972_v24, 0.0  ;;  %v4697_v2 = vor.u32 %v5619_v16, %v4696_v32  ;;  %v5584_v7 = vld [vmem:[#allocation5 + $0x204] sm:$0xf]  ;;  %v4802_v32 = vld [vmem:[#allocation5 + $0x3e8] sm:$0xf0] }
 0x13d   : > { %v4565_v63 = vor.u32 %v5584_v7, %v4562_v0  ;;  %v4794_v7 = vld [vmem:[#allocation5 + $0x3d8] sm:$0xf0] }
 0x13e   : > { %v1940_v40 = vadd.f32 %v1859_v6, %v6083_v41  ;;  %v4570_v41 = vld [vmem:[#allocation5 + $0x218] sm:$0xf0]  ;;  %2639 = vmatpush.bf16.msrb.mxu1 %v4645_v43  ;;  %v1943_v53 = vadd.f32 %v1825_v31, %v1279_v45  ;;  %v4761_v6 = vor.u32 %v5635_v34, %v4760_v52  ;;  %2598 = vmatpush.bf16.msra.mxu2 %v4697_v2  ;;  %v4688_v31 = vld [vmem:[#allocation5 + $0x300] sm:$0xf]  ;;  %v5633_v43 = vld [vmem:[#allocation5 + $0x384] sm:$0xf0] }
 0x13f   : > { %v4573_v48 = vor.u32 %v5586_v22, %v4570_v41  ;;  %v4689_v28 = vor.u32 %v5617_v35, %v4688_v31  ;;  %v4730_v2 = vld [vmem:[#allocation5 + $0x358] sm:$0xf0]  ;;  %v5642_v52 = vld [vmem:[#allocation5 + $0x3d4] sm:$0xf]  ;;  %v4722_v31 = vld [vmem:[#allocation5 + $0x348] sm:$0xf0] }
 0x140   : > { %v1961_v33 = vadd.f32 %v6129_v44, %v1940_v40  ;;  %v1964_v9 = vadd.f32 %v6120_v14, %v1943_v53  ;;  %2612 = vmatpush.bf16.msra.mxu3 %v4761_v6  ;;  %v4813_v53 = vor.u32 %v5646_v39, %v4810_v20  ;;  %v4778_v20 = vld [vmem:[#allocation5 + $0x3b8] sm:$0xf0] }
 0x141   : > { %2626 = vmatpush.bf16.msrb.mxu0 %v4573_v48 }
 0x142   : > { %v1973_v51 = vmax.f32 %v1961_v33, 0.0  ;;  %v1842_v54 = vpop.f32.mrf.mxu2  ;;  %v1809_v19 = vpop.f32.mrf.mxu0  ;;  %2640 = vmatpush.bf16.msrb.mxu1 %v4637_v30  ;;  %v1976_v26 = vmax.f32 %v1964_v9, 0.0  ;;  %v4753_v33 = vor.u32 %v5633_v43, %v4752_v27  ;;  %2599 = vmatpush.bf16.msra.mxu2 %v4689_v28  ;;  %v4738_v30 = vld [vmem:[#allocation5 + $0x368] sm:$0xf0]  ;;  %v5640_v28 = vld [vmem:[#allocation5 + $0x3c4] sm:$0xf]  ;;  %v907_v43 = vadd.f32 %v6065_v23, %v6063_v21 }
 0x143   : > { %v1860_v18 = vpop.f32.mrf.mxu3  ;;  %v1827_v62 = vpop.f32.mrf.mxu1  ;;  %v4786_v27 = vld [vmem:[#allocation5 + $0x3c8] sm:$0xf0] }
 0x144   : > { %v2007_v58 = vsel %vm1991_vm3, %v1973_v51, 0.0  ;;  %v1861_v59 = vadd.f32 %v1860_v18, %v1842_v54  ;;  %v1828_v47 = vadd.f32 %v1827_v62, %v1809_v19  ;;  %2613 = vmatpush.bf16.msra.mxu3 %v4753_v33  ;;  %v5628_v54 = vld [vmem:[#allocation5 + $0x364] sm:$0xf]  ;;  %v5626_v62 = vld [vmem:[#allocation5 + $0x354] sm:$0xf]  ;;  %v1369_v39 = vadd.f32 %v6104_v60, %v907_v43 }
 0x145   : > { %v6147_v5 = vpack.c.bf16 %v2007_v58, %v2006_v57  ;;  %2627 = vmatpush.bf16.msrb.mxu0 %v4565_v63  ;;  %v4741_v18 = vor.u32 %v5628_v54, %v4738_v30  ;;  %v5644_v19 = vld [vmem:[#allocation5 + $0x3e4] sm:$0xf]  ;;  %v4733_v9 = vor.u32 %v5626_v62, %v4730_v2 }
 0x146   : > { %v1944_v11 = vadd.f32 %v1861_v59, %v1315_v36  ;;  %v1947_v40 = vadd.f32 %v1828_v47, %v6090_v50  ;;  %2641 = vmatpush.bf16.msrb.mxu1 %v4629_v17  ;;  %v4749_v50 = vor.u32 %v5630_v10, %v4746_v13  ;;  %v4805_v16 = vor.u32 %v5644_v19, %v4802_v32  ;;  %v6199_v32 = vld [vmem:[#allocation5 + $0xf0] sm:$0xf]  ;;  %v5620_v2 = vld [vmem:[#allocation5 + $0x324] sm:$0xf] }
 0x147   : > { %2024 = vst [vmem:[#allocation2 + $0x28] sm:$0xff] %v6147_v5  ;;  %v2171_v47 = vunpack.c.l.b16 %v6147_v5  ;;  %v2172_v6 = vunpack.c.h.b16 %v6147_v5  ;;  %v4789_v10 = vor.u32 %v5640_v28, %v4786_v27  ;;  %v5634_v28 = vld [vmem:[#allocation5 + $0x394] sm:$0xf] }
 0x148   : > { %v1965_v24 = vadd.f32 %v6129_v44, %v1944_v11  ;;  %v1968_v46 = vadd.f32 %v6120_v14, %v1947_v40  ;;  %2648 = vmatpush.bf16.msrb.mxu2 %v4749_v50  ;;  %2662 = vmatpush.bf16.msrb.mxu3 %v4813_v53  ;;  %v5624_v40 = vld [vmem:[#allocation5 + $0x344] sm:$0xf]  ;;  %v5638_v50 = vld [vmem:[#allocation5 + $0x3b4] sm:$0xf] }
 0x149   : > { %v4725_v35 = vor.u32 %v5624_v40, %v4722_v31  ;;  %v4781_v53 = vor.u32 %v5638_v50, %v4778_v20  ;;  %v5618_v31 = vld [vmem:[#allocation5 + $0x314] sm:$0xf] }
 0x14a   : > { %v1977_v29 = vmax.f32 %v1965_v24, 0.0  ;;  %v1845_v45 = vpop.f32.mrf.mxu2  ;;  %v1811_v41 = vpop.f32.mrf.mxu0  ;;  %v1980_v57 = vmax.f32 %v1968_v46, 0.0 }
 0x14b   : > { %v1863_v22 = vpop.f32.mrf.mxu3  ;;  %v1829_v51 = vpop.f32.mrf.mxu1  ;;  %v4714_v41 = vld [vmem:[#allocation5 + $0x338] sm:$0xf0] }
 0x14c   : > { %v6156_v48 = vpack.c.bf16 %v1977_v29, %v1976_v26  ;;  %v1864_v49 = vadd.f32 %v1863_v22, %v1845_v45  ;;  %2649 = vmatpush.bf16.msrb.mxu2 %v4741_v18  ;;  %2663 = vmatpush.bf16.msrb.mxu3 %v4805_v16  ;;  %v2014_v11 = vsel %vm1996_vm4, %v1980_v57, 0.0  ;;  %v6182_v29 = vperm.slane %v6117_v56, 2  ;;  %v5622_v22 = vld [vmem:[#allocation5 + $0x334] sm:$0xf]  ;;  %v6191_v51 = vld [vmem:[#allocation5 + $0x74] sm:$0xf0] }
 0x14d   : > { %v4717_v23 = vor.u32 %v5622_v22, %v4714_v41  ;;  %v6201_v16 = vld [vmem:[#allocation5 + $0xf4] sm:$0xf0]  ;;  %v1387_v57 = vadd.f32 %v6106_v61, %v1369_v39 }
 0x14e   : > { %v1948_v36 = vadd.f32 %v1864_v49, %v6092_v42  ;;  %v2175_v14 = vunpack.c.l.b16 %v6156_v48  ;;  %v2176_v59 = vunpack.c.h.b16 %v6156_v48  ;;  %v6186_v13 = vld [vmem:[#allocation2 + $0x28] sm:$0xee]  ;;  %v6189_v49 = vld [vmem:[#allocation5 + $0x70] sm:$0xf] }
 0x14f   : > { %v3181_v54 = vunpack.c.l.b16 %v6186_v13  ;;  %v3182_v27 = vunpack.c.h.b16 %v6186_v13 }
 0x150   : > { %v1969_v58 = vadd.f32 %v6129_v44, %v1948_v36  ;;  %v4797_v44 = vor.u32 %v5642_v52, %v4794_v7  ;;  %v6172_v15 = vpack.c.b16 %v2175_v14, %v2171_v47  ;;  %v6176_v5 = vpack.c.b16 %v2176_v59, %v2172_v6  ;;  %2650 = vmatpush.bf16.msrb.mxu2 %v4733_v9  ;;  %v4706_v52 = vld [vmem:[#allocation5 + $0x328] sm:$0xf0]  ;;  %v5636_v7 = vld [vmem:[#allocation5 + $0x3a4] sm:$0xf] }
 0x151   : > { %v6196_v36 = vperm.slane %v6117_v56, 3  ;;  %v4873_v47 = vor.u32 %v6191_v51, %v6189_v49  ;;  %v4709_v6 = vor.u32 %v5620_v2, %v4706_v52  ;;  %v3185_v61 = vpack.c.b16 %v2175_v14, %v3181_v54  ;;  %v5616_v2 = vld [vmem:[#allocation5 + $0x304] sm:$0xf] }
 0x152   : > { %v1981_v34 = vmax.f32 %v1969_v58, 0.0  ;;  %v1847_v42 = vpop.f32.mrf.mxu2  ;;  %v1876_v4 = vpop.f32.mrf.mxu0  ;;  %2664 = vmatpush.bf16.msrb.mxu3 %v4797_v44  ;;  %v2195_v45 = vshll.u32 %v6172_v15, 16  ;;  %v2207_v33 = vshll.u32 %v6176_v5, 16  ;;  %v2193_v19 = vshrl.u32 %v6172_v15, 16 }
 0x153   : > { %v1865_v0 = vpop.f32.mrf.mxu3  ;;  %v1894_v1 = vpop.f32.mrf.mxu1  ;;  %v3186_v52 = vpack.c.b16 %v2176_v59, %v3182_v27  ;;  %v4754_v59 = vld [vmem:[#allocation5 + $0x388] sm:$0xf0] }
 0x154   : > { %v2015_v63 = vsel %vm1996_vm4, %v1981_v34, 0.0  ;;  %v1895_v24 = vadd.f32 %v1894_v1, %v1876_v4  ;;  %2651 = vmatpush.bf16.msrb.mxu2 %v4725_v35  ;;  %v2197_v58 = vrot.slane %v2195_v45, 1  ;;  %v2209_v62 = vrot.slane %v2207_v33, 1  ;;  %v4770_v0 = vld [vmem:[#allocation5 + $0x3a8] sm:$0xf0] }
 0x155   : > { %v2022_v17 = vpack.c.bf16 %v2015_v63, %v2014_v11  ;;  %v4773_v44 = vor.u32 %v5636_v7, %v4770_v0  ;;  %v4937_v1 = vor.u32 %v6201_v16, %v6199_v32  ;;  %v4698_v35 = vld [vmem:[#allocation5 + $0x318] sm:$0xf0] }
 0x156   : > { %v1941_v26 = vadd.f32 %v1895_v24, %v6095_v25  ;;  %2665 = vmatpush.bf16.msrb.mxu3 %v4789_v10  ;;  %v2198_v24 = vor.u32 %v2197_v58, %v2193_v19  ;;  %v4701_v45 = vor.u32 %v5618_v31, %v4698_v35  ;;  %v4762_v33 = vld [vmem:[#allocation5 + $0x398] sm:$0xf0]  ;;  %v5533_v19 = vld [vmem:[#allocation5 + $0x64] sm:$0xf0]  ;;  %v4928_v58 = vld [vmem:[#allocation5 + $0xe0] sm:$0xf] }
 0x157   : > { %2028 = vst [vmem:[#allocation2 + $0x18] sm:$0x11] %v2022_v17 }
 0x158   : > { %v1962_v30 = vadd.f32 %v6182_v29, %v1941_v26  ;;  %2652 = vmatpush.bf16.msrb.mxu2 %v4717_v23  ;;  %v3189_v23 = vrot.slane %v3185_v61, 1  ;;  %v4920_v61 = vld [vmem:[#allocation5 + $0xd0] sm:$0xf] }
 0x15a   : > { %v1912_v21 = vpop.f32.mrf.mxu2  ;;  %v1878_v46 = vpop.f32.mrf.mxu0  ;;  %2666 = vmatpush.bf16.msrb.mxu3 %v4781_v53  ;;  %v1974_v11 = vmax.f32 %v1962_v30, 0.0 }
 0x15b   : > { %v1930_v25 = vpop.f32.mrf.mxu3  ;;  %v1896_v18 = vpop.f32.mrf.mxu1 }
 0x15c   : > { %v1931_v60 = vadd.f32 %v1930_v25, %v1912_v21  ;;  %v1897_v42 = vadd.f32 %v1896_v18, %v1878_v46  ;;  %2653 = vmatpush.bf16.msrb.mxu2 %v4709_v6  ;;  %v4765_v21 = vor.u32 %v5634_v28, %v4762_v33  ;;  %v2008_v20 = vsel %vm1991_vm3, %v1974_v11, 0.0  ;;  %v4864_v18 = vld [vmem:[#allocation5 + $0x60] sm:$0xf] }
 0x15d   : > { %v4865_v0 = vor.u32 %v5533_v19, %v4864_v18  ;;  %v4912_v33 = vld [vmem:[#allocation5 + $0xc0] sm:$0xf] }
 0x15e   : > { %v1942_v34 = vadd.f32 %v1931_v60, %v6100_v3  ;;  %v2098_v56 = vld [vmem:[#allocation2 + $0x18] sm:$0x11]  ;;  %v2205_v3 = vshrl.u32 %v6176_v5, 16  ;;  %v1945_v14 = vadd.f32 %v1897_v42, %v6102_v55  ;;  %2667 = vmatpush.bf16.msrb.mxu3 %v4773_v44  ;;  %v5531_v44 = vld [vmem:[#allocation5 + $0x54] sm:$0xf0] }
 0x15f   : > { %v2179_v4 = vunpack.c.l.b16 %v2098_v56  ;;  %v2180_v9 = vunpack.c.h.b16 %v2098_v56  ;;  %v4690_v56 = vld [vmem:[#allocation5 + $0x308] sm:$0xf0] }
 0x160   : > { %v1963_v63 = vadd.f32 %v6196_v36, %v1942_v34  ;;  %v2210_v26 = vor.u32 %v2209_v62, %v2205_v3  ;;  %2654 = vmatpush.bf16.msrb.mxu2 %v4701_v45  ;;  %v1966_v32 = vadd.f32 %v6182_v29, %v1945_v14  ;;  %v5549_v62 = vld [vmem:[#allocation5 + $0xe4] sm:$0xf0]  ;;  %v4693_v48 = vor.u32 %v5616_v2, %v4690_v56  ;;  %v4896_v2 = vld [vmem:[#allocation5 + $0xa0] sm:$0xf] }
 0x161   : > { %v2187_v17 = vpack.c.b16 %v2179_v4, %v2179_v4  ;;  %v6213_v40 = vpack.c.b16 %v2180_v9, %v2180_v9  ;;  %v4929_v4 = vor.u32 %v5549_v62, %v4928_v58  ;;  %v4856_v9 = vld [vmem:[#allocation5 + $0x50] sm:$0xf]  ;;  %v4832_v58 = vld [vmem:[#allocation5 + $0x20] sm:$0xf]  ;;  %v5525_v62 = vld [vmem:[#allocation5 + $0x24] sm:$0xf0] }
 0x162   : > { %v1975_v43 = vmax.f32 %v1963_v63, 0.0  ;;  %v1914_v10 = vpop.f32.mrf.mxu2  ;;  %v1881_v22 = vpop.f32.mrf.mxu0  ;;  %2668 = vmatpush.bf16.msrb.mxu3 %v4765_v21  ;;  %v1978_v63 = vmax.f32 %v1966_v32, 0.0  ;;  %v4833_v56 = vor.u32 %v5525_v62, %v4832_v58 }
 0x163   : > { %v1932_v39 = vpop.f32.mrf.mxu3  ;;  %v2200_v41 = vshll.u32 %v2187_v17, 16  ;;  %v2212_v50 = vshll.u32 %v6213_v40, 16  ;;  %v1899_v55 = vpop.f32.mrf.mxu1  ;;  %v3190_v46 = vrot.slane %v2187_v17, 1  ;;  %v5547_v17 = vld [vmem:[#allocation5 + $0xd4] sm:$0xf0]  ;;  %v3193_v31 = vrot.slane %v6213_v40, 1 }
 0x164   : > { %v2009_v13 = vsel %vm1991_vm3, %v1975_v43, 0.0  ;;  %v1933_v25 = vadd.f32 %v1932_v39, %v1914_v10  ;;  %v1900_v54 = vadd.f32 %v1899_v55, %v1881_v22  ;;  %2655 = vmatpush.bf16.msrb.mxu2 %v4693_v48  ;;  %v4857_v43 = vor.u32 %v5531_v44, %v4856_v9  ;;  %v4848_v10 = vld [vmem:[#allocation5 + $0x40] sm:$0xf]  ;;  %v5545_v39 = vld [vmem:[#allocation5 + $0xc4] sm:$0xf0] }
 0x165   : > { %v6222_v53 = vpack.c.bf16 %v2009_v13, %v2008_v20  ;;  %v2202_v30 = vrot.slane %v2200_v41, 1  ;;  %v2214_v60 = vrot.slane %v2212_v50, 1  ;;  %v6226_v12 = vsel %vm918_vm1, %v3189_v23, %v3190_v46  ;;  %v5527_v55 = vld [vmem:[#allocation5 + $0x34] sm:$0xf0]  ;;  %v4888_v48 = vld [vmem:[#allocation5 + $0x90] sm:$0xf] }
 0x166   : > { %v1946_v16 = vadd.f32 %v1933_v25, %v1387_v57  ;;  %v5632_v57 = vld [vmem:[#allocation5 + $0x384] sm:$0xf]  ;;  %v1949_v7 = vadd.f32 %v1900_v54, %v6109_v8  ;;  %v4921_v14 = vor.u32 %v5547_v17, %v4920_v61  ;;  %v4913_v13 = vor.u32 %v5545_v39, %v4912_v33  ;;  %v4840_v25 = vld [vmem:[#allocation5 + $0x30] sm:$0xf]  ;;  %v4880_v9 = vld [vmem:[#allocation5 + $0x80] sm:$0xf] }
 0x167   : > { %2025 = vst [vmem:[#allocation2 + $0x10] sm:$0xff] %v6222_v53  ;;  %v6232_v34 = vsel %vm2191_vm5, %v2198_v24, %v2202_v30  ;;  %v6235_v42 = vsel %vm2191_vm5, %v2210_v26, %v2214_v60  ;;  %v4757_v11 = vor.u32 %v5632_v57, %v4754_v59  ;;  %v3192_v24 = vrot.slane %v3186_v52, 1  ;;  %v5529_v26 = vld [vmem:[#allocation5 + $0x44] sm:$0xf0]  ;;  %v4904_v54 = vld [vmem:[#allocation5 + $0xb0] sm:$0xf] }
 0x168   : > { %v1967_v6 = vadd.f32 %v6196_v36, %v1946_v16  ;;  %2572 = vmatmul.bf16.vlgmr.msra.gmra.mxu0 %v6232_v34  ;;  %2586 = vmatmul.bf16.vlgmr.msra.gmra.mxu1 %v6235_v42  ;;  %v1970_v51 = vadd.f32 %v6182_v29, %v1949_v7  ;;  %v2173_v40 = vunpack.c.l.b16 %v6222_v53  ;;  %v2174_v29 = vunpack.c.h.b16 %v6222_v53  ;;  %v5543_v30 = vld [vmem:[#allocation5 + $0xb4] sm:$0xf0]  ;;  %v5541_v52 = vld [vmem:[#allocation5 + $0xa4] sm:$0xf0]  ;;  %v4874_v17 = vld [vmem:[#allocation5 + $0x78] sm:$0xf0] }
 0x169   : > { %3000 = vmatpush.bf16.msra.mxu0 %v4873_v47  ;;  %3014 = vmatpush.bf16.msra.mxu1 %v4937_v1  ;;  %v6249_v27 = vsel %vm918_vm1, %v3192_v24, %v3193_v31  ;;  %v4841_v32 = vor.u32 %v5527_v55, %v4840_v25  ;;  %v4905_v16 = vor.u32 %v5543_v30, %v4904_v54  ;;  %v5523_v7 = vld [vmem:[#allocation5 + $0x14] sm:$0xf0]  ;;  %v5550_v24 = vld [vmem:[#allocation5 + $0xf4] sm:$0xf]  ;;  %v5532_v25 = vld [vmem:[#allocation5 + $0x64] sm:$0xf] }
 0x16a   : > { %v1979_v3 = vmax.f32 %v1967_v6, 0.0  ;;  %v1917_v8 = vpop.f32.mrf.mxu2  ;;  %v1883_v28 = vpop.f32.mrf.mxu0  ;;  %2669 = vmatpush.bf16.msrb.mxu3 %v4757_v11  ;;  %v1982_v50 = vmax.f32 %v1970_v51, 0.0  ;;  %v4897_v57 = vor.u32 %v5541_v52, %v4896_v2  ;;  %v5539_v59 = vld [vmem:[#allocation5 + $0x94] sm:$0xf0]  ;;  %v4825_v11 = vor.u32 %v5523_v7, %v4824_v38  ;;  %v4866_v55 = vld [vmem:[#allocation5 + $0x68] sm:$0xf0] }
 0x16b   : > { %v1935_v35 = vpop.f32.mrf.mxu3  ;;  %v1901_v1 = vpop.f32.mrf.mxu1  ;;  %v4930_v54 = vld [vmem:[#allocation5 + $0xe8] sm:$0xf0]  ;;  %v4992_v2 = vld [vmem:[#allocation5 + $0x160] sm:$0xf]  ;;  %v5565_v52 = vld [vmem:[#allocation5 + $0x164] sm:$0xf0]  ;;  %v4869_v7 = vor.u32 %v5532_v25, %v4866_v55 }
 0x16c   : > { %v6245_v49 = vpack.c.bf16 %v1979_v3, %v1978_v63  ;;  %v1936_v47 = vadd.f32 %v1935_v35, %v1917_v8  ;;  %v5537_v63 = vld [vmem:[#allocation5 + $0x84] sm:$0xf0]  ;;  %v4938_v35 = vld [vmem:[#allocation5 + $0xf8] sm:$0xf0]  ;;  %v5567_v1 = vld [vmem:[#allocation5 + $0x174] sm:$0xf0] }
 0x16d   : > { %3001 = vmatpush.bf16.msra.mxu0 %v4865_v0  ;;  %3015 = vmatpush.bf16.msra.mxu1 %v4929_v4  ;;  %v4816_v0 = vld [vmem:[#allocation5] sm:$0xf]  ;;  %v5521_v4 = vld [vmem:[#allocation5 + $0x4] sm:$0xf0]  ;;  %v5559_v25 = vld [vmem:[#allocation5 + $0x134] sm:$0xf0] }
 0x16e   : > { %v1950_v45 = vadd.f32 %v1936_v47, %v6112_v37  ;;  %v2177_v22 = vunpack.c.l.b16 %v6245_v49  ;;  %v2178_v41 = vunpack.c.h.b16 %v6245_v49  ;;  %v4849_v37 = vor.u32 %v5529_v26, %v4848_v10  ;;  %v3113_v6 = vld [vmem:[#allocation2 + $0x10] sm:$0xee]  ;;  %v5000_v47 = vld [vmem:[#allocation5 + $0x170] sm:$0xf] }
 0x16f   : > { %v3183_v44 = vunpack.c.l.b16 %v3113_v6  ;;  %v3184_v61 = vunpack.c.h.b16 %v3113_v6 }
 0x170   : > { %v1971_v21 = vadd.f32 %v6196_v36, %v1950_v45  ;;  %v6259_v23 = vpack.c.b16 %v2177_v22, %v2173_v40  ;;  %v6263_v20 = vpack.c.b16 %v2178_v41, %v2174_v29  ;;  %v2016_v36 = vsel %vm1996_vm4, %v1982_v50, 0.0  ;;  %v5064_v29 = vld [vmem:[#allocation5 + $0x1f0] sm:$0xf] }
 0x171   : > { %3002 = vmatpush.bf16.msra.mxu0 %v4857_v43  ;;  %3016 = vmatpush.bf16.msra.mxu1 %v4921_v14  ;;  %v4817_v43 = vor.u32 %v5521_v4, %v4816_v0  ;;  %v4881_v14 = vor.u32 %v5537_v63, %v4880_v9  ;;  %v3187_v10 = vpack.c.b16 %v2177_v22, %v3183_v44  ;;  %v5581_v0 = vld [vmem:[#allocation5 + $0x1e4] sm:$0xf0]  ;;  %v5530_v4 = vld [vmem:[#allocation5 + $0x54] sm:$0xf]  ;;  %v4858_v9 = vld [vmem:[#allocation5 + $0x58] sm:$0xf0] }
 0x172   : > { %v1983_v46 = vmax.f32 %v1971_v21, 0.0  ;;  %v1919_v53 = vpop.f32.mrf.mxu2  ;;  %v2219_v3 = vshll.u32 %v6259_v23, 16  ;;  %v2231_v8 = vshll.u32 %v6263_v20, 16  ;;  %v3188_v26 = vpack.c.b16 %v2178_v41, %v3184_v61  ;;  %v5548_v41 = vld [vmem:[#allocation5 + $0xe4] sm:$0xf] }
 0x173   : > { %v1937_v60 = vpop.f32.mrf.mxu3  ;;  %v4941_v21 = vor.u32 %v5550_v24, %v4938_v35  ;;  %v2229_v22 = vshrl.u32 %v6263_v20, 16  ;;  %v3195_v30 = vrot.slane %v3187_v10, 1  ;;  %v5546_v44 = vld [vmem:[#allocation5 + $0xd4] sm:$0xf]  ;;  %v4922_v61 = vld [vmem:[#allocation5 + $0xd8] sm:$0xf0] }
 0x174   : > { %v2017_v18 = vsel %vm1996_vm4, %v1983_v46, 0.0  ;;  %v2221_v45 = vrot.slane %v2219_v3, 1  ;;  %v2233_v39 = vrot.slane %v2231_v8, 1  ;;  %v2217_v46 = vshrl.u32 %v6259_v23, 16  ;;  %v4984_v63 = vld [vmem:[#allocation5 + $0x150] sm:$0xf] }
 0x175   : > { %v2023_v19 = vpack.c.bf16 %v2017_v18, %v2016_v36  ;;  %3003 = vmatpush.bf16.msra.mxu0 %v4849_v37  ;;  %3017 = vmatpush.bf16.msra.mxu1 %v4913_v13  ;;  %v5001_v37 = vor.u32 %v5567_v1, %v5000_v47  ;;  %v5583_v13 = vld [vmem:[#allocation5 + $0x1f4] sm:$0xf0]  ;;  %v3198_v36 = vrot.slane %v3188_v26, 1  ;;  %v4861_v3 = vor.u32 %v5530_v4, %v4858_v9  ;;  %v4850_v35 = vld [vmem:[#allocation5 + $0x48] sm:$0xf0] }
 0x176   : > { %v5065_v62 = vor.u32 %v5583_v13, %v5064_v29  ;;  %v4925_v8 = vor.u32 %v5546_v44, %v4922_v61  ;;  %v5579_v24 = vld [vmem:[#allocation5 + $0x1d4] sm:$0xf0]  ;;  %v5542_v29 = vld [vmem:[#allocation5 + $0xb4] sm:$0xf]  ;;  %v4968_v13 = vld [vmem:[#allocation5 + $0x130] sm:$0xf] }
 0x177   : > { %2029 = vst [vmem:[#allocation2 + $0x20] sm:$0x11] %v2023_v19  ;;  %v2222_v19 = vor.u32 %v2221_v45, %v2217_v46  ;;  %v5577_v45 = vld [vmem:[#allocation5 + $0x1c4] sm:$0xf0]  ;;  %v4952_v4 = vld [vmem:[#allocation5 + $0x110] sm:$0xf] }
 0x178   : > { %2628 = vmatmul.bf16.vlgmr.msrb.gmra.mxu0 %v6232_v34  ;;  %2642 = vmatmul.bf16.vlgmr.msrb.gmra.mxu1 %v6235_v42  ;;  %v4889_v34 = vor.u32 %v5539_v59, %v4888_v48  ;;  %v5534_v42 = vld [vmem:[#allocation5 + $0x74] sm:$0xf]  ;;  %v4933_v48 = vor.u32 %v5548_v41, %v4930_v54  ;;  %v5056_v59 = vld [vmem:[#allocation5 + $0x1e0] sm:$0xf]  ;;  %v4834_v41 = vld [vmem:[#allocation5 + $0x28] sm:$0xf0] }
 0x179   : > { %3004 = vmatpush.bf16.msra.mxu0 %v4841_v32  ;;  %3018 = vmatpush.bf16.msra.mxu1 %v4905_v16  ;;  %v4877_v50 = vor.u32 %v5534_v42, %v4874_v17  ;;  %v2234_v16 = vor.u32 %v2233_v39, %v2229_v22  ;;  %v5563_v42 = vld [vmem:[#allocation5 + $0x154] sm:$0xf0]  ;;  %v5048_v17 = vld [vmem:[#allocation5 + $0x1d0] sm:$0xf]  ;;  %v4842_v39 = vld [vmem:[#allocation5 + $0x38] sm:$0xf0] }
 0x17a   : > { %v4985_v47 = vor.u32 %v5563_v42, %v4984_v63  ;;  %v5049_v1 = vor.u32 %v5579_v24, %v5048_v17  ;;  %v5575_v22 = vld [vmem:[#allocation5 + $0x1b4] sm:$0xf0]  ;;  %v5540_v54 = vld [vmem:[#allocation5 + $0xa4] sm:$0xf]  ;;  %v5016_v44 = vld [vmem:[#allocation5 + $0x190] sm:$0xf] }
 0x17b   : > { %v5555_v9 = vld [vmem:[#allocation5 + $0x114] sm:$0xf0]  ;;  %v5520_v63 = vld [vmem:[#allocation5 + $0x4] sm:$0xf]  ;;  %v4818_v42 = vld [vmem:[#allocation5 + $0x8] sm:$0xf0] }
 0x17c   : > { %v5192_v17 = vld [vmem:[#allocation5 + $0x4f0] sm:$0xf]  ;;  %v5679_v24 = vld [vmem:[#allocation5 + $0x4f4] sm:$0xf0] }
 0x17d   : > { %3005 = vmatpush.bf16.msra.mxu0 %v4833_v56  ;;  %3019 = vmatpush.bf16.msra.mxu1 %v4897_v57 }
 0x17e   : > { %v2099_v31 = vld [vmem:[#allocation2 + $0x20] sm:$0x11] }
 0x17f   : > { %v2181_v28 = vunpack.c.l.b16 %v2099_v31  ;;  %v2182_v51 = vunpack.c.h.b16 %v2099_v31  ;;  %v5528_v31 = vld [vmem:[#allocation5 + $0x44] sm:$0xf] }
 0x180   : > { %v4853_v10 = vor.u32 %v5528_v31, %v4850_v35  ;;  %v4953_v31 = vor.u32 %v5555_v9, %v4952_v4 }
 0x181   : > { %3006 = vmatpush.bf16.msra.mxu0 %v4825_v11  ;;  %3020 = vmatpush.bf16.msra.mxu1 %v4889_v34  ;;  %v2189_v40 = vpack.c.b16 %v2181_v28, %v2181_v28  ;;  %v2190_v33 = vpack.c.b16 %v2182_v51, %v2182_v51  ;;  %v4993_v11 = vor.u32 %v5565_v52, %v4992_v2  ;;  %v5544_v28 = vld [vmem:[#allocation5 + $0xc4] sm:$0xf]  ;;  %v4914_v51 = vld [vmem:[#allocation5 + $0xc8] sm:$0xf0]  ;;  %v5522_v2 = vld [vmem:[#allocation5 + $0x14] sm:$0xf] }
 0x182   : > { %v5057_v34 = vor.u32 %v5581_v0, %v5056_v59  ;;  %v4917_v26 = vor.u32 %v5544_v28, %v4914_v51  ;;  %v4826_v52 = vld [vmem:[#allocation5 + $0x18] sm:$0xf0]  ;;  %v4944_v28 = vld [vmem:[#allocation5 + $0x100] sm:$0xf]  ;;  %v4821_v51 = vor.u32 %v5520_v63, %v4818_v42  ;;  %v5576_v63 = vld [vmem:[#allocation5 + $0x1c4] sm:$0xf] }
 0x183   : > { %v2224_v53 = vshll.u32 %v2189_v40, 16  ;;  %v2236_v49 = vshll.u32 %v2190_v33, 16  ;;  %v3196_v60 = vrot.slane %v2189_v40, 1  ;;  %v3199_v18 = vrot.slane %v2190_v33, 1  ;;  %v5040_v40 = vld [vmem:[#allocation5 + $0x1c0] sm:$0xf] }
 0x184   : > { %v5526_v33 = vld [vmem:[#allocation5 + $0x34] sm:$0xf]  ;;  %v4829_v61 = vor.u32 %v5522_v2, %v4826_v52  ;;  %v5042_v42 = vld [vmem:[#allocation5 + $0x1c8] sm:$0xf0] }
 0x185   : > { %3007 = vmatpush.bf16.msra.mxu0 %v4817_v43  ;;  %3021 = vmatpush.bf16.msra.mxu1 %v4881_v14  ;;  %v2226_v32 = vrot.slane %v2224_v53, 1  ;;  %v2238_v58 = vrot.slane %v2236_v49, 1  ;;  %v6280_v56 = vsel %vm918_vm1, %v3195_v30, %v3196_v60  ;;  %v6283_v57 = vsel %vm918_vm1, %v3198_v36, %v3199_v18  ;;  %v4976_v43 = vld [vmem:[#allocation5 + $0x140] sm:$0xf]  ;;  %v5561_v14 = vld [vmem:[#allocation5 + $0x144] sm:$0xf0] }
 0x186   : > { %v4845_v55 = vor.u32 %v5526_v33, %v4842_v39  ;;  %v5032_v53 = vld [vmem:[#allocation5 + $0x1b0] sm:$0xf]  ;;  %v5524_v49 = vld [vmem:[#allocation5 + $0x24] sm:$0xf]  ;;  %v4898_v30 = vld [vmem:[#allocation5 + $0xa8] sm:$0xf0]  ;;  %v4969_v60 = vor.u32 %v5559_v25, %v4968_v13 }
 0x187   : > { %v6286_v38 = vsel %vm2191_vm5, %v2222_v19, %v2226_v32  ;;  %v6289_v6 = vsel %vm2191_vm5, %v2234_v16, %v2238_v58  ;;  %v5033_v36 = vor.u32 %v5575_v22, %v5032_v53  ;;  %v4960_v18 = vld [vmem:[#allocation5 + $0x120] sm:$0xf]  ;;  %v5557_v19 = vld [vmem:[#allocation5 + $0x124] sm:$0xf0]  ;;  %v4837_v32 = vor.u32 %v5524_v49, %v4834_v41  ;;  %v5582_v33 = vld [vmem:[#allocation5 + $0x1f4] sm:$0xf] }
 0x188   : > { %2600 = vmatmul.bf16.vlgmr.msra.gmra.mxu2 %v6286_v38  ;;  %2614 = vmatmul.bf16.vlgmr.msra.gmra.mxu3 %v6289_v6  ;;  %v4901_v16 = vor.u32 %v5540_v54, %v4898_v30  ;;  %v5024_v58 = vld [vmem:[#allocation5 + $0x1a0] sm:$0xf]  ;;  %v4961_v59 = vor.u32 %v5557_v19, %v4960_v18  ;;  %v5066_v39 = vld [vmem:[#allocation5 + $0x1f8] sm:$0xf0]  ;;  %v5677_v25 = vld [vmem:[#allocation5 + $0x4e4] sm:$0xf0] }
 0x189   : > { %3056 = vmatpush.bf16.msrb.mxu0 %v4877_v50  ;;  %3070 = vmatpush.bf16.msrb.mxu1 %v4941_v21  ;;  %v4906_v50 = vld [vmem:[#allocation5 + $0xb8] sm:$0xf0]  ;;  %v4977_v21 = vor.u32 %v5561_v14, %v4976_v43  ;;  %v5008_v43 = vld [vmem:[#allocation5 + $0x180] sm:$0xf]  ;;  %v5569_v14 = vld [vmem:[#allocation5 + $0x184] sm:$0xf0] }
 0x18a   : > { %3008 = vmatmul.bf16.vlgmr.msra.gmra.mxu0 %v6172_v15  ;;  %3022 = vmatmul.bf16.vlgmr.msra.gmra.mxu1 %v6176_v5  ;;  %v4909_v46 = vor.u32 %v5542_v29, %v4906_v50  ;;  %v5120_v29 = vld [vmem:[#allocation5 + $0x460] sm:$0xf]  ;;  %v5564_v53 = vld [vmem:[#allocation5 + $0x164] sm:$0xf]  ;;  %v4994_v22 = vld [vmem:[#allocation5 + $0x168] sm:$0xf0] }
 0x18b   : > { %3028 = vmatpush.bf16.msra.mxu2 %v5001_v37  ;;  %3042 = vmatpush.bf16.msra.mxu3 %v5065_v62  ;;  %v5041_v37 = vor.u32 %v5577_v45, %v5040_v40  ;;  %v5573_v62 = vld [vmem:[#allocation5 + $0x1a4] sm:$0xf0]  ;;  %v5566_v40 = vld [vmem:[#allocation5 + $0x174] sm:$0xf]  ;;  %v5002_v45 = vld [vmem:[#allocation5 + $0x178] sm:$0xf0] }
 0x18c   : > { %v5025_v0 = vor.u32 %v5573_v62, %v5024_v58  ;;  %v5184_v13 = vld [vmem:[#allocation5 + $0x4e0] sm:$0xf]  ;;  %v5580_v54 = vld [vmem:[#allocation5 + $0x1e4] sm:$0xf]  ;;  %v5058_v30 = vld [vmem:[#allocation5 + $0x1e8] sm:$0xf0] }
 0x18d   : > { %3057 = vmatpush.bf16.msrb.mxu0 %v4869_v7  ;;  %3071 = vmatpush.bf16.msrb.mxu1 %v4933_v48  ;;  %v5538_v7 = vld [vmem:[#allocation5 + $0x94] sm:$0xf]  ;;  %v4890_v48 = vld [vmem:[#allocation5 + $0x98] sm:$0xf0]  ;;  %v5185_v41 = vor.u32 %v5677_v25, %v5184_v13  ;;  %v5176_v18 = vld [vmem:[#allocation5 + $0x4d0] sm:$0xf] }
 0x18e   : > { %v5675_v19 = vld [vmem:[#allocation5 + $0x4d4] sm:$0xf0]  ;;  %v5562_v58 = vld [vmem:[#allocation5 + $0x154] sm:$0xf]  ;;  %v4986_v62 = vld [vmem:[#allocation5 + $0x158] sm:$0xf0] }
 0x18f   : > { %3029 = vmatpush.bf16.msra.mxu2 %v4993_v11  ;;  %3043 = vmatpush.bf16.msra.mxu3 %v5057_v34  ;;  %v4893_v11 = vor.u32 %v5538_v7, %v4890_v48  ;;  %v5571_v34 = vld [vmem:[#allocation5 + $0x194] sm:$0xf0]  ;;  %v5177_v52 = vor.u32 %v5675_v19, %v5176_v18  ;;  %v5578_v7 = vld [vmem:[#allocation5 + $0x1d4] sm:$0xf]  ;;  %v5050_v48 = vld [vmem:[#allocation5 + $0x1d8] sm:$0xf0]  ;;  %v4989_v4 = vor.u32 %v5562_v58, %v4986_v62 }
 0x190   : > { %v5017_v35 = vor.u32 %v5571_v34, %v5016_v44  ;;  %v5053_v9 = vor.u32 %v5578_v7, %v5050_v48  ;;  %v5560_v44 = vld [vmem:[#allocation5 + $0x144] sm:$0xf]  ;;  %v5080_v13 = vld [vmem:[#allocation5 + $0x410] sm:$0xf]  ;;  %v5651_v25 = vld [vmem:[#allocation5 + $0x414] sm:$0xf0] }
 0x191   : > { %3058 = vmatpush.bf16.msrb.mxu0 %v4861_v3  ;;  %3072 = vmatpush.bf16.msrb.mxu1 %v4925_v8  ;;  %v4882_v3 = vld [vmem:[#allocation5 + $0x88] sm:$0xf0]  ;;  %v5663_v8 = vld [vmem:[#allocation5 + $0x474] sm:$0xf0]  ;;  %v5072_v18 = vld [vmem:[#allocation5 + $0x400] sm:$0xf] }
 0x192   : > { %v5649_v19 = vld [vmem:[#allocation5 + $0x404] sm:$0xf0]  ;;  %v5662_v58 = vld [vmem:[#allocation5 + $0x474] sm:$0xf]  ;;  %v5130_v62 = vld [vmem:[#allocation5 + $0x478] sm:$0xf0] }
 0x193   : > { %3030 = vmatpush.bf16.msra.mxu2 %v4985_v47  ;;  %3044 = vmatpush.bf16.msra.mxu3 %v5049_v1  ;;  %v5553_v1 = vld [vmem:[#allocation5 + $0x104] sm:$0xf0] }
 0x194   : > { %v4945_v50 = vor.u32 %v5553_v1, %v4944_v28  ;;  %v5034_v1 = vld [vmem:[#allocation5 + $0x1b8] sm:$0xf0] }
 0x195   : > { %3059 = vmatpush.bf16.msrb.mxu0 %v4853_v10  ;;  %3073 = vmatpush.bf16.msrb.mxu1 %v4917_v26  ;;  %v5193_v26 = vor.u32 %v5679_v24, %v5192_v17  ;;  %v5045_v24 = vor.u32 %v5576_v63, %v5042_v42  ;;  %v5320_v63 = vld [vmem:[#allocation5 + $0x5f0] sm:$0xf]  ;;  %v5711_v42 = vld [vmem:[#allocation5 + $0x5f4] sm:$0xf0] }
 0x197   : > { %3031 = vmatpush.bf16.msra.mxu2 %v4977_v21  ;;  %3045 = vmatpush.bf16.msra.mxu3 %v5041_v37  ;;  %v5009_v21 = vor.u32 %v5569_v14, %v5008_v43  ;;  %v5661_v37 = vld [vmem:[#allocation5 + $0x464] sm:$0xf0]  ;;  %v5088_v43 = vld [vmem:[#allocation5 + $0x420] sm:$0xf] }
 0x198   : > { %2656 = vmatmul.bf16.vlgmr.msrb.gmra.mxu2 %v6286_v38  ;;  %2670 = vmatmul.bf16.vlgmr.msrb.gmra.mxu3 %v6289_v6  ;;  %v5536_v38 = vld [vmem:[#allocation5 + $0x84] sm:$0xf]  ;;  %v5128_v6 = vld [vmem:[#allocation5 + $0x470] sm:$0xf]  ;;  %v5121_v49 = vor.u32 %v5661_v37, %v5120_v29  ;;  %v5653_v14 = vld [vmem:[#allocation5 + $0x424] sm:$0xf0] }
 0x199   : > { %3060 = vmatpush.bf16.msrb.mxu0 %v4845_v55  ;;  %3074 = vmatpush.bf16.msrb.mxu1 %v4909_v46  ;;  %v4885_v47 = vor.u32 %v5536_v38, %v4882_v3  ;;  %v5129_v10 = vor.u32 %v5663_v8, %v5128_v6  ;;  %v5005_v55 = vor.u32 %v5566_v40, %v5002_v45  ;;  %v5096_v38 = vld [vmem:[#allocation5 + $0x430] sm:$0xf]  ;;  %v5655_v3 = vld [vmem:[#allocation5 + $0x434] sm:$0xf0]  ;;  %v5026_v37 = vld [vmem:[#allocation5 + $0x1a8] sm:$0xf0] }
 0x19a   : > { %v5069_v46 = vor.u32 %v5582_v33, %v5066_v39  ;;  %v5160_v6 = vld [vmem:[#allocation5 + $0x4b0] sm:$0xf]  ;;  %v5671_v8 = vld [vmem:[#allocation5 + $0x4b4] sm:$0xf0]  ;;  %v5097_v28 = vor.u32 %v5655_v3, %v5096_v38  ;;  %v5556_v33 = vld [vmem:[#allocation5 + $0x124] sm:$0xf]  ;;  %v5089_v29 = vor.u32 %v5653_v14, %v5088_v43 }
 0x19b   : > { %3032 = vmatpush.bf16.msra.mxu2 %v4969_v60  ;;  %3046 = vmatpush.bf16.msra.mxu3 %v5033_v36  ;;  %v5112_v60 = vld [vmem:[#allocation5 + $0x450] sm:$0xf]  ;;  %v5659_v36 = vld [vmem:[#allocation5 + $0x454] sm:$0xf0]  ;;  %v4962_v39 = vld [vmem:[#allocation5 + $0x128] sm:$0xf0] }
 0x19c   : > { %v5113_v2 = vor.u32 %v5659_v36, %v5112_v60  ;;  %v5018_v36 = vld [vmem:[#allocation5 + $0x198] sm:$0xf0]  ;;  %v5660_v38 = vld [vmem:[#allocation5 + $0x464] sm:$0xf]  ;;  %v5312_v43 = vld [vmem:[#allocation5 + $0x5e0] sm:$0xf] }
 0x19d   : > { %3061 = vmatpush.bf16.msrb.mxu0 %v4837_v32  ;;  %3075 = vmatpush.bf16.msrb.mxu1 %v4901_v16  ;;  %v4997_v32 = vor.u32 %v5564_v53, %v4994_v22  ;;  %v5061_v16 = vor.u32 %v5580_v54, %v5058_v30  ;;  %v4965_v53 = vor.u32 %v5556_v33, %v4962_v39  ;;  %v5570_v54 = vld [vmem:[#allocation5 + $0x194] sm:$0xf]  ;;  %v5709_v14 = vld [vmem:[#allocation5 + $0x5e4] sm:$0xf0] }
 0x19e   : > { %v5081_v30 = vor.u32 %v5651_v25, %v5080_v13  ;;  %v5021_v48 = vor.u32 %v5570_v54, %v5018_v36  ;;  %v5313_v39 = vor.u32 %v5709_v14, %v5312_v43  ;;  %v5304_v13 = vld [vmem:[#allocation5 + $0x5d0] sm:$0xf]  ;;  %v5707_v25 = vld [vmem:[#allocation5 + $0x5d4] sm:$0xf0]  ;;  %v5232_v54 = vld [vmem:[#allocation5 + $0x540] sm:$0xf] }
 0x19f   : > { %3033 = vmatpush.bf16.msra.mxu2 %v4961_v59  ;;  %3047 = vmatpush.bf16.msra.mxu3 %v5025_v0  ;;  %v5104_v59 = vld [vmem:[#allocation5 + $0x440] sm:$0xf]  ;;  %v5272_v43 = vld [vmem:[#allocation5 + $0x590] sm:$0xf]  ;;  %v5699_v14 = vld [vmem:[#allocation5 + $0x594] sm:$0xf0] }
 0x1a0   : > { %v5168_v0 = vld [vmem:[#allocation5 + $0x4c0] sm:$0xf] }
 0x1a1   : > { %3062 = vmatpush.bf16.msrb.mxu0 %v4829_v61  ;;  %3076 = vmatpush.bf16.msrb.mxu1 %v4893_v11  ;;  %v4978_v61 = vld [vmem:[#allocation5 + $0x148] sm:$0xf0] }
 0x1a2   : > { %v4981_v17 = vor.u32 %v5560_v44, %v4978_v61  ;;  %v5133_v44 = vor.u32 %v5662_v58, %v5130_v62  ;;  %v5162_v58 = vld [vmem:[#allocation5 + $0x4b8] sm:$0xf0] }
 0x1a3   : > { %3034 = vmatpush.bf16.msra.mxu2 %v4953_v31  ;;  %3048 = vmatpush.bf16.msra.mxu3 %v5017_v35  ;;  %v5558_v31 = vld [vmem:[#allocation5 + $0x134] sm:$0xf]  ;;  %v4970_v35 = vld [vmem:[#allocation5 + $0x138] sm:$0xf0] }
 0x1a4   : > { %v4973_v40 = vor.u32 %v5558_v31, %v4970_v35  ;;  %v5321_v35 = vor.u32 %v5711_v42, %v5320_v63 }
 0x1a5   : > { %3063 = vmatpush.bf16.msrb.mxu0 %v4821_v51  ;;  %3077 = vmatpush.bf16.msrb.mxu1 %v4885_v47  ;;  %v5161_v51 = vor.u32 %v5671_v8, %v5160_v6  ;;  %v5574_v47 = vld [vmem:[#allocation5 + $0x1b4] sm:$0xf]  ;;  %v5122_v8 = vld [vmem:[#allocation5 + $0x468] sm:$0xf0] }
 0x1a6   : > { %v5037_v45 = vor.u32 %v5574_v47, %v5034_v1  ;;  %v5125_v47 = vor.u32 %v5660_v38, %v5122_v8  ;;  %v5280_v38 = vld [vmem:[#allocation5 + $0x5a0] sm:$0xf]  ;;  %v5082_v8 = vld [vmem:[#allocation5 + $0x418] sm:$0xf0] }
 0x1a7   : > { %3035 = vmatpush.bf16.msra.mxu2 %v4945_v50  ;;  %3049 = vmatpush.bf16.msra.mxu3 %v5009_v21  ;;  %v5572_v21 = vld [vmem:[#allocation5 + $0x1a4] sm:$0xf] }
 0x1a8   : > { %3064 = vmatmul.bf16.vlgmr.msrb.gmra.mxu0 %v6172_v15  ;;  %3078 = vmatmul.bf16.vlgmr.msrb.gmra.mxu1 %v6176_v5  ;;  %v5657_v15 = vld [vmem:[#allocation5 + $0x444] sm:$0xf0]  ;;  %v5029_v22 = vor.u32 %v5572_v21, %v5026_v37 }
 0x1a9   : > { %3525 = vmatpush.bf16.msra.mxu0 %v5129_v10  ;;  %3539 = vmatpush.bf16.msra.mxu1 %v5193_v26  ;;  %v5673_v5 = vld [vmem:[#allocation5 + $0x4c4] sm:$0xf0]  ;;  %v5105_v11 = vor.u32 %v5657_v15, %v5104_v59  ;;  %v5152_v10 = vld [vmem:[#allocation5 + $0x4a0] sm:$0xf]  ;;  %v5552_v59 = vld [vmem:[#allocation5 + $0x104] sm:$0xf]  ;;  %v5073_v15 = vor.u32 %v5649_v19, %v5072_v18 }
 0x1aa   : > { %3036 = vmatmul.bf16.vlgmr.msra.gmra.mxu2 %v6259_v23  ;;  %3050 = vmatmul.bf16.vlgmr.msra.gmra.mxu3 %v6263_v20  ;;  %v5169_v34 = vor.u32 %v5673_v5, %v5168_v0  ;;  %v5669_v26 = vld [vmem:[#allocation5 + $0x4a4] sm:$0xf0]  ;;  %v4946_v5 = vld [vmem:[#allocation5 + $0x108] sm:$0xf0]  ;;  %v5296_v18 = vld [vmem:[#allocation5 + $0x5c0] sm:$0xf] }
 0x1ab   : > { %3084 = vmatpush.bf16.msrb.mxu2 %v5005_v55  ;;  %3098 = vmatpush.bf16.msrb.mxu3 %v5069_v46  ;;  %v5153_v50 = vor.u32 %v5669_v26, %v5152_v10  ;;  %v5144_v55 = vld [vmem:[#allocation5 + $0x490] sm:$0xf]  ;;  %v5667_v46 = vld [vmem:[#allocation5 + $0x494] sm:$0xf0]  ;;  %v4949_v3 = vor.u32 %v5552_v59, %v4946_v5  ;;  %v5658_v10 = vld [vmem:[#allocation5 + $0x454] sm:$0xf] }
 0x1ac   : > { %v5145_v60 = vor.u32 %v5667_v46, %v5144_v55  ;;  %v5114_v26 = vld [vmem:[#allocation5 + $0x458] sm:$0xf0]  ;;  %v5656_v55 = vld [vmem:[#allocation5 + $0x444] sm:$0xf]  ;;  %v5106_v46 = vld [vmem:[#allocation5 + $0x448] sm:$0xf0] }
 0x1ad   : > { %3526 = vmatpush.bf16.msra.mxu0 %v5121_v49  ;;  %3540 = vmatpush.bf16.msra.mxu1 %v5185_v41  ;;  %v5554_v49 = vld [vmem:[#allocation5 + $0x114] sm:$0xf]  ;;  %v4954_v41 = vld [vmem:[#allocation5 + $0x118] sm:$0xf0]  ;;  %v5117_v21 = vor.u32 %v5658_v10, %v5114_v26  ;;  %v5705_v19 = vld [vmem:[#allocation5 + $0x5c4] sm:$0xf0] }
 0x1ae   : > { %v4957_v7 = vor.u32 %v5554_v49, %v4954_v41  ;;  %v5305_v41 = vor.u32 %v5707_v25, %v5304_v13  ;;  %v5297_v62 = vor.u32 %v5705_v19, %v5296_v18  ;;  %v5288_v59 = vld [vmem:[#allocation5 + $0x5b0] sm:$0xf]  ;;  %v5090_v5 = vld [vmem:[#allocation5 + $0x428] sm:$0xf0]  ;;  %v5648_v10 = vld [vmem:[#allocation5 + $0x404] sm:$0xf] }
 0x1af   : > { %3085 = vmatpush.bf16.msrb.mxu2 %v4997_v32  ;;  %3099 = vmatpush.bf16.msrb.mxu3 %v5061_v16  ;;  %v5136_v32 = vld [vmem:[#allocation5 + $0x480] sm:$0xf]  ;;  %v5665_v16 = vld [vmem:[#allocation5 + $0x484] sm:$0xf0]  ;;  %v5074_v26 = vld [vmem:[#allocation5 + $0x408] sm:$0xf0] }
 0x1b0   : > { %v5137_v0 = vor.u32 %v5665_v16, %v5136_v32  ;;  %v5654_v32 = vld [vmem:[#allocation5 + $0x434] sm:$0xf]  ;;  %v5098_v16 = vld [vmem:[#allocation5 + $0x438] sm:$0xf0]  ;;  %v5264_v13 = vld [vmem:[#allocation5 + $0x580] sm:$0xf] }
 0x1b1   : > { %3527 = vmatpush.bf16.msra.mxu0 %v5113_v2  ;;  %3541 = vmatpush.bf16.msra.mxu1 %v5177_v52  ;;  %v5678_v2 = vld [vmem:[#allocation5 + $0x4f4] sm:$0xf]  ;;  %v5194_v52 = vld [vmem:[#allocation5 + $0x4f8] sm:$0xf0]  ;;  %v5697_v25 = vld [vmem:[#allocation5 + $0x584] sm:$0xf0] }
 0x1b2   : > { %v5197_v61 = vor.u32 %v5678_v2, %v5194_v52  ;;  %v5224_v2 = vld [vmem:[#allocation5 + $0x530] sm:$0xf]  ;;  %v5687_v52 = vld [vmem:[#allocation5 + $0x534] sm:$0xf0]  ;;  %v5708_v18 = vld [vmem:[#allocation5 + $0x5e4] sm:$0xf] }
 0x1b3   : > { %3086 = vmatpush.bf16.msrb.mxu2 %v4989_v4  ;;  %3100 = vmatpush.bf16.msrb.mxu3 %v5053_v9  ;;  %v5568_v4 = vld [vmem:[#allocation5 + $0x184] sm:$0xf]  ;;  %v5010_v9 = vld [vmem:[#allocation5 + $0x188] sm:$0xf0] }
 0x1b4   : > { %v5013_v6 = vor.u32 %v5568_v4, %v5010_v9  ;;  %v5668_v4 = vld [vmem:[#allocation5 + $0x4a4] sm:$0xf]  ;;  %v5154_v9 = vld [vmem:[#allocation5 + $0x4a8] sm:$0xf0] }
 0x1b5   : > { %3528 = vmatpush.bf16.msra.mxu0 %v5105_v11  ;;  %3542 = vmatpush.bf16.msra.mxu1 %v5169_v34  ;;  %v5256_v11 = vld [vmem:[#allocation5 + $0x570] sm:$0xf]  ;;  %v5695_v34 = vld [vmem:[#allocation5 + $0x574] sm:$0xf0]  ;;  %v5157_v42 = vor.u32 %v5668_v4, %v5154_v9  ;;  %v5314_v19 = vld [vmem:[#allocation5 + $0x5e8] sm:$0xf0] }
 0x1b6   : > { %v5257_v31 = vor.u32 %v5695_v34, %v5256_v11  ;;  %v5216_v11 = vld [vmem:[#allocation5 + $0x520] sm:$0xf]  ;;  %v5685_v34 = vld [vmem:[#allocation5 + $0x524] sm:$0xf0]  ;;  %v5686_v9 = vld [vmem:[#allocation5 + $0x534] sm:$0xf] }
 0x1b7   : > { %3087 = vmatpush.bf16.msrb.mxu2 %v4981_v17  ;;  %3101 = vmatpush.bf16.msrb.mxu3 %v5045_v24  ;;  %v5676_v17 = vld [vmem:[#allocation5 + $0x4e4] sm:$0xf]  ;;  %v5186_v24 = vld [vmem:[#allocation5 + $0x4e8] sm:$0xf0] }
 0x1b8   : > { %v5189_v1 = vor.u32 %v5676_v17, %v5186_v24  ;;  %v5666_v17 = vld [vmem:[#allocation5 + $0x494] sm:$0xf]  ;;  %v5146_v24 = vld [vmem:[#allocation5 + $0x498] sm:$0xf0] }
 0x1b9   : > { %3529 = vmatpush.bf16.msra.mxu0 %v5097_v28  ;;  %3543 = vmatpush.bf16.msra.mxu1 %v5161_v51  ;;  %v5248_v28 = vld [vmem:[#allocation5 + $0x560] sm:$0xf]  ;;  %v5693_v51 = vld [vmem:[#allocation5 + $0x564] sm:$0xf0] }
 0x1ba   : > { %v5249_v33 = vor.u32 %v5693_v51, %v5248_v28  ;;  %v5208_v28 = vld [vmem:[#allocation5 + $0x510] sm:$0xf]  ;;  %v5683_v51 = vld [vmem:[#allocation5 + $0x514] sm:$0xf0] }
 0x1bb   : > { %3088 = vmatpush.bf16.msrb.mxu2 %v4973_v40  ;;  %3102 = vmatpush.bf16.msrb.mxu3 %v5037_v45  ;;  %v5674_v40 = vld [vmem:[#allocation5 + $0x4d4] sm:$0xf]  ;;  %v5178_v45 = vld [vmem:[#allocation5 + $0x4d8] sm:$0xf0] }
 0x1bc   : > { %v5181_v37 = vor.u32 %v5674_v40, %v5178_v45  ;;  %v5664_v40 = vld [vmem:[#allocation5 + $0x484] sm:$0xf]  ;;  %v5138_v45 = vld [vmem:[#allocation5 + $0x488] sm:$0xf0] }
 0x1bd   : > { %3530 = vmatpush.bf16.msra.mxu0 %v5089_v29  ;;  %3544 = vmatpush.bf16.msra.mxu1 %v5153_v50  ;;  %v5240_v29 = vld [vmem:[#allocation5 + $0x550] sm:$0xf]  ;;  %v5691_v50 = vld [vmem:[#allocation5 + $0x554] sm:$0xf0] }
 0x1be   : > { %v5241_v49 = vor.u32 %v5691_v50, %v5240_v29  ;;  %v5200_v29 = vld [vmem:[#allocation5 + $0x500] sm:$0xf]  ;;  %v5077_v50 = vor.u32 %v5648_v10, %v5074_v26  ;;  %v5680_v10 = vld [vmem:[#allocation5 + $0x504] sm:$0xf]  ;;  %v5202_v26 = vld [vmem:[#allocation5 + $0x508] sm:$0xf0] }
 0x1bf   : > { %3089 = vmatpush.bf16.msrb.mxu2 %v4965_v53  ;;  %3103 = vmatpush.bf16.msrb.mxu3 %v5029_v22  ;;  %v5672_v53 = vld [vmem:[#allocation5 + $0x4c4] sm:$0xf]  ;;  %v5170_v22 = vld [vmem:[#allocation5 + $0x4c8] sm:$0xf0] }
 0x1c0   : > { %v5173_v36 = vor.u32 %v5672_v53, %v5170_v22  ;;  %v5710_v53 = vld [vmem:[#allocation5 + $0x5f4] sm:$0xf]  ;;  %v5322_v22 = vld [vmem:[#allocation5 + $0x5f8] sm:$0xf0] }
 0x1c1   : > { %3531 = vmatpush.bf16.msra.mxu0 %v5081_v30  ;;  %3545 = vmatpush.bf16.msra.mxu1 %v5145_v60  ;;  %v5689_v30 = vld [vmem:[#allocation5 + $0x544] sm:$0xf0]  ;;  %v5109_v60 = vor.u32 %v5656_v55, %v5106_v46  ;;  %v5694_v55 = vld [vmem:[#allocation5 + $0x574] sm:$0xf]  ;;  %v5258_v46 = vld [vmem:[#allocation5 + $0x578] sm:$0xf0] }
 0x1c3   : > { %3090 = vmatpush.bf16.msrb.mxu2 %v4957_v7  ;;  %3104 = vmatpush.bf16.msrb.mxu3 %v5021_v48  ;;  %v5101_v7 = vor.u32 %v5654_v32, %v5098_v16  ;;  %v5317_v16 = vor.u32 %v5708_v18, %v5314_v19 }
 0x1c5   : > { %3532 = vmatpush.bf16.msra.mxu0 %v5073_v15  ;;  %3546 = vmatpush.bf16.msra.mxu1 %v5137_v0  ;;  %v5703_v15 = vld [vmem:[#allocation5 + $0x5b4] sm:$0xf0]  ;;  %v5652_v0 = vld [vmem:[#allocation5 + $0x424] sm:$0xf] }
 0x1c6   : > { %v5093_v63 = vor.u32 %v5652_v0, %v5090_v5  ;;  %v5298_v0 = vld [vmem:[#allocation5 + $0x5c8] sm:$0xf0] }
 0x1c7   : > { %3091 = vmatpush.bf16.msrb.mxu2 %v4949_v3  ;;  %3105 = vmatpush.bf16.msrb.mxu3 %v5013_v6  ;;  %v5701_v3 = vld [vmem:[#allocation5 + $0x5a4] sm:$0xf0]  ;;  %v5650_v6 = vld [vmem:[#allocation5 + $0x414] sm:$0xf] }
 0x1c8   : > { %3533 = vmatmul.bf16.vlgmr.msra.gmra.mxu0 %v6226_v12  ;;  %3547 = vmatmul.bf16.vlgmr.msra.gmra.mxu1 %v6249_v27 }
 0x1c9   : > { %3581 = vmatpush.bf16.msrb.mxu0 %v5133_v44  ;;  %3595 = vmatpush.bf16.msrb.mxu1 %v5197_v61  ;;  %v5225_v44 = vor.u32 %v5687_v52, %v5224_v2  ;;  %v5289_v61 = vor.u32 %v5703_v15, %v5288_v59  ;;  %v5706_v2 = vld [vmem:[#allocation5 + $0x5d4] sm:$0xf]  ;;  %v5306_v52 = vld [vmem:[#allocation5 + $0x5d8] sm:$0xf0]  ;;  %v5234_v59 = vld [vmem:[#allocation5 + $0x548] sm:$0xf0] }
 0x1ca   : > { %3092 = vmatmul.bf16.vlgmr.msrb.gmra.mxu2 %v6259_v23  ;;  %3106 = vmatmul.bf16.vlgmr.msrb.gmra.mxu3 %v6263_v20  ;;  %v5670_v23 = vld [vmem:[#allocation5 + $0x4b4] sm:$0xf]  ;;  %v5233_v20 = vor.u32 %v5689_v30, %v5232_v54  ;;  %v5261_v54 = vor.u32 %v5694_v55, %v5258_v46  ;;  %v5325_v30 = vor.u32 %v5710_v53, %v5322_v22  ;;  %v5704_v15 = vld [vmem:[#allocation5 + $0x5c4] sm:$0xf] }
 0x1cb   : > { %3553 = vmatpush.bf16.msra.mxu2 %v5257_v31  ;;  %3567 = vmatpush.bf16.msra.mxu3 %v5321_v35  ;;  %v5165_v48 = vor.u32 %v5670_v23, %v5162_v58  ;;  %v5217_v31 = vor.u32 %v5685_v34, %v5216_v11  ;;  %v5281_v35 = vor.u32 %v5701_v3, %v5280_v38  ;;  %v5690_v23 = vld [vmem:[#allocation5 + $0x554] sm:$0xf]  ;;  %v5226_v11 = vld [vmem:[#allocation5 + $0x538] sm:$0xf0] }
 0x1cc   : > { %v5301_v4 = vor.u32 %v5704_v15, %v5298_v0  ;;  %v5702_v34 = vld [vmem:[#allocation5 + $0x5b4] sm:$0xf]  ;;  %v5229_v38 = vor.u32 %v5686_v9, %v5226_v11 }
 0x1cd   : > { %3582 = vmatpush.bf16.msrb.mxu0 %v5125_v47  ;;  %3596 = vmatpush.bf16.msrb.mxu1 %v5189_v1  ;;  %v5085_v47 = vor.u32 %v5650_v6, %v5082_v8  ;;  %v5149_v1 = vor.u32 %v5666_v17, %v5146_v24  ;;  %v5684_v6 = vld [vmem:[#allocation5 + $0x524] sm:$0xf]  ;;  %v5218_v8 = vld [vmem:[#allocation5 + $0x528] sm:$0xf0] }
 0x1ce   : > { %v5700_v17 = vld [vmem:[#allocation5 + $0x5a4] sm:$0xf]  ;;  %v5282_v24 = vld [vmem:[#allocation5 + $0x5a8] sm:$0xf0] }
 0x1cf   : > { %3554 = vmatpush.bf16.msra.mxu2 %v5249_v33  ;;  %3568 = vmatpush.bf16.msra.mxu3 %v5313_v39  ;;  %v5209_v33 = vor.u32 %v5683_v51, %v5208_v28  ;;  %v5273_v39 = vor.u32 %v5699_v14, %v5272_v43  ;;  %v5682_v28 = vld [vmem:[#allocation5 + $0x514] sm:$0xf]  ;;  %v5210_v51 = vld [vmem:[#allocation5 + $0x518] sm:$0xf0] }
 0x1d0   : > { %v5213_v43 = vor.u32 %v5682_v28, %v5210_v51 }
 0x1d1   : > { %3583 = vmatpush.bf16.msrb.mxu0 %v5117_v21  ;;  %3597 = vmatpush.bf16.msrb.mxu1 %v5181_v37  ;;  %v5141_v21 = vor.u32 %v5664_v40, %v5138_v45  ;;  %v5681_v37 = vld [vmem:[#allocation5 + $0x504] sm:$0xf0]  ;;  %v5696_v40 = vld [vmem:[#allocation5 + $0x584] sm:$0xf]  ;;  %v5266_v45 = vld [vmem:[#allocation5 + $0x588] sm:$0xf0] }
 0x1d3   : > { %3555 = vmatpush.bf16.msra.mxu2 %v5241_v49  ;;  %3569 = vmatpush.bf16.msra.mxu3 %v5305_v41  ;;  %v5201_v49 = vor.u32 %v5681_v37, %v5200_v29  ;;  %v5265_v41 = vor.u32 %v5697_v25, %v5264_v13 }
 0x1d5   : > { %3584 = vmatpush.bf16.msrb.mxu0 %v5109_v60  ;;  %3598 = vmatpush.bf16.msrb.mxu1 %v5173_v36  ;;  %v5692_v60 = vld [vmem:[#allocation5 + $0x564] sm:$0xf]  ;;  %v5250_v36 = vld [vmem:[#allocation5 + $0x568] sm:$0xf0] }
 0x1d6   : > { %v5253_v32 = vor.u32 %v5692_v60, %v5250_v36 }
 0x1d7   : > { %3556 = vmatpush.bf16.msra.mxu2 %v5233_v20  ;;  %3570 = vmatpush.bf16.msra.mxu3 %v5297_v62  ;;  %v5242_v62 = vld [vmem:[#allocation5 + $0x558] sm:$0xf0] }
 0x1d9   : > { %3585 = vmatpush.bf16.msrb.mxu0 %v5101_v7  ;;  %3599 = vmatpush.bf16.msrb.mxu1 %v5165_v48  ;;  %v5309_v48 = vor.u32 %v5706_v2, %v5306_v52 }
 0x1db   : > { %3557 = vmatpush.bf16.msra.mxu2 %v5225_v44  ;;  %3571 = vmatpush.bf16.msra.mxu3 %v5289_v61 }
 0x1dd   : > { %3586 = vmatpush.bf16.msrb.mxu0 %v5093_v63  ;;  %3600 = vmatpush.bf16.msrb.mxu1 %v5157_v42  ;;  %v5290_v63 = vld [vmem:[#allocation5 + $0x5b8] sm:$0xf0] }
 0x1de   : > { %v5293_v3 = vor.u32 %v5702_v34, %v5290_v63 }
 0x1df   : > { %3558 = vmatpush.bf16.msra.mxu2 %v5217_v31  ;;  %3572 = vmatpush.bf16.msra.mxu3 %v5281_v35  ;;  %v5221_v31 = vor.u32 %v5684_v6, %v5218_v8  ;;  %v5285_v35 = vor.u32 %v5700_v17, %v5282_v24 }
 0x1e1   : > { %3587 = vmatpush.bf16.msrb.mxu0 %v5085_v47  ;;  %3601 = vmatpush.bf16.msrb.mxu1 %v5149_v1  ;;  %v5698_v47 = vld [vmem:[#allocation5 + $0x594] sm:$0xf]  ;;  %v5274_v1 = vld [vmem:[#allocation5 + $0x598] sm:$0xf0] }
 0x1e2   : > { %v5277_v14 = vor.u32 %v5698_v47, %v5274_v1  ;;  %v3650_v1 = vld [vmem:[%s5899_s13] sm:$0xcc] }
 0x1e3   : > { %3559 = vmatpush.bf16.msra.mxu2 %v5209_v33  ;;  %3573 = vmatpush.bf16.msra.mxu3 %v5273_v39  ;;  %v5205_v33 = vor.u32 %v5680_v10, %v5202_v26  ;;  %v5269_v39 = vor.u32 %v5696_v40, %v5266_v45  ;;  %v263_v45 = vld [vmem:[%s6352_s4] sm:$0x3] }
 0x1e5   : > { %3588 = vmatpush.bf16.msrb.mxu0 %v5077_v50  ;;  %3602 = vmatpush.bf16.msrb.mxu1 %v5141_v21  ;;  %v2573_v58 = vpop.f32.mrf.mxu0  ;;  %v2587_v20 = vpop.f32.mrf.mxu1 }
 0x1e6   : > { %v2588_v7 = vadd.f32 %v2587_v20, %v2573_v58 }
 0x1e7   : > { %3560 = vmatpush.bf16.msra.mxu2 %v5201_v49  ;;  %3574 = vmatpush.bf16.msra.mxu3 %v5265_v41 }
 0x1e8   : > { %3589 = vmatmul.bf16.vlgmr.msrb.gmra.mxu0 %v6226_v12  ;;  %3603 = vmatmul.bf16.vlgmr.msrb.gmra.mxu1 %v6249_v27  ;;  %v5245_v12 = vor.u32 %v5690_v23, %v5242_v62  ;;  %v5688_v27 = vld [vmem:[#allocation5 + $0x544] sm:$0xf] }
 0x1e9   : > { %v5237_v5 = vor.u32 %v5688_v27, %v5234_v59 }
 0x1ea   : > { %3561 = vmatmul.bf16.vlgmr.msra.gmra.mxu2 %v6280_v56  ;;  %3575 = vmatmul.bf16.vlgmr.msra.gmra.mxu3 %v6283_v57 }
 0x1eb   : > { %3609 = vmatpush.bf16.msrb.mxu2 %v5261_v54  ;;  %3623 = vmatpush.bf16.msrb.mxu3 %v5325_v30 }
 0x1ed   : > { %v2575_v44 = vpop.f32.mrf.mxu0  ;;  %v2589_v61 = vpop.f32.mrf.mxu1 }
 0x1ee   : > { %v2590_v42 = vadd.f32 %v2589_v61, %v2575_v44 }
 0x1ef   : > { %3610 = vmatpush.bf16.msrb.mxu2 %v5253_v32  ;;  %3624 = vmatpush.bf16.msrb.mxu3 %v5317_v16 }
 0x1f3   : > { %3611 = vmatpush.bf16.msrb.mxu2 %v5245_v12  ;;  %3625 = vmatpush.bf16.msrb.mxu3 %v5309_v48  ;;  %v5829_v48 = vmov 0  }
 0x1f4   : > { %260 = vst [vmem:[%s6320_s19] sm:$0x33] %v5829_v48 }
 0x1f5   : > { %v2629_v53 = vpop.f32.mrf.mxu0  ;;  %v2643_v22 = vpop.f32.mrf.mxu1  ;;  %261 = vst [vmem:[%s6320_s19 + $0x10] sm:$0xcc] %v5829_v48 }
 0x1f6   : > { %v2644_v9 = vadd.f32 %v2643_v22, %v2629_v53 }
 0x1f7   : > { %3612 = vmatpush.bf16.msrb.mxu2 %v5237_v5  ;;  %3626 = vmatpush.bf16.msrb.mxu3 %v5301_v4 }
 0x1fb   : > { %3613 = vmatpush.bf16.msrb.mxu2 %v5229_v38  ;;  %3627 = vmatpush.bf16.msrb.mxu3 %v5293_v3 }
 0x1fd   : > { %v2631_v54 = vpop.f32.mrf.mxu0  ;;  %v2645_v30 = vpop.f32.mrf.mxu1 }
 0x1fe   : > { %v2646_v63 = vadd.f32 %v2645_v30, %v2631_v54 }
 0x1ff   : > { %3614 = vmatpush.bf16.msrb.mxu2 %v5221_v31  ;;  %3628 = vmatpush.bf16.msrb.mxu3 %v5285_v35 }
 0x203   : > { %3615 = vmatpush.bf16.msrb.mxu2 %v5213_v43  ;;  %3629 = vmatpush.bf16.msrb.mxu3 %v5277_v14  ;;  %v3651_v43 = vld [vmem:[%s5899_s13 + $0x8] sm:$0xff] }
 0x207   : > { %3616 = vmatpush.bf16.msrb.mxu2 %v5205_v33  ;;  %3630 = vmatpush.bf16.msrb.mxu3 %v5269_v39  ;;  %v3023_v18 = vpop.f32.mrf.mxu1  ;;  %v3653_v33 = vunpack.c.l.bf16 %v3650_v1  ;;  %v3655_v39 = vunpack.c.l.bf16 %v3651_v43 }
 0x20a   : > { %3617 = vmatmul.bf16.vlgmr.msrb.gmra.mxu2 %v6280_v56  ;;  %3631 = vmatmul.bf16.vlgmr.msrb.gmra.mxu3 %v6283_v57  ;;  %v3009_v56 = vpop.f32.mrf.mxu0 }
 0x20b   : > { %v2601_v29 = vpop.f32.mrf.mxu2  ;;  %v2615_v50 = vpop.f32.mrf.mxu3 }
 0x20c   : > { %v2602_v21 = vadd.f32 %v2601_v29, %v2588_v7  ;;  %v3654_v29 = vunpack.c.h.bf16 %v3650_v1 }
 0x20e   : > { %v2616_v37 = vadd.f32 %v2615_v50, %v2602_v21  ;;  %v3656_v50 = vunpack.c.h.bf16 %v3651_v43 }
 0x20f   : > { %v3025_v16 = vpop.f32.mrf.mxu1 }
 0x210   : > { %v3010_v34 = vadd.f32 %v3009_v56, %v2616_v37  ;;  %v3669_v56 = vrot.slane %v3654_v29, 4 }
 0x212   : > { %v3011_v32 = vpop.f32.mrf.mxu0  ;;  %v3024_v3 = vadd.f32 %v3023_v18, %v3010_v34  ;;  %v3670_v18 = vrot.slane %v3656_v50, 4 }
 0x213   : > { %v2603_v13 = vpop.f32.mrf.mxu2  ;;  %v2617_v55 = vpop.f32.mrf.mxu3 }
 0x214   : > { %v2604_v25 = vadd.f32 %v2603_v13, %v2590_v42 }
 0x216   : > { %v2618_v46 = vadd.f32 %v2617_v55, %v2604_v25 }
 0x218   : > { %v3012_v17 = vadd.f32 %v3011_v32, %v2618_v46  ;;  %v3652_v32 = vld [vmem:[%s5899_s13 + $0x10] sm:$0x33] }
 0x21a   : > { %v3026_v26 = vadd.f32 %v3025_v16, %v3012_v17  ;;  %v3643_v16 = vperm.slane %v263_v45, 1 }
 0x21b   : > { %v2657_v49 = vpop.f32.mrf.mxu2  ;;  %v2671_v41 = vpop.f32.mrf.mxu3 }
 0x21c   : > { %v2658_v11 = vadd.f32 %v2657_v49, %v2644_v9 }
 0x21e   : > { %v2672_v42 = vadd.f32 %v2671_v41, %v2658_v11  ;;  %v3642_v41 = vperm.slane %v263_v45, 0 }
 0x223   : > { %v2659_v60 = vpop.f32.mrf.mxu2  ;;  %v2673_v36 = vpop.f32.mrf.mxu3 }
 0x224   : > { %v2660_v31 = vadd.f32 %v2659_v60, %v2646_v63  ;;  %v3666_v60 = vrot.slane %v3653_v33, 4 }
 0x225   : > { %v3065_v20 = vpop.f32.mrf.mxu0  ;;  %v3079_v62 = vpop.f32.mrf.mxu1 }
 0x226   : > { %v3066_v24 = vadd.f32 %v3065_v20, %v2672_v42  ;;  %v2674_v10 = vadd.f32 %v2673_v36, %v2660_v31  ;;  %v3667_v36 = vrot.slane %v3655_v39, 4 }
 0x228   : > { %v3080_v14 = vadd.f32 %v3079_v62, %v3066_v24 }
 0x22d   : > { %v3037_v57 = vpop.f32.mrf.mxu2  ;;  %v3051_v19 = vpop.f32.mrf.mxu3 }
 0x22e   : > { %v3067_v7 = vpop.f32.mrf.mxu0  ;;  %v6313_v12 = vpop.f32.mrf.mxu1  ;;  %v3038_v47 = vadd.f32 %v3037_v57, %v3024_v3 }
 0x22f   : > { %v3068_v55 = vadd.f32 %v3067_v7, %v2674_v10 }
 0x230   : > { %v3052_v21 = vadd.f32 %v3051_v19, %v3038_v47 }
 0x235   : > { %v3039_v23 = vpop.f32.mrf.mxu2  ;;  %v6311_v58 = vpop.f32.mrf.mxu3 }
 0x236   : > { %v3040_v46 = vadd.f32 %v3039_v23, %v3026_v26 }
 0x238   : > { %v3054_v9 = vadd.f32 %v6311_v58, %v3040_v46 }
 0x245   : > { %v3534_v15 = vpop.f32.mrf.mxu0  ;;  %v3548_v0 = vpop.f32.mrf.mxu1 }
 0x246   : > { %v3549_v38 = vadd.f32 %v3548_v0, %v3534_v15  ;;  %v3668_v15 = vsel %vm3665_vm6, %v3666_v60, %v3667_v36  ;;  %v3657_v0 = vunpack.c.l.bf16 %v3652_v32 }
 0x24d   : > { %v3093_v2 = vpop.f32.mrf.mxu2  ;;  %v3107_v52 = vpop.f32.mrf.mxu3 }
 0x24e   : > { %v3536_v44 = vpop.f32.mrf.mxu0  ;;  %v3550_v61 = vpop.f32.mrf.mxu1  ;;  %v3094_v13 = vadd.f32 %v3093_v2, %v3080_v14  ;;  %v3082_v2 = vadd.f32 %v6313_v12, %v3068_v55 }
 0x24f   : > { %v3551_v37 = vadd.f32 %v3550_v61, %v3536_v44 }
 0x250   : > { %v3108_v57 = vadd.f32 %v3107_v52, %v3094_v13 }
 0x255   : > { %v6324_v27 = vpop.f32.mrf.mxu2  ;;  %v6326_v59 = vpop.f32.mrf.mxu3 }
 0x256   : > { %v3096_v52 = vadd.f32 %v6324_v27, %v3082_v2 }
 0x265   : > { %v3590_v28 = vpop.f32.mrf.mxu0  ;;  %v3604_v51 = vpop.f32.mrf.mxu1 }
 0x266   : > { %v3605_v25 = vadd.f32 %v3604_v51, %v3590_v28 }
 0x26d   : > { %v3562_v5 = vpop.f32.mrf.mxu2  ;;  %v3576_v4 = vpop.f32.mrf.mxu3 }
 0x26e   : > { %v3563_v35 = vadd.f32 %v3562_v5, %v3549_v38  ;;  %v3592_v20 = vpop.f32.mrf.mxu0  ;;  %v3606_v62 = vpop.f32.mrf.mxu1  ;;  %v3671_v5 = vsel %vm3665_vm6, %v3669_v56, %v3670_v18  ;;  %v3672_v38 = vrot.slane %v3657_v0, 4 }
 0x26f   : > { %v3607_v44 = vadd.f32 %v3606_v62, %v3592_v20 }
 0x270   : > { %v3577_v40 = vadd.f32 %v3576_v4, %v3563_v35  ;;  %v3658_v4 = vunpack.c.h.bf16 %v3652_v32  ;;  %v3673_v27 = vsel %vm3665_vm6, %v3667_v36, %v3672_v38 }
 0x272   : > { %v3637_v49 = vadd.f32 %v3577_v40, %v3052_v21 }
 0x274   : > { %v3646_v23 = vadd.f32 %v3642_v41, %v3637_v49 }
 0x275   : > { %v3564_v6 = vpop.f32.mrf.mxu2  ;;  %v3578_v8 = vpop.f32.mrf.mxu3 }
 0x276   : > { %v3565_v54 = vadd.f32 %v3564_v6, %v3551_v37  ;;  %v3680_v34 = vadd.f32 %v3668_v15, %v3646_v23  ;;  %v3674_v6 = vrot.slane %v3658_v4, 4 }
 0x278   : > { %v3579_v7 = vadd.f32 %v3578_v8, %v3565_v54  ;;  %v3110_v8 = vadd.f32 %v6326_v59, %v3096_v52  ;;  %v3675_v28 = vsel %vm3665_vm6, %v3670_v18, %v3674_v6 }
 0x27a   : > { %v3639_v63 = vadd.f32 %v3579_v7, %v3054_v9 }
 0x27c   : > { %v3648_v31 = vadd.f32 %v3642_v41, %v3639_v63 }
 0x27e   : > { %v3682_v47 = vadd.f32 %v3673_v27, %v3648_v31 }
 0x28d   : > { %v3618_v53 = vpop.f32.mrf.mxu2  ;;  %v3632_v22 = vpop.f32.mrf.mxu3 }
 0x28e   : > { %v3619_v30 = vadd.f32 %v3618_v53, %v3605_v25 }
 0x290   : > { %v3633_v19 = vadd.f32 %v3632_v22, %v3619_v30 }
 0x292   : > { %v3638_v48 = vadd.f32 %v3633_v19, %v3108_v57 }
 0x294   : > { %v3647_v61 = vadd.f32 %v3643_v16, %v3638_v48 }
 0x295   : > { %v3620_v11 = vpop.f32.mrf.mxu2  ;;  %v3634_v3 = vpop.f32.mrf.mxu3 }
 0x296   : > { %v3681_v12 = vadd.f32 %v3671_v5, %v3647_v61  ;;  %v3621_v42 = vadd.f32 %v3620_v11, %v3607_v44 }
 0x298   : > { %v3684_v17 = vpack.c.bf16 %v3681_v12, %v3680_v34  ;;  %v3635_v24 = vadd.f32 %v3634_v3, %v3621_v42 }
 0x29a   : > { %v3691_v35 = vrot.slane %v3684_v17, 6  ;;  %v3640_v58 = vadd.f32 %v3635_v24, %v3110_v8 }
 0x29c   : > { %3699 = vst [vmem:[%s6320_s19] sm:$0xcc] %v3691_v35  ;;  %v3649_v51 = vadd.f32 %v3643_v16, %v3640_v58  ;;  %v3692_v59 = vrot.slane %v3691_v35, 4 }
 0x29e   : > { %v3683_v1 = vadd.f32 %v3675_v28, %v3649_v51 }
 0x2a0   : > { %v3685_v43 = vpack.c.bf16 %v3683_v1, %v3682_v47 }
 0x2a2   : > { %v3693_v14 = vrot.slane %v3685_v43, 6 }
 0x2a4   : > { %v3694_v10 = vsel %vm3690_vm9, %v3692_v59, %v3693_v14  ;;  %v3695_v26 = vrot.slane %v3693_v14, 4 }
 0x2a5   : > { %3700 = vst [vmem:[%s6320_s19 + $0x8] sm:$0xff] %v3694_v10 }
 0x2a6   : > { %3701 = vst [vmem:[%s6320_s19 + $0x10] sm:$0x33] %v3695_v26 }
 0x2a7 PF: > { %s17_s18 = sadd.s32 1, %s5821_s18  }
 0x2a8   : > { %p14_p7 = scmp.ge.s32.totalorder %s17_s18, 4  }
 0x2aa   :  { %16 = sbr.rel (!%p14_p7) target bundleno = 2 (0x2), region = 83 }
 0x2af   :  { %3723 = vsyncpa [#allocation4], 1 }
 0x2b0   :  { %3725 = vsyncpa [#allocation4 + $0x1], 1 }
 0x2b1   :  { %3726 = vsyncpa [#allocation6], 1 }

</bundles_post_ra>
